<compile_context>
chip_gen: v5e
topology: v5e:2x2
jax: 0.10.0
libtpu: 0.0.40
codegen_flags: <defaults>
</compile_context>

<pallas_src>
import functools

import jax
import jax.numpy as jnp
import numpy as np
from jax.experimental import pallas as pl
from jax.experimental.pallas import tpu as pltpu


# ----------------------------------------------------------------------------
# Parameter preparation (synthetic weights, eval-mode BN folded into weights).
# ----------------------------------------------------------------------------
def _fold_bn(w, b, gamma, beta, mean, var, eps=1e-5):
    """Fold eval-mode BatchNorm into a preceding (in, out) weight + (1, out) bias."""
    scale = gamma / jnp.sqrt(var + eps)                 # (out,)
    return w * scale[None, :], ((b - mean) * scale + beta).reshape(1, -1)


def make_params(key, k_cls):
    keys = iter(jax.random.split(key, 96))

    def w(shape, scale=0.05):
        return scale * jax.random.normal(next(keys), shape, jnp.float32)

    def bn(c):
        gamma = 1.0 + 0.1 * jax.random.normal(next(keys), (c,), jnp.float32)
        beta = 0.1 * jax.random.normal(next(keys), (c,), jnp.float32)
        mean = 0.1 * jax.random.normal(next(keys), (c,), jnp.float32)
        var = 1.0 + 0.1 * jnp.abs(jax.random.normal(next(keys), (c,), jnp.float32))
        return gamma, beta, mean, var

    def fold(win, bout, c):
        return _fold_bn(win, bout, *bn(c))

    bf = lambda a: a.astype(jnp.bfloat16)

    # ---- STN3d: per-point MLP (tiled kernel) ----
    s_w1, s_b1 = fold(w((3, 64)), w((64,)), 64)
    s_w2, s_b2 = fold(w((64, 128)), w((128,)), 128)
    s_w3, s_b3 = fold(w((128, 1024)), w((1024,)), 1024)
    stn_point_p = (s_w1, s_b1, bf(s_w2), s_b2, bf(s_w3), s_b3)

    # ---- STN3d: FC head on the pooled feature (tiny kernel) ----
    s_w4, s_b4 = fold(w((1024, 512)), w((512,)), 512)
    s_w5, s_b5 = fold(w((512, 256)), w((256,)), 256)
    s_w6 = w((256, 9))
    s_b6 = w((9,)).reshape(1, 9) + jnp.eye(3, dtype=jnp.float32).reshape(1, 9)  # identity folded in
    stn_fc_p = (bf(s_w4), s_b4, bf(s_w5), s_b5, bf(s_w6), s_b6)

    # ---- PointNetfeat ----
    f_w1, f_b1 = fold(w((3, 64)), w((64,)), 64)
    f_w2, f_b2 = fold(w((64, 128)), w((128,)), 128)
    f_w3, f_b3 = fold(w((128, 1024)), w((1024,)), 1024)   # bn3, NO relu before max
    feat_p = (f_w1, f_b1, bf(f_w2), f_b2, bf(f_w3), f_b3)

    # ---- Dense segmentation head ----
    d_w1, d_b1 = fold(w((1088, 512)), w((512,)), 512)
    d_w1g, d_w1p = d_w1[:1024], d_w1[1024:]               # [global 1024 | pointfeat 64] split
    d_w2, d_b2 = fold(w((512, 256)), w((256,)), 256)
    d_w3, d_b3 = fold(w((256, 128)), w((128,)), 128)
    d_w4 = w((128, k_cls))
    d_b4 = w((k_cls,)).reshape(1, k_cls)
    head_p = (bf(d_w1g), bf(d_w1p), d_b1, bf(d_w2), d_b2, bf(d_w3), d_b3, bf(d_w4), d_b4)

    return stn_point_p, stn_fc_p, feat_p, head_p


# ----------------------------------------------------------------------------
# Kernels
# ----------------------------------------------------------------------------
def stn_point_kernel(x_ref, w1_ref, b1_ref, w2_ref, b2_ref, w3_ref, b3_ref,
                     pmax_ref, *, n_valid, tile):
    """Per-point MLP 3-64-128-1024 + per-tile max.  Writes a partial (B,1024) max per grid step."""
    t = pl.program_id(0)
    x = x_ref[...]                                    # (B, T, 3) f32
    Bk, T = x.shape[0], x.shape[1]

    # conv1 (K=3): VPU broadcast FMAs instead of an MXU pass.
    w1 = w1_ref[...]                                  # (3, 64) f32
    h1 = (x[:, :, 0:1] * w1[0:1, :] +
          x[:, :, 1:2] * w1[1:2, :] +
          x[:, :, 2:3] * w1[2:3, :]) + b1_ref[...]
    h1 = jnp.maximum(h1, 0.0).reshape(Bk * T, 64)     # flatten -> 2-D matmuls (good MXU row fill)

    h2 = jnp.maximum(
        jnp.dot(h1.astype(jnp.bfloat16), w2_ref[...],
                preferred_element_type=jnp.float32) + b2_ref[...], 0.0)     # (B*T, 128)
    h3 = jnp.maximum(
        jnp.dot(h2.astype(jnp.bfloat16), w3_ref[...],
                preferred_element_type=jnp.float32) + b3_ref[...], 0.0)     # (B*T, 1024)
    h3 = h3.reshape(Bk, T, 1024)

    # Mask padded tail points before the max.
    point_idx = t * tile + jax.lax.broadcasted_iota(jnp.int32, (1, T, 1), 1)
    h3 = jnp.where(point_idx < n_valid, h3, -jnp.inf)
    pmax_ref[...] = jnp.max(h3, axis=1)[None, :, :]   # (1, B, 1024) partial max


def stn_fc_kernel(f_ref, w4_ref, b4_ref, w5_ref, b5_ref, w6_ref, b6_ref, trans_ref):
    """STN FC head 1024-512-256-9 on the pooled feature (runs once, tiny)."""
    f = f_ref[...]                                    # (B, 1024) f32
    g = jnp.maximum(
        jnp.dot(f.astype(jnp.bfloat16), w4_ref[...],
                preferred_element_type=jnp.float32) + b4_ref[...], 0.0)
    g = jnp.maximum(
        jnp.dot(g.astype(jnp.bfloat16), w5_ref[...],
                preferred_element_type=jnp.float32) + b5_ref[...], 0.0)
    # b6 already contains the flattened 3x3 identity.
    trans_ref[...] = jnp.dot(g.astype(jnp.bfloat16), w6_ref[...],
                             preferred_element_type=jnp.float32) + b6_ref[...]


def _folded_conv1(x, tr, w1, b1):
    """relu((x @ trans) @ W1 + b1) computed as x @ (trans @ W1) + b1 with VPU broadcast FMAs."""
    def w_eff(i):                                     # (B, 64): row i of (trans @ W1)
        return (tr[:, 3 * i + 0:3 * i + 1] * w1[0:1, :] +
                tr[:, 3 * i + 1:3 * i + 2] * w1[1:2, :] +
                tr[:, 3 * i + 2:3 * i + 3] * w1[2:3, :])
    h = (x[:, :, 0:1] * w_eff(0)[:, None, :] +
         x[:, :, 1:2] * w_eff(1)[:, None, :] +
         x[:, :, 2:3] * w_eff(2)[:, None, :]) + b1
    return jnp.maximum(h, 0.0)                        # (B, T, 64) = pointfeat


def feat_point_kernel(x_ref, tr_ref, w1_ref, b1_ref, w2_ref, b2_ref, w3_ref, b3_ref,
                      pmax_ref, *, n_valid, tile):
    """PointNetfeat per-point MLP with the input transform folded into conv1; partial (B,1024) max."""
    t = pl.program_id(0)
    x = x_ref[...]                                    # (B, T, 3) f32
    Bk, T = x.shape[0], x.shape[1]

    h1 = _folded_conv1(x, tr_ref[...], w1_ref[...], b1_ref[...])            # (B, T, 64)
    h2 = jnp.maximum(
        jnp.dot(h1.reshape(Bk * T, 64).astype(jnp.bfloat16), w2_ref[...],
                preferred_element_type=jnp.float32) + b2_ref[...], 0.0)     # (B*T, 128)
    h3 = jnp.dot(h2.astype(jnp.bfloat16), w3_ref[...],
                 preferred_element_type=jnp.float32) + b3_ref[...]          # bn3, no relu
    h3 = h3.reshape(Bk, T, 1024)

    point_idx = t * tile + jax.lax.broadcasted_iota(jnp.int32, (1, T, 1), 1)
    h3 = jnp.where(point_idx < n_valid, h3, -jnp.inf)
    pmax_ref[...] = jnp.max(h3, axis=1)[None, :, :]   # (1, B, 1024) partial max


def gc_kernel(gf_ref, w1g_ref, b1_ref, gc_ref):
    """Global-feature part of head conv1: gc = gf @ W1g + b1, computed once (hoisted out of tiles)."""
    gc_ref[...] = jnp.dot(gf_ref[...].astype(jnp.bfloat16), w1g_ref[...],
                          preferred_element_type=jnp.float32) + b1_ref[...]


def head_kernel(x_ref, tr_ref, gc_ref, fw1_ref, fb1_ref, w1p_ref,
                w2_ref, b2_ref, w3_ref, b3_ref, w4_ref, b4_ref, out_ref):
    """Per-point segmentation head.  pointfeat is recomputed (cheap VPU K=3 conv) instead of being
    stored/reloaded via HBM; the global contribution gc is a precomputed (B,512) constant block."""
    x = x_ref[...]                                    # (B, T, 3) f32
    Bk, T = x.shape[0], x.shape[1]
    k_cls = out_ref.shape[-1]

    pf = _folded_conv1(x, tr_ref[...], fw1_ref[...], fb1_ref[...])          # (B, T, 64)

    # conv1 (1088->512) split: point part per point, global part (incl. b1) precomputed in gc.
    hp = jnp.dot(pf.reshape(Bk * T, 64).astype(jnp.bfloat16), w1p_ref[...],
                 preferred_element_type=jnp.float32)                         # (B*T, 512)
    h = jnp.maximum(hp.reshape(Bk, T, 512) + gc_ref[...][:, None, :], 0.0)
    h = h.reshape(Bk * T, 512)

    h = jnp.maximum(
        jnp.dot(h.astype(jnp.bfloat16), w2_ref[...],
                preferred_element_type=jnp.float32) + b2_ref[...], 0.0)     # (B*T, 256)
    h = jnp.maximum(
        jnp.dot(h.astype(jnp.bfloat16), w3_ref[...],
                preferred_element_type=jnp.float32) + b3_ref[...], 0.0)     # (B*T, 128)
    logits = jnp.dot(h.astype(jnp.bfloat16), w4_ref[...],
                     preferred_element_type=jnp.float32) + b4_ref[...]      # (B*T, k)

    # log_softmax over classes
    m = jnp.max(logits, axis=-1, keepdims=True)
    z = logits - m
    lse = jnp.log(jnp.sum(jnp.exp(z), axis=-1, keepdims=True))
    out_ref[...] = (z - lse).reshape(Bk, T, k_cls)


# ----------------------------------------------------------------------------
# Wrapper
# ----------------------------------------------------------------------------
def _tpu_vmem_bytes():
    """Generation-aware VMEM capacity (v7x: 64 MiB, v5e/v6e: 128 MiB)."""
    try:
        info = pltpu.get_tpu_info()
        for attr in ("vmem_capacity_bytes", "vmem_size_bytes", "vmem_bytes"):
            v = getattr(info, attr, None)
            if v:
                return int(v)
    except Exception:
        pass
    try:
        kind = jax.devices()[0].device_kind.lower()
    except Exception:
        kind = ""
    if "v5" in kind or "v6" in kind:
        return 128 * 1024 * 1024
    return 64 * 1024 * 1024          # conservative default (covers v7x's 64 MiB)


def _pick_tile(B, N, vmem_bytes):
    """Size the point tile from the real VMEM gate: ~8 KiB of f32 temporaries per point per batch
    row (dominated by the (B*tile, 1024) h3), keeping ~30% of VMEM for activations."""
    per_point = 8 * 1024 * B
    budget = int(vmem_bytes * 0.30)
    t = max(128, budget // per_point)
    t = min(t, 1024)
    t = (t // 128) * 128
    n_round = ((N + 127) // 128) * 128
    return max(128, min(t, n_round))


def _const_specs(params):
    # Full-array blocks with a constant index_map -> stay resident in VMEM across the grid.
    return [pl.BlockSpec(p.shape, lambda t: (0, 0)) for p in params]


def pointnet_densecls_forward(x_bcn, params, *, tile_n=None):
    """x_bcn: (B, 3, N) float32 — same layout as the PyTorch module input."""
    stn_point_p, stn_fc_p, feat_p, head_p = params
    (d_w1g, d_w1p, d_b1, d_w2, d_b2, d_w3, d_b3, d_w4, d_b4) = head_p
    (f_w1, f_b1, f_w2, f_b2, f_w3, f_b3) = feat_p

    B, C, N = x_bcn.shape
    assert C == 3
    x_pts = jnp.transpose(x_bcn, (0, 2, 1)).astype(jnp.float32)   # (B, N, 3) channels-last

    vmem = _tpu_vmem_bytes()
    tile = tile_n if tile_n is not None else _pick_tile(B, N, vmem)
    nt = pl.cdiv(N, tile)
    n_pad = nt * tile
    if n_pad != N:
        x_pts = jnp.pad(x_pts, ((0, 0), (0, n_pad - N), (0, 0)))
    k_cls = d_w4.shape[1]

    vmem_limit = min(int(vmem * 0.7), 96 * 1024 * 1024)
    cp_par = pltpu.CompilerParams(dimension_semantics=("parallel",),
                                  vmem_limit_bytes=vmem_limit)
    cp_one = pltpu.CompilerParams(dimension_semantics=("arbitrary",))

    x_spec = pl.BlockSpec((B, tile, 3), lambda t: (0, t, 0))
    pmax_spec = pl.BlockSpec((1, B, 1024), lambda t: (t, 0, 0))

    # --- 1) STN3d point pass: independent tiles write partial maxes (parallel on v7x) ---
    stn_pmax = pl.pallas_call(
        functools.partial(stn_point_kernel, n_valid=N, tile=tile),
        out_shape=jax.ShapeDtypeStruct((nt, B, 1024), jnp.float32),
        grid=(nt,),
        in_specs=[x_spec] + _const_specs(stn_point_p),
        out_specs=pmax_spec,
        compiler_params=cp_par,
    )(x_pts, *stn_point_p)
    stn_max = jnp.max(stn_pmax, axis=0)                           # (B, 1024) global max-pool

    # --- 2) STN FC head (tiny, runs once) ---
    trans9 = pl.pallas_call(
        stn_fc_kernel,
        out_shape=jax.ShapeDtypeStruct((B, 9), jnp.float32),
        grid=(1,),
        in_specs=[pl.BlockSpec((B, 1024), lambda t: (0, 0))] + _const_specs(stn_fc_p),
        out_specs=pl.BlockSpec((B, 9), lambda t: (0, 0)),
        compiler_params=cp_one,
    )(stn_max, *stn_fc_p)

    # --- 3) PointNetfeat point pass: partial maxes (no pointfeat HBM round-trip) ---
    feat_pmax = pl.pallas_call(
        functools.partial(feat_point_kernel, n_valid=N, tile=tile),
        out_shape=jax.ShapeDtypeStruct((nt, B, 1024), jnp.float32),
        grid=(nt,),
        in_specs=[x_spec, pl.BlockSpec((B, 9), lambda t: (0, 0))] + _const_specs(feat_p),
        out_specs=pmax_spec,
        compiler_params=cp_par,
    )(x_pts, trans9, *feat_p)
    gf = jnp.max(feat_pmax, axis=0)                               # (B, 1024) global feature

    # --- 4) Hoisted global projection gc = gf @ W1g + b1 (tiny, runs once) ---
    gc = pl.pallas_call(
        gc_kernel,
        out_shape=jax.ShapeDtypeStruct((B, 512), jnp.float32),
        grid=(1,),
        in_specs=[pl.BlockSpec((B, 1024), lambda t: (0, 0)),
                  pl.BlockSpec((1024, 512), lambda t: (0, 0)),
                  pl.BlockSpec((1, 512), lambda t: (0, 0))],
        out_specs=pl.BlockSpec((B, 512), lambda t: (0, 0)),
        compiler_params=cp_one,
    )(gf, d_w1g, d_b1)

    # --- 5) Segmentation head: per-point MLP + log_softmax, tiles independent (parallel) ---
    head_const = (f_w1, f_b1, d_w1p, d_w2, d_b2, d_w3, d_b3, d_w4, d_b4)
    logp_pad = pl.pallas_call(
        head_kernel,
        out_shape=jax.ShapeDtypeStruct((B, n_pad, k_cls), jnp.float32),
        grid=(nt,),
        in_specs=[x_spec,
                  pl.BlockSpec((B, 9), lambda t: (0, 0)),
                  pl.BlockSpec((B, 512), lambda t: (0, 0))] + _const_specs(head_const),
        out_specs=pl.BlockSpec((B, tile, k_cls), lambda t: (0, t, 0)),
        compiler_params=cp_par,
    )(x_pts, trans9, gc, *head_const)

    logp = logp_pad[:, :N, :] if n_pad != N else logp_pad
    return logp, trans9.reshape(B, 3, 3), None


# ----------------------------------------------------------------------------
# Pure-JAX reference with identical math (bf16 weights, f32 accumulation)
# ----------------------------------------------------------------------------
def _mm(a_f32, w_bf16):
    return jnp.dot(a_f32.astype(jnp.bfloat16), w_bf16, preferred_element_type=jnp.float32)


def pointnet_densecls_reference(x_bcn, params):
    stn_point_p, stn_fc_p, feat_p, head_p = params
    (s_w1, s_b1, s_w2, s_b2, s_w3, s_b3) = stn_point_p
    (s_w4, s_b4, s_w5, s_b5, s_w6, s_b6) = stn_fc_p
    (f_w1, f_b1, f_w2, f_b2, f_w3, f_b3) = feat_p
    (d_w1g, d_w1p, d_b1, d_w2, d_b2, d_w3, d_b3, d_w4, d_b4) = head_p
    B, _, N = x_bcn.shape
    x = jnp.transpose(x_bcn, (0, 2, 1)).astype(jnp.float32)                  # (B, N, 3)

    # STN3d
    h = jnp.maximum(jnp.einsum('bnc,cd->bnd', x, s_w1) + s_b1, 0.0)
    h = jnp.maximum(_mm(h.reshape(B * N, 64), s_w2) + s_b2, 0.0)
    h = jnp.maximum(_mm(h, s_w3) + s_b3, 0.0)
    feat1 = jnp.max(h.reshape(B, N, 1024), axis=1)
    g = jnp.maximum(_mm(feat1, s_w4) + s_b4, 0.0)
    g = jnp.maximum(_mm(g, s_w5) + s_b5, 0.0)
    trans = (_mm(g, s_w6) + s_b6).reshape(B, 3, 3)                           # identity already in b6

    # PointNetfeat (global_feat=False)
    xt = jnp.einsum('bnc,bcd->bnd', x, trans)
    pf = jnp.maximum(jnp.einsum('bnc,cd->bnd', xt, f_w1) + f_b1, 0.0)        # (B, N, 64)
    h = jnp.maximum(_mm(pf.reshape(B * N, 64), f_w2) + f_b2, 0.0)
    h = _mm(h, f_w3) + f_b3                                                  # bn3, no relu
    gf = jnp.max(h.reshape(B, N, 1024), axis=1)                              # (B, 1024)

    # Dense head on concat([global, pointfeat])
    d_w1_full = jnp.concatenate([d_w1g, d_w1p], axis=0)                      # (1088, 512)
    cat = jnp.concatenate([jnp.broadcast_to(gf[:, None, :], (B, N, 1024)), pf], axis=-1)
    h = jnp.maximum(_mm(cat.reshape(B * N, 1088), d_w1_full) + d_b1, 0.0)
    h = jnp.maximum(_mm(h, d_w2) + d_b2, 0.0)
    h = jnp.maximum(_mm(h, d_w3) + d_b3, 0.0)
    logits = _mm(h, d_w4) + d_b4
    logp = jax.nn.log_softmax(logits, axis=-1).reshape(B, N, -1)
    return logp, trans, None


# ----------------------------------------------------------------------------
if __name__ == "__main__":
    key = jax.random.PRNGKey(0)
    k_x, k_p = jax.random.split(key)

    # Small demo shapes; N chosen non-multiple-of-128 to exercise the padded/masked tail path.
    B, N, K_CLS = 2, 300, 3
    x = jax.random.normal(k_x, (B, 3, N), jnp.float32)           # PyTorch layout (B, 3, N)
    params = make_params(k_p, K_CLS)

    logp, trans, trans_feat = pointnet_densecls_forward(x, params)
    logp, trans = jax.block_until_ready((logp, trans))

    ref_logp, ref_trans, _ = pointnet_densecls_reference(x, params)
    ref_logp, ref_trans = jax.block_until_ready((ref_logp, ref_trans))

    assert logp.shape == (B, N, K_CLS), logp.shape
    assert trans.shape == (B, 3, 3), trans.shape
    assert trans_feat is None

    np.testing.assert_allclose(np.asarray(trans), np.asarray(ref_trans), rtol=1e-2, atol=1e-2)
    np.testing.assert_allclose(np.asarray(logp), np.asarray(ref_logp), rtol=1e-2, atol=1e-2)
    # log-probs should normalize per point
    np.testing.assert_allclose(np.exp(np.asarray(logp)).sum(-1), 1.0, rtol=1e-3, atol=1e-3)

    print("KERNEL_OK")
</pallas_src>

<mosaic_0001>
module attributes {stable_mosaic.version = 11 : i64} {
  func.func @stn_point_kernel(%arg0: i32, %arg1: memref<2x384x3xf32, #tpu.memory_space<vmem>>, %arg2: memref<3x64xf32, #tpu.memory_space<vmem>>, %arg3: memref<1x64xf32, #tpu.memory_space<vmem>>, %arg4: memref<64x128xbf16, #tpu.memory_space<vmem>>, %arg5: memref<1x128xf32, #tpu.memory_space<vmem>>, %arg6: memref<128x1024xbf16, #tpu.memory_space<vmem>>, %arg7: memref<1x1024xf32, #tpu.memory_space<vmem>>, %arg8: memref<1x2x1024xf32, #tpu.memory_space<vmem>>) attributes {dimension_semantics = [#tpu.dimension_semantics<parallel>], iteration_bounds = array<i64: 1>, scalar_prefetch = 0 : i64, scratch_operands = 0 : i64, tpu.core_type = #tpu.core_type<tc>, window_params = [{transform_indices = @transform_0, window_bounds = array<i64: 2, 384, 3>}, {pipeline_mode = #tpu.pipeline_mode<synchronous>, transform_indices = @transform_1, window_bounds = array<i64: 3, 64>}, {pipeline_mode = #tpu.pipeline_mode<synchronous>, transform_indices = @transform_2, window_bounds = array<i64: 1, 64>}, {pipeline_mode = #tpu.pipeline_mode<synchronous>, transform_indices = @transform_3, window_bounds = array<i64: 64, 128>}, {pipeline_mode = #tpu.pipeline_mode<synchronous>, transform_indices = @transform_4, window_bounds = array<i64: 1, 128>}, {pipeline_mode = #tpu.pipeline_mode<synchronous>, transform_indices = @transform_5, window_bounds = array<i64: 128, 1024>}, {pipeline_mode = #tpu.pipeline_mode<synchronous>, transform_indices = @transform_6, window_bounds = array<i64: 1, 1024>}, {transform_indices = @transform_7, window_bounds = array<i64: 1, 2, 1024>}]} {
    %c0 = arith.constant 0 : index
    %c0_0 = arith.constant 0 : index
    %c0_1 = arith.constant 0 : index
    %0 = vector.load %arg1[%c0, %c0_0, %c0_1] : memref<2x384x3xf32, #tpu.memory_space<vmem>>, vector<2x384x3xf32>
    %c0_2 = arith.constant 0 : index
    %c0_3 = arith.constant 0 : index
    %1 = vector.load %arg2[%c0_2, %c0_3] : memref<3x64xf32, #tpu.memory_space<vmem>>, vector<3x64xf32>
    %2 = vector.extract_strided_slice %0 {offsets = [0, 0, 0], sizes = [2, 384, 1], strides = [1, 1, 1]} : vector<2x384x3xf32> to vector<2x384x1xf32>
    %3 = vector.extract_strided_slice %1 {offsets = [0, 0], sizes = [1, 64], strides = [1, 1]} : vector<3x64xf32> to vector<1x64xf32>
    %4 = vector.shape_cast %3 : vector<1x64xf32> to vector<1x1x64xf32>
    %5 = vector.broadcast %2 : vector<2x384x1xf32> to vector<2x384x64xf32>
    %6 = vector.broadcast %4 : vector<1x1x64xf32> to vector<2x384x64xf32>
    %7 = arith.mulf %5, %6 : vector<2x384x64xf32>
    %8 = vector.extract_strided_slice %0 {offsets = [0, 0, 1], sizes = [2, 384, 1], strides = [1, 1, 1]} : vector<2x384x3xf32> to vector<2x384x1xf32>
    %9 = vector.extract_strided_slice %1 {offsets = [1, 0], sizes = [1, 64], strides = [1, 1]} : vector<3x64xf32> to vector<1x64xf32>
    %10 = vector.shape_cast %9 : vector<1x64xf32> to vector<1x1x64xf32>
    %11 = vector.broadcast %8 : vector<2x384x1xf32> to vector<2x384x64xf32>
    %12 = vector.broadcast %10 : vector<1x1x64xf32> to vector<2x384x64xf32>
    %13 = arith.mulf %11, %12 : vector<2x384x64xf32>
    %14 = arith.addf %7, %13 : vector<2x384x64xf32>
    %15 = vector.extract_strided_slice %0 {offsets = [0, 0, 2], sizes = [2, 384, 1], strides = [1, 1, 1]} : vector<2x384x3xf32> to vector<2x384x1xf32>
    %16 = vector.extract_strided_slice %1 {offsets = [2, 0], sizes = [1, 64], strides = [1, 1]} : vector<3x64xf32> to vector<1x64xf32>
    %17 = vector.shape_cast %16 : vector<1x64xf32> to vector<1x1x64xf32>
    %18 = vector.broadcast %15 : vector<2x384x1xf32> to vector<2x384x64xf32>
    %19 = vector.broadcast %17 : vector<1x1x64xf32> to vector<2x384x64xf32>
    %20 = arith.mulf %18, %19 : vector<2x384x64xf32>
    %21 = arith.addf %14, %20 : vector<2x384x64xf32>
    %c0_4 = arith.constant 0 : index
    %c0_5 = arith.constant 0 : index
    %22 = vector.load %arg3[%c0_4, %c0_5] : memref<1x64xf32, #tpu.memory_space<vmem>>, vector<1x64xf32>
    %23 = vector.shape_cast %22 : vector<1x64xf32> to vector<1x1x64xf32>
    %24 = vector.broadcast %23 : vector<1x1x64xf32> to vector<2x384x64xf32>
    %25 = arith.addf %21, %24 : vector<2x384x64xf32>
    %cst = arith.constant 0.000000e+00 : f32
    %26 = vector.broadcast %cst : f32 to vector<2x384x64xf32>
    %27 = arith.maximumf %25, %26 : vector<2x384x64xf32>
    %28 = vector.shape_cast %27 : vector<2x384x64xf32> to vector<768x64xf32>
    %29 = arith.truncf %28 : vector<768x64xf32> to vector<768x64xbf16>
    %c0_6 = arith.constant 0 : index
    %c0_7 = arith.constant 0 : index
    %30 = vector.load %arg4[%c0_6, %c0_7] : memref<64x128xbf16, #tpu.memory_space<vmem>>, vector<64x128xbf16>
    %cst_8 = arith.constant dense<0.000000e+00> : vector<768x128xf32>
    %31 = tpu.matmul %29, %30, %cst_8 {dimension_numbers = #tpu.dot_dimension_numbers<[1], [0], [0], [1], [0, 0, 1, 1], [], []>} : vector<768x64xbf16>, vector<64x128xbf16>, vector<768x128xf32> -> vector<768x128xf32>
    %c0_9 = arith.constant 0 : index
    %c0_10 = arith.constant 0 : index
    %32 = vector.load %arg5[%c0_9, %c0_10] : memref<1x128xf32, #tpu.memory_space<vmem>>, vector<1x128xf32>
    %33 = vector.broadcast %32 : vector<1x128xf32> to vector<768x128xf32>
    %34 = arith.addf %31, %33 : vector<768x128xf32>
    %cst_11 = arith.constant 0.000000e+00 : f32
    %35 = vector.broadcast %cst_11 : f32 to vector<768x128xf32>
    %36 = arith.maximumf %34, %35 : vector<768x128xf32>
    %37 = arith.truncf %36 : vector<768x128xf32> to vector<768x128xbf16>
    %c0_12 = arith.constant 0 : index
    %c0_13 = arith.constant 0 : index
    %38 = vector.load %arg6[%c0_12, %c0_13] : memref<128x1024xbf16, #tpu.memory_space<vmem>>, vector<128x1024xbf16>
    %cst_14 = arith.constant dense<0.000000e+00> : vector<768x1024xf32>
    %39 = tpu.matmul %37, %38, %cst_14 {dimension_numbers = #tpu.dot_dimension_numbers<[1], [0], [0], [1], [0, 0, 1, 1], [], []>} : vector<768x128xbf16>, vector<128x1024xbf16>, vector<768x1024xf32> -> vector<768x1024xf32>
    %c0_15 = arith.constant 0 : index
    %c0_16 = arith.constant 0 : index
    %40 = vector.load %arg7[%c0_15, %c0_16] : memref<1x1024xf32, #tpu.memory_space<vmem>>, vector<1x1024xf32>
    %41 = vector.broadcast %40 : vector<1x1024xf32> to vector<768x1024xf32>
    %42 = arith.addf %39, %41 : vector<768x1024xf32>
    %cst_17 = arith.constant 0.000000e+00 : f32
    %43 = vector.broadcast %cst_17 : f32 to vector<768x1024xf32>
    %44 = arith.maximumf %42, %43 : vector<768x1024xf32>
    %45 = vector.shape_cast %44 : vector<768x1024xf32> to vector<2x384x1024xf32>
    %c384_i32 = arith.constant 384 : i32
    %46 = arith.muli %arg0, %c384_i32 : i32
    %47 = tpu.iota {dimensions = array<i32: 1>} : vector<1x384x1xi32>
    %48 = vector.broadcast %46 : i32 to vector<1x384x1xi32>
    %49 = arith.addi %48, %47 : vector<1x384x1xi32>
    %c300_i32 = arith.constant 300 : i32
    %50 = vector.broadcast %c300_i32 : i32 to vector<1x384x1xi32>
    %51 = arith.cmpi slt, %49, %50 : vector<1x384x1xi32>
    %cst_18 = arith.constant 0xFF800000 : f32
    %52 = vector.shape_cast %51 : vector<1x384x1xi1> to vector<1x384x1xi1>
    %53 = vector.broadcast %52 : vector<1x384x1xi1> to vector<2x384x1024xi1>
    %54 = vector.broadcast %cst_18 : f32 to vector<2x384x1024xf32>
    %55 = arith.select %53, %45, %54 : vector<2x384x1024xi1>, vector<2x384x1024xf32>
    %cst_19 = arith.constant dense<0xFF800000> : vector<2x1024xf32>
    %56 = vector.multi_reduction <maximumf>, %55, %cst_19 [1] : vector<2x384x1024xf32> to vector<2x1024xf32>
    %57 = vector.shape_cast %56 : vector<2x1024xf32> to vector<1x2x1024xf32>
    %c0_20 = arith.constant 0 : index
    %c0_21 = arith.constant 0 : index
    %c0_22 = arith.constant 0 : index
    %58 = vector.load %arg8[%c0_20, %c0_21, %c0_22] : memref<1x2x1024xf32, #tpu.memory_space<vmem>>, vector<1x2x1024xf32>
    tpu.vector_store %arg8[%c0_20, %c0_21, %c0_22], %57 {strides = array<i32>} : memref<1x2x1024xf32, #tpu.memory_space<vmem>>, vector<1x2x1024xf32>,
    return
  }
  func.func @transform_0(%arg0: i32) -> (i32, i32, i32) {
    %c0_i32 = arith.constant 0 : i32
    %c0_i32_0 = arith.constant 0 : i32
    %c0_i32_1 = arith.constant 0 : i32
    return %c0_i32, %arg0, %c0_i32_0 : i32, i32, i32
  }
  func.func @transform_1(%arg0: i32) -> (i32, i32) {
    %c0_i32 = arith.constant 0 : i32
    %c0_i32_0 = arith.constant 0 : i32
    %c0_i32_1 = arith.constant 0 : i32
    return %c0_i32, %c0_i32_0 : i32, i32
  }
  func.func @transform_2(%arg0: i32) -> (i32, i32) {
    %c0_i32 = arith.constant 0 : i32
    %c0_i32_0 = arith.constant 0 : i32
    %c0_i32_1 = arith.constant 0 : i32
    return %c0_i32, %c0_i32_0 : i32, i32
  }
  func.func @transform_3(%arg0: i32) -> (i32, i32) {
    %c0_i32 = arith.constant 0 : i32
    %c0_i32_0 = arith.constant 0 : i32
    %c0_i32_1 = arith.constant 0 : i32
    return %c0_i32, %c0_i32_0 : i32, i32
  }
  func.func @transform_4(%arg0: i32) -> (i32, i32) {
    %c0_i32 = arith.constant 0 : i32
    %c0_i32_0 = arith.constant 0 : i32
    %c0_i32_1 = arith.constant 0 : i32
    return %c0_i32, %c0_i32_0 : i32, i32
  }
  func.func @transform_5(%arg0: i32) -> (i32, i32) {
    %c0_i32 = arith.constant 0 : i32
    %c0_i32_0 = arith.constant 0 : i32
    %c0_i32_1 = arith.constant 0 : i32
    return %c0_i32, %c0_i32_0 : i32, i32
  }
  func.func @transform_6(%arg0: i32) -> (i32, i32) {
    %c0_i32 = arith.constant 0 : i32
    %c0_i32_0 = arith.constant 0 : i32
    %c0_i32_1 = arith.constant 0 : i32
    return %c0_i32, %c0_i32_0 : i32, i32
  }
  func.func @transform_7(%arg0: i32) -> (i32, i32, i32) {
    %c0_i32 = arith.constant 0 : i32
    %c0_i32_0 = arith.constant 0 : i32
    %c0_i32_1 = arith.constant 0 : i32
    return %arg0, %c0_i32, %c0_i32_0 : i32, i32, i32
  }
}

</mosaic_0001>

<bundles_post_ra>
// kernel: tpu_custom_call.1
= control target key start
LH: loop header
LB: loop body
LE: loop exit
PB: predicated region body
PF: predicated region fallthrough
CT: control target
= control target key end

     0   :  { %v11931_v2 = vmov 2   ;;  %v11933_v3 = vmov 1   ;;  %s11921_s0 = inlined_call_operand.vmem [shape: f32[2,384,3], index: 0, kind: input, shape index: {}]   ;;  %s11922_s1 = inlined_call_operand.vmem [shape: f32[3,64], index: 1, kind: input, shape index: {}]   ;;  %s11923_s2 = inlined_call_operand.vmem [shape: f32[1,64], index: 2, kind: input, shape index: {}]   ;;  %s11924_s3 = inlined_call_operand.vmem [shape: bf16[64,128], index: 3, kind: input, shape index: {}]   ;;  %s11925_s4 = inlined_call_operand.vmem [shape: f32[1,128], index: 4, kind: input, shape index: {}]   ;;  %s11926_s5 = inlined_call_operand.vmem [shape: bf16[128,1024], index: 5, kind: input, shape index: {}]   ;;  %s11927_s6 = inlined_call_operand.vmem [shape: f32[1,1024], index: 6, kind: input, shape index: {}]   ;;  %s11928_s7 = inlined_call_operand.hbm [shape: f32[1,2,1024], index: 7, kind: output, shape index: {}]  }
   0x1   :  { %v81_v0 = vld [vmem:[%s11921_s0 + $0x1a8] sm:$0xff]  ;;  %v8447_v1 = vld [vmem:[%s11921_s0 + $0xd0] sm:$0xff]  ;;  %8191 = vset.pattern.permute.xlu2 %v11931_v2  ;;  %8194 = vset.pattern.permute.xlu0 %v11933_v3 }
   0x2   :  { %8190 = vset.pattern.permute.xlu1 %v11933_v3  ;;  %915 = vperm.xlu0 %8194, %v81_v0  }
   0x3   :  { %1384 = vperm.xlu2 %8191, %v8447_v1   ;;  %807 = vperm.xlu1 %8190, %v8447_v1  }
   0x4   :  { %12 = vsyncpa [#allocation3], 0  ;;  %v57_v4 = vld [vmem:[%s11921_s0 + $0xe8] sm:$0xff]  ;;  %v8460_v5 = vld [vmem:[%s11921_s0 + $0xd8] sm:$0xff]  ;;  %v11929_v8 = vmov 0   ;;  %vm2136_vm0 = vcmask 523264  }
   0x5   :  { %v8467_v6 = vld [vmem:[%s11921_s0 + $0x1b8] sm:$0xff]  ;;  %v8472_v7 = vld [vmem:[%s11921_s0 + $0x1a0] sm:$0xff]  ;;  %v8481_v9 = vld [vmem:[%s11921_s0 + $0x270] sm:$0xff]  ;;  %vm7723_vm2 = vcmask 1041408   ;;  %vm7725_vm3 = vcmask 1045508   ;;  %vm7727_vm4 = vcmask 1043456  }
   0x6   :  { %v8490_v10 = vld [vmem:[%s11921_s0 + $0x20] sm:$0xff]  ;;  %v29_v11 = vld [vmem:[%s11921_s0 + $0x8] sm:$0xff]  ;;  %v8511_v14 = vld [vmem:[%s11921_s0 + $0x38] sm:$0xff]  ;;  %vm7743_vm5 = vcmask 1041409   ;;  %vm7745_vm6 = vcmask 1043459   ;;  %vm7747_vm7 = vcmask 1045509  }
   0x7   :  { %v28_v12 = vld [vmem:[%s11921_s0] sm:$0xff]  ;;  %v8504_v13 = vld [vmem:[%s11921_s0 + $0x288] sm:$0xff]  ;;  %v30_v17 = vld [vmem:[%s11921_s0 + $0x10] sm:$0xff]  ;;  %vm7749_vm8 = vcmask 1047559   ;;  %s7769_s8 = sshll.u32 %s11928_s7, 4  ;;  %s7770_s8 = int_to_ptr.hbm [resolvable:$true] %s7769_s8 }
   0x8   :  { %v8517_v15 = vld [vmem:[%s11921_s0 + $0xe0] sm:$0xff]  ;;  %v8534_v18 = vld [vmem:[%s11921_s0 + $0x278] sm:$0xff]  ;;  %v8542_v19 = vld [vmem:[%s11921_s0 + $0x28] sm:$0xff] }
   0x9   :  { %v104_v16 = vld [vmem:[%s11921_s0 + $0x260] sm:$0xff]  ;;  %v105_v20 = vld [vmem:[%s11921_s0 + $0x268] sm:$0xff]  ;;  %v8552_v21 = vld [vmem:[%s11921_s0 + $0x1b0] sm:$0xff] }
   0xa   :  { %819 = vperm.xlu0 %8194, %v57_v4   ;;  %v8557_v22 = vld [vmem:[%s11921_s0 + $0x110] sm:$0xff]  ;;  %v8567_v24 = vld [vmem:[%s11921_s0 + $0x1e0] sm:$0xff]  ;;  %v8576_v26 = vld [vmem:[%s11921_s0 + $0x128] sm:$0xff] }
   0xb   :  { %1388 = vperm.xlu2 %8191, %v8460_v5   ;;  %811 = vperm.xlu1 %8190, %v8460_v5   ;;  %v91_v28 = vld [vmem:[%s11921_s0 + $0x1f8] sm:$0xff]  ;;  %v114_v32 = vld [vmem:[%s11921_s0 + $0x2b0] sm:$0xff]  ;;  %v40_v38 = vld [vmem:[%s11921_s0 + $0x60] sm:$0xff] }
   0xc   :  { %v58_v33 = vld [vmem:[%s11921_s0 + $0xf0] sm:$0xff]  ;;  %v31_v34 = vld [vmem:[%s11921_s0 + $0x18] sm:$0xff]  ;;  %v117_v42 = vld [vmem:[%s11921_s0 + $0x2c8] sm:$0xff] }
   0xd   :  { %v8628_v43 = vld [vmem:[%s11921_s0 + $0xf8] sm:$0xff]  ;;  %v8100_v49 = vld [vmem:[%s11924_s3 + $0x10] sm:$0xff]  ;;  %v8099_v51 = vld [vmem:[%s11924_s3 + $0x8] sm:$0xff] }
   0xe   :  { %v8101_v45 = vld [vmem:[%s11924_s3 + $0x18] sm:$0xff]  ;;  %v72_v53 = vld [vmem:[%s11921_s0 + $0x160] sm:$0xff]  ;;  %v98_v59 = vld [vmem:[%s11921_s0 + $0x230] sm:$0xff] }
   0xf   :  { %2285 = vmatpush.bf16.msra.mxu0 %v8101_v45  ;;  %8168 = vmatpush.bf16.msra.mxu3 %v8101_v45  ;;  %v43_v48 = vld [vmem:[%s11921_s0 + $0x78] sm:$0xff]  ;;  %v8098_v54 = vld [vmem:[%s11924_s3] sm:$0xff] }
  0x10   :  { %8166 = vmatpush.bf16.msra.mxu1 %v8101_v45  ;;  %8167 = vmatpush.bf16.msra.mxu2 %v8101_v45  ;;  %v84_v57 = vld [vmem:[%s11921_s0 + $0x1c0] sm:$0xff] }
  0x11   :  { %v124_v62 = vld [vmem:[%s11922_s1] sm:$0x7] }
  0x12   :  { %923 = vperm.xlu0 %8194, %v8467_v6   ;;  %v8680_v63 = vperm.slane %v124_v62, 1 }
  0x13   :  { %8193 = vset.pattern.permute.xlu2 %v11933_v3  ;;  %8192 = vset.pattern.permute.xlu1 %v11929_v8 }
  0x14   :  { %911 = vperm.xlu2 %8193, %v8472_v7   ;;  %392 = vperm.xlu1 %8192, %v81_v0  }
  0x15   :  { %2286 = vmatpush.bf16.msra.mxu0 %v8100_v49  ;;  %8171 = vmatpush.bf16.msra.mxu3 %v8100_v49 }
  0x16   :  { %8169 = vmatpush.bf16.msra.mxu1 %v8100_v49  ;;  %8170 = vmatpush.bf16.msra.mxu2 %v8100_v49 }
  0x19   :  { %2287 = vmatpush.bf16.msra.mxu0 %v8099_v51  ;;  %8174 = vmatpush.bf16.msra.mxu3 %v8099_v51 }
  0x1a   :  { %1015 = vperm.xlu0 %8194, %v8481_v9   ;;  %8172 = vmatpush.bf16.msra.mxu1 %v8099_v51 }
  0x1b   :  { %8173 = vmatpush.bf16.msra.mxu2 %v8099_v51 }
  0x1c   :  { %8196 = vset.pattern.permute.xlu2 %v11931_v2  ;;  %8195 = vset.pattern.permute.xlu1 %v11931_v2 }
  0x1d   :  { %1492 = vperm.xlu2 %8196, %v81_v0   ;;  %1488 = vperm.xlu1 %8195, %v8472_v7   ;;  %v8683_v0 = vperm.slane %v124_v62, 0 }
  0x1e   :  { %2288 = vmatpush.bf16.msra.mxu0 %v8098_v54  ;;  %8177 = vmatpush.bf16.msra.mxu3 %v8098_v54 }
  0x1f   :  { %8175 = vmatpush.bf16.msra.mxu1 %v8098_v54  ;;  %8176 = vmatpush.bf16.msra.mxu2 %v8098_v54 }
  0x22   :  { %719 = vperm.xlu0 %8194, %v8490_v10  }
  0x25   :  { %8198 = vset.pattern.permute.xlu2 %v11929_v8  ;;  %8197 = vset.pattern.permute.xlu1 %v11929_v8 }
  0x26   :  { %132 = vperm.xlu2 %8198, %v29_v11   ;;  %127 = vperm.xlu1 %8197, %v28_v12  }
  0x2a   :  { %1027 = vperm.xlu0 %8194, %v8504_v13  }
  0x2e   :  { %8199 = vset.pattern.permute.xlu2 %v11933_v3  ;;  %272 = vperm.xlu1 %8197, %v57_v4  }
  0x2f   :  { %703 = vperm.xlu2 %8199, %v28_v12  }
  0x32   :  { %731 = vperm.xlu0 %8194, %v8511_v14  }
  0x36   :  { %8200 = vset.pattern.permute.xlu1 %v11933_v3 }
  0x37   :  { %815 = vperm.xlu2 %8199, %v8517_v15   ;;  %707 = vperm.xlu1 %8200, %v29_v11  }
  0x3a   :  { %8236 = vset.pattern.permute.xlu0 %v11931_v2 }
  0x3b   :  { %1584 = vperm.xlu0 %8236, %v104_v16  }
  0x3f   :  { %8202 = vset.pattern.permute.xlu2 %v11931_v2  ;;  %8201 = vset.pattern.permute.xlu1 %v11931_v2 }
  0x40   :  { %1284 = vperm.xlu2 %8202, %v29_v11   ;;  %1280 = vperm.xlu1 %8201, %v28_v12   ;;  %v8689_v12 = vperm.slane %v124_v62, 2 }
  0x43   :  { %1288 = vperm.xlu0 %8236, %v30_v17  }
  0x48   :  { %1396 = vperm.xlu2 %8202, %v57_v4   ;;  %1392 = vperm.xlu1 %8201, %v8517_v15  }
  0x4b   :  { %1596 = vperm.xlu0 %8236, %v8534_v18  }
  0x50   :  { %8204 = vset.pattern.permute.xlu2 %v11929_v8  ;;  %8203 = vset.pattern.permute.xlu1 %v11929_v8 }
  0x51   :  { %507 = vperm.xlu2 %8204, %v104_v16   ;;  %402 = vperm.xlu1 %8203, %v8467_v6  }
  0x53   :  { %1300 = vperm.xlu0 %8236, %v8542_v19  }
  0x59   :  { %8205 = vset.pattern.permute.xlu2 %v11933_v3  ;;  %512 = vperm.xlu1 %8203, %v105_v20  }
  0x5a   :  { %919 = vperm.xlu2 %8205, %v8552_v21  }
  0x5b   :  { %1416 = vperm.xlu0 %8236, %v8557_v22  }
  0x5d   :  { %v8562_v23 = vpop.permute.xlu2 %1384 }
  0x61   :  { %8206 = vset.pattern.permute.xlu1 %v11933_v3 }
  0x62   :  { %1011 = vperm.xlu2 %8205, %v105_v20   ;;  %1007 = vperm.xlu1 %8206, %v104_v16  }
  0x63   :  { %1520 = vperm.xlu0 %8236, %v8567_v24  }
  0x65   :  { %v8571_v25 = vpop.permute.xlu2 %1388 }
  0x6a   :  { %8208 = vset.pattern.permute.xlu2 %v11931_v2  ;;  %8207 = vset.pattern.permute.xlu1 %v11931_v2 }
  0x6b   :  { %1500 = vperm.xlu2 %8208, %v8467_v6   ;;  %1496 = vperm.xlu1 %8207, %v8552_v21   ;;  %v75_v6 = vld [vmem:[%s11921_s0 + $0x178] sm:$0xff] }
  0x6c   :  { %1428 = vperm.xlu0 %8236, %v8576_v26  }
  0x6e   :  { %v8583_v27 = vpop.permute.xlu2 %911 }
  0x73   :  { %8209 = vset.pattern.permute.xlu2 %v11929_v8  ;;  %1588 = vperm.xlu1 %8207, %v105_v20  }
  0x74   :  { %1532 = vperm.xlu0 %8236, %v91_v28   ;;  %137 = vperm.xlu2 %8209, %v30_v17   ;;  %v8589_v29 = vpop.permute.xlu0 %915 }
  0x75   :  { %v8591_v30 = vpop.permute.xlu1 %807 }
  0x77   :  { %v8593_v31 = vpop.permute.xlu2 %1492 }
  0x7b   :  { %8210 = vset.pattern.permute.xlu1 %v11929_v8 }
  0x7c   :  { %1624 = vperm.xlu0 %8236, %v114_v32   ;;  %277 = vperm.xlu2 %8209, %v58_v33   ;;  %v8605_v35 = vpop.permute.xlu0 %819 }
  0x7d   :  { %142 = vperm.xlu1 %8210, %v31_v34   ;;  %v8607_v36 = vpop.permute.xlu1 %811 }
  0x80   :  { %v8609_v37 = vpop.permute.xlu2 %132 }
  0x81   :  { %v607_v16 = vmul.f32 %v8683_v0, %v8609_v37 }
  0x84   :  { %1328 = vperm.xlu0 %8236, %v40_v38   ;;  %8212 = vset.pattern.permute.xlu2 %v11933_v3  ;;  %v8615_v39 = vpop.permute.xlu0 %923 }
  0x85   :  { %8211 = vset.pattern.permute.xlu1 %v11933_v3  ;;  %715 = vperm.xlu2 %8212, %v31_v34  }
  0x86   :  { %711 = vperm.xlu1 %8211, %v30_v17   ;;  %v8618_v40 = vpop.permute.xlu1 %392 }
  0x89   :  { %v8620_v41 = vpop.permute.xlu2 %703 }
  0x8c   :  { %1636 = vperm.xlu0 %8236, %v117_v42   ;;  %v8630_v44 = vpop.permute.xlu0 %1015  ;;  %v101_v42 = vld [vmem:[%s11921_s0 + $0x248] sm:$0xff] }
  0x8d   :  { %827 = vperm.xlu2 %8212, %v8628_v43  }
  0x8e   :  { %823 = vperm.xlu1 %8211, %v58_v33  }
  0x8f   :  { %v8636_v46 = vpop.permute.xlu1 %1488 }
  0x91   :  { %v8638_v47 = vpop.permute.xlu2 %815 }
  0x94   :  { %1340 = vperm.xlu0 %8236, %v43_v48   ;;  %v8646_v50 = vpop.permute.xlu0 %719 }
  0x95   :  { %8214 = vset.pattern.permute.xlu2 %v11931_v2 }
  0x96   :  { %8213 = vset.pattern.permute.xlu1 %v11931_v2  ;;  %1400 = vperm.xlu2 %8214, %v58_v33   ;;  %v8701_v33 = vld [vmem:[%s11921_s0 + $0x1c8] sm:$0xff] }
  0x97   :  { %1292 = vperm.xlu1 %8213, %v31_v34   ;;  %v1087_v34 = vmul.f32 %v8680_v63, %v8620_v41  ;;  %v8715_v41 = vld [vmem:[%s11923_s2] ss:$0 sm:$0xff] }
  0x98   :  { %v128_v52 = vpop.permute.xlu1 %127 }
  0x99   :  { %v606_v38 = vmul.f32 %v8683_v0, %v128_v52 }
  0x9a   :  { %v1285_v55 = vpop.permute.xlu2 %1284 }
  0x9b   :  { %v1665_v20 = vmul.f32 %v8689_v12, %v1285_v55  ;;  %v1183_v48 = vadd.f32 %v1087_v34, %v606_v38  ;;  %v60_v34 = vld [vmem:[%s11921_s0 + $0x100] sm:$0xff] }
  0x9c   :  { %1456 = vperm.xlu0 %8236, %v72_v53   ;;  %v8659_v56 = vpop.permute.xlu0 %1027 }
  0x9e   :  { %8215 = vset.pattern.permute.xlu2 %v11929_v8 }
  0x9f   :  { %1404 = vperm.xlu1 %8213, %v8628_v43   ;;  %407 = vperm.xlu2 %8215, %v84_v57  }
  0xa0   :  { %v8666_v58 = vpop.permute.xlu1 %272 }
  0xa2   :  { %v8671_v60 = vpop.permute.xlu2 %1396 }
  0xa4   :  { %1560 = vperm.xlu0 %8236, %v98_v59   ;;  %v8673_v61 = vpop.permute.xlu0 %731 }
  0xa7   :  { %8216 = vset.pattern.permute.xlu1 %v11929_v8  ;;  %522 = vperm.xlu2 %8215, %v8534_v18  }
  0xa8   :  { %517 = vperm.xlu1 %8216, %v8481_v9  }
  0xa9   :  { %v708_v4 = vpop.permute.xlu1 %707 }
  0xaa   :  { %v1088_v11 = vmul.f32 %v8680_v63, %v708_v4 }
  0xab   :  { %v8693_v17 = vpop.permute.xlu2 %507 }
  0xac   :  { %1468 = vperm.xlu0 %8236, %v75_v6   ;;  %v1184_v28 = vadd.f32 %v1088_v11, %v607_v16 }
  0xad   :  { %v8696_v32 = vpop.permute.xlu0 %1584 }
  0xae   :  { %v1761_v37 = vadd.f32 %v1665_v20, %v1184_v28 }
  0xaf   :  { %8218 = vset.pattern.permute.xlu2 %v11933_v3 }
  0xb0   :  { %8217 = vset.pattern.permute.xlu1 %v11933_v3  ;;  %931 = vperm.xlu2 %8218, %v8701_v33   ;;  %v1861_v54 = vadd.f32 %v8715_v41, %v1761_v37 }
  0xb1   :  { %927 = vperm.xlu1 %8217, %v84_v57  }
  0xb2   :  { %v1281_v45 = vpop.permute.xlu1 %1280  ;;  %v1957_v62 = vmax.f32 %v1861_v54, 0.0 }
  0xb3   :  { %v1664_v49 = vmul.f32 %v8689_v12, %v1281_v45 }
  0xb4   :  { %1572 = vperm.xlu0 %8236, %v101_v42   ;;  %v8718_v51 = vpop.permute.xlu2 %919 }
  0xb5   :  { %v1760_v52 = vadd.f32 %v1664_v49, %v1183_v48  ;;  %v8720_v53 = vpop.permute.xlu0 %1288 }
  0xb7   :  { %v1860_v55 = vadd.f32 %v8715_v41, %v1760_v52  ;;  %v1740_v52 = vmul.f32 %v8689_v12, %v8696_v32 }
  0xb8   :  { %8219 = vset.pattern.permute.xlu2 %v11931_v2 }
  0xb9   :  { %1019 = vperm.xlu1 %8217, %v8534_v18   ;;  %1504 = vperm.xlu2 %8219, %v84_v57   ;;  %v1956_v59 = vmax.f32 %v1860_v55, 0.0 }
  0xba   :  { %v8726_v4 = vpop.permute.xlu1 %1392 }
  0xbb   :  { %v2052_v6 = vpack.c.bf16 %v1957_v62, %v1956_v59 }
  0xbc   :  { %8317 = vset.pattern.permute.xlu0 %v11929_v8  ;;  %v1012_v11 = vpop.permute.xlu2 %1011 }
  0xbd   :  { %257 = vperm.xlu0 %8317, %v8447_v1   ;;  %7794 = vmatmul.msk.bf16.vlgmr.msra.gmra.mxu0 %vm2136_vm0, %v2052_v6  ;;  %v8731_v16 = vpop.permute.xlu0 %1596  ;;  %v1164_v55 = vmul.f32 %v8680_v63, %v1012_v11 }
  0xc1   :  { %8220 = vset.pattern.permute.xlu1 %v11931_v2  ;;  %1592 = vperm.xlu2 %8219, %v8481_v9  }
  0xc2   :  { %1508 = vperm.xlu1 %8220, %v8701_v33  }
  0xc3   :  { %v8736_v18 = vpop.permute.xlu1 %402 }
  0xc5   :  { %262 = vperm.xlu0 %8317, %v8460_v5   ;;  %v8739_v57 = vpop.permute.xlu0 %1300  ;;  %v8741_v20 = vpop.permute.xlu2 %1500  ;;  %v61_v5 = vld [vmem:[%s11921_s0 + $0x108] sm:$0xff] }
  0xc9   :  { %8222 = vset.pattern.permute.xlu2 %v11929_v8 }
  0xca   :  { %8221 = vset.pattern.permute.xlu1 %v11929_v8  ;;  %152 = vperm.xlu2 %8222, %v8542_v19  }
  0xcb   :  { %147 = vperm.xlu1 %8221, %v8490_v10   ;;  %v513_v1 = vpop.permute.xlu1 %512 }
  0xcc   :  { %v683_v59 = vmul.f32 %v8683_v0, %v513_v1 }
  0xcd   :  { %387 = vperm.xlu0 %8317, %v8472_v7   ;;  %v8748_v9 = vpop.permute.xlu0 %1416 }
  0xce   :  { %11994 = vst [vmem:[#allocation5_spill] sm:$0xff] %v8748_v9  ;;  %v8750_v28 = vpop.permute.xlu2 %137 }
  0xd2   :  { %292 = vperm.xlu2 %8222, %v61_v5  }
  0xd3   :  { %287 = vperm.xlu1 %8221, %v60_v34  }
  0xd4   :  { %v1008_v38 = vpop.permute.xlu1 %1007 }
  0xd5   :  { %267 = vperm.xlu0 %8317, %v8517_v15   ;;  %v8759_v37 = vpop.permute.xlu0 %1520  ;;  %v1163_v42 = vmul.f32 %v8680_v63, %v1008_v38  ;;  %v682_v15 = vmul.f32 %v8683_v0, %v8693_v17  ;;  %v1260_v17 = vadd.f32 %v1164_v55, %v683_v59  ;;  %v87_v55 = vld [vmem:[%s11921_s0 + $0x1d8] sm:$0xff] }
  0xd6   :  { %11995 = vst [vmem:[#allocation6_spill] sm:$0xff] %v8759_v37  ;;  %v8761_v7 = vpop.permute.xlu2 %277 }
  0xd7   :  { %v1259_v54 = vadd.f32 %v1163_v42, %v682_v15 }
  0xda   :  { %8224 = vset.pattern.permute.xlu2 %v11933_v3 }
  0xdb   :  { %8223 = vset.pattern.permute.xlu1 %v11933_v3  ;;  %831 = vperm.xlu2 %8224, %v60_v34  }
  0xdc   :  { %723 = vperm.xlu1 %8223, %v8542_v19   ;;  %v1836_v19 = vadd.f32 %v1740_v52, %v1259_v54 }
  0xdd   :  { %397 = vperm.xlu0 %8317, %v8552_v21   ;;  %v8768_v45 = vpop.permute.xlu1 %1496 }
  0xde   :  { %v8772_v48 = vpop.permute.xlu0 %1428  ;;  %v1936_v11 = vadd.f32 %v8715_v41, %v1836_v19 }
  0xdf   :  { %11996 = vst [vmem:[#allocation7_spill] sm:$0xff] %v8772_v48  ;;  %v716_v49 = vpop.permute.xlu2 %715 }
  0xe0   :  { %v2032_v42 = vmax.f32 %v1936_v11, 0.0 }
  0xe3   :  { %8225 = vset.pattern.permute.xlu2 %v11931_v2 }
  0xe4   :  { %835 = vperm.xlu1 %8223, %v61_v5   ;;  %1296 = vperm.xlu2 %8225, %v8490_v10  }
  0xe5   :  { %282 = vperm.xlu0 %8317, %v8628_v43   ;;  %v1589_v21 = vpop.permute.xlu1 %1588 }
  0xe6   :  { %v1741_v62 = vmul.f32 %v8689_v12, %v1589_v21  ;;  %v8782_v6 = vpop.permute.xlu0 %1532  ;;  %v8813_v21 = vld [vmem:[%s11921_s0 + $0x30] sm:$0xff] }
  0xe7   :  { %11997 = vst [vmem:[#allocation8_spill] sm:$0xff] %v8782_v6  ;;  %v8784_v32 = vpop.permute.xlu2 %827 }
  0xe8   :  { %v1837_v38 = vadd.f32 %v1741_v62, %v1260_v17 }
  0xea   :  { %v1937_v1 = vadd.f32 %v8715_v41, %v1837_v38 }
  0xec   :  { %8226 = vset.pattern.permute.xlu1 %v11931_v2  ;;  %1412 = vperm.xlu2 %8225, %v61_v5   ;;  %v2033_v10 = vmax.f32 %v1937_v1, 0.0  ;;  %v86_v5 = vld [vmem:[%s11921_s0 + $0x1d0] sm:$0xff]  ;;  %v608_v1 = vmul.f32 %v8683_v0, %v8750_v28 }
  0xed   :  { %1408 = vperm.xlu1 %8226, %v60_v34   ;;  %412 = vperm.xlu0 %8317, %v8701_v33   ;;  %v108_v33 = vld [vmem:[%s11921_s0 + $0x280] sm:$0xff] }
  0xee   :  { %v8790_v43 = vpop.permute.xlu0 %1624  ;;  %v2090_v15 = vpack.c.bf16 %v2033_v10, %v2032_v42  ;;  %v1666_v42 = vmul.f32 %v8689_v12, %v8720_v53 }
  0xef   :  { %11998 = vst [vmem:[#allocation9_spill] sm:$0xff] %v8790_v43  ;;  %v143_v52 = vpop.permute.xlu1 %142 }
  0xf0   :  { %7832 = vmatmul.msk.bf16.vlgmr.msra.gmra.mxu3 %vm2136_vm0, %v2090_v15  ;;  %v8793_v54 = vpop.permute.xlu2 %1400  ;;  %v8830_v15 = vld [vmem:[%s11921_s0 + $0x298] sm:$0xff]  ;;  %v609_v2 = vmul.f32 %v8683_v0, %v143_v52  ;;  %v8845_v52 = vld [vmem:[%s11921_s0 + $0x48] sm:$0xff] }
  0xf4   :  { %8228 = vset.pattern.permute.xlu2 %v11929_v8 }
  0xf5   :  { %8227 = vset.pattern.permute.xlu1 %v11929_v8  ;;  %422 = vperm.xlu2 %8228, %v87_v55   ;;  %v1090_v8 = vmul.f32 %v8680_v63, %v716_v49 }
  0xf6   :  { %417 = vperm.xlu1 %8227, %v86_v5   ;;  %v8806_v34 = vpop.permute.xlu0 %1328  ;;  %527 = vperm.xlu0 %8317, %v108_v33  }
  0xf7   :  { %11999 = vst [vmem:[#allocation10_spill] sm:$0xff] %v8806_v34 }
  0xf8   :  { %v712_v59 = vpop.permute.xlu1 %711 }
  0xf9   :  { %v8808_v19 = vpop.permute.xlu2 %407  ;;  %v1089_v62 = vmul.f32 %v8680_v63, %v712_v59 }
  0xfb   :  { %v1185_v10 = vadd.f32 %v1089_v62, %v608_v1  ;;  %v1186_v62 = vadd.f32 %v1090_v8, %v609_v2 }
  0xfd   :  { %8229 = vset.pattern.permute.xlu2 %v11933_v3  ;;  %v1762_v28 = vadd.f32 %v1666_v42, %v1185_v10 }
  0xfe   :  { %532 = vperm.xlu1 %8227, %v8504_v13   ;;  %935 = vperm.xlu2 %8229, %v86_v5   ;;  %v8817_v17 = vpop.permute.xlu0 %1636 }
  0xff   :  { %12000 = vst [vmem:[#allocation11_spill] sm:$0xff] %v8817_v17  ;;  %157 = vperm.xlu0 %8317, %v8813_v21   ;;  %v1862_v49 = vadd.f32 %v8715_v41, %v1762_v28 }
 0x100   :  { %v8821_v38 = vpop.permute.xlu1 %823 }
 0x101   :  { %v523_v11 = vpop.permute.xlu2 %522  ;;  %v1958_v2 = vmax.f32 %v1862_v49, 0.0 }
 0x102   :  { %v685_v6 = vmul.f32 %v8683_v0, %v523_v11 }
 0x106   :  { %8230 = vset.pattern.permute.xlu1 %v11933_v3  ;;  %1023 = vperm.xlu2 %8229, %v108_v33   ;;  %v8835_v59 = vpop.permute.xlu0 %1340 }
 0x107   :  { %12001 = vst [vmem:[#allocation12_spill] sm:$0xff] %v8835_v59  ;;  %939 = vperm.xlu1 %8230, %v87_v55   ;;  %542 = vperm.xlu0 %8317, %v8830_v15   ;;  %v12002_v59 = vmov 2  }
 0x109   :  { %v1293_v53 = vpop.permute.xlu1 %1292 }
 0x10a   :  { %v1667_v1 = vmul.f32 %v8689_v12, %v1293_v53  ;;  %v8839_v17 = vpop.permute.xlu2 %931 }
 0x10c   :  { %v1763_v34 = vadd.f32 %v1667_v1, %v1186_v62  ;;  %v8872_v62 = vld [vmem:[%s11921_s0 + $0x200] sm:$0xff]  ;;  %v12008_v1 = vmov 0  }
 0x10d   :  { %12007 = vst [vmem:[#allocation17_spill] sm:$0xff] %v8872_v62 }
 0x10e   :  { %v1863_v3 = vadd.f32 %v8715_v41, %v1763_v34  ;;  %8232 = vset.pattern.permute.xlu2 %v12002_v59  ;;  %v8849_v43 = vpop.permute.xlu0 %1456  ;;  %v8861_v34 = vld [vmem:[%s11921_s0 + $0x130] sm:$0xff] }
 0x10f   :  { %12003 = vst [vmem:[#allocation13_spill] sm:$0xff] %v8849_v43  ;;  %8231 = vset.pattern.permute.xlu1 %v12002_v59  ;;  %1516 = vperm.xlu2 %8232, %v87_v55  }
 0x110   :  { %1512 = vperm.xlu1 %8231, %v86_v5   ;;  %v1959_v8 = vmax.f32 %v1863_v3, 0.0  ;;  %172 = vperm.xlu0 %8317, %v8845_v52   ;;  %12004 = vst [vmem:[#allocation14_spill] sm:$0xff] %v8861_v34 }
 0x111   :  { %v8853_v42 = vpop.permute.xlu1 %1404 }
 0x112   :  { %v2053_v10 = vpack.c.bf16 %v1959_v8, %v1958_v2 }
 0x113   :  { %v8855_v28 = vpop.permute.xlu2 %1504 }
 0x114   :  { %7795 = vmatmul.msk.bf16.gmra.mxu0 %vm2136_vm0, %v2053_v10  ;;  %v8891_v10 = vld [vmem:[%s11921_s0 + $0x118] sm:$0xff] }
 0x116   :  { %v8863_v53 = vpop.permute.xlu0 %1560 }
 0x117   :  { %12005 = vst [vmem:[#allocation15_spill] sm:$0xff] %v8863_v53  ;;  %1604 = vperm.xlu2 %8232, %v8504_v13  }
 0x118   :  { %1600 = vperm.xlu1 %8231, %v108_v33   ;;  %317 = vperm.xlu0 %8317, %v8861_v34   ;;  %v1165_v33 = vmul.f32 %v8680_v63, %v8630_v44  ;;  %v12011_v44 = vmov 1   ;;  %v95_v34 = vld [vmem:[%s11921_s0 + $0x218] sm:$0xff] }
 0x11a   :  { %v518_v3 = vpop.permute.xlu1 %517 }
 0x11b   :  { %v1593_v55 = vpop.permute.xlu2 %1592  ;;  %v684_v49 = vmul.f32 %v8683_v0, %v518_v3 }
 0x11c   :  { %v1742_v43 = vmul.f32 %v8689_v12, %v1593_v55 }
 0x11d   :  { %v1261_v53 = vadd.f32 %v1165_v33, %v684_v49 }
 0x11e   :  { %v8867_v5 = vpop.permute.xlu0 %1468 }
 0x11f   :  { %12006 = vst [vmem:[#allocation16_spill] sm:$0xff] %v8867_v5  ;;  %8234 = vset.pattern.permute.xlu2 %v12008_v1  ;;  %v8896_v5 = vld [vmem:[%s11921_s0 + $0x148] sm:$0xff]  ;;  %v1838_v48 = vadd.f32 %v1742_v43, %v1261_v53 }
 0x120   :  { %8233 = vset.pattern.permute.xlu1 %v12008_v1  ;;  %297 = vperm.xlu2 %8234, %v8557_v22   ;;  %12010 = vst [vmem:[#allocation19_spill] sm:$0xff] %v8896_v5 }
 0x121   :  { %162 = vperm.xlu1 %8233, %v8511_v14   ;;  %447 = vperm.xlu0 %8317, %v8872_v62   ;;  %v1938_v37 = vadd.f32 %v8715_v41, %v1838_v48 }
 0x123   :  { %v8879_v13 = vpop.permute.xlu1 %927  ;;  %v2034_v53 = vmax.f32 %v1938_v37, 0.0 }
 0x124   :  { %v8884_v2 = vpop.permute.xlu2 %152 }
 0x126   :  { %v8886_v8 = vpop.permute.xlu0 %1572 }
 0x127   :  { %12009 = vst [vmem:[#allocation18_spill] sm:$0xff] %v8886_v8  ;;  %v1743_v8 = vmul.f32 %v8689_v12, %v8731_v16  ;;  %v1113_v16 = vmul.f32 %v8680_v63, %v8591_v30 }
 0x128   :  { %8235 = vset.pattern.permute.xlu2 %v12011_v44 }
 0x129   :  { %302 = vperm.xlu1 %8233, %v8891_v10   ;;  %727 = vperm.xlu2 %8235, %v8813_v21  }
 0x12a   :  { %332 = vperm.xlu0 %8317, %v8896_v5  }
 0x12b   :  { %v1020_v3 = vpop.permute.xlu1 %1019 }
 0x12c   :  { %v1166_v62 = vmul.f32 %v8680_v63, %v1020_v3  ;;  %v8907_v33 = vpop.permute.xlu2 %292 }
 0x12e   :  { %v1262_v55 = vadd.f32 %v1166_v62, %v685_v6 }
 0x12f   :  { %v258_v49 = vpop.permute.xlu0 %257 }
 0x130   :  { %v1839_v5 = vadd.f32 %v1743_v8, %v1262_v55  ;;  %v632_v9 = vmul.f32 %v8683_v0, %v258_v49  ;;  %v1690_v8 = vmul.f32 %v8689_v12, %v8562_v23  ;;  %v1140_v55 = vmul.f32 %v8680_v63, %v8589_v29  ;;  %v118_v23 = vld [vmem:[%s11921_s0 + $0x2d0] sm:$0xff] }
 0x131   :  { %8237 = vset.pattern.permute.xlu1 %v12011_v44  ;;  %843 = vperm.xlu2 %8235, %v8891_v10   ;;  %v1691_v29 = vmul.f32 %v8689_v12, %v8571_v25  ;;  %v1139_v25 = vmul.f32 %v8680_v63, %v8583_v27 }
 0x132   :  { %839 = vperm.xlu1 %8237, %v8557_v22   ;;  %v1939_v6 = vadd.f32 %v8715_v41, %v1839_v5  ;;  %462 = vperm.xlu0 %8317, %v95_v34   ;;  %v1209_v43 = vadd.f32 %v1113_v16, %v632_v9  ;;  %v659_v22 = vmul.f32 %v8683_v0, %v8618_v40 }
 0x133   :  { %v1114_v9 = vmul.f32 %v8680_v63, %v8607_v36  ;;  %v1717_v36 = vmul.f32 %v8689_v12, %v8593_v31  ;;  %v635_v31 = vmul.f32 %v8683_v0, %v8666_v58 }
 0x134   :  { %v8920_v11 = vpop.permute.xlu1 %1508  ;;  %v2035_v48 = vmax.f32 %v1939_v6, 0.0  ;;  %v1786_v34 = vadd.f32 %v1690_v8, %v1209_v43  ;;  %v1236_v40 = vadd.f32 %v1140_v55, %v659_v22  ;;  %v44_v22 = vld [vmem:[%s11921_s0 + $0x80] sm:$0xff] }
 0x135   :  { %v8922_v62 = vpop.permute.xlu2 %831 }
 0x136   :  { %v2091_v3 = vpack.c.bf16 %v2035_v48, %v2034_v53  ;;  %v1886_v16 = vadd.f32 %v8715_v41, %v1786_v34  ;;  %v1813_v48 = vadd.f32 %v1717_v36, %v1236_v40  ;;  %v1693_v34 = vmul.f32 %v8689_v12, %v8671_v60 }
 0x137   :  { %v263_v30 = vpop.permute.xlu0 %262  ;;  %v1091_v36 = vmul.f32 %v8680_v63, %v8646_v50  ;;  %v8991_v50 = vld [vmem:[%s11921_s0 + $0x1e8] sm:$0xff] }
 0x138   :  { %v633_v37 = vmul.f32 %v8683_v0, %v263_v30  ;;  %7833 = vmatmul.msk.bf16.gmra.mxu3 %vm2136_vm0, %v2091_v3  ;;  %v1982_v3 = vmax.f32 %v1886_v16, 0.0  ;;  %v1716_v30 = vmul.f32 %v8689_v12, %v8636_v46  ;;  %v1913_v58 = vadd.f32 %v8715_v41, %v1813_v48 }
 0x139   :  { %8239 = vset.pattern.permute.xlu2 %v12002_v59  ;;  %v1142_v46 = vmul.f32 %v8680_v63, %v8615_v39  ;;  %v1115_v16 = vmul.f32 %v8680_v63, %v8638_v47  ;;  %v1719_v47 = vmul.f32 %v8689_v12, %v8741_v20 }
 0x13a   :  { %v1210_v5 = vadd.f32 %v1114_v9, %v633_v37  ;;  %8238 = vset.pattern.permute.xlu1 %v12002_v59  ;;  %1308 = vperm.xlu2 %8239, %v8511_v14   ;;  %v1116_v14 = vmul.f32 %v8680_v63, %v8605_v35 }
 0x13b   :  { %1304 = vperm.xlu1 %8238, %v8813_v21   ;;  %577 = vperm.xlu0 %8317, %v118_v23  }
 0x13c   :  { %v1787_v49 = vadd.f32 %v1691_v29, %v1210_v5  ;;  %v1212_v9 = vadd.f32 %v1116_v14, %v635_v31  ;;  %v1692_v14 = vmul.f32 %v8689_v12, %v8726_v4  ;;  %v121_v31 = vld [vmem:[%s11921_s0 + $0x2e8] sm:$0xff] }
 0x13d   :  { %v148_v6 = vpop.permute.xlu1 %147 }
 0x13e   :  { %v1297_v43 = vpop.permute.xlu2 %1296  ;;  %v1887_v53 = vadd.f32 %v8715_v41, %v1787_v49  ;;  %v610_v60 = vmul.f32 %v8683_v0, %v148_v6  ;;  %v2009_v49 = vmax.f32 %v1913_v58, 0.0 }
 0x13f   :  { %v388_v8 = vpop.permute.xlu0 %387 }
 0x140   :  { %v658_v21 = vmul.f32 %v8683_v0, %v388_v8  ;;  %v1983_v55 = vmax.f32 %v1887_v53, 0.0  ;;  %v1789_v53 = vadd.f32 %v1693_v34, %v1212_v9 }
 0x142   :  { %v1235_v27 = vadd.f32 %v1139_v25, %v658_v21  ;;  %8240 = vset.pattern.permute.xlu2 %v12008_v1  ;;  %v2065_v35 = vpack.c.bf16 %v1983_v55, %v1982_v3  ;;  %v1187_v21 = vadd.f32 %v1091_v36, %v610_v60  ;;  %v1668_v3 = vmul.f32 %v8689_v12, %v1297_v43 }
 0x143   :  { %1420 = vperm.xlu1 %8238, %v8891_v10   ;;  %427 = vperm.xlu2 %8240, %v8567_v24   ;;  %v661_v10 = vmul.f32 %v8683_v0, %v8736_v18  ;;  %v8984_v18 = vld [vmem:[%s11921_s0 + $0x290] sm:$0xff]  ;;  %v1889_v4 = vadd.f32 %v8715_v41, %v1789_v53  ;;  %v1117_v43 = vmul.f32 %v8680_v63, %v8821_v38 }
 0x144   :  { %v1812_v37 = vadd.f32 %v1716_v30, %v1235_v27  ;;  %7807 = vmatmul.msk.bf16.vlgmr.msra.gmra.mxu1 %vm2136_vm0, %v2065_v35  ;;  %207 = vperm.xlu0 %8317, %v44_v22   ;;  %v1669_v22 = vmul.f32 %v8689_v12, %v8739_v57  ;;  %v611_v35 = vmul.f32 %v8683_v0, %v8884_v2 }
 0x145   :  { %v8966_v23 = vpop.permute.xlu1 %287  ;;  %v1238_v6 = vadd.f32 %v1142_v46, %v661_v10  ;;  %v1764_v58 = vadd.f32 %v1668_v3, %v1187_v21  ;;  %v1141_v46 = vmul.f32 %v8680_v63, %v8718_v51  ;;  %v636_v36 = vmul.f32 %v8683_v0, %v8761_v7  ;;  %v47_v7 = vld [vmem:[%s11921_s0 + $0x98] sm:$0xff] }
 0x146   :  { %v8972_v29 = vpop.permute.xlu2 %1412  ;;  %v1912_v5 = vadd.f32 %v8715_v41, %v1812_v37  ;;  %v1718_v2 = vmul.f32 %v8689_v12, %v8768_v45  ;;  %v1118_v21 = vmul.f32 %v8680_v63, %v8784_v32  ;;  %v1143_v3 = vmul.f32 %v8680_v63, %v8879_v13  ;;  %v76_v13 = vld [vmem:[%s11921_s0 + $0x180] sm:$0xff] }
 0x147   :  { %v268_v40 = vpop.permute.xlu0 %267  ;;  %v1815_v20 = vadd.f32 %v1719_v47, %v1238_v6  ;;  %v1213_v53 = vadd.f32 %v1117_v43, %v636_v36  ;;  %v1864_v51 = vadd.f32 %v8715_v41, %v1764_v58 }
 0x148   :  { %v634_v39 = vmul.f32 %v8683_v0, %v268_v40  ;;  %v2008_v25 = vmax.f32 %v1912_v5, 0.0  ;;  %v1985_v5 = vmax.f32 %v1889_v4, 0.0 }
 0x149   :  { %v1915_v60 = vadd.f32 %v8715_v41, %v1815_v20 }
 0x14a   :  { %v1211_v48 = vadd.f32 %v1115_v16, %v634_v39  ;;  %v2078_v8 = vpack.c.bf16 %v2009_v49, %v2008_v25  ;;  %v1694_v16 = vmul.f32 %v8689_v12, %v8793_v54 }
 0x14b   :  { %8241 = vset.pattern.permute.xlu1 %v12008_v1  ;;  %537 = vperm.xlu2 %8240, %v8984_v18  }
 0x14c   :  { %v1788_v55 = vadd.f32 %v1692_v14, %v1211_v48  ;;  %432 = vperm.xlu1 %8241, %v8991_v50   ;;  %7820 = vmatmul.msk.bf16.vlgmr.msra.gmra.mxu2 %vm2136_vm0, %v2078_v8  ;;  %v1790_v6 = vadd.f32 %v1694_v16, %v1213_v53  ;;  %v1960_v48 = vmax.f32 %v1864_v51, 0.0 }
 0x14d   :  { %592 = vperm.xlu0 %8317, %v121_v31   ;;  %v2011_v31 = vmax.f32 %v1915_v60, 0.0  ;;  %v638_v60 = vmul.f32 %v8683_v0, %v8966_v23  ;;  %v102_v23 = vld [vmem:[%s11921_s0 + $0x250] sm:$0xff] }
 0x14e   :  { %v724_v30 = vpop.permute.xlu1 %723  ;;  %v1888_v27 = vadd.f32 %v8715_v41, %v1788_v55  ;;  %v1890_v32 = vadd.f32 %v8715_v41, %v1790_v6 }
 0x14f   :  { %v1092_v9 = vmul.f32 %v8680_v63, %v724_v30  ;;  %v398_v34 = vpop.permute.xlu0 %397  ;;  %v9012_v37 = vpop.permute.xlu2 %422  ;;  %v1695_v30 = vmul.f32 %v8689_v12, %v8853_v42 }
 0x150   :  { %v660_v57 = vmul.f32 %v8683_v0, %v398_v34  ;;  %v1984_v10 = vmax.f32 %v1888_v27, 0.0 }
 0x151   :  { %v1188_v38 = vadd.f32 %v1092_v9, %v611_v35  ;;  %v1720_v35 = vmul.f32 %v8689_v12, %v8855_v28 }
 0x152   :  { %v1237_v40 = vadd.f32 %v1141_v46, %v660_v57  ;;  %v2066_v49 = vpack.c.bf16 %v1985_v5, %v1984_v10  ;;  %v1986_v46 = vmax.f32 %v1890_v32, 0.0  ;;  %v1144_v57 = vmul.f32 %v8680_v63, %v8839_v17 }
 0x153   :  { %v1765_v39 = vadd.f32 %v1669_v22, %v1188_v38  ;;  %8243 = vset.pattern.permute.xlu2 %v12011_v44  ;;  %v662_v22 = vmul.f32 %v8683_v0, %v8808_v19  ;;  %v1119_v38 = vmul.f32 %v8680_v63, %v8922_v62  ;;  %v639_v17 = vmul.f32 %v8683_v0, %v8907_v33 }
 0x154   :  { %v1814_v25 = vadd.f32 %v1718_v2, %v1237_v40  ;;  %8242 = vset.pattern.permute.xlu1 %v12011_v44  ;;  %947 = vperm.xlu2 %8243, %v8991_v50   ;;  %v1721_v40 = vmul.f32 %v8689_v12, %v8920_v11  ;;  %v1697_v11 = vmul.f32 %v8689_v12, %v8972_v29 }
 0x155   :  { %943 = vperm.xlu1 %8242, %v8567_v24   ;;  %7808 = vmatmul.msk.bf16.gmra.mxu1 %vm2136_vm0, %v2066_v49  ;;  %v1865_v45 = vadd.f32 %v8715_v41, %v1765_v39  ;;  %v1239_v58 = vadd.f32 %v1143_v3, %v662_v22  ;;  %v1215_v39 = vadd.f32 %v1119_v38, %v638_v60 }
 0x156   :  { %v836_v54 = vpop.permute.xlu1 %835  ;;  %v1914_v14 = vadd.f32 %v8715_v41, %v1814_v25  ;;  %222 = vperm.xlu0 %8317, %v47_v7  }
 0x157   :  { %v283_v47 = vpop.permute.xlu0 %282  ;;  %v1961_v8 = vmax.f32 %v1865_v45, 0.0  ;;  %v1816_v10 = vadd.f32 %v1720_v35, %v1239_v58  ;;  %v1120_v2 = vmul.f32 %v8680_v63, %v836_v54 }
 0x158   :  { %v637_v24 = vmul.f32 %v8683_v0, %v283_v47  ;;  %v9040_v4 = vpop.permute.xlu2 %935  ;;  %v2010_v55 = vmax.f32 %v1914_v14, 0.0 }
 0x159   :  { %v2054_v20 = vpack.c.bf16 %v1961_v8, %v1960_v48  ;;  %v1916_v62 = vadd.f32 %v8715_v41, %v1816_v10  ;;  %v1216_v7 = vadd.f32 %v1120_v2, %v639_v17  ;;  %v1145_v58 = vmul.f32 %v8680_v63, %v9040_v4 }
 0x15a   :  { %v1214_v27 = vadd.f32 %v1118_v21, %v637_v24  ;;  %v2079_v43 = vpack.c.bf16 %v2011_v31, %v2010_v55  ;;  %v9093_v31 = vld [vmem:[%s11921_s0 + $0x120] sm:$0xff] }
 0x15b   :  { %7796 = vmatmul.msk.bf16.gmra.mxu0 %vm2136_vm0, %v2054_v20  ;;  %v2012_v54 = vmax.f32 %v1916_v62, 0.0  ;;  %v1793_v47 = vadd.f32 %v1697_v11, %v1216_v7 }
 0x15c   :  { %v1791_v9 = vadd.f32 %v1695_v30, %v1214_v27  ;;  %1035 = vperm.xlu2 %8243, %v8830_v15   ;;  %7821 = vmatmul.msk.bf16.gmra.mxu2 %vm2136_vm0, %v2079_v43  ;;  %v9110_v27 = vld [vmem:[%s11921_s0 + $0x1f0] sm:$0xff] }
 0x15d   :  { %1031 = vperm.xlu1 %8242, %v8984_v18  }
 0x15e   :  { %v1891_v19 = vadd.f32 %v8715_v41, %v1791_v9  ;;  %367 = vperm.xlu0 %8317, %v76_v13   ;;  %v665_v13 = vmul.f32 %v8683_v0, %v9012_v37 }
 0x15f   :  { %v1409_v42 = vpop.permute.xlu1 %1408  ;;  %v413_v34 = vpop.permute.xlu0 %412 }
 0x160   :  { %v663_v28 = vmul.f32 %v8683_v0, %v413_v34  ;;  %v9060_v5 = vpop.permute.xlu2 %1023  ;;  %v1987_v36 = vmax.f32 %v1891_v19, 0.0  ;;  %v1696_v53 = vmul.f32 %v8689_v12, %v1409_v42  ;;  %v1168_v19 = vmul.f32 %v8680_v63, %v8659_v56 }
 0x161   :  { %v1167_v2 = vmul.f32 %v8680_v63, %v9060_v5 }
 0x162   :  { %v1240_v49 = vadd.f32 %v1144_v57, %v663_v28  ;;  %v2067_v16 = vpack.c.bf16 %v1987_v36, %v1986_v46  ;;  %v1792_v25 = vadd.f32 %v1696_v53, %v1215_v39 }
 0x164   :  { %v1817_v51 = vadd.f32 %v1721_v40, %v1240_v49  ;;  %8245 = vset.pattern.permute.xlu2 %v12002_v59  ;;  %v1892_v8 = vadd.f32 %v8715_v41, %v1792_v25  ;;  %v8346_v49 = vld [vmem:[%s11921_s0 + $0x128] sm:$0xff] }
 0x165   :  { %8244 = vset.pattern.permute.xlu1 %v12002_v59  ;;  %7809 = vmatmul.msk.bf16.gmra.mxu1 %vm2136_vm0, %v2067_v16 }
 0x166   :  { %1608 = vperm.xlu2 %8245, %v8984_v18   ;;  %1524 = vperm.xlu1 %8244, %v8991_v50   ;;  %v1917_v33 = vadd.f32 %v8715_v41, %v1817_v51  ;;  %v36_v18 = vld [vmem:[%s11921_s0 + $0x40] sm:$0xff]  ;;  %v1893_v50 = vadd.f32 %v8715_v41, %v1793_v47  ;;  %v1988_v21 = vmax.f32 %v1892_v8, 0.0 }
 0x167   :  { %497 = vperm.xlu0 %8317, %v102_v23  }
 0x168   :  { %v418_v45 = vpop.permute.xlu1 %417  ;;  %v2013_v14 = vmax.f32 %v1917_v33, 0.0  ;;  %v528_v6 = vpop.permute.xlu0 %527  ;;  %v1989_v24 = vmax.f32 %v1893_v50, 0.0  ;;  %v112_v50 = vld [vmem:[%s11921_s0 + $0x2a0] sm:$0xff] }
 0x169   :  { %v1517_v48 = vpop.permute.xlu2 %1516  ;;  %v664_v9 = vmul.f32 %v8683_v0, %v418_v45  ;;  %v686_v56 = vmul.f32 %v8683_v0, %v528_v6 }
 0x16a   :  { %v2080_v29 = vpack.c.bf16 %v2013_v14, %v2012_v54  ;;  %v2068_v22 = vpack.c.bf16 %v1989_v24, %v1988_v21  ;;  %v1094_v21 = vmul.f32 %v8680_v63, %v8673_v61 }
 0x16b   :  { %v1241_v57 = vadd.f32 %v1145_v58, %v664_v9  ;;  %v1263_v62 = vadd.f32 %v1167_v2, %v686_v56  ;;  %v9186_v58 = vld [vmem:[%s11921_s0 + $0x138] sm:$0xff] }
 0x16c   :  { %7822 = vmatmul.msk.bf16.gmra.mxu2 %vm2136_vm0, %v2080_v29  ;;  %v8347_v29 = vld [vmem:[%s11921_s0 + $0x1f8] sm:$0xff] }
 0x16e   :  { %8246 = vset.pattern.permute.xlu2 %v12008_v1  ;;  %1612 = vperm.xlu1 %8244, %v8830_v15  }
 0x16f   :  { %167 = vperm.xlu2 %8246, %v36_v18   ;;  %8325 = vset.pattern.permute.xlu0 %v12011_v44 }
 0x170   :  { %v533_v3 = vpop.permute.xlu1 %532  ;;  %847 = vperm.xlu0 %8325, %v9093_v31  }
 0x171   :  { %v9099_v55 = vpop.permute.xlu0 %157  ;;  %v1605_v20 = vpop.permute.xlu2 %1604  ;;  %v687_v37 = vmul.f32 %v8683_v0, %v533_v3 }
 0x172   :  { %v1745_v36 = vmul.f32 %v8689_v12, %v1605_v20 }
 0x173   :  { %v1264_v28 = vadd.f32 %v1168_v19, %v687_v37 }
 0x175   :  { %7810 = vmatmul.msk.bf16.gmra.mxu1 %vm2136_vm0, %v2068_v22  ;;  %v1841_v16 = vadd.f32 %v1745_v36, %v1264_v28 }
 0x176   :  { %8247 = vset.pattern.permute.xlu1 %v12008_v1 }
 0x177   :  { %312 = vperm.xlu2 %8246, %v8576_v26   ;;  %307 = vperm.xlu1 %8247, %v9093_v31   ;;  %v1723_v26 = vmul.f32 %v8689_v12, %v1517_v48  ;;  %v1941_v7 = vadd.f32 %v8715_v41, %v1841_v16 }
 0x178   :  { %951 = vperm.xlu0 %8325, %v9110_v27  }
 0x179   :  { %v940_v15 = vpop.permute.xlu1 %939  ;;  %v9105_v30 = vpop.permute.xlu0 %542  ;;  %v2037_v54 = vmax.f32 %v1941_v7, 0.0 }
 0x17a   :  { %v1146_v43 = vmul.f32 %v8680_v63, %v940_v15  ;;  %v9113_v32 = vpop.permute.xlu2 %297 }
 0x17c   :  { %v1242_v35 = vadd.f32 %v1146_v43, %v665_v13  ;;  %v612_v43 = vmul.f32 %v8683_v0, %v9099_v55  ;;  %v640_v55 = vmul.f32 %v8683_v0, %v9113_v32 }
 0x17e   :  { %v1819_v42 = vadd.f32 %v1723_v26, %v1242_v35 }
 0x17f   :  { %8249 = vset.pattern.permute.xlu2 %v12011_v44  ;;  %8248 = vset.pattern.permute.xlu1 %v12011_v44 }
 0x180   :  { %739 = vperm.xlu2 %8249, %v8845_v52   ;;  %735 = vperm.xlu1 %8248, %v36_v18   ;;  %v1919_v60 = vadd.f32 %v8715_v41, %v1819_v42 }
 0x181   :  { %859 = vperm.xlu0 %8325, %v9186_v58  }
 0x182   :  { %v1513_v34 = vpop.permute.xlu1 %1512  ;;  %v9128_v46 = vpop.permute.xlu0 %172  ;;  %v2015_v53 = vmax.f32 %v1919_v60, 0.0 }
 0x183   :  { %v1722_v4 = vmul.f32 %v8689_v12, %v1513_v34  ;;  %v728_v10 = vpop.permute.xlu2 %727  ;;  %v12012_v34 = vld [vmem:[#allocation5_spill] sm:$0xff] }
 0x184   :  { %v1093_v13 = vmul.f32 %v8680_v63, %v728_v10 }
 0x185   :  { %v1818_v38 = vadd.f32 %v1722_v4, %v1241_v57  ;;  %v1698_v57 = vmul.f32 %v8689_v12, %v12012_v34 }
 0x186   :  { %v1189_v19 = vadd.f32 %v1093_v13, %v612_v43 }
 0x187   :  { %v1918_v40 = vadd.f32 %v8715_v41, %v1818_v38 }
 0x188   :  { %8250 = vset.pattern.permute.xlu2 %v12002_v59  ;;  %851 = vperm.xlu1 %8248, %v8346_v49  }
 0x189   :  { %1312 = vperm.xlu2 %8250, %v36_v18   ;;  %v2014_v17 = vmax.f32 %v1918_v40, 0.0  ;;  %v113_v18 = vld [vmem:[%s11921_s0 + $0x2a8] sm:$0xff] }
 0x18a   :  { %v1601_v51 = vpop.permute.xlu1 %1600  ;;  %v9142_v11 = vpop.permute.xlu0 %317 }
 0x18b   :  { %v1744_v23 = vmul.f32 %v8689_v12, %v1601_v51  ;;  %v844_v5 = vpop.permute.xlu2 %843  ;;  %v2081_v39 = vpack.c.bf16 %v2015_v53, %v2014_v17 }
 0x18c   :  { %v1122_v36 = vmul.f32 %v8680_v63, %v844_v5 }
 0x18d   :  { %v1840_v33 = vadd.f32 %v1744_v23, %v1263_v62  ;;  %7823 = vmatmul.msk.bf16.gmra.mxu2 %vm2136_vm0, %v2081_v39 }
 0x18f   :  { %v1940_v25 = vadd.f32 %v8715_v41, %v1840_v33 }
 0x190   :  { %8251 = vset.pattern.permute.xlu1 %v12002_v59 }
 0x191   :  { %1424 = vperm.xlu2 %8250, %v9093_v31   ;;  %1316 = vperm.xlu1 %8251, %v8845_v52   ;;  %v2036_v45 = vmax.f32 %v1940_v25, 0.0 }
 0x193   :  { %v163_v14 = vpop.permute.xlu1 %162  ;;  %v2092_v6 = vpack.c.bf16 %v2037_v54, %v2036_v45  ;;  %v9151_v48 = vpop.permute.xlu0 %447  ;;  %v39_v54 = vld [vmem:[%s11921_s0 + $0x58] sm:$0xff] }
 0x194   :  { %v1309_v47 = vpop.permute.xlu2 %1308  ;;  %v613_v3 = vmul.f32 %v8683_v0, %v163_v14 }
 0x195   :  { %7834 = vmatmul.msk.bf16.gmra.mxu3 %vm2136_vm0, %v2092_v6  ;;  %v1671_v15 = vmul.f32 %v8689_v12, %v1309_v47 }
 0x196   :  { %v1190_v22 = vadd.f32 %v1094_v21, %v613_v3 }
 0x198   :  { %v1767_v61 = vadd.f32 %v1671_v15, %v1190_v22 }
 0x199   :  { %8253 = vset.pattern.permute.xlu2 %v12008_v1  ;;  %8252 = vset.pattern.permute.xlu1 %v12008_v1 }
 0x19a   :  { %442 = vperm.xlu2 %8253, %v8347_v29   ;;  %437 = vperm.xlu1 %8252, %v9110_v27   ;;  %v1867_v4 = vadd.f32 %v8715_v41, %v1767_v61  ;;  %v12014_v61 = vld [vmem:[#allocation14_spill] sm:$0xff] }
 0x19b   :  { %v303_v52 = vpop.permute.xlu1 %302 }
 0x19c   :  { %v9167_v31 = vpop.permute.xlu0 %332  ;;  %v641_v38 = vmul.f32 %v8683_v0, %v303_v52  ;;  %v1963_v56 = vmax.f32 %v1867_v4, 0.0 }
 0x19d   :  { %v9159_v8 = vpop.permute.xlu2 %427 }
 0x19e   :  { %v1218_v16 = vadd.f32 %v1122_v36, %v641_v38 }
 0x1a2   :  { %552 = vperm.xlu2 %8253, %v113_v18   ;;  %547 = vperm.xlu1 %8252, %v112_v50  }
 0x1a4   :  { %v840_v24 = vpop.permute.xlu1 %839  ;;  %v9180_v26 = vpop.permute.xlu0 %462 }
 0x1a5   :  { %v9172_v20 = vpop.permute.xlu2 %537  ;;  %v1121_v35 = vmul.f32 %v8680_v63, %v840_v24  ;;  %v12013_v24 = vld [vmem:[#allocation6_spill] sm:$0xff] }
 0x1a6   :  { %v1724_v22 = vmul.f32 %v8689_v12, %v12013_v24 }
 0x1a7   :  { %v1217_v10 = vadd.f32 %v1121_v35, %v640_v55  ;;  %v688_v55 = vmul.f32 %v8683_v0, %v9172_v20  ;;  %v689_v20 = vmul.f32 %v8683_v0, %v9105_v30 }
 0x1a9   :  { %v1794_v32 = vadd.f32 %v1698_v57, %v1217_v10  ;;  %v9253_v10 = vld [vmem:[%s11923_s2] ss:$0 sm:$0xff] }
 0x1aa   :  { %8255 = vset.pattern.permute.xlu2 %v12011_v44  ;;  %8254 = vset.pattern.permute.xlu1 %v12011_v44 }
 0x1ab   :  { %1039 = vperm.xlu2 %8255, %v112_v50   ;;  %955 = vperm.xlu1 %8254, %v8347_v29   ;;  %v1894_v23 = vadd.f32 %v8715_v41, %v1794_v32 }
 0x1ad   :  { %v1305_v9 = vpop.permute.xlu1 %1304  ;;  %v9200_v40 = vpop.permute.xlu0 %577 }
 0x1ae   :  { %v1670_v37 = vmul.f32 %v8689_v12, %v1305_v9  ;;  %v948_v42 = vpop.permute.xlu2 %947 }
 0x1af   :  { %v1148_v43 = vmul.f32 %v8680_v63, %v948_v42 }
 0x1b0   :  { %v1766_v28 = vadd.f32 %v1670_v37, %v1189_v19 }
 0x1b2   :  { %v1866_v60 = vadd.f32 %v8715_v41, %v1766_v28 }
 0x1b3   :  { %8256 = vset.pattern.permute.xlu2 %v12002_v59  ;;  %1043 = vperm.xlu1 %8254, %v113_v18  }
 0x1b4   :  { %1528 = vperm.xlu2 %8256, %v9110_v27   ;;  %v1962_v2 = vmax.f32 %v1866_v60, 0.0  ;;  %v1990_v27 = vmax.f32 %v1894_v23, 0.0 }
 0x1b5   :  { %v1421_v49 = vpop.permute.xlu1 %1420 }
 0x1b6   :  { %v1699_v17 = vmul.f32 %v8689_v12, %v1421_v49  ;;  %v2055_v53 = vpack.c.bf16 %v1963_v56, %v1962_v2  ;;  %v1036_v51 = vpop.permute.xlu2 %1035  ;;  %v9207_v25 = vpop.permute.xlu0 %207 }
 0x1b7   :  { %v1170_v38 = vmul.f32 %v8680_v63, %v1036_v51 }
 0x1b8   :  { %v1795_v62 = vadd.f32 %v1699_v17, %v1218_v16  ;;  %7797 = vmatmul.msk.bf16.gmra.mxu0 %vm2136_vm0, %v2055_v53 }
 0x1b9   :  { %v1266_v16 = vadd.f32 %v1170_v38, %v689_v20  ;;  %v615_v38 = vmul.f32 %v8683_v0, %v9128_v46 }
 0x1ba   :  { %v1895_v5 = vadd.f32 %v8715_v41, %v1795_v62  ;;  %v38_v41 = vld [vmem:[%s11921_s0 + $0x50] sm:$0xff] }
 0x1bb   :  { %8257 = vset.pattern.permute.xlu1 %v12002_v59 }
 0x1bc   :  { %1620 = vperm.xlu2 %8256, %v113_v18   ;;  %1616 = vperm.xlu1 %8257, %v112_v50   ;;  %v1991_v39 = vmax.f32 %v1895_v5, 0.0  ;;  %v9228_v18 = vld [vmem:[%s11921_s0 + $0x208] sm:$0xff]  ;;  %v666_v50 = vmul.f32 %v8683_v0, %v9159_v8 }
 0x1bd   :  { %963 = vperm.xlu0 %8325, %v9228_v18  }
 0x1be   :  { %v433_v7 = vpop.permute.xlu1 %432  ;;  %v2069_v33 = vpack.c.bf16 %v1991_v39, %v1990_v27 }
 0x1bf   :  { %v9218_v6 = vpop.permute.xlu0 %592  ;;  %v667_v13 = vmul.f32 %v8683_v0, %v433_v7 }
 0x1c0   :  { %7811 = vmatmul.msk.bf16.gmra.mxu1 %vm2136_vm0, %v2069_v33  ;;  %v1609_v45 = vpop.permute.xlu2 %1608 }
 0x1c1   :  { %v1244_v19 = vadd.f32 %v1148_v43, %v667_v13  ;;  %v1746_v42 = vmul.f32 %v8689_v12, %v1609_v45 }
 0x1c4   :  { %8259 = vset.pattern.permute.xlu2 %v12008_v1  ;;  %8258 = vset.pattern.permute.xlu1 %v12008_v1 }
 0x1c5   :  { %182 = vperm.xlu2 %8259, %v39_v54   ;;  %177 = vperm.xlu1 %8258, %v38_v41  }
 0x1c7   :  { %v944_v14 = vpop.permute.xlu1 %943 }
 0x1c8   :  { %v1147_v29 = vmul.f32 %v8680_v63, %v944_v14  ;;  %v9235_v3 = vpop.permute.xlu0 %222 }
 0x1c9   :  { %v9220_v47 = vpop.permute.xlu2 %167 }
 0x1ca   :  { %v1243_v15 = vadd.f32 %v1147_v29, %v666_v50  ;;  %v115_v50 = vld [vmem:[%s11921_s0 + $0x2b8] sm:$0xff] }
 0x1cc   :  { %v1820_v35 = vadd.f32 %v1724_v22, %v1243_v15  ;;  %v12015_v15 = vld [vmem:[#allocation17_spill] sm:$0xff] }
 0x1cd   :  { %8260 = vset.pattern.permute.xlu2 %v12011_v44  ;;  %322 = vperm.xlu1 %8258, %v9186_v58  }
 0x1ce   :  { %743 = vperm.xlu2 %8260, %v38_v41   ;;  %v1920_v28 = vadd.f32 %v9253_v10, %v1820_v35 }
 0x1cf   :  { %v1032_v52 = vpop.permute.xlu1 %1031 }
 0x1d0   :  { %v1169_v8 = vmul.f32 %v8680_v63, %v1032_v52  ;;  %v9256_v36 = vpop.permute.xlu0 %367  ;;  %v2016_v2 = vmax.f32 %v1920_v28, 0.0 }
 0x1d1   :  { %v9233_v21 = vpop.permute.xlu2 %312 }
 0x1d2   :  { %v1265_v57 = vadd.f32 %v1169_v8, %v688_v55  ;;  %v643_v8 = vmul.f32 %v8683_v0, %v9233_v21 }
 0x1d4   :  { %v1842_v32 = vadd.f32 %v1746_v42, %v1265_v57 }
 0x1d5   :  { %8261 = vset.pattern.permute.xlu1 %v12011_v44 }
 0x1d6   :  { %855 = vperm.xlu2 %8260, %v12014_v61   ;;  %747 = vperm.xlu1 %8261, %v39_v54   ;;  %v1942_v51 = vadd.f32 %v9253_v10, %v1842_v32 }
 0x1d8   :  { %v1525_v9 = vpop.permute.xlu1 %1524  ;;  %v2038_v27 = vmax.f32 %v1942_v51, 0.0 }
 0x1d9   :  { %v1725_v37 = vmul.f32 %v8689_v12, %v1525_v9  ;;  %v9268_v5 = vpop.permute.xlu0 %497 }
 0x1da   :  { %v9247_v34 = vpop.permute.xlu2 %739 }
 0x1db   :  { %v1821_v4 = vadd.f32 %v1725_v37, %v1244_v19  ;;  %v614_v19 = vmul.f32 %v8683_v0, %v9220_v47  ;;  %v1096_v21 = vmul.f32 %v8680_v63, %v9247_v34 }
 0x1dd   :  { %v1921_v60 = vadd.f32 %v9253_v10, %v1821_v4 }
 0x1de   :  { %8263 = vset.pattern.permute.xlu2 %v12002_v59  ;;  %8262 = vset.pattern.permute.xlu1 %v12002_v59 }
 0x1df   :  { %1324 = vperm.xlu2 %8263, %v39_v54   ;;  %1320 = vperm.xlu1 %8262, %v38_v41   ;;  %v2017_v56 = vmax.f32 %v1921_v60, 0.0  ;;  %v8349_v41 = vld [vmem:[%s11921_s0 + $0x2b0] sm:$0xff] }
 0x1e0   :  { %v1613_v49 = vpop.permute.xlu1 %1612 }
 0x1e1   :  { %v1747_v17 = vmul.f32 %v8689_v12, %v1613_v49  ;;  %v2082_v53 = vpack.c.bf16 %v2017_v56, %v2016_v2  ;;  %v1192_v49 = vadd.f32 %v1096_v21, %v615_v38 }
 0x1e2   :  { %v848_v54 = vpop.permute.xlu0 %847 }
 0x1e3   :  { %v1843_v62 = vadd.f32 %v1747_v17, %v1266_v16  ;;  %v1313_v30 = vpop.permute.xlu2 %1312  ;;  %7824 = vmatmul.msk.bf16.gmra.mxu2 %vm2136_vm0, %v2082_v53  ;;  %v1123_v14 = vmul.f32 %v8680_v63, %v848_v54 }
 0x1e4   :  { %v1672_v57 = vmul.f32 %v8689_v12, %v1313_v30 }
 0x1e5   :  { %v1943_v23 = vadd.f32 %v9253_v10, %v1843_v62 }
 0x1e7   :  { %1436 = vperm.xlu2 %8263, %v9186_v58   ;;  %1432 = vperm.xlu1 %8262, %v12014_v61   ;;  %v2039_v39 = vmax.f32 %v1943_v23, 0.0  ;;  %v12016_v61 = vld [vmem:[#allocation7_spill] sm:$0xff] }
 0x1e8   :  { %v1701_v35 = vmul.f32 %v8689_v12, %v12016_v61 }
 0x1e9   :  { %v308_v7 = vpop.permute.xlu1 %307  ;;  %v2093_v33 = vpack.c.bf16 %v2039_v39, %v2038_v27 }
 0x1ea   :  { %v642_v29 = vmul.f32 %v8683_v0, %v308_v7  ;;  %v952_v7 = vpop.permute.xlu0 %951 }
 0x1eb   :  { %7835 = vmatmul.msk.bf16.gmra.mxu3 %vm2136_vm0, %v2093_v33  ;;  %v1425_v45 = vpop.permute.xlu2 %1424  ;;  %v8350_v33 = vld [vmem:[%s11921_s0 + $0x60] sm:$0xff] }
 0x1ec   :  { %v1219_v24 = vadd.f32 %v1123_v14, %v642_v29  ;;  %v1700_v22 = vmul.f32 %v8689_v12, %v1425_v45  ;;  %v41_v14 = vld [vmem:[%s11921_s0 + $0x68] sm:$0xff] }
 0x1ee   :  { %v1796_v9 = vadd.f32 %v1700_v22, %v1219_v24  ;;  %v12017_v22 = vld [vmem:[#allocation8_spill] sm:$0xff] }
 0x1ef   :  { %8265 = vset.pattern.permute.xlu2 %v12008_v1  ;;  %8264 = vset.pattern.permute.xlu1 %v12008_v1 }
 0x1f0   :  { %557 = vperm.xlu2 %8265, %v8349_v41   ;;  %452 = vperm.xlu1 %8264, %v9228_v18   ;;  %v1896_v28 = vadd.f32 %v9253_v10, %v1796_v9 }
 0x1f2   :  { %v736_v58 = vpop.permute.xlu1 %735  ;;  %v1992_v2 = vmax.f32 %v1896_v28, 0.0 }
 0x1f3   :  { %v1095_v43 = vmul.f32 %v8680_v63, %v736_v58  ;;  %v68_v58 = vld [vmem:[%s11921_s0 + $0x140] sm:$0xff] }
 0x1f4   :  { %v9281_v52 = vpop.permute.xlu2 %442 }
 0x1f5   :  { %v1191_v4 = vadd.f32 %v1095_v43, %v614_v19  ;;  %v669_v43 = vmul.f32 %v8683_v0, %v9281_v52  ;;  %v9342_v52 = vld [vmem:[%s11921_s0 + $0x2c0] sm:$0xff] }
 0x1f6   :  { %1055 = vperm.xlu0 %8325, %v9342_v52  }
 0x1f7   :  { %v1768_v60 = vadd.f32 %v1672_v57, %v1191_v4 }
 0x1f8   :  { %8266 = vset.pattern.permute.xlu2 %v12011_v44  ;;  %562 = vperm.xlu1 %8264, %v115_v50  }
 0x1f9   :  { %959 = vperm.xlu2 %8266, %v12015_v15   ;;  %v1868_v46 = vadd.f32 %v9253_v10, %v1768_v60 }
 0x1fa   :  { %v852_v13 = vpop.permute.xlu1 %851 }
 0x1fb   :  { %v1124_v55 = vmul.f32 %v8680_v63, %v852_v13  ;;  %v1964_v30 = vmax.f32 %v1868_v46, 0.0 }
 0x1fc   :  { %v9297_v37 = vpop.permute.xlu2 %552 }
 0x1fd   :  { %v1220_v42 = vadd.f32 %v1124_v55, %v643_v8 }
 0x1ff   :  { %v1797_v20 = vadd.f32 %v1701_v35, %v1220_v42 }
 0x200   :  { %8267 = vset.pattern.permute.xlu1 %v12011_v44 }
 0x201   :  { %1051 = vperm.xlu2 %8266, %v115_v50   ;;  %1047 = vperm.xlu1 %8267, %v8349_v41   ;;  %v1897_v47 = vadd.f32 %v9253_v10, %v1797_v20  ;;  %v691_v20 = vmul.f32 %v8683_v0, %v9297_v37 }
 0x203   :  { %v1317_v32 = vpop.permute.xlu1 %1316  ;;  %v1993_v56 = vmax.f32 %v1897_v47, 0.0 }
 0x204   :  { %v1673_v16 = vmul.f32 %v8689_v12, %v1317_v32 }
 0x205   :  { %v1040_v17 = vpop.permute.xlu2 %1039  ;;  %v2070_v53 = vpack.c.bf16 %v1993_v56, %v1992_v2  ;;  %v12018_v56 = vld [vmem:[#allocation19_spill] sm:$0xff] }
 0x206   :  { %v1769_v62 = vadd.f32 %v1673_v16, %v1192_v49  ;;  %v1171_v32 = vmul.f32 %v8680_v63, %v1040_v17 }
 0x207   :  { %7812 = vmatmul.msk.bf16.gmra.mxu1 %vm2136_vm0, %v2070_v53 }
 0x208   :  { %v1869_v34 = vadd.f32 %v9253_v10, %v1769_v62 }
 0x209   :  { %8269 = vset.pattern.permute.xlu2 %v12002_v59  ;;  %8268 = vset.pattern.permute.xlu1 %v12002_v59 }
 0x20a   :  { %1540 = vperm.xlu2 %8269, %v9228_v18   ;;  %1536 = vperm.xlu1 %8268, %v12015_v15   ;;  %v1965_v51 = vmax.f32 %v1869_v34, 0.0  ;;  %v1149_v18 = vmul.f32 %v8680_v63, %v952_v7  ;;  %v1727_v15 = vmul.f32 %v8689_v12, %v12017_v22  ;;  %v94_v7 = vld [vmem:[%s11921_s0 + $0x210] sm:$0xff] }
 0x20c   :  { %v438_v23 = vpop.permute.xlu1 %437  ;;  %v2056_v27 = vpack.c.bf16 %v1965_v51, %v1964_v30 }
 0x20d   :  { %v668_v54 = vmul.f32 %v8683_v0, %v438_v23 }
 0x20e   :  { %v1529_v39 = vpop.permute.xlu2 %1528  ;;  %7798 = vmatmul.msk.bf16.gmra.mxu0 %vm2136_vm0, %v2056_v27 }
 0x20f   :  { %v1245_v29 = vadd.f32 %v1149_v18, %v668_v54  ;;  %v8352_v54 = vld [vmem:[%s11921_s0 + $0x2c8] sm:$0xff] }
 0x212   :  { %8270 = vset.pattern.permute.xlu2 %v12008_v1  ;;  %1628 = vperm.xlu1 %8268, %v115_v50   ;;  %v1726_v50 = vmul.f32 %v8689_v12, %v1529_v39 }
 0x213   :  { %187 = vperm.xlu2 %8270, %v8350_v33  }
 0x214   :  { %v548_v45 = vpop.permute.xlu1 %547  ;;  %v1822_v13 = vadd.f32 %v1726_v50, %v1245_v29 }
 0x215   :  { %v690_v2 = vmul.f32 %v8683_v0, %v548_v45 }
 0x216   :  { %v1621_v41 = vpop.permute.xlu2 %1620  ;;  %v1922_v9 = vadd.f32 %v9253_v10, %v1822_v13 }
 0x217   :  { %v1749_v47 = vmul.f32 %v8689_v12, %v1621_v41  ;;  %v1267_v53 = vadd.f32 %v1171_v32, %v690_v2 }
 0x218   :  { %v2018_v4 = vmax.f32 %v1922_v9, 0.0 }
 0x21a   :  { %8271 = vset.pattern.permute.xlu1 %v12008_v1 }
 0x21b   :  { %327 = vperm.xlu2 %8270, %v68_v58   ;;  %192 = vperm.xlu1 %8271, %v41_v14  }
 0x21d   :  { %v956_v24 = vpop.permute.xlu1 %955 }
 0x21e   :  { %v1150_v61 = vmul.f32 %v8680_v63, %v956_v24 }
 0x21f   :  { %v183_v35 = vpop.permute.xlu2 %182 }
 0x220   :  { %v1246_v8 = vadd.f32 %v1150_v61, %v669_v43  ;;  %v617_v29 = vmul.f32 %v8683_v0, %v183_v35  ;;  %v8353_v61 = vld [vmem:[%s11921_s0 + $0x218] sm:$0xff] }
 0x222   :  { %v1823_v55 = vadd.f32 %v1727_v15, %v1246_v8  ;;  %v860_v15 = vpop.permute.xlu0 %859 }
 0x223   :  { %8273 = vset.pattern.permute.xlu2 %v12011_v44  ;;  %8272 = vset.pattern.permute.xlu1 %v12011_v44  ;;  %v1126_v35 = vmul.f32 %v8680_v63, %v860_v15  ;;  %v670_v15 = vmul.f32 %v8683_v0, %v9151_v48 }
 0x224   :  { %755 = vperm.xlu2 %8273, %v41_v14   ;;  %751 = vperm.xlu1 %8272, %v8350_v33   ;;  %v1923_v19 = vadd.f32 %v9253_v10, %v1823_v55  ;;  %v8351_v33 = vld [vmem:[%s11921_s0 + $0x148] sm:$0xff] }
 0x225   :  { %v1044_v42 = vpop.permute.xlu1 %1043 }
 0x226   :  { %v1172_v57 = vmul.f32 %v8680_v63, %v1044_v42  ;;  %v2019_v28 = vmax.f32 %v1923_v19, 0.0 }
 0x228   :  { %v744_v38 = vpop.permute.xlu2 %743  ;;  %v2083_v21 = vpack.c.bf16 %v2019_v28, %v2018_v4  ;;  %v1268_v60 = vadd.f32 %v1172_v57, %v691_v20 }
 0x229   :  { %v1097_v43 = vmul.f32 %v8680_v63, %v744_v38 }
 0x22a   :  { %7825 = vmatmul.msk.bf16.gmra.mxu2 %vm2136_vm0, %v2083_v21  ;;  %v1845_v49 = vadd.f32 %v1749_v47, %v1268_v60  ;;  %v644_v21 = vmul.f32 %v8683_v0, %v9142_v11 }
 0x22c   :  { %867 = vperm.xlu2 %8273, %v12018_v56   ;;  %863 = vperm.xlu1 %8272, %v68_v58   ;;  %v1945_v34 = vadd.f32 %v9253_v10, %v1845_v49 }
 0x22e   :  { %v1617_v16 = vpop.permute.xlu1 %1616  ;;  %v2041_v51 = vmax.f32 %v1945_v34, 0.0 }
 0x22f   :  { %v1748_v62 = vmul.f32 %v8689_v12, %v1617_v16 }
 0x230   :  { %v856_v37 = vpop.permute.xlu2 %855 }
 0x231   :  { %v1844_v46 = vadd.f32 %v1748_v62, %v1267_v53  ;;  %v1125_v47 = vmul.f32 %v8680_v63, %v856_v37 }
 0x233   :  { %v1944_v30 = vadd.f32 %v9253_v10, %v1844_v46  ;;  %v1221_v16 = vadd.f32 %v1125_v47, %v644_v21 }
 0x234   :  { %8275 = vset.pattern.permute.xlu2 %v12002_v59  ;;  %8274 = vset.pattern.permute.xlu1 %v12002_v59 }
 0x235   :  { %1440 = vperm.xlu2 %8275, %v68_v58   ;;  %1332 = vperm.xlu1 %8274, %v41_v14   ;;  %v2040_v17 = vmax.f32 %v1944_v30, 0.0  ;;  %v9374_v58 = vld [vmem:[%s11921_s0 + $0x70] sm:$0xff] }
 0x236   :  { %759 = vperm.xlu0 %8325, %v9374_v58  }
 0x237   :  { %v178_v23 = vpop.permute.xlu1 %177  ;;  %v2094_v27 = vpack.c.bf16 %v2041_v51, %v2040_v17 }
 0x238   :  { %v616_v13 = vmul.f32 %v8683_v0, %v178_v23 }
 0x239   :  { %v1325_v39 = vpop.permute.xlu2 %1324  ;;  %7836 = vmatmul.msk.bf16.gmra.mxu3 %vm2136_vm0, %v2094_v27 }
 0x23a   :  { %v1675_v24 = vmul.f32 %v8689_v12, %v1325_v39  ;;  %v1193_v19 = vadd.f32 %v1097_v43, %v616_v13  ;;  %v8354_v39 = vld [vmem:[%s11921_s0 + $0x78] sm:$0xff] }
 0x23d   :  { %8276 = vset.pattern.permute.xlu2 %v12008_v1  ;;  %1444 = vperm.xlu1 %8274, %v8351_v33   ;;  %v71_v33 = vld [vmem:[%s11921_s0 + $0x158] sm:$0xff] }
 0x23e   :  { %457 = vperm.xlu2 %8276, %v94_v7  }
 0x23f   :  { %v323_v45 = vpop.permute.xlu1 %322 }
 0x240   :  { %v645_v8 = vmul.f32 %v8683_v0, %v323_v45  ;;  %v70_v45 = vld [vmem:[%s11921_s0 + $0x150] sm:$0xff] }
 0x241   :  { %v1437_v18 = vpop.permute.xlu2 %1436 }
 0x242   :  { %v1222_v4 = vadd.f32 %v1126_v35, %v645_v8  ;;  %v1703_v28 = vmul.f32 %v8689_v12, %v1437_v18  ;;  %v964_v18 = vpop.permute.xlu0 %963  ;;  %v9434_v35 = vld [vmem:[%s11921_s0 + $0x2d8] sm:$0xff] }
 0x243   :  { %1067 = vperm.xlu0 %8325, %v9434_v35  }
 0x244   :  { %v1799_v32 = vadd.f32 %v1703_v28, %v1222_v4 }
 0x245   :  { %8277 = vset.pattern.permute.xlu1 %v12008_v1 }
 0x246   :  { %572 = vperm.xlu2 %8276, %v8352_v54   ;;  %567 = vperm.xlu1 %8277, %v9342_v52   ;;  %v1899_v34 = vadd.f32 %v9253_v10, %v1799_v32 }
 0x248   :  { %v748_v41 = vpop.permute.xlu1 %747  ;;  %v1995_v17 = vmax.f32 %v1899_v34, 0.0 }
 0x249   :  { %v1098_v14 = vmul.f32 %v8680_v63, %v748_v41 }
 0x24a   :  { %v9379_v50 = vpop.permute.xlu2 %557 }
 0x24b   :  { %v1194_v22 = vadd.f32 %v1098_v14, %v617_v29  ;;  %v692_v48 = vmul.f32 %v8683_v0, %v9379_v50 }
 0x24d   :  { %v1771_v9 = vadd.f32 %v1675_v24, %v1194_v22 }
 0x24e   :  { %8279 = vset.pattern.permute.xlu2 %v12011_v44  ;;  %8278 = vset.pattern.permute.xlu1 %v12011_v44 }
 0x24f   :  { %971 = vperm.xlu2 %8279, %v8353_v61   ;;  %967 = vperm.xlu1 %8278, %v94_v7   ;;  %v1871_v38 = vadd.f32 %v9253_v10, %v1771_v9 }
 0x251   :  { %v1321_v55 = vpop.permute.xlu1 %1320  ;;  %v1967_v56 = vmax.f32 %v1871_v38, 0.0 }
 0x252   :  { %v1674_v42 = vmul.f32 %v8689_v12, %v1321_v55 }
 0x253   :  { %v960_v57 = vpop.permute.xlu2 %959 }
 0x254   :  { %v1770_v20 = vadd.f32 %v1674_v42, %v1193_v19  ;;  %v1151_v43 = vmul.f32 %v8680_v63, %v960_v57  ;;  %v12019_v42 = vld [vmem:[#allocation9_spill] sm:$0xff] }
 0x255   :  { %v1750_v57 = vmul.f32 %v8689_v12, %v12019_v42 }
 0x256   :  { %v1870_v60 = vadd.f32 %v9253_v10, %v1770_v20  ;;  %v1247_v9 = vadd.f32 %v1151_v43, %v670_v15  ;;  %v8355_v43 = vld [vmem:[%s11921_s0 + $0x2d0] sm:$0xff] }
 0x257   :  { %8280 = vset.pattern.permute.xlu2 %v12002_v59  ;;  %1059 = vperm.xlu1 %8278, %v8352_v54   ;;  %v1152_v54 = vmul.f32 %v8680_v63, %v964_v18 }
 0x258   :  { %1544 = vperm.xlu2 %8280, %v94_v7   ;;  %v1966_v2 = vmax.f32 %v1870_v60, 0.0 }
 0x259   :  { %v1433_v49 = vpop.permute.xlu1 %1432 }
 0x25a   :  { %v1702_v53 = vmul.f32 %v8689_v12, %v1433_v49  ;;  %v2057_v62 = vpack.c.bf16 %v1967_v56, %v1966_v2 }
 0x25b   :  { %v1052_v46 = vpop.permute.xlu2 %1051 }
 0x25c   :  { %v1798_v11 = vadd.f32 %v1702_v53, %v1221_v16  ;;  %7799 = vmatmul.msk.bf16.gmra.mxu0 %vm2136_vm0, %v2057_v62  ;;  %v1174_v38 = vmul.f32 %v8680_v63, %v1052_v46 }
 0x25e   :  { %v1898_v37 = vadd.f32 %v9253_v10, %v1798_v11 }
 0x25f   :  { %8281 = vset.pattern.permute.xlu1 %v12002_v59 }
 0x260   :  { %1632 = vperm.xlu2 %8280, %v9342_v52   ;;  %1548 = vperm.xlu1 %8281, %v8353_v61   ;;  %v1994_v30 = vmax.f32 %v1898_v37, 0.0 }
 0x262   :  { %v453_v51 = vpop.permute.xlu1 %452  ;;  %v2071_v23 = vpack.c.bf16 %v1995_v17, %v1994_v30 }
 0x263   :  { %v671_v41 = vmul.f32 %v8683_v0, %v453_v51  ;;  %v97_v51 = vld [vmem:[%s11921_s0 + $0x228] sm:$0xff] }
 0x264   :  { %7813 = vmatmul.msk.bf16.gmra.mxu1 %vm2136_vm0, %v2071_v23  ;;  %v1541_v27 = vpop.permute.xlu2 %1540  ;;  %v96_v23 = vld [vmem:[%s11921_s0 + $0x220] sm:$0xff] }
 0x265   :  { %v1248_v24 = vadd.f32 %v1152_v54, %v671_v41  ;;  %v1729_v22 = vmul.f32 %v8689_v12, %v1541_v27  ;;  %v12020_v41 = vld [vmem:[#allocation10_spill] sm:$0xff] }
 0x267   :  { %v1825_v13 = vadd.f32 %v1729_v22, %v1248_v24 }
 0x268   :  { %8283 = vset.pattern.permute.xlu2 %v12008_v1  ;;  %8282 = vset.pattern.permute.xlu1 %v12008_v1 }
 0x269   :  { %202 = vperm.xlu2 %8283, %v8354_v39   ;;  %197 = vperm.xlu1 %8282, %v9374_v58   ;;  %v1925_v4 = vadd.f32 %v9253_v10, %v1825_v13 }
 0x26a   :  { %v563_v52 = vpop.permute.xlu1 %562 }
 0x26b   :  { %v693_v21 = vmul.f32 %v8683_v0, %v563_v52  ;;  %v2021_v32 = vmax.f32 %v1925_v4, 0.0 }
 0x26d   :  { %v9412_v7 = vpop.permute.xlu2 %187  ;;  %v1270_v56 = vadd.f32 %v1174_v38, %v693_v21 }
 0x26e   :  { %v618_v18 = vmul.f32 %v8683_v0, %v9412_v7 }
 0x271   :  { %342 = vperm.xlu2 %8283, %v71_v33   ;;  %337 = vperm.xlu1 %8282, %v70_v45  }
 0x273   :  { %v1048_v14 = vpop.permute.xlu1 %1047 }
 0x274   :  { %v1173_v61 = vmul.f32 %v8680_v63, %v1048_v14  ;;  %v1676_v14 = vmul.f32 %v8689_v12, %v12020_v41 }
 0x275   :  { %v9422_v29 = vpop.permute.xlu2 %327 }
 0x276   :  { %v1269_v28 = vadd.f32 %v1173_v61, %v692_v48 }
 0x278   :  { %v1846_v50 = vadd.f32 %v1750_v57, %v1269_v28  ;;  %v647_v28 = vmul.f32 %v8683_v0, %v9167_v31 }
 0x279   :  { %8285 = vset.pattern.permute.xlu2 %v12011_v44  ;;  %8284 = vset.pattern.permute.xlu1 %v12011_v44 }
 0x27a   :  { %871 = vperm.xlu2 %8285, %v70_v45   ;;  %763 = vperm.xlu1 %8284, %v8354_v39   ;;  %v1946_v46 = vadd.f32 %v9253_v10, %v1846_v50 }
 0x27c   :  { %v1537_v8 = vpop.permute.xlu1 %1536 }
 0x27d   :  { %v1728_v55 = vmul.f32 %v8689_v12, %v1537_v8  ;;  %v646_v8 = vmul.f32 %v8683_v0, %v9422_v29 }
 0x27e   :  { %v756_v19 = vpop.permute.xlu2 %755 }
 0x27f   :  { %v1824_v20 = vadd.f32 %v1728_v55, %v1247_v9  ;;  %v1100_v22 = vmul.f32 %v8680_v63, %v756_v19 }
 0x281   :  { %v1924_v47 = vadd.f32 %v9253_v10, %v1824_v20 }
 0x282   :  { %8286 = vset.pattern.permute.xlu2 %v12002_v59  ;;  %875 = vperm.xlu1 %8284, %v71_v33  }
 0x283   :  { %1336 = vperm.xlu2 %8286, %v9374_v58   ;;  %v2020_v60 = vmax.f32 %v1924_v47, 0.0  ;;  %v2042_v58 = vmax.f32 %v1946_v46, 0.0 }
 0x284   :  { %v1629_v2 = vpop.permute.xlu1 %1628 }
 0x285   :  { %v1751_v49 = vmul.f32 %v8689_v12, %v1629_v2  ;;  %v2084_v16 = vpack.c.bf16 %v2021_v32, %v2020_v60 }
 0x286   :  { %v868_v53 = vpop.permute.xlu2 %867 }
 0x287   :  { %v1847_v62 = vadd.f32 %v1751_v49, %v1270_v56  ;;  %7826 = vmatmul.msk.bf16.gmra.mxu2 %vm2136_vm0, %v2084_v16  ;;  %v1128_v20 = vmul.f32 %v8680_v63, %v868_v53 }
 0x289   :  { %v1947_v34 = vadd.f32 %v9253_v10, %v1847_v62  ;;  %v1224_v60 = vadd.f32 %v1128_v20, %v647_v28 }
 0x28a   :  { %8287 = vset.pattern.permute.xlu1 %v12002_v59 }
 0x28b   :  { %1452 = vperm.xlu2 %8286, %v71_v33   ;;  %1448 = vperm.xlu1 %8287, %v70_v45   ;;  %v2043_v11 = vmax.f32 %v1947_v34, 0.0  ;;  %v9470_v45 = vld [vmem:[%s11921_s0 + $0x88] sm:$0xff] }
 0x28c   :  { %771 = vperm.xlu0 %8325, %v9470_v45  }
 0x28d   :  { %v193_v37 = vpop.permute.xlu1 %192  ;;  %v2095_v30 = vpack.c.bf16 %v2043_v11, %v2042_v58  ;;  %v1056_v11 = vpop.permute.xlu0 %1055 }
 0x28e   :  { %v619_v15 = vmul.f32 %v8683_v0, %v193_v37  ;;  %v8356_v37 = vld [vmem:[%s11921_s0 + $0x160] sm:$0xff] }
 0x28f   :  { %7837 = vmatmul.msk.bf16.gmra.mxu3 %vm2136_vm0, %v2095_v30  ;;  %v1441_v17 = vpop.permute.xlu2 %1440  ;;  %v1175_v30 = vmul.f32 %v8680_v63, %v1056_v11 }
 0x290   :  { %v1196_v48 = vadd.f32 %v1100_v22, %v619_v15  ;;  %v1704_v19 = vmul.f32 %v8689_v12, %v1441_v17 }
 0x293   :  { %8289 = vset.pattern.permute.xlu2 %v12008_v1  ;;  %8288 = vset.pattern.permute.xlu1 %v12008_v1 }
 0x294   :  { %472 = vperm.xlu2 %8289, %v97_v51   ;;  %467 = vperm.xlu1 %8288, %v96_v23  }
 0x296   :  { %v752_v27 = vpop.permute.xlu1 %751 }
 0x297   :  { %v1099_v52 = vmul.f32 %v8680_v63, %v752_v27 }
 0x298   :  { %v9462_v39 = vpop.permute.xlu2 %457 }
 0x299   :  { %v1195_v24 = vadd.f32 %v1099_v52, %v618_v18  ;;  %v672_v15 = vmul.f32 %v8683_v0, %v9462_v39 }
 0x29b   :  { %v1772_v13 = vadd.f32 %v1676_v14, %v1195_v24 }
 0x29c   :  { %8290 = vset.pattern.permute.xlu2 %v12011_v44  ;;  %582 = vperm.xlu1 %8288, %v9434_v35  }
 0x29d   :  { %975 = vperm.xlu2 %8290, %v96_v23   ;;  %v1872_v4 = vadd.f32 %v9253_v10, %v1772_v13  ;;  %v12021_v13 = vld [vmem:[#allocation11_spill] sm:$0xff] }
 0x29e   :  { %v864_v33 = vpop.permute.xlu1 %863 }
 0x29f   :  { %v1127_v7 = vmul.f32 %v8680_v63, %v864_v33  ;;  %v1968_v21 = vmax.f32 %v1872_v4, 0.0  ;;  %v8357_v33 = vld [vmem:[%s11921_s0 + $0x80] sm:$0xff] }
 0x2a0   :  { %v9475_v54 = vpop.permute.xlu2 %572 }
 0x2a1   :  { %v1223_v42 = vadd.f32 %v1127_v7, %v646_v8  ;;  %v695_v14 = vmul.f32 %v8683_v0, %v9475_v54  ;;  %v1753_v7 = vmul.f32 %v8689_v12, %v12021_v13  ;;  %v673_v54 = vmul.f32 %v8683_v0, %v9180_v26 }
 0x2a3   :  { %v1800_v29 = vadd.f32 %v1704_v19, %v1223_v42 }
 0x2a4   :  { %8291 = vset.pattern.permute.xlu1 %v12011_v44 }
 0x2a5   :  { %1063 = vperm.xlu2 %8290, %v8355_v43   ;;  %979 = vperm.xlu1 %8291, %v97_v51   ;;  %v1900_v49 = vadd.f32 %v9253_v10, %v1800_v29 }
 0x2a7   :  { %v1333_v61 = vpop.permute.xlu1 %1332  ;;  %v1996_v62 = vmax.f32 %v1900_v49, 0.0 }
 0x2a8   :  { %v1677_v9 = vmul.f32 %v8689_v12, %v1333_v61  ;;  %v760_v49 = vpop.permute.xlu0 %759 }
 0x2a9   :  { %v9489_v55 = vpop.permute.xlu2 %971 }
 0x2aa   :  { %v1773_v57 = vadd.f32 %v1677_v9, %v1196_v48  ;;  %v1154_v42 = vmul.f32 %v8680_v63, %v9489_v55 }
 0x2ac   :  { %v1873_v38 = vadd.f32 %v9253_v10, %v1773_v57 }
 0x2ad   :  { %8293 = vset.pattern.permute.xlu2 %v12002_v59  ;;  %8292 = vset.pattern.permute.xlu1 %v12002_v59 }
 0x2ae   :  { %1556 = vperm.xlu2 %8293, %v97_v51   ;;  %1552 = vperm.xlu1 %8292, %v96_v23   ;;  %v1969_v47 = vmax.f32 %v1873_v38, 0.0  ;;  %v73_v23 = vld [vmem:[%s11921_s0 + $0x168] sm:$0xff]  ;;  %v1250_v38 = vadd.f32 %v1154_v42, %v673_v54 }
 0x2af   :  { %v1445_v50 = vpop.permute.xlu1 %1444 }
 0x2b0   :  { %v1705_v32 = vmul.f32 %v8689_v12, %v1445_v50  ;;  %v2058_v2 = vpack.c.bf16 %v1969_v47, %v1968_v21 }
 0x2b2   :  { %v1801_v56 = vadd.f32 %v1705_v32, %v1224_v60  ;;  %v1545_v31 = vpop.permute.xlu2 %1544  ;;  %7800 = vmatmul.msk.bf16.gmra.mxu0 %vm2136_vm0, %v2058_v2 }
 0x2b3   :  { %v1730_v8 = vmul.f32 %v8689_v12, %v1545_v31 }
 0x2b4   :  { %v1901_v16 = vadd.f32 %v9253_v10, %v1801_v56 }
 0x2b6   :  { %v1997_v53 = vmax.f32 %v1901_v16, 0.0  ;;  %1644 = vperm.xlu2 %8293, %v9434_v35   ;;  %1640 = vperm.xlu1 %8292, %v8355_v43   ;;  %v8358_v16 = vld [vmem:[%s11921_s0 + $0x230] sm:$0xff] }
 0x2b8   :  { %v568_v46 = vpop.permute.xlu1 %567  ;;  %v2072_v34 = vpack.c.bf16 %v1997_v53, %v1996_v62  ;;  %v1101_v62 = vmul.f32 %v8680_v63, %v760_v49 }
 0x2b9   :  { %v694_v17 = vmul.f32 %v8683_v0, %v568_v46 }
 0x2ba   :  { %7814 = vmatmul.msk.bf16.gmra.mxu1 %vm2136_vm0, %v2072_v34  ;;  %v1633_v58 = vpop.permute.xlu2 %1632  ;;  %v120_v34 = vld [vmem:[%s11921_s0 + $0x2e0] sm:$0xff] }
 0x2bb   :  { %v1271_v27 = vadd.f32 %v1175_v30, %v694_v17  ;;  %v1752_v52 = vmul.f32 %v8689_v12, %v1633_v58  ;;  %v99_v58 = vld [vmem:[%s11921_s0 + $0x238] sm:$0xff] }
 0x2bd   :  { %v1848_v24 = vadd.f32 %v1752_v52, %v1271_v27  ;;  %v12022_v52 = vld [vmem:[#allocation12_spill] sm:$0xff] }
 0x2be   :  { %8295 = vset.pattern.permute.xlu2 %v12008_v1  ;;  %8294 = vset.pattern.permute.xlu1 %v12008_v1 }
 0x2bf   :  { %347 = vperm.xlu2 %8295, %v8356_v37   ;;  %212 = vperm.xlu1 %8294, %v9470_v45   ;;  %v1948_v9 = vadd.f32 %v9253_v10, %v1848_v24 }
 0x2c1   :  { %v968_v35 = vpop.permute.xlu1 %967  ;;  %v2044_v4 = vmax.f32 %v1948_v9, 0.0 }
 0x2c2   :  { %v1153_v18 = vmul.f32 %v8680_v63, %v968_v35 }
 0x2c3   :  { %v9513_v51 = vpop.permute.xlu2 %202 }
 0x2c4   :  { %v1249_v48 = vadd.f32 %v1153_v18, %v672_v15  ;;  %v621_v30 = vmul.f32 %v8683_v0, %v9513_v51 }
 0x2c6   :  { %v1826_v57 = vadd.f32 %v1730_v8, %v1249_v48 }
 0x2c7   :  { %8296 = vset.pattern.permute.xlu2 %v12011_v44  ;;  %352 = vperm.xlu1 %8294, %v73_v23  }
 0x2c8   :  { %767 = vperm.xlu2 %8296, %v8357_v33   ;;  %v1926_v26 = vadd.f32 %v9253_v10, %v1826_v57 }
 0x2c9   :  { %v1060_v41 = vpop.permute.xlu1 %1059 }
 0x2ca   :  { %v1176_v22 = vmul.f32 %v8680_v63, %v1060_v41  ;;  %v2022_v32 = vmax.f32 %v1926_v26, 0.0 }
 0x2cb   :  { %v9529_v43 = vpop.permute.xlu2 %342 }
 0x2cc   :  { %v1272_v61 = vadd.f32 %v1176_v22, %v695_v14  ;;  %v9575_v22 = vld [vmem:[%s11921_s0 + $0x170] sm:$0xff] }
 0x2cd   :  { %887 = vperm.xlu0 %8325, %v9575_v22  }
 0x2ce   :  { %v1849_v19 = vadd.f32 %v1753_v7, %v1272_v61  ;;  %v649_v61 = vmul.f32 %v8683_v0, %v9529_v43 }
 0x2cf   :  { %8297 = vset.pattern.permute.xlu1 %v12011_v44 }
 0x2d0   :  { %883 = vperm.xlu2 %8296, %v73_v23   ;;  %879 = vperm.xlu1 %8297, %v8356_v37   ;;  %v1949_v39 = vadd.f32 %v9253_v10, %v1849_v19 }
 0x2d2   :  { %v1549_v28 = vpop.permute.xlu1 %1548  ;;  %v2045_v20 = vmax.f32 %v1949_v39, 0.0  ;;  %v8359_v39 = vld [vmem:[%s11921_s0 + $0x2e8] sm:$0xff] }
 0x2d3   :  { %v1731_v29 = vmul.f32 %v8689_v12, %v1549_v28 }
 0x2d4   :  { %v872_v21 = vpop.permute.xlu2 %871  ;;  %v2096_v47 = vpack.c.bf16 %v2045_v20, %v2044_v4 }
 0x2d5   :  { %v1827_v50 = vadd.f32 %v1731_v29, %v1250_v38  ;;  %v1129_v54 = vmul.f32 %v8680_v63, %v872_v21 }
 0x2d6   :  { %7838 = vmatmul.msk.bf16.gmra.mxu3 %vm2136_vm0, %v2096_v47 }
 0x2d7   :  { %v1927_v55 = vadd.f32 %v9253_v10, %v1827_v50 }
 0x2d8   :  { %8299 = vset.pattern.permute.xlu2 %v12002_v59  ;;  %8298 = vset.pattern.permute.xlu1 %v12002_v59 }
 0x2d9   :  { %v2023_v60 = vmax.f32 %v1927_v55, 0.0  ;;  %1348 = vperm.xlu2 %8299, %v9470_v45   ;;  %1344 = vperm.xlu1 %8298, %v8357_v33   ;;  %v1679_v33 = vmul.f32 %v8689_v12, %v12022_v52 }
 0x2db   :  { %v198_v2 = vpop.permute.xlu1 %197  ;;  %v2085_v56 = vpack.c.bf16 %v2023_v60, %v2022_v32  ;;  %v46_v32 = vld [vmem:[%s11921_s0 + $0x90] sm:$0xff] }
 0x2dc   :  { %v620_v45 = vmul.f32 %v8683_v0, %v198_v2 }
 0x2dd   :  { %v1337_v31 = vpop.permute.xlu2 %1336  ;;  %7827 = vmatmul.msk.bf16.gmra.mxu2 %vm2136_vm0, %v2085_v56 }
 0x2de   :  { %v1197_v11 = vadd.f32 %v1101_v62, %v620_v45  ;;  %v1678_v37 = vmul.f32 %v8689_v12, %v1337_v31  ;;  %v8360_v31 = vld [vmem:[%s11921_s0 + $0x178] sm:$0xff] }
 0x2e0   :  { %v1774_v17 = vadd.f32 %v1678_v37, %v1197_v11 }
 0x2e1   :  { %8300 = vset.pattern.permute.xlu2 %v12008_v1  ;;  %1460 = vperm.xlu1 %8298, %v73_v23  }
 0x2e2   :  { %477 = vperm.xlu2 %8300, %v8358_v16   ;;  %v1874_v41 = vadd.f32 %v9253_v10, %v1774_v17 }
 0x2e3   :  { %v338_v53 = vpop.permute.xlu1 %337 }
 0x2e4   :  { %v1970_v15 = vmax.f32 %v1874_v41, 0.0  ;;  %v648_v42 = vmul.f32 %v8683_v0, %v338_v53 }
 0x2e5   :  { %v1453_v46 = vpop.permute.xlu2 %1452 }
 0x2e6   :  { %v1707_v9 = vmul.f32 %v8689_v12, %v1453_v46  ;;  %v1225_v43 = vadd.f32 %v1129_v54, %v648_v42 }
 0x2e9   :  { %8301 = vset.pattern.permute.xlu1 %v12008_v1 }
 0x2ea   :  { %587 = vperm.xlu2 %8300, %v120_v34   ;;  %482 = vperm.xlu1 %8301, %v99_v58  }
 0x2ec   :  { %v764_v35 = vpop.permute.xlu1 %763 }
 0x2ed   :  { %v1102_v23 = vmul.f32 %v8680_v63, %v764_v35  ;;  %v8361_v35 = vld [vmem:[%s11921_s0 + $0x98] sm:$0xff] }
 0x2ee   :  { %v473_v27 = vpop.permute.xlu2 %472 }
 0x2ef   :  { %v1198_v18 = vadd.f32 %v1102_v23, %v621_v30  ;;  %v675_v62 = vmul.f32 %v8683_v0, %v473_v27 }
 0x2f1   :  { %v1775_v14 = vadd.f32 %v1679_v33, %v1198_v18 }
 0x2f2   :  { %8303 = vset.pattern.permute.xlu2 %v12011_v44  ;;  %8302 = vset.pattern.permute.xlu1 %v12011_v44 }
 0x2f3   :  { %987 = vperm.xlu2 %8303, %v99_v58   ;;  %983 = vperm.xlu1 %8302, %v8358_v16   ;;  %v1875_v24 = vadd.f32 %v9253_v10, %v1775_v14  ;;  %v9606_v16 = vld [vmem:[%s11921_s0 + $0x240] sm:$0xff] }
 0x2f4   :  { %v876_v51 = vpop.permute.xlu1 %875  ;;  %991 = vperm.xlu0 %8325, %v9606_v16  }
 0x2f5   :  { %v1130_v13 = vmul.f32 %v8680_v63, %v876_v51  ;;  %v1971_v7 = vmax.f32 %v1875_v24, 0.0 }
 0x2f7   :  { %v976_v8 = vpop.permute.xlu2 %975  ;;  %v2059_v48 = vpack.c.bf16 %v1971_v7, %v1970_v15  ;;  %v1226_v19 = vadd.f32 %v1130_v13, %v649_v61  ;;  %v696_v15 = vmul.f32 %v8683_v0, %v9200_v40 }
 0x2f8   :  { %v1155_v11 = vmul.f32 %v8680_v63, %v976_v8 }
 0x2f9   :  { %7801 = vmatmul.msk.bf16.gmra.mxu0 %vm2136_vm0, %v2059_v48  ;;  %v1803_v57 = vadd.f32 %v1707_v9, %v1226_v19 }
 0x2fb   :  { %1075 = vperm.xlu2 %8303, %v8359_v39   ;;  %1071 = vperm.xlu1 %8302, %v120_v34   ;;  %v1903_v29 = vadd.f32 %v9253_v10, %v1803_v57 }
 0x2fd   :  { %v1449_v4 = vpop.permute.xlu1 %1448  ;;  %v1999_v50 = vmax.f32 %v1903_v29, 0.0  ;;  %v9640_v29 = vld [vmem:[%s11921_s0 + $0x188] sm:$0xff] }
 0x2fe   :  { %v1706_v28 = vmul.f32 %v8689_v12, %v1449_v4  ;;  %899 = vperm.xlu0 %8325, %v9640_v29  }
 0x2ff   :  { %v1064_v20 = vpop.permute.xlu2 %1063 }
 0x300   :  { %v1802_v38 = vadd.f32 %v1706_v28, %v1225_v43  ;;  %v1177_v13 = vmul.f32 %v8680_v63, %v1064_v20 }
 0x302   :  { %v1902_v47 = vadd.f32 %v9253_v10, %v1802_v38  ;;  %v1273_v19 = vadd.f32 %v1177_v13, %v696_v15 }
 0x303   :  { %8305 = vset.pattern.permute.xlu2 %v12002_v59  ;;  %8304 = vset.pattern.permute.xlu1 %v12002_v59 }
 0x304   :  { %v1998_v21 = vmax.f32 %v1902_v47, 0.0  ;;  %1648 = vperm.xlu2 %8305, %v120_v34   ;;  %1564 = vperm.xlu1 %8304, %v99_v58   ;;  %v1068_v58 = vpop.permute.xlu0 %1067 }
 0x305   :  { %v1178_v30 = vmul.f32 %v8680_v63, %v1068_v58 }
 0x306   :  { %v468_v26 = vpop.permute.xlu1 %467  ;;  %v2073_v55 = vpack.c.bf16 %v1999_v50, %v1998_v21  ;;  %v9653_v21 = vld [vmem:[%s11921_s0 + $0xb0] sm:$0xff] }
 0x307   :  { %v674_v37 = vmul.f32 %v8683_v0, %v468_v26  ;;  %791 = vperm.xlu0 %8325, %v9653_v21   ;;  %v123_v26 = vld [vmem:[%s11921_s0 + $0x2f8] sm:$0xff] }
 0x308   :  { %v1557_v60 = vpop.permute.xlu2 %1556  ;;  %7815 = vmatmul.msk.bf16.gmra.mxu1 %vm2136_vm0, %v2073_v55  ;;  %v122_v55 = vld [vmem:[%s11921_s0 + $0x2f0] sm:$0xff] }
 0x309   :  { %v1733_v46 = vmul.f32 %v8689_v12, %v1557_v60  ;;  %v1251_v52 = vadd.f32 %v1155_v11, %v674_v37 }
 0x30c   :  { %8306 = vset.pattern.permute.xlu2 %v12008_v1  ;;  %1652 = vperm.xlu1 %8304, %v8359_v39   ;;  %v772_v60 = vpop.permute.xlu0 %771 }
 0x30d   :  { %217 = vperm.xlu2 %8306, %v46_v32  }
 0x30e   :  { %v583_v2 = vpop.permute.xlu1 %582 }
 0x30f   :  { %v697_v17 = vmul.f32 %v8683_v0, %v583_v2  ;;  %8332 = vset.pattern.permute.xlu0 %v12002_v59 }
 0x310   :  { %v1645_v56 = vpop.permute.xlu2 %1644 }
 0x311   :  { %v1274_v41 = vadd.f32 %v1178_v30, %v697_v17  ;;  %v1755_v14 = vmul.f32 %v8689_v12, %v1645_v56 }
 0x313   :  { %v1851_v61 = vadd.f32 %v1755_v14, %v1274_v41 }
 0x314   :  { %8307 = vset.pattern.permute.xlu1 %v12008_v1 }
 0x315   :  { %362 = vperm.xlu2 %8306, %v8360_v31   ;;  %357 = vperm.xlu1 %8307, %v9575_v22   ;;  %v1951_v57 = vadd.f32 %v9253_v10, %v1851_v61 }
 0x317   :  { %v980_v49 = vpop.permute.xlu1 %979  ;;  %v2047_v43 = vmax.f32 %v1951_v57, 0.0 }
 0x318   :  { %v1156_v53 = vmul.f32 %v8680_v63, %v980_v49 }
 0x319   :  { %v9611_v45 = vpop.permute.xlu2 %347 }
 0x31a   :  { %v1252_v34 = vadd.f32 %v1156_v53, %v675_v62  ;;  %v622_v62 = vmul.f32 %v8683_v0, %v9207_v25  ;;  %v650_v37 = vmul.f32 %v8683_v0, %v9611_v45  ;;  %v9682_v25 = vld [vmem:[%s11923_s2] ss:$0 sm:$0xff] }
 0x31c   :  { %v1829_v23 = vadd.f32 %v1733_v46, %v1252_v34 }
 0x31d   :  { %8309 = vset.pattern.permute.xlu2 %v12011_v44  ;;  %8308 = vset.pattern.permute.xlu1 %v12011_v44 }
 0x31e   :  { %779 = vperm.xlu2 %8309, %v8361_v35   ;;  %775 = vperm.xlu1 %8308, %v46_v32   ;;  %v1929_v51 = vadd.f32 %v9253_v10, %v1829_v23 }
 0x320   :  { %v1553_v27 = vpop.permute.xlu1 %1552  ;;  %v2025_v48 = vmax.f32 %v1929_v51, 0.0 }
 0x321   :  { %v1732_v33 = vmul.f32 %v8689_v12, %v1553_v27 }
 0x322   :  { %v768_v18 = vpop.permute.xlu2 %767 }
 0x323   :  { %v1828_v24 = vadd.f32 %v1732_v33, %v1251_v52  ;;  %v1103_v46 = vmul.f32 %v8680_v63, %v768_v18  ;;  %v12023_v33 = vld [vmem:[#allocation13_spill] sm:$0xff] }
 0x324   :  { %v1708_v18 = vmul.f32 %v8689_v12, %v12023_v33 }
 0x325   :  { %v1928_v7 = vadd.f32 %v9253_v10, %v1828_v24 }
 0x326   :  { %8310 = vset.pattern.permute.xlu2 %v12002_v59  ;;  %891 = vperm.xlu1 %8308, %v8360_v31  }
 0x327   :  { %v2024_v8 = vmax.f32 %v1928_v7, 0.0  ;;  %1352 = vperm.xlu2 %8310, %v46_v32   ;;  %v1104_v32 = vmul.f32 %v8680_v63, %v772_v60  ;;  %v8162_v60 = vld [vmem:[%s11926_s5 + $0x1dc] sm:$0xf0] }
 0x328   :  { %v1641_v9 = vpop.permute.xlu1 %1640 }
 0x329   :  { %v1754_v54 = vmul.f32 %v8689_v12, %v1641_v9  ;;  %v2086_v42 = vpack.c.bf16 %v2025_v48, %v2024_v8 }
 0x32a   :  { %v884_v39 = vpop.permute.xlu2 %883 }
 0x32b   :  { %v1850_v40 = vadd.f32 %v1754_v54, %v1273_v19  ;;  %7828 = vmatmul.msk.bf16.gmra.mxu2 %vm2136_vm0, %v2086_v42  ;;  %v1132_v41 = vmul.f32 %v8680_v63, %v884_v39 }
 0x32d   :  { %v1950_v4 = vadd.f32 %v9253_v10, %v1850_v40  ;;  %v8362_v10 = vld [vmem:[%s11921_s0 + $0x248] sm:$0xff] }
 0x32e   :  { %8311 = vset.pattern.permute.xlu1 %v12002_v59 }
 0x32f   :  { %v2046_v28 = vmax.f32 %v1950_v4, 0.0  ;;  %1464 = vperm.xlu2 %8310, %v9575_v22   ;;  %1356 = vperm.xlu1 %8311, %v8361_v35   ;;  %v1199_v35 = vadd.f32 %v1103_v46, %v622_v62  ;;  %v49_v4 = vld [vmem:[%s11921_s0 + $0xa8] sm:$0xff] }
 0x331   :  { %v213_v20 = vpop.permute.xlu1 %212  ;;  %v2097_v38 = vpack.c.bf16 %v2047_v43, %v2046_v28  ;;  %v48_v43 = vld [vmem:[%s11921_s0 + $0xa0] sm:$0xff] }
 0x332   :  { %v623_v2 = vmul.f32 %v8683_v0, %v213_v20 }
 0x333   :  { %7839 = vmatmul.msk.bf16.gmra.mxu3 %vm2136_vm0, %v2097_v38  ;;  %v1349_v47 = vpop.permute.xlu2 %1348 }
 0x334   :  { %v1200_v49 = vadd.f32 %v1104_v32, %v623_v2  ;;  %v1681_v53 = vmul.f32 %v8689_v12, %v1349_v47 }
 0x336   :  { %v1777_v34 = vadd.f32 %v1681_v53, %v1200_v49 }
 0x337   :  { %8313 = vset.pattern.permute.xlu2 %v12008_v1  ;;  %8312 = vset.pattern.permute.xlu1 %v12008_v1 }
 0x338   :  { %492 = vperm.xlu2 %8313, %v8362_v10   ;;  %487 = vperm.xlu1 %8312, %v9606_v16   ;;  %v1877_v23 = vadd.f32 %v9682_v25, %v1777_v34 }
 0x339   :  { %v353_v22 = vpop.permute.xlu1 %352 }
 0x33a   :  { %v651_v45 = vmul.f32 %v8683_v0, %v353_v22  ;;  %v1973_v24 = vmax.f32 %v1877_v23, 0.0 }
 0x33c   :  { %v9656_v50 = vpop.permute.xlu2 %477  ;;  %v1228_v7 = vadd.f32 %v1132_v41, %v651_v45 }
 0x33d   :  { %v676_v22 = vmul.f32 %v8683_v0, %v9656_v50  ;;  %v8364_v50 = vld [vmem:[%s11921_s0 + $0x180] sm:$0xff] }
 0x340   :  { %602 = vperm.xlu2 %8313, %v123_v26   ;;  %597 = vperm.xlu1 %8312, %v122_v55  }
 0x342   :  { %v880_v56 = vpop.permute.xlu1 %879 }
 0x343   :  { %v1131_v58 = vmul.f32 %v8680_v63, %v880_v56  ;;  %v12024_v56 = vld [vmem:[#allocation15_spill] sm:$0xff] }
 0x344   :  { %v9667_v31 = vpop.permute.xlu2 %587  ;;  %v1734_v49 = vmul.f32 %v8689_v12, %v12024_v56  ;;  %v888_v56 = vpop.permute.xlu0 %887 }
 0x345   :  { %v1227_v27 = vadd.f32 %v1131_v58, %v650_v37  ;;  %v8158_v58 = vld [vmem:[%s11926_s5 + $0x1c4] sm:$0xf] }
 0x347   :  { %v1804_v51 = vadd.f32 %v1708_v18, %v1227_v27 }
 0x348   :  { %8315 = vset.pattern.permute.xlu2 %v12011_v44  ;;  %8314 = vset.pattern.permute.xlu1 %v12011_v44 }
 0x349   :  { %1079 = vperm.xlu2 %8315, %v122_v55   ;;  %995 = vperm.xlu1 %8314, %v8362_v10   ;;  %v1904_v19 = vadd.f32 %v9682_v25, %v1804_v51  ;;  %v9714_v10 = vld [vmem:[%s11921_s0 + $0x258] sm:$0xff] }
 0x34a   :  { %1580 = vperm.xlu0 %8332, %v9714_v10  }
 0x34b   :  { %v1345_v11 = vpop.permute.xlu1 %1344  ;;  %v2000_v39 = vmax.f32 %v1904_v19, 0.0 }
 0x34c   :  { %v1680_v30 = vmul.f32 %v8689_v12, %v1345_v11  ;;  %v8070_v11 = vld [vmem:[%s11926_s5 + $0x1e0] sm:$0xf0] }
 0x34d   :  { %v988_v17 = vpop.permute.xlu2 %987 }
 0x34e   :  { %v1776_v52 = vadd.f32 %v1680_v30, %v1199_v35  ;;  %v1158_v53 = vmul.f32 %v8680_v63, %v988_v17  ;;  %v8073_v35 = vor.u32 %v8158_v58, %v8070_v11  ;;  %v698_v30 = vmul.f32 %v8683_v0, %v9667_v31 }
 0x34f   :  { %v699_v31 = vmul.f32 %v8683_v0, %v9218_v6  ;;  %v9765_v6 = vld [vmem:[%s11921_s0 + $0xb8] sm:$0xff] }
 0x350   :  { %v1876_v14 = vadd.f32 %v9682_v25, %v1776_v52  ;;  %3325 = vmatpush.bf16.msrb.mxu2 %v8073_v35  ;;  %v8046_v35 = vld [vmem:[%s11926_s5 + $0x1a8] sm:$0xf0] }
 0x351   :  { %8316 = vset.pattern.permute.xlu2 %v12002_v59  ;;  %1083 = vperm.xlu1 %8314, %v123_v26  }
 0x352   :  { %v1972_v15 = vmax.f32 %v1876_v14, 0.0  ;;  %1568 = vperm.xlu2 %8316, %v9606_v16   ;;  %1372 = vperm.xlu0 %8332, %v9765_v6  }
 0x353   :  { %v1461_v13 = vpop.permute.xlu1 %1460 }
 0x354   :  { %v1709_v61 = vmul.f32 %v8689_v12, %v1461_v13  ;;  %v2060_v8 = vpack.c.bf16 %v1973_v24, %v1972_v15  ;;  %v8159_v13 = vld [vmem:[%s11926_s5 + $0x1cc] sm:$0xf] }
 0x355   :  { %v1076_v9 = vpop.permute.xlu2 %1075 }
 0x356   :  { %v1805_v48 = vadd.f32 %v1709_v61, %v1228_v7  ;;  %7802 = vmatmul.msk.bf16.gmra.mxu0 %vm2136_vm0, %v2060_v8  ;;  %v1180_v45 = vmul.f32 %v8680_v63, %v1076_v9  ;;  %v8078_v7 = vld [vmem:[%s11926_s5 + $0x1e8] sm:$0xf0] }
 0x357   :  { %v8081_v8 = vor.u32 %v8159_v13, %v8078_v7 }
 0x358   :  { %v1905_v54 = vadd.f32 %v9682_v25, %v1805_v48  ;;  %v1276_v48 = vadd.f32 %v1180_v45, %v699_v31 }
 0x359   :  { %8318 = vset.pattern.permute.xlu1 %v12002_v59  ;;  %3823 = vmatpush.bf16.msrb.mxu0 %v8081_v8 }
 0x35a   :  { %v2001_v42 = vmax.f32 %v1905_v54, 0.0  ;;  %1660 = vperm.xlu2 %8316, %v123_v26   ;;  %1656 = vperm.xlu1 %8318, %v122_v55   ;;  %v8068_v55 = vld [vmem:[%s11926_s5 + $0x1c0] sm:$0xf] }
 0x35b   :  { %v8069_v2 = vor.u32 %v8162_v60, %v8068_v55  ;;  %8339 = vset.pattern.permute.xlu0 %v12011_v44 }
 0x35c   :  { %v483_v16 = vpop.permute.xlu1 %482  ;;  %v2074_v57 = vpack.c.bf16 %v2001_v42, %v2000_v39 }
 0x35d   :  { %v677_v62 = vmul.f32 %v8683_v0, %v483_v16  ;;  %3076 = vmatpush.bf16.msrb.mxu1 %v8069_v2  ;;  %v8038_v2 = vld [vmem:[%s11926_s5 + $0x1a0] sm:$0xf0] }
 0x35e   :  { %7816 = vmatmul.msk.bf16.gmra.mxu1 %vm2136_vm0, %v2074_v57  ;;  %v1649_v40 = vpop.permute.xlu2 %1648 }
 0x35f   :  { %v1254_v17 = vadd.f32 %v1158_v53, %v677_v62  ;;  %v1756_v52 = vmul.f32 %v8689_v12, %v1649_v40 }
 0x362   :  { %8320 = vset.pattern.permute.xlu2 %v12008_v1  ;;  %8319 = vset.pattern.permute.xlu1 %v12008_v1 }
 0x363   :  { %232 = vperm.xlu2 %8320, %v49_v4   ;;  %227 = vperm.xlu1 %8319, %v48_v43  }
 0x365   :  { %v984_v28 = vpop.permute.xlu1 %983 }
 0x366   :  { %v1157_v38 = vmul.f32 %v8680_v63, %v984_v28  ;;  %v8036_v28 = vld [vmem:[%s11926_s5 + $0x180] sm:$0xf] }
 0x367   :  { %v9706_v20 = vpop.permute.xlu2 %217 }
 0x368   :  { %v1253_v32 = vadd.f32 %v1157_v38, %v676_v22  ;;  %v8154_v38 = vld [vmem:[%s11926_s5 + $0x19c] sm:$0xf0]  ;;  %v8163_v22 = vld [vmem:[%s11926_s5 + $0x1e4] sm:$0xf0] }
 0x36a   :  { %v1830_v46 = vadd.f32 %v1734_v49, %v1253_v32  ;;  %v8150_v32 = vld [vmem:[%s11926_s5 + $0x184] sm:$0xf]  ;;  %v8365_v49 = vld [vmem:[%s11921_s0 + $0x250] sm:$0xff] }
 0x36b   :  { %8321 = vset.pattern.permute.xlu2 %v12011_v44  ;;  %372 = vperm.xlu1 %8319, %v9640_v29   ;;  %v8041_v53 = vor.u32 %v8150_v32, %v8038_v2  ;;  %v8006_v32 = vld [vmem:[%s11926_s5 + $0x160] sm:$0xf0] }
 0x36c   :  { %783 = vperm.xlu2 %8321, %v48_v43   ;;  %v1930_v41 = vadd.f32 %v9682_v25, %v1830_v46 }
 0x36d   :  { %v1072_v47 = vpop.permute.xlu1 %1071  ;;  %3326 = vmatpush.bf16.msrb.mxu2 %v8041_v53  ;;  %v9872_v53 = vld [vmem:[%s11921_s0 + $0xc0] sm:$0xff] }
 0x36e   :  { %v1179_v34 = vmul.f32 %v8680_v63, %v1072_v47  ;;  %v2026_v15 = vmax.f32 %v1930_v41, 0.0  ;;  %v8037_v47 = vor.u32 %v8154_v38, %v8036_v28  ;;  %v624_v41 = vmul.f32 %v8683_v0, %v9706_v20  ;;  %v9853_v38 = vld [vmem:[%s11921_s0 + $0x198] sm:$0xff]  ;;  %799 = vperm.xlu0 %8339, %v9872_v53  }
 0x36f   :  { %v9719_v26 = vpop.permute.xlu2 %362 }
 0x370   :  { %v1275_v33 = vadd.f32 %v1179_v34, %v698_v30  ;;  %3077 = vmatpush.bf16.msrb.mxu1 %v8037_v47  ;;  %v9858_v47 = vld [vmem:[%s11921_s0 + $0x190] sm:$0xff] }
 0x372   :  { %v1852_v24 = vadd.f32 %v1756_v52, %v1275_v33  ;;  %v653_v52 = vmul.f32 %v8683_v0, %v9719_v26  ;;  %v8155_v26 = vld [vmem:[%s11926_s5 + $0x1a4] sm:$0xf0] }
 0x373   :  { %8322 = vset.pattern.permute.xlu1 %v12011_v44 }
 0x374   :  { %895 = vperm.xlu2 %8321, %v8364_v50   ;;  %787 = vperm.xlu1 %8322, %v49_v4   ;;  %v1952_v39 = vadd.f32 %v9682_v25, %v1852_v24 }
 0x376   :  { %v1565_v37 = vpop.permute.xlu1 %1564  ;;  %v2048_v40 = vmax.f32 %v1952_v39, 0.0  ;;  %8343 = vset.pattern.permute.xlu0 %v12002_v59 }
 0x377   :  { %v1735_v23 = vmul.f32 %v8689_v12, %v1565_v37  ;;  %v8151_v37 = vld [vmem:[%s11926_s5 + $0x18c] sm:$0xf] }
 0x378   :  { %v9745_v27 = vpop.permute.xlu2 %779  ;;  %v8049_v30 = vor.u32 %v8151_v37, %v8046_v35  ;;  %v7980_v37 = vld [vmem:[%s11926_s5 + $0x108] sm:$0xf] }
 0x379   :  { %v1831_v18 = vadd.f32 %v1735_v23, %v1254_v17  ;;  %v8139_v35 = vld [vmem:[%s11926_s5 + $0x124] sm:$0xf0] }
 0x37a   :  { %3824 = vmatpush.bf16.msrb.mxu0 %v8049_v30 }
 0x37b   :  { %v1931_v14 = vadd.f32 %v9682_v25, %v1831_v18 }
 0x37c   :  { %8324 = vset.pattern.permute.xlu2 %v12002_v59  ;;  %8323 = vset.pattern.permute.xlu1 %v12002_v59 }
 0x37d   :  { %v2027_v51 = vmax.f32 %v1931_v14, 0.0  ;;  %1364 = vperm.xlu2 %8324, %v49_v4   ;;  %1360 = vperm.xlu1 %8323, %v48_v43   ;;  %v12025_v14 = vld [vmem:[#allocation16_spill] sm:$0xff] }
 0x37e   :  { %v1653_v61 = vpop.permute.xlu1 %1652  ;;  %v1711_v31 = vmul.f32 %v8689_v12, %v12025_v14  ;;  %v7948_v14 = vld [vmem:[%s11926_s5 + $0xc8] sm:$0xf] }
 0x37f   :  { %v1757_v9 = vmul.f32 %v8689_v12, %v1653_v61  ;;  %v2087_v19 = vpack.c.bf16 %v2027_v51, %v2026_v15  ;;  %v1106_v61 = vmul.f32 %v8680_v63, %v9745_v27  ;;  %v8146_v27 = vld [vmem:[%s11926_s5 + $0x15c] sm:$0xf0] }
 0x381   :  { %v1853_v54 = vadd.f32 %v1757_v9, %v1276_v48  ;;  %v1353_v42 = vpop.permute.xlu2 %1352  ;;  %7829 = vmatmul.msk.bf16.gmra.mxu2 %vm2136_vm0, %v2087_v19  ;;  %v625_v48 = vmul.f32 %v8683_v0, %v9235_v3  ;;  %v8004_v19 = vld [vmem:[%s11926_s5 + $0x140] sm:$0xf] }
 0x382   :  { %v1682_v51 = vmul.f32 %v8689_v12, %v1353_v42 }
 0x383   :  { %v1953_v16 = vadd.f32 %v9682_v25, %v1853_v54 }
 0x385   :  { %v2049_v57 = vmax.f32 %v1953_v16, 0.0  ;;  %1476 = vperm.xlu2 %8324, %v9640_v29   ;;  %1472 = vperm.xlu1 %8323, %v8364_v50   ;;  %v8076_v29 = vld [vmem:[%s11926_s5 + $0x1c8] sm:$0xf]  ;;  %v1133_v50 = vmul.f32 %v8680_v63, %v888_v56  ;;  %v8005_v16 = vor.u32 %v8146_v27, %v8004_v19 }
 0x386   :  { %v8077_v60 = vor.u32 %v8163_v22, %v8076_v29 }
 0x387   :  { %v358_v4 = vpop.permute.xlu1 %357  ;;  %v2098_v43 = vpack.c.bf16 %v2049_v57, %v2048_v40  ;;  %v1202_v57 = vadd.f32 %v1106_v61, %v625_v48  ;;  %3078 = vmatpush.bf16.msrb.mxu1 %v8005_v16  ;;  %v8123_v61 = vld [vmem:[%s11926_s5 + $0xa4] sm:$0xf0] }
 0x388   :  { %3574 = vmatpush.bf16.msrb.mxu3 %v8077_v60  ;;  %v652_v46 = vmul.f32 %v8683_v0, %v358_v4  ;;  %v8142_v60 = vld [vmem:[%s11926_s5 + $0x144] sm:$0xf] }
 0x389   :  { %7840 = vmatmul.msk.bf16.gmra.mxu3 %vm2136_vm0, %v2098_v43  ;;  %v1465_v55 = vpop.permute.xlu2 %1464  ;;  %v8009_v2 = vor.u32 %v8142_v60, %v8006_v32  ;;  %v8107_v60 = vld [vmem:[%s11926_s5 + $0x24] sm:$0xf0] }
 0x38a   :  { %v1229_v58 = vadd.f32 %v1133_v50, %v652_v46  ;;  %v1710_v11 = vmul.f32 %v8689_v12, %v1465_v55  ;;  %v8147_v50 = vld [vmem:[%s11926_s5 + $0x164] sm:$0xf0] }
 0x38b   :  { %3327 = vmatpush.bf16.msrb.mxu2 %v8009_v2 }
 0x38c   :  { %v1806_v33 = vadd.f32 %v1710_v11, %v1229_v58  ;;  %v992_v11 = vpop.permute.xlu0 %991 }
 0x38d   :  { %8327 = vset.pattern.permute.xlu2 %v12011_v44  ;;  %8326 = vset.pattern.permute.xlu1 %v12008_v1 }
 0x38e   :  { %999 = vperm.xlu2 %8327, %v8365_v49   ;;  %502 = vperm.xlu1 %8326, %v9714_v10   ;;  %v1906_v20 = vadd.f32 %v9682_v25, %v1806_v33 }
 0x390   :  { %v776_v62 = vpop.permute.xlu1 %775  ;;  %v2002_v54 = vmax.f32 %v1906_v20, 0.0 }
 0x391   :  { %v1105_v17 = vmul.f32 %v8680_v63, %v776_v62  ;;  %v8012_v62 = vld [vmem:[%s11926_s5 + $0x148] sm:$0xf] }
 0x392   :  { %v9800_v34 = vpop.permute.xlu2 %492  ;;  %v8013_v58 = vor.u32 %v8147_v50, %v8012_v62 }
 0x393   :  { %v1201_v15 = vadd.f32 %v1105_v17, %v624_v41  ;;  %v7981_v17 = vor.u32 %v8139_v35, %v7980_v37 }
 0x395   :  { %v1778_v9 = vadd.f32 %v1682_v51, %v1201_v15  ;;  %v7972_v15 = vld [vmem:[%s11926_s5 + $0x100] sm:$0xf] }
 0x396   :  { %8329 = vset.pattern.permute.xlu2 %v12002_v59  ;;  %8328 = vset.pattern.permute.xlu1 %v12011_v44 }
 0x397   :  { %1576 = vperm.xlu2 %8329, %v8365_v49   ;;  %1003 = vperm.xlu1 %8328, %v9714_v10   ;;  %v8044_v10 = vld [vmem:[%s11926_s5 + $0x188] sm:$0xf]  ;;  %v1878_v28 = vadd.f32 %v9682_v25, %v1778_v9  ;;  %v679_v9 = vmul.f32 %v8683_v0, %v9800_v34 }
 0x398   :  { %v892_v23 = vpop.permute.xlu1 %891  ;;  %v8045_v13 = vor.u32 %v8155_v26, %v8044_v10  ;;  %v9909_v10 = vpop.f32.mrf.mxu3 }
 0x399   :  { %v1134_v18 = vmul.f32 %v8680_v63, %v892_v23  ;;  %v1974_v55 = vmax.f32 %v1878_v28, 0.0  ;;  %v8143_v23 = vld [vmem:[%s11926_s5 + $0x14c] sm:$0xf]  ;;  %12026 = vst [vmem:[#allocation5_spill] sm:$0xff] %v9909_v10  ;;  %v8134_v28 = vld [vmem:[%s11926_s5 + $0x104] sm:$0xf] }
 0x39a   :  { %v9818_v45 = vpop.permute.xlu2 %602  ;;  %3575 = vmatpush.bf16.msrb.mxu3 %v8045_v13  ;;  %v8138_v13 = vld [vmem:[%s11926_s5 + $0x11c] sm:$0xf0] }
 0x39b   :  { %v1230_v24 = vadd.f32 %v1134_v18, %v653_v52  ;;  %v8014_v52 = vld [vmem:[%s11926_s5 + $0x168] sm:$0xf0]  ;;  %v7973_v20 = vor.u32 %v8138_v13, %v7972_v15 }
 0x39c   :  { %v8017_v41 = vor.u32 %v8143_v23, %v8014_v52 }
 0x39d   :  { %v1807_v7 = vadd.f32 %v1711_v31, %v1230_v24  ;;  %v8131_v31 = vld [vmem:[%s11926_s5 + $0xe4] sm:$0xf0]  ;;  %3079 = vmatpush.bf16.msrb.mxu1 %v7973_v20 }
 0x39e   :  { %3576 = vmatpush.bf16.msrb.mxu3 %v8013_v58  ;;  %3825 = vmatpush.bf16.msrb.mxu0 %v8017_v41  ;;  %v7949_v24 = vor.u32 %v8131_v31, %v7948_v14  ;;  %v701_v58 = vmul.f32 %v8683_v0, %v9818_v45  ;;  %v53_v45 = vld [vmem:[%s11921_s0 + $0xc8] sm:$0xff] }
 0x39f   :  { %8331 = vset.pattern.permute.xlu2 %v12008_v1  ;;  %8330 = vset.pattern.permute.xlu1 %v12008_v1  ;;  %v1907_v8 = vadd.f32 %v9682_v25, %v1807_v7  ;;  %v7916_v7 = vld [vmem:[%s11926_s5 + $0x88] sm:$0xf] }
 0x3a0   :  { %242 = vperm.xlu2 %8331, %v9765_v6   ;;  %237 = vperm.xlu1 %8330, %v9653_v21   ;;  %v9956_v32 = vpop.f32.mrf.mxu3 }
 0x3a1   :  { %v1357_v42 = vpop.permute.xlu1 %1356  ;;  %v2003_v39 = vmax.f32 %v1907_v8, 0.0  ;;  %v7917_v8 = vor.u32 %v8123_v61, %v7916_v7  ;;  %12028 = vst [vmem:[#allocation6_spill] sm:$0xff] %v9956_v32 }
 0x3a2   :  { %v1683_v3 = vmul.f32 %v8689_v12, %v1357_v42  ;;  %3577 = vmatpush.bf16.msrb.mxu3 %v7981_v17  ;;  %v7884_v42 = vld [vmem:[%s11926_s5 + $0x48] sm:$0xf] }
 0x3a3   :  { %v9846_v40 = vpop.permute.xlu2 %1079  ;;  %v2075_v4 = vpack.c.bf16 %v2003_v39, %v2002_v54  ;;  %v12027_v39 = vld [vmem:[#allocation18_spill] sm:$0xff] }
 0x3a4   :  { %v1779_v43 = vadd.f32 %v1683_v3, %v1202_v57  ;;  %v1737_v16 = vmul.f32 %v8689_v12, %v12027_v39  ;;  %v9940_v57 = vpop.f32.mrf.mxu0 }
 0x3a5   :  { %7817 = vmatmul.msk.bf16.gmra.mxu1 %vm2136_vm0, %v2075_v4 }
 0x3a6   :  { %v1879_v29 = vadd.f32 %v9682_v25, %v1779_v43  ;;  %3578 = vmatpush.bf16.msrb.mxu3 %v7949_v24 }
 0x3a8   :  { %v1975_v22 = vmax.f32 %v1879_v29, 0.0  ;;  %382 = vperm.xlu2 %8331, %v9853_v38   ;;  %377 = vperm.xlu1 %8330, %v9858_v47   ;;  %v7974_v29 = vld [vmem:[%s11926_s5 + $0x120] sm:$0xf0]  ;;  %v9972_v52 = vpop.f32.mrf.mxu3 }
 0x3a9   :  { %12029 = vst [vmem:[#allocation14_spill] sm:$0xff] %v9972_v52 }
 0x3aa   :  { %v488_v56 = vpop.permute.xlu1 %487  ;;  %v2061_v49 = vpack.c.bf16 %v1975_v22, %v1974_v55  ;;  %3579 = vmatpush.bf16.msrb.mxu3 %v7917_v8  ;;  %v7977_v22 = vor.u32 %v8134_v28, %v7974_v29  ;;  %v7852_v55 = vld [vmem:[%s11926_s5 + $0x8] sm:$0xf] }
 0x3ab   :  { %v678_v33 = vmul.f32 %v8683_v0, %v488_v56  ;;  %v7853_v56 = vor.u32 %v8107_v60, %v7852_v55  ;;  %v8127_v60 = vld [vmem:[%s11926_s5 + $0xcc] sm:$0xf] }
 0x3ac   :  { %v1569_v46 = vpop.permute.xlu2 %1568  ;;  %7803 = vmatmul.msk.bf16.gmra.mxu0 %vm2136_vm0, %v2061_v49  ;;  %3328 = vmatpush.bf16.msrb.mxu2 %v7977_v22  ;;  %v2292_v17 = vpop.f32.mrf.mxu0 }
 0x3ad   :  { %v1736_v51 = vmul.f32 %v8689_v12, %v1569_v46 }
 0x3b0   :  { %8334 = vset.pattern.permute.xlu2 %v12011_v44  ;;  %8333 = vset.pattern.permute.xlu1 %v12011_v44  ;;  %v9995_v7 = vpop.f32.mrf.mxu3 }
 0x3b1   :  { %903 = vperm.xlu2 %8334, %v9858_v47   ;;  %795 = vperm.xlu1 %8333, %v9765_v6   ;;  %v1159_v6 = vmul.f32 %v8680_v63, %v992_v11  ;;  %12030 = vst [vmem:[#allocation17_spill] sm:$0xff] %v9995_v7 }
 0x3b2   :  { %v9892_v30 = vpop.permute.xlu1 %597 }
 0x3b3   :  { %v1255_v26 = vadd.f32 %v1159_v6, %v678_v33  ;;  %v700_v23 = vmul.f32 %v8683_v0, %v9892_v30  ;;  %v7982_v30 = vld [vmem:[%s11926_s5 + $0x128] sm:$0xf0]  ;;  %v9986_v33 = vpop.f32.mrf.mxu2 }
 0x3b4   :  { %v1661_v18 = vpop.permute.xlu2 %1660 }
 0x3b5   :  { %v1832_v19 = vadd.f32 %v1736_v51, %v1255_v26  ;;  %v2295_v51 = vpop.f32.mrf.mxu0 }
 0x3b7   :  { %v1932_v4 = vadd.f32 %v9682_v25, %v1832_v19  ;;  %v8126_v19 = vld [vmem:[%s11926_s5 + $0xc4] sm:$0xf] }
 0x3b9   :  { %8335 = vset.pattern.permute.xlu2 %v12002_v59  ;;  %907 = vperm.xlu1 %8333, %v9853_v38   ;;  %v2028_v62 = vmax.f32 %v1932_v4, 0.0 }
 0x3ba   :  { %1368 = vperm.xlu2 %8335, %v9653_v21   ;;  %v8115_v21 = vld [vmem:[%s11926_s5 + $0x64] sm:$0xf0] }
 0x3bb   :  { %v996_v48 = vpop.permute.xlu1 %995  ;;  %v7885_v3 = vor.u32 %v8115_v21, %v7884_v42  ;;  %v7942_v42 = vld [vmem:[%s11926_s5 + $0xe0] sm:$0xf0] }
 0x3bc   :  { %v1160_v27 = vmul.f32 %v8680_v63, %v996_v48  ;;  %v9998_v48 = vpop.f32.mrf.mxu2  ;;  %v7945_v39 = vor.u32 %v8126_v19, %v7942_v42  ;;  %v8118_v19 = vld [vmem:[%s11926_s5 + $0x84] sm:$0xf] }
 0x3bd   :  { %v9930_v54 = vpop.permute.xlu2 %232  ;;  %3580 = vmatpush.bf16.msrb.mxu3 %v7885_v3  ;;  %v2297_v21 = vpop.f32.mrf.mxu0  ;;  %v7910_v42 = vld [vmem:[%s11926_s5 + $0xa0] sm:$0xf0] }
 0x3be   :  { %v1256_v34 = vadd.f32 %v1160_v27, %v679_v9  ;;  %v7940_v9 = vld [vmem:[%s11926_s5 + $0xc0] sm:$0xf]  ;;  %3329 = vmatpush.bf16.msrb.mxu2 %v7945_v39 }
 0x3c0   :  { %v1833_v43 = vadd.f32 %v1737_v16, %v1256_v34  ;;  %v10016_v16 = vld [vmem:[%s11925_s4] ss:$0 sm:$0xff]  ;;  %v10018_v34 = vpop.f32.mrf.mxu3 }
 0x3c1   :  { %8336 = vset.pattern.permute.xlu1 %v12002_v59  ;;  %3581 = vmatpush.bf16.msrb.mxu3 %v7853_v56  ;;  %12031 = vst [vmem:[#allocation7_spill] sm:$0xff] %v10018_v34  ;;  %v2293_v3 = vadd.f32 %v10016_v16, %v2292_v17  ;;  %v2291_v28 = vadd.f32 %v10016_v16, %v9940_v57 }
 0x3c2   :  { %1480 = vperm.xlu1 %8336, %v9858_v47   ;;  %v1933_v2 = vadd.f32 %v9682_v25, %v1833_v43  ;;  %1484 = vperm.xlu2 %8335, %v9853_v38   ;;  %v1759_v47 = vmul.f32 %v8689_v12, %v1661_v18  ;;  %v1181_v38 = vmul.f32 %v8680_v63, %v9846_v40  ;;  %v8135_v40 = vld [vmem:[%s11926_s5 + $0x10c] sm:$0xf]  ;;  %v10022_v43 = vpop.f32.mrf.mxu1 }
 0x3c3   :  { %v1084_v49 = vpop.permute.xlu1 %1083  ;;  %v7985_v41 = vor.u32 %v8135_v40, %v7982_v30  ;;  %v2531_v22 = vmax.f32 %v2293_v3, 0.0 }
 0x3c4   :  { %v1182_v50 = vmul.f32 %v8680_v63, %v1084_v49  ;;  %v2029_v46 = vmax.f32 %v1933_v2, 0.0  ;;  %v1277_v14 = vadd.f32 %v1181_v38, %v700_v23  ;;  %v10026_v29 = vpop.f32.mrf.mxu2  ;;  %v2530_v2 = vmax.f32 %v2291_v28, 0.0 }
 0x3c5   :  { %3826 = vmatpush.bf16.msrb.mxu0 %v7985_v41  ;;  %v10028_v55 = vpop.f32.mrf.mxu0  ;;  %v2296_v41 = vadd.f32 %v10016_v16, %v2295_v51  ;;  %v7908_v51 = vld [vmem:[%s11926_s5 + $0x80] sm:$0xf]  ;;  %v7913_v28 = vor.u32 %v8118_v19, %v7910_v42  ;;  %v8102_v19 = vld [vmem:[%s11926_s5 + $0x4] sm:$0xf] }
 0x3c6   :  { %v9964_v11 = vpop.permute.xlu2 %783  ;;  %v2088_v37 = vpack.c.bf16 %v2029_v46, %v2028_v62  ;;  %v1278_v35 = vadd.f32 %v1182_v50, %v701_v58  ;;  %v10036_v62 = vpack.c.bf16 %v2531_v22, %v2530_v2 }
 0x3c7   :  { %v1107_v23 = vmul.f32 %v8680_v63, %v9964_v11  ;;  %3330 = vmatpush.bf16.msrb.mxu2 %v7913_v28  ;;  %v680_v28 = vmul.f32 %v8683_v0, %v9268_v5 }
 0x3c8   :  { %7830 = vmatmul.msk.bf16.gmra.mxu2 %vm2136_vm0, %v2088_v37  ;;  %v1855_v6 = vadd.f32 %v1759_v47, %v1278_v35  ;;  %12032 = vst [vmem:[#allocation8_spill] sm:$0xff] %v10036_v62  ;;  %v10038_v57 = vpop.f32.mrf.mxu3  ;;  %v627_v37 = vmul.f32 %v8683_v0, %v9930_v54 }
 0x3c9   :  { %12033 = vst [vmem:[#allocation19_spill] sm:$0xff] %v10038_v57 }
 0x3ca   :  { %8337 = vset.pattern.permute.xlu1 %v12008_v1  ;;  %8338 = vset.pattern.permute.xlu2 %v12008_v1  ;;  %v1955_v26 = vadd.f32 %v9682_v25, %v1855_v6  ;;  %v10042_v58 = vpop.f32.mrf.mxu1  ;;  %v2298_v6 = vadd.f32 %v10016_v16, %v2297_v21 }
 0x3cb   :  { %247 = vperm.xlu1 %8337, %v9872_v53   ;;  %252 = vperm.xlu2 %8338, %v53_v45  }
 0x3cc   :  { %v1657_v18 = vpop.permute.xlu1 %1656  ;;  %v2051_v20 = vmax.f32 %v1955_v26, 0.0  ;;  %v10046_v47 = vpop.f32.mrf.mxu2 }
 0x3cd   :  { %v1758_v31 = vmul.f32 %v8689_v12, %v1657_v18  ;;  %v2302_v38 = vpop.f32.mrf.mxu0 }
 0x3ce   :  { %v9989_v24 = vpop.permute.xlu2 %895 }
 0x3cf   :  { %v1854_v1 = vadd.f32 %v1758_v31, %v1277_v14  ;;  %v900_v14 = vpop.permute.xlu0 %899  ;;  %v1135_v3 = vmul.f32 %v8680_v63, %v9989_v24 }
 0x3d0   :  { %v10055_v30 = vpop.f32.mrf.mxu3 }
 0x3d1   :  { %v1954_v15 = vadd.f32 %v9682_v25, %v1854_v1  ;;  %12034 = vst [vmem:[#allocation9_spill] sm:$0xff] %v10055_v30  ;;  %v1136_v1 = vmul.f32 %v8680_v63, %v900_v14  ;;  %v7918_v14 = vld [vmem:[%s11926_s5 + $0xa8] sm:$0xf0] }
 0x3d3   :  { %v2050_v13 = vmax.f32 %v1954_v15, 0.0  ;;  %8340 = vset.pattern.permute.xlu1 %v12011_v44  ;;  %8341 = vset.pattern.permute.xlu2 %v12002_v59  ;;  %v8130_v44 = vld [vmem:[%s11926_s5 + $0xdc] sm:$0xf0]  ;;  %v2533_v15 = vmax.f32 %v2298_v6, 0.0  ;;  %v8110_v6 = vld [vmem:[%s11926_s5 + $0x44] sm:$0xf] }
 0x3d4   :  { %803 = vperm.xlu1 %8340, %v53_v45   ;;  %1376 = vperm.xlu2 %8341, %v9872_v53   ;;  %v7941_v53 = vor.u32 %v8130_v44, %v7940_v9  ;;  %v8122_v44 = vld [vmem:[%s11926_s5 + $0x9c] sm:$0xf0]  ;;  %v10077_v21 = vpop.f32.mrf.mxu2 }
 0x3d5   :  { %v228_v61 = vpop.permute.xlu1 %227  ;;  %v2099_v8 = vpack.c.bf16 %v2051_v20, %v2050_v13  ;;  %v10061_v13 = vpop.f32.mrf.mxu1 }
 0x3d6   :  { %3080 = vmatpush.bf16.msrb.mxu1 %v7941_v53  ;;  %v7909_v53 = vor.u32 %v8122_v44, %v7908_v51  ;;  %v10079_v39 = vpop.f32.mrf.mxu0 }
 0x3d7   :  { %7841 = vmatmul.msk.bf16.gmra.mxu3 %vm2136_vm0, %v2099_v8  ;;  %v1365_v27 = vpop.permute.xlu2 %1364 }
 0x3d8   :  { %v1685_v35 = vmul.f32 %v8689_v12, %v1365_v27  ;;  %v2532_v27 = vmax.f32 %v2296_v41, 0.0  ;;  %v8119_v41 = vld [vmem:[%s11926_s5 + $0x8c] sm:$0xf] }
 0x3da   :  { %v10084_v22 = vpack.c.bf16 %v2533_v15, %v2532_v27  ;;  %3081 = vmatpush.bf16.msrb.mxu1 %v7909_v53  ;;  %v7846_v27 = vld [vmem:[%s11926_s5 + $0x20] sm:$0xf0] }
 0x3dc   :  { %8342 = vset.pattern.permute.xlu1 %v12002_v59  ;;  %v7950_v59 = vld [vmem:[%s11926_s5 + $0xe8] sm:$0xf0]  ;;  %12035 = vst [vmem:[#allocation10_spill] sm:$0xff] %v10084_v22 }
 0x3dd   :  { %1380 = vperm.xlu1 %8342, %v53_v45   ;;  %v373_v4 = vpop.permute.xlu1 %372  ;;  %v7953_v49 = vor.u32 %v8127_v60, %v7950_v59  ;;  %v626_v45 = vmul.f32 %v8683_v0, %v228_v61  ;;  %v654_v60 = vmul.f32 %v8683_v0, %v9256_v36  ;;  %v10094_v36 = vpop.f32.mrf.mxu1 }
 0x3de   :  { %v655_v18 = vmul.f32 %v8683_v0, %v373_v4 }
 0x3df   :  { %v1477_v56 = vpop.permute.xlu2 %1476  ;;  %3827 = vmatpush.bf16.msrb.mxu0 %v7953_v49  ;;  %v1203_v26 = vadd.f32 %v1107_v23, %v626_v45  ;;  %v1231_v24 = vadd.f32 %v1135_v3, %v654_v60 }
 0x3e0   :  { %v1232_v20 = vadd.f32 %v1136_v1, %v655_v18  ;;  %v1713_v61 = vmul.f32 %v8689_v12, %v1477_v56  ;;  %v7878_v18 = vld [vmem:[%s11926_s5 + $0x60] sm:$0xf0]  ;;  %v10110_v1 = vpop.f32.mrf.mxu2 }
 0x3e2   :  { %v1809_v59 = vadd.f32 %v1713_v61, %v1232_v20  ;;  %v7921_v20 = vor.u32 %v8119_v41, %v7918_v14  ;;  %v2301_v61 = vadd.f32 %v10016_v16, %v10028_v55  ;;  %v7849_v55 = vor.u32 %v8102_v19, %v7846_v27 }
 0x3e4   :  { %3828 = vmatpush.bf16.msrb.mxu0 %v7921_v20  ;;  %v2534_v42 = vmax.f32 %v2301_v61, 0.0 }
 0x3e5   :  { %v10133_v60 = vpop.f32.mrf.mxu1 }
 0x3e6   :  { %v788_v50 = vpop.permute.xlu1 %787 }
 0x3e7   :  { %v1108_v46 = vmul.f32 %v8680_v63, %v788_v50  ;;  %3582 = vmatmul.bf16.vlgmr.msrb.gmra.mxu3 %v10036_v62 }
 0x3e8   :  { %v10053_v40 = vpop.permute.xlu2 %999 }
 0x3e9   :  { %v1204_v17 = vadd.f32 %v1108_v46, %v627_v37  ;;  %v10089_v46 = vpop.f32.mrf.mxu3  ;;  %v1161_v3 = vmul.f32 %v8680_v63, %v10053_v40 }
 0x3ea   :  { %12036 = vst [vmem:[#allocation11_spill] sm:$0xff] %v10089_v46 }
 0x3eb   :  { %v1781_v54 = vadd.f32 %v1685_v35, %v1204_v17  ;;  %v1909_v17 = vadd.f32 %v9682_v25, %v1809_v59 }
 0x3ed   :  { %v1881_v9 = vadd.f32 %v9682_v25, %v1781_v54  ;;  %v2303_v54 = vadd.f32 %v10016_v16, %v2302_v38 }
 0x3ef   :  { %v1361_v31 = vpop.permute.xlu1 %1360  ;;  %v1977_v56 = vmax.f32 %v1881_v9, 0.0  ;;  %v2535_v53 = vmax.f32 %v2303_v54, 0.0 }
 0x3f0   :  { %v1684_v11 = vmul.f32 %v8689_v12, %v1361_v31  ;;  %v7881_v31 = vor.u32 %v8110_v6, %v7878_v18  ;;  %v8114_v18 = vld [vmem:[%s11926_s5 + $0x5c] sm:$0xf0] }
 0x3f1   :  { %v1577_v49 = vpop.permute.xlu2 %1576  ;;  %v10118_v9 = vpop.f32.mrf.mxu3 }
 0x3f2   :  { %v1780_v8 = vadd.f32 %v1684_v11, %v1203_v26  ;;  %v2307_v26 = vpop.f32.mrf.mxu0  ;;  %v2005_v11 = vmax.f32 %v1909_v17, 0.0  ;;  %3331 = vmatpush.bf16.msrb.mxu2 %v7881_v31  ;;  %12037 = vst [vmem:[#allocation12_spill] sm:$0xff] %v10118_v9 }
 0x3f3   :  { %v2308_v54 = vadd.f32 %v10016_v16, %v2307_v26 }
 0x3f4   :  { %v1880_v4 = vadd.f32 %v9682_v25, %v1780_v8  ;;  %v10114_v8 = vpop.permute.xlu0 %791 }
 0x3f6   :  { %v1976_v2 = vmax.f32 %v1880_v4, 0.0  ;;  %3332 = vmatpush.bf16.msrb.mxu2 %v7849_v55  ;;  %v10129_v4 = vpack.c.bf16 %v2535_v53, %v2534_v42 }
 0x3f7   :  { %3587 = vmatmul.bf16.gmra.mxu3 %v10084_v22  ;;  %v1473_v50 = vpop.permute.xlu1 %1472 }
 0x3f8   :  { %v1712_v37 = vmul.f32 %v8689_v12, %v1473_v50  ;;  %v2062_v35 = vpack.c.bf16 %v1977_v56, %v1976_v2  ;;  %12038 = vst [vmem:[#allocation13_spill] sm:$0xff] %v10129_v4  ;;  %v1738_v2 = vmul.f32 %v8689_v12, %v1577_v49  ;;  %v10137_v50 = vpop.f32.mrf.mxu2  ;;  %v7876_v49 = vld [vmem:[%s11926_s5 + $0x40] sm:$0xf] }
 0x3f9   :  { %v10141_v40 = vpop.f32.mrf.mxu3  ;;  %v7877_v41 = vor.u32 %v8114_v18, %v7876_v49  ;;  %v1109_v49 = vmul.f32 %v8680_v63, %v10114_v8 }
 0x3fa   :  { %v1808_v23 = vadd.f32 %v1712_v37, %v1231_v24  ;;  %7804 = vmatmul.msk.bf16.gmra.mxu0 %vm2136_vm0, %v2062_v35  ;;  %v10116_v38 = vpop.permute.xlu2 %242  ;;  %v2310_v59 = vpop.f32.mrf.mxu0  ;;  %v1257_v24 = vadd.f32 %v1161_v3, %v680_v28  ;;  %12039 = vst [vmem:[#allocation15_spill] sm:$0xff] %v10141_v40 }
 0x3fb   :  { %3082 = vmatpush.bf16.msrb.mxu1 %v7877_v41 }
 0x3fc   :  { %v1908_v45 = vadd.f32 %v9682_v25, %v1808_v23  ;;  %v1581_v56 = vpop.permute.xlu0 %1580  ;;  %v1834_v17 = vadd.f32 %v1738_v2, %v1257_v24 }
 0x3fe   :  { %v2004_v15 = vmax.f32 %v1908_v45, 0.0  ;;  %v1739_v45 = vmul.f32 %v8689_v12, %v1581_v56  ;;  %v1934_v14 = vadd.f32 %v9682_v25, %v1834_v17 }
 0x400   :  { %v503_v51 = vpop.permute.xlu1 %502  ;;  %v2076_v44 = vpack.c.bf16 %v2005_v11, %v2004_v15  ;;  %v2306_v11 = vadd.f32 %v10016_v16, %v10079_v39  ;;  %v10156_v15 = vpop.f32.mrf.mxu1  ;;  %v2030_v19 = vmax.f32 %v1934_v14, 0.0 }
 0x401   :  { %v681_v23 = vmul.f32 %v8683_v0, %v503_v51  ;;  %v2537_v51 = vmax.f32 %v2308_v54, 0.0  ;;  %v10161_v26 = vpop.f32.mrf.mxu2  ;;  %v2311_v54 = vadd.f32 %v10016_v16, %v2310_v59 }
 0x402   :  { %7818 = vmatmul.msk.bf16.gmra.mxu1 %vm2136_vm0, %v2076_v44  ;;  %v10139_v37 = vpop.permute.xlu2 %382  ;;  %v2312_v20 = vpop.f32.mrf.mxu0  ;;  %v2536_v55 = vmax.f32 %v2306_v11, 0.0 }
 0x403   :  { %v10159_v44 = vpop.f32.mrf.mxu3 }
 0x404   :  { %12040 = vst [vmem:[#allocation16_spill] sm:$0xff] %v10159_v44  ;;  %v10165_v28 = vpack.c.bf16 %v2537_v51, %v2536_v55  ;;  %v1373_v11 = vpop.permute.xlu0 %1372 }
 0x405   :  { %v1687_v59 = vmul.f32 %v8689_v12, %v1373_v11 }
 0x406   :  { %12041 = vst [vmem:[#allocation18_spill] sm:$0xff] %v10165_v28 }
 0x407   :  { %3592 = vmatmul.bf16.gmra.mxu3 %v10129_v4 }
 0x408   :  { %v10169_v2 = vpop.f32.mrf.mxu1 }
 0x409   :  { %v1004_v35 = vpop.permute.xlu1 %1003  ;;  %v10171_v24 = vpop.f32.mrf.mxu2 }
 0x40a   :  { %v1162_v5 = vmul.f32 %v8680_v63, %v1004_v35  ;;  %v2315_v39 = vpop.f32.mrf.mxu0  ;;  %12042 = vst [vmem:[#allocation20_spill] sm:$0xff] %v10171_v24 }
 0x40b   :  { %v10163_v42 = vpop.permute.xlu2 %903  ;;  %v10173_v35 = vpop.f32.mrf.mxu3 }
 0x40c   :  { %v1258_v6 = vadd.f32 %v1162_v5, %v681_v23  ;;  %12043 = vst [vmem:[#allocation21_spill] sm:$0xff] %v10173_v35  ;;  %v2313_v23 = vadd.f32 %v10016_v16, %v2312_v20 }
 0x40e   :  { %v1835_v31 = vadd.f32 %v1739_v45, %v1258_v6  ;;  %v8111_v45 = vld [vmem:[%s11926_s5 + $0x4c] sm:$0xf] }
 0x40f   :  { %v7886_v6 = vld [vmem:[%s11926_s5 + $0x68] sm:$0xf0] }
 0x410   :  { %v1935_v61 = vadd.f32 %v9682_v25, %v1835_v31  ;;  %v7889_v18 = vor.u32 %v8111_v45, %v7886_v6  ;;  %v2539_v31 = vmax.f32 %v2313_v23, 0.0  ;;  %v8092_v45 = vld [vmem:[%s11926_s5 + $0x1d8] sm:$0xf] }
 0x412   :  { %v2031_v27 = vmax.f32 %v1935_v61, 0.0  ;;  %v238_v53 = vpop.permute.xlu1 %237  ;;  %3829 = vmatpush.bf16.msrb.mxu0 %v7889_v18  ;;  %v2317_v20 = vpop.f32.mrf.mxu0  ;;  %v2538_v61 = vmax.f32 %v2311_v54, 0.0 }
 0x413   :  { %v628_v17 = vmul.f32 %v8683_v0, %v238_v53  ;;  %v629_v53 = vmul.f32 %v8683_v0, %v10116_v38  ;;  %v8106_v38 = vld [vmem:[%s11926_s5 + $0x1c] sm:$0xf0] }
 0x414   :  { %v2089_v3 = vpack.c.bf16 %v2031_v27, %v2030_v19  ;;  %v1369_v5 = vpop.permute.xlu2 %1368  ;;  %v10187_v19 = vpop.f32.mrf.mxu1 }
 0x415   :  { %v1205_v41 = vadd.f32 %v1109_v49, %v628_v17  ;;  %v1686_v14 = vmul.f32 %v8689_v12, %v1369_v5  ;;  %v10189_v27 = vpop.f32.mrf.mxu3  ;;  %v10197_v17 = vpack.c.bf16 %v2539_v31, %v2538_v61  ;;  %v7844_v5 = vld [vmem:[%s11926_s5] sm:$0xf]  ;;  %v8165_v49 = vld [vmem:[%s11926_s5 + $0x1f4] sm:$0xf0] }
 0x416   :  { %7831 = vmatmul.msk.bf16.gmra.mxu2 %vm2136_vm0, %v2089_v3  ;;  %12044 = vst [vmem:[#allocation22_spill] sm:$0xff] %v10189_v27  ;;  %v10195_v3 = vpop.f32.mrf.mxu2  ;;  %v7845_v6 = vor.u32 %v8106_v38, %v7844_v5  ;;  %v2318_v27 = vadd.f32 %v10016_v16, %v2317_v20 }
 0x417   :  { %3597 = vmatmul.bf16.gmra.mxu3 %v10165_v28  ;;  %v1782_v8 = vadd.f32 %v1686_v14, %v1205_v41  ;;  %12045 = vst [vmem:[#allocation23_spill] sm:$0xff] %v10195_v3  ;;  %v8093_v41 = vor.u32 %v8165_v49, %v8092_v45 }
 0x418   :  { %12046 = vst [vmem:[#allocation24_spill] sm:$0xff] %v10197_v17  ;;  %3083 = vmatpush.bf16.msrb.mxu1 %v7845_v6  ;;  %v2541_v49 = vmax.f32 %v2318_v27, 0.0 }
 0x419   :  { %v1882_v18 = vadd.f32 %v9682_v25, %v1782_v8  ;;  %4570 = vmatpush.bf16.msra.mxu3 %v8093_v41  ;;  %v657_v8 = vmul.f32 %v8683_v0, %v10139_v37 }
 0x41a   :  { %v378_v56 = vpop.permute.xlu1 %377  ;;  %v2320_v14 = vpop.f32.mrf.mxu0 }
 0x41c   :  { %v10215_v61 = vpop.f32.mrf.mxu1  ;;  %v1485_v5 = vpop.permute.xlu2 %1484 }
 0x41d   :  { %v1715_v6 = vmul.f32 %v8689_v12, %v1485_v5 }
 0x41e   :  { %v10218_v38 = vpop.f32.mrf.mxu2 }
 0x41f   :  { %12047 = vst [vmem:[#allocation25_spill] sm:$0xff] %v10218_v38 }
 0x423   :  { %v796_v51 = vpop.permute.xlu1 %795 }
 0x424   :  { %v1110_v55 = vmul.f32 %v8680_v63, %v796_v51  ;;  %v1978_v51 = vmax.f32 %v1882_v18, 0.0  ;;  %v1137_v18 = vmul.f32 %v8680_v63, %v10163_v42  ;;  %v10244_v42 = vld [vmem:[%s11923_s2] ss:$0 sm:$0xff] }
 0x426   :  { %v1206_v23 = vadd.f32 %v1110_v55, %v629_v53  ;;  %3333 = vmatmul.bf16.vlgmr.msrb.gmra.mxu2 %v10036_v62  ;;  %v10239_v27 = vpop.f32.mrf.mxu2 }
 0x427   :  { %3602 = vmatmul.bf16.gmra.mxu3 %v10197_v17  ;;  %12051 = vst [vmem:[#allocation29_spill] sm:$0xff] %v10239_v27 }
 0x428   :  { %v1783_v54 = vadd.f32 %v1687_v59, %v1206_v23  ;;  %v10223_v59 = vpop.f32.mrf.mxu3 }
 0x429   :  { %12048 = vst [vmem:[#allocation26_spill] sm:$0xff] %v10223_v59 }
 0x42a   :  { %v1883_v31 = vadd.f32 %v9682_v25, %v1783_v54  ;;  %v2316_v25 = vadd.f32 %v10016_v16, %v2315_v39  ;;  %v656_v54 = vmul.f32 %v8683_v0, %v378_v56 }
 0x42b   :  { %v908_v11 = vpop.permute.xlu1 %907 }
 0x42c   :  { %v1979_v53 = vmax.f32 %v1883_v31, 0.0  ;;  %v1138_v55 = vmul.f32 %v8680_v63, %v908_v11  ;;  %v2540_v20 = vmax.f32 %v2316_v25, 0.0  ;;  %v2322_v31 = vpop.f32.mrf.mxu0  ;;  %v8160_v25 = vld [vmem:[%s11926_s5 + $0x1d4] sm:$0xf] }
 0x42e   :  { %v2063_v23 = vpack.c.bf16 %v1979_v53, %v1978_v51  ;;  %v1234_v45 = vadd.f32 %v1138_v55, %v657_v8  ;;  %v10231_v11 = vpack.c.bf16 %v2541_v49, %v2540_v20  ;;  %v1233_v51 = vadd.f32 %v1137_v18, %v656_v54  ;;  %v10234_v53 = vpop.f32.mrf.mxu1  ;;  %v8103_v8 = vld [vmem:[%s11926_s5 + $0xc] sm:$0xf]  ;;  %v8086_v49 = vld [vmem:[%s11926_s5 + $0x1f0] sm:$0xf0] }
 0x42f   :  { %v8089_v18 = vor.u32 %v8160_v25, %v8086_v49  ;;  %v10270_v25 = vpop.f32.mrf.mxu2 }
 0x430   :  { %7805 = vmatmul.msk.bf16.gmra.mxu0 %vm2136_vm0, %v2063_v23  ;;  %v1811_v41 = vadd.f32 %v1715_v6, %v1234_v45  ;;  %12049 = vst [vmem:[#allocation27_spill] sm:$0xff] %v10231_v11  ;;  %v10236_v55 = vpop.f32.mrf.mxu3  ;;  %v7854_v23 = vld [vmem:[%s11926_s5 + $0x28] sm:$0xf0] }
 0x431   :  { %12050 = vst [vmem:[#allocation28_spill] sm:$0xff] %v10236_v55  ;;  %v7857_v6 = vor.u32 %v8103_v8, %v7854_v23  ;;  %4321 = vmatpush.bf16.msra.mxu2 %v8089_v18  ;;  %v8164_v8 = vld [vmem:[%s11926_s5 + $0x1ec] sm:$0xf0]  ;;  %v800_v18 = vpop.permute.xlu0 %799 }
 0x432   :  { %v1911_v56 = vadd.f32 %v10244_v42, %v1811_v41  ;;  %12052 = vst [vmem:[#allocation30_spill] sm:$0xff] %v10270_v25  ;;  %v1111_v59 = vmul.f32 %v8680_v63, %v800_v18  ;;  %v8161_v18 = vld [vmem:[%s11926_s5 + $0x1dc] sm:$0xf] }
 0x433   :  { %3830 = vmatpush.bf16.msrb.mxu0 %v7857_v6 }
 0x434   :  { %v1481_v37 = vpop.permute.xlu1 %1480  ;;  %v2007_v54 = vmax.f32 %v1911_v56, 0.0  ;;  %v2325_v41 = vpop.f32.mrf.mxu0 }
 0x435   :  { %v1714_v39 = vmul.f32 %v8689_v12, %v1481_v37  ;;  %v2323_v37 = vadd.f32 %v10016_v16, %v2322_v31 }
 0x436   :  { %3338 = vmatmul.bf16.gmra.mxu2 %v10084_v22  ;;  %v10268_v23 = vpop.f32.mrf.mxu1 }
 0x437   :  { %v1810_v5 = vadd.f32 %v1714_v39, %v1233_v51  ;;  %3607 = vmatmul.bf16.gmra.mxu3 %v10231_v11  ;;  %v253_v39 = vpop.permute.xlu2 %252  ;;  %v2543_v6 = vmax.f32 %v2323_v37, 0.0  ;;  %v10286_v37 = vpop.f32.mrf.mxu2 }
 0x438   :  { %v10274_v31 = vpop.f32.mrf.mxu3  ;;  %12056 = vst [vmem:[#allocation34_spill] sm:$0xff] %v10286_v37 }
 0x439   :  { %v1910_v45 = vadd.f32 %v10244_v42, %v1810_v5  ;;  %v8084_v5 = vld [vmem:[%s11926_s5 + $0x1d0] sm:$0xf]  ;;  %12053 = vst [vmem:[#allocation31_spill] sm:$0xff] %v10274_v31  ;;  %v8094_v31 = vld [vmem:[%s11926_s5 + $0x1f8] sm:$0xf0] }
 0x43a   :  { %v8085_v56 = vor.u32 %v8164_v8, %v8084_v5  ;;  %v10298_v9 = vor.u32 %v8161_v18, %v8094_v31 }
 0x43b   :  { %v2006_v20 = vmax.f32 %v1910_v45, 0.0  ;;  %v2321_v45 = vadd.f32 %v10016_v16, %v2320_v14 }
 0x43c   :  { %4072 = vmatpush.bf16.msra.mxu1 %v8085_v56  ;;  %12057 = vst [vmem:[#allocation35_spill] sm:$0xff] %v10298_v9  ;;  %4819 = vmatpush.bf16.msra.mxu0 %v10298_v9 }
 0x43d   :  { %v2077_v51 = vpack.c.bf16 %v2007_v54, %v2006_v20  ;;  %v248_v55 = vpop.permute.xlu1 %247  ;;  %v2542_v49 = vmax.f32 %v2321_v45, 0.0  ;;  %v2327_v20 = vpop.f32.mrf.mxu0 }
 0x43e   :  { %v630_v44 = vmul.f32 %v8683_v0, %v248_v55  ;;  %v10282_v14 = vpop.f32.mrf.mxu1  ;;  %v2328_v55 = vadd.f32 %v10016_v16, %v2327_v20 }
 0x43f   :  { %7819 = vmatmul.msk.bf16.gmra.mxu1 %vm2136_vm0, %v2077_v51  ;;  %v10276_v54 = vpack.c.bf16 %v2543_v6, %v2542_v49  ;;  %v1377_v8 = vpop.permute.xlu2 %1376  ;;  %v631_v6 = vmul.f32 %v8683_v0, %v253_v39  ;;  %v10306_v20 = vpop.f32.mrf.mxu2 }
 0x440   :  { %v10284_v51 = vpop.f32.mrf.mxu3  ;;  %v1207_v56 = vadd.f32 %v1111_v59, %v630_v44  ;;  %v1688_v45 = vmul.f32 %v8689_v12, %v1377_v8  ;;  %v2326_v44 = vadd.f32 %v10016_v16, %v2325_v41  ;;  %12058 = vst [vmem:[#allocation36_spill] sm:$0xff] %v10306_v20 }
 0x441   :  { %12054 = vst [vmem:[#allocation32_spill] sm:$0xff] %v10276_v54 }
 0x442   :  { %12055 = vst [vmem:[#allocation33_spill] sm:$0xff] %v10284_v51  ;;  %v1784_v35 = vadd.f32 %v1688_v45, %v1207_v56  ;;  %v2544_v45 = vmax.f32 %v2326_v44, 0.0 }
 0x444   :  { %v1884_v31 = vadd.f32 %v10244_v42, %v1784_v35 }
 0x445   :  { %v2330_v51 = vpop.f32.mrf.mxu0 }
 0x446   :  { %3343 = vmatmul.bf16.gmra.mxu2 %v10129_v4  ;;  %v804_v5 = vpop.permute.xlu1 %803  ;;  %v1980_v40 = vmax.f32 %v1884_v31, 0.0  ;;  %v2331_v44 = vadd.f32 %v10016_v16, %v2330_v51 }
 0x447   :  { %3612 = vmatmul.bf16.gmra.mxu3 %v10276_v54  ;;  %v1112_v49 = vmul.f32 %v8680_v63, %v804_v5  ;;  %v10302_v63 = vpop.f32.mrf.mxu1  ;;  %v2545_v5 = vmax.f32 %v2328_v55, 0.0  ;;  %v10321_v35 = vpop.f32.mrf.mxu2 }
 0x448   :  { %v10308_v8 = vpop.f32.mrf.mxu3  ;;  %12062 = vst [vmem:[#allocation40_spill] sm:$0xff] %v10321_v35 }
 0x449   :  { %v1208_v59 = vadd.f32 %v1112_v49, %v631_v6  ;;  %12059 = vst [vmem:[#allocation37_spill] sm:$0xff] %v10308_v8  ;;  %v10312_v18 = vpack.c.bf16 %v2545_v5, %v2544_v45 }
 0x44b   :  { %12060 = vst [vmem:[#allocation38_spill] sm:$0xff] %v10312_v18 }
 0x44f   :  { %3084 = vmatmul.bf16.vlgmr.msrb.gmra.mxu1 %v10036_v62  ;;  %v1381_v0 = vpop.permute.xlu1 %1380  ;;  %v10316_v49 = vpop.f32.mrf.mxu1 }
 0x450   :  { %v1689_v39 = vmul.f32 %v8689_v12, %v1381_v0  ;;  %v2332_v12 = vpop.f32.mrf.mxu0 }
 0x452   :  { %v1785_v56 = vadd.f32 %v1689_v39, %v1208_v59 }
 0x454   :  { %v1885_v41 = vadd.f32 %v10244_v42, %v1785_v56  ;;  %v2333_v42 = vadd.f32 %v10016_v16, %v2332_v12 }
 0x456   :  { %v1981_v30 = vmax.f32 %v1885_v41, 0.0  ;;  %3348 = vmatmul.bf16.gmra.mxu2 %v10165_v28  ;;  %v2547_v59 = vmax.f32 %v2333_v42, 0.0  ;;  %v10347_v42 = vld [vmem:[%s11927_s6] sm:$0xff] }
 0x457   :  { %3617 = vmatmul.bf16.gmra.mxu3 %v10312_v18  ;;  %v10326_v39 = vpop.f32.mrf.mxu1 }
 0x458   :  { %v2064_v6 = vpack.c.bf16 %v1981_v30, %v1980_v40  ;;  %v2335_v0 = vpop.f32.mrf.mxu0  ;;  %v10330_v30 = vpop.f32.mrf.mxu2  ;;  %v2546_v40 = vmax.f32 %v2331_v44, 0.0 }
 0x459   :  { %12064 = vst [vmem:[#allocation42_spill] sm:$0xff] %v10330_v30 }
 0x45a   :  { %7806 = vmatmul.msk.bf16.gmra.mxu0 %vm2136_vm0, %v2064_v6  ;;  %v10319_v55 = vpop.f32.mrf.mxu3  ;;  %v10332_v31 = vpack.c.bf16 %v2547_v59, %v2546_v40  ;;  %v2336_v6 = vadd.f32 %v10016_v16, %v2335_v0 }
 0x45b   :  { %12061 = vst [vmem:[#allocation39_spill] sm:$0xff] %v10319_v55 }
 0x45c   :  { %12065 = vst [vmem:[#allocation43_spill] sm:$0xff] %v10332_v31  ;;  %v2548_v40 = vmax.f32 %v2336_v6, 0.0 }
 0x45f   :  { %3089 = vmatmul.bf16.gmra.mxu1 %v10084_v22  ;;  %v10337_v51 = vpop.f32.mrf.mxu1 }
 0x460   :  { %v2337_v56 = vpop.f32.mrf.mxu0  ;;  %v10339_v41 = vpop.f32.mrf.mxu2 }
 0x461   :  { %12066 = vst [vmem:[#allocation44_spill] sm:$0xff] %v10339_v41  ;;  %v2338_v12 = vadd.f32 %v10016_v16, %v2337_v56 }
 0x462   :  { %v10328_v5 = vpop.f32.mrf.mxu3 }
 0x463   :  { %12063 = vst [vmem:[#allocation41_spill] sm:$0xff] %v10328_v5  ;;  %v2549_v44 = vmax.f32 %v2338_v12, 0.0 }
 0x465   :  { %v10356_v56 = vpack.c.bf16 %v2549_v44, %v2548_v40 }
 0x466   :  { %3353 = vmatmul.bf16.gmra.mxu2 %v10197_v17 }
 0x467   :  { %3622 = vmatmul.bf16.gmra.mxu3 %v10332_v31  ;;  %v10352_v55 = vpop.f32.mrf.mxu1 }
 0x468   :  { %v10354_v5 = vpop.f32.mrf.mxu2 }
 0x469   :  { %12067 = vst [vmem:[#allocation45_spill] sm:$0xff] %v10354_v5 }
 0x46a   :  { %v3583_v45 = vpop.f32.mrf.mxu3  ;;  %3831 = vmatmul.bf16.vlgmr.msrb.gmra.mxu0 %v10036_v62  ;;  %v10350_v62 = vperm.slane %v10347_v42, 2 }
 0x46c   :  { %v3584_v8 = vadd.f32 %v3583_v45, %v10350_v62 }
 0x46e   :  { %v5070_v46 = vmax.f32 %v3584_v8, 0.0 }
 0x46f   :  { %3094 = vmatmul.bf16.gmra.mxu1 %v10129_v4  ;;  %v10364_v44 = vpop.f32.mrf.mxu1 }
 0x470   :  { %v10367_v40 = vpop.f32.mrf.mxu2 }
 0x471   :  { %12068 = vst [vmem:[#allocation46_spill] sm:$0xff] %v10367_v40 }
 0x472   :  { %v3585_v59 = vpop.f32.mrf.mxu3 }
 0x473   :  { %v3586_v0 = vadd.f32 %v3585_v59, %v10350_v62 }
 0x475   :  { %v5078_v12 = vmax.f32 %v3586_v0, 0.0 }
 0x476   :  { %3358 = vmatmul.bf16.gmra.mxu2 %v10231_v11 }
 0x477   :  { %v2340_v9 = vpop.f32.mrf.mxu0  ;;  %3627 = vmatmul.bf16.gmra.mxu3 %v10356_v56  ;;  %v6953_v57 = vmax.f32 %v5070_v46, %v5078_v12 }
 0x478   :  { %v2341_v59 = vadd.f32 %v10016_v16, %v2340_v9  ;;  %v10377_v9 = vpop.f32.mrf.mxu2 }
 0x479   :  { %12069 = vst [vmem:[#allocation47_spill] sm:$0xff] %v10377_v9 }
 0x47a   :  { %v3588_v6 = vpop.f32.mrf.mxu3  ;;  %3836 = vmatmul.bf16.gmra.mxu0 %v10084_v22  ;;  %v2550_v10 = vmax.f32 %v2341_v59, 0.0 }
 0x47b   :  { %v3589_v34 = vadd.f32 %v3588_v6, %v10350_v62 }
 0x47d   :  { %v5086_v52 = vmax.f32 %v3589_v34, 0.0  ;;  %v10374_v34 = vpop.f32.mrf.mxu1 }
 0x47f   :  { %v6954_v7 = vmax.f32 %v6953_v57, %v5086_v52  ;;  %v2342_v45 = vpop.f32.mrf.mxu0  ;;  %3099 = vmatmul.bf16.gmra.mxu1 %v10165_v28  ;;  %v8060_v52 = vld [vmem:[%s11926_s5 + $0x198] sm:$0xf] }
 0x480   :  { %v2343_v0 = vadd.f32 %v10016_v16, %v2342_v45  ;;  %v8157_v57 = vld [vmem:[%s11926_s5 + $0x1b4] sm:$0xf0]  ;;  %v10391_v9 = vpop.f32.mrf.mxu2 }
 0x481   :  { %12070 = vst [vmem:[#allocation48_spill] sm:$0xff] %v10391_v9 }
 0x482   :  { %v2551_v32 = vmax.f32 %v2343_v0, 0.0  ;;  %v3590_v22 = vpop.f32.mrf.mxu3 }
 0x483   :  { %v3591_v46 = vadd.f32 %v3590_v22, %v10350_v62 }
 0x484   :  { %v10371_v8 = vpack.c.bf16 %v2551_v32, %v2550_v10  ;;  %v8061_v10 = vor.u32 %v8157_v57, %v8060_v52 }
 0x485   :  { %v5094_v32 = vmax.f32 %v3591_v46, 0.0  ;;  %v10389_v0 = vpop.f32.mrf.mxu1  ;;  %v8152_v46 = vld [vmem:[%s11926_s5 + $0x194] sm:$0xf] }
 0x486   :  { %3363 = vmatmul.bf16.gmra.mxu2 %v10276_v54  ;;  %4571 = vmatpush.bf16.msra.mxu3 %v8061_v10 }
 0x487   :  { %3632 = vmatmul.bf16.gmra.mxu3 %v10371_v8  ;;  %v6955_v6 = vmax.f32 %v6954_v7, %v5094_v32  ;;  %v8054_v7 = vld [vmem:[%s11926_s5 + $0x1b0] sm:$0xf0] }
 0x488   :  { %v8057_v57 = vor.u32 %v8152_v46, %v8054_v7 }
 0x48a   :  { %v3593_v12 = vpop.f32.mrf.mxu3  ;;  %3841 = vmatmul.bf16.gmra.mxu0 %v10129_v4  ;;  %4322 = vmatpush.bf16.msra.mxu2 %v8057_v57  ;;  %v8052_v4 = vld [vmem:[%s11926_s5 + $0x190] sm:$0xf] }
 0x48b   :  { %v3594_v22 = vadd.f32 %v3593_v12, %v10350_v62 }
 0x48d   :  { %v5102_v59 = vmax.f32 %v3594_v22, 0.0  ;;  %v10401_v52 = vpop.f32.mrf.mxu1 }
 0x48f   :  { %v6956_v45 = vmax.f32 %v6955_v6, %v5102_v59  ;;  %3104 = vmatmul.bf16.gmra.mxu1 %v10197_v17 }
 0x492   :  { %v3595_v5 = vpop.f32.mrf.mxu3 }
 0x493   :  { %v3596_v40 = vadd.f32 %v3595_v5, %v10350_v62 }
 0x495   :  { %v5110_v10 = vmax.f32 %v3596_v40, 0.0  ;;  %v8156_v40 = vld [vmem:[%s11926_s5 + $0x1ac] sm:$0xf0]  ;;  %v10413_v57 = vpop.f32.mrf.mxu1 }
 0x496   :  { %3368 = vmatmul.bf16.gmra.mxu2 %v10312_v18  ;;  %v8053_v7 = vor.u32 %v8156_v40, %v8052_v4 }
 0x497   :  { %v6957_v22 = vmax.f32 %v6956_v45, %v5110_v10 }
 0x498   :  { %4073 = vmatpush.bf16.msra.mxu1 %v8053_v7 }
 0x499   :  { %v2475_v32 = vpop.f32.mrf.mxu2 }
 0x49a   :  { %v3598_v12 = vpop.f32.mrf.mxu3  ;;  %3846 = vmatmul.bf16.gmra.mxu0 %v10165_v28  ;;  %v2476_v46 = vadd.f32 %v10016_v16, %v2475_v32 }
 0x49b   :  { %v3599_v5 = vadd.f32 %v3598_v12, %v10350_v62 }
 0x49c   :  { %v2604_v12 = vmax.f32 %v2476_v46, 0.0 }
 0x49d   :  { %v5118_v6 = vmax.f32 %v3599_v5, 0.0  ;;  %v10420_v41 = vpop.f32.mrf.mxu1 }
 0x49f   :  { %v6958_v59 = vmax.f32 %v6957_v22, %v5118_v6  ;;  %3109 = vmatmul.bf16.gmra.mxu1 %v10231_v11 }
 0x4a1   :  { %v2477_v28 = vpop.f32.mrf.mxu2 }
 0x4a2   :  { %v2478_v45 = vadd.f32 %v10016_v16, %v2477_v28  ;;  %v3600_v10 = vpop.f32.mrf.mxu3  ;;  %v10425_v28 = vperm.slane %v10347_v42, 1 }
 0x4a3   :  { %v3601_v22 = vadd.f32 %v3600_v10, %v10350_v62  ;;  %v8153_v10 = vld [vmem:[%s11926_s5 + $0x19c] sm:$0xf] }
 0x4a4   :  { %v2605_v5 = vmax.f32 %v2478_v45, 0.0 }
 0x4a5   :  { %v5126_v9 = vmax.f32 %v3601_v22, 0.0 }
 0x4a6   :  { %v10417_v6 = vpack.c.bf16 %v2605_v5, %v2604_v12  ;;  %3373 = vmatmul.bf16.gmra.mxu2 %v10332_v31  ;;  %v8062_v12 = vld [vmem:[%s11926_s5 + $0x1b8] sm:$0xf0] }
 0x4a7   :  { %v6959_v40 = vmax.f32 %v6958_v59, %v5126_v9  ;;  %v10435_v22 = vor.u32 %v8153_v10, %v8062_v12 }
 0x4a8   :  { %12071 = vst [vmem:[#allocation49_spill] sm:$0xff] %v10417_v6 }
 0x4a9   :  { %v3334_v30 = vpop.f32.mrf.mxu2  ;;  %12072 = vst [vmem:[#allocation50_spill] sm:$0xff] %v10435_v22  ;;  %4820 = vmatpush.bf16.msra.mxu0 %v10435_v22 }
 0x4aa   :  { %v3603_v4 = vpop.f32.mrf.mxu3  ;;  %3851 = vmatmul.bf16.gmra.mxu0 %v10197_v17  ;;  %v3335_v5 = vadd.f32 %v3334_v30, %v10425_v28 }
 0x4ab   :  { %v3604_v32 = vadd.f32 %v3603_v4, %v10350_v62 }
 0x4ad   :  { %v5134_v46 = vmax.f32 %v3604_v32, 0.0  ;;  %v2345_v7 = vpop.f32.mrf.mxu0  ;;  %v10439_v32 = vpop.f32.mrf.mxu1 }
 0x4af   :  { %v6960_v45 = vmax.f32 %v6959_v40, %v5134_v46  ;;  %3114 = vmatmul.bf16.gmra.mxu1 %v10276_v54  ;;  %v5069_v40 = vmax.f32 %v3335_v5, 0.0  ;;  %v2346_v46 = vadd.f32 %v10016_v16, %v2345_v7 }
 0x4b1   :  { %v3336_v4 = vpop.f32.mrf.mxu2  ;;  %v2552_v10 = vmax.f32 %v2346_v46, 0.0 }
 0x4b2   :  { %v3337_v9 = vadd.f32 %v3336_v4, %v10425_v28  ;;  %v3605_v59 = vpop.f32.mrf.mxu3 }
 0x4b3   :  { %v3606_v6 = vadd.f32 %v3605_v59, %v10350_v62 }
 0x4b4   :  { %v5077_v17 = vmax.f32 %v3337_v9, 0.0 }
 0x4b5   :  { %v2347_v20 = vpop.f32.mrf.mxu0  ;;  %v5142_v4 = vmax.f32 %v3606_v6, 0.0 }
 0x4b6   :  { %v6900_v35 = vmax.f32 %v5069_v40, %v5077_v17  ;;  %v2348_v30 = vadd.f32 %v10016_v16, %v2347_v20  ;;  %3378 = vmatmul.bf16.gmra.mxu2 %v10356_v56 }
 0x4b7   :  { %v6961_v17 = vmax.f32 %v6960_v45, %v5142_v4 }
 0x4b8   :  { %v2553_v12 = vmax.f32 %v2348_v30, 0.0 }
 0x4b9   :  { %v3339_v25 = vpop.f32.mrf.mxu2 }
 0x4ba   :  { %v10445_v37 = vpack.c.bf16 %v2553_v12, %v2552_v10  ;;  %v3340_v22 = vadd.f32 %v3339_v25, %v10425_v28  ;;  %v3608_v5 = vpop.f32.mrf.mxu3  ;;  %3856 = vmatmul.bf16.gmra.mxu0 %v10231_v11 }
 0x4bb   :  { %v3609_v7 = vadd.f32 %v3608_v5, %v10350_v62 }
 0x4bc   :  { %v5085_v9 = vmax.f32 %v3340_v22, 0.0  ;;  %v2415_v59 = vpop.f32.mrf.mxu1  ;;  %3637 = vmatmul.bf16.gmra.mxu3 %v10445_v37 }
 0x4bd   :  { %v5150_v20 = vmax.f32 %v3609_v7, 0.0  ;;  %v2416_v25 = vadd.f32 %v10016_v16, %v2415_v59 }
 0x4be   :  { %v6901_v40 = vmax.f32 %v6900_v35, %v5085_v9 }
 0x4bf   :  { %v6962_v46 = vmax.f32 %v6961_v17, %v5150_v20  ;;  %3119 = vmatmul.bf16.gmra.mxu1 %v10312_v18  ;;  %v2580_v45 = vmax.f32 %v2416_v25, 0.0  ;;  %v10463_v25 = vperm.slane %v10347_v42, 0 }
 0x4c1   :  { %v3341_v6 = vpop.f32.mrf.mxu2 }
 0x4c2   :  { %v3342_v30 = vadd.f32 %v3341_v6, %v10425_v28  ;;  %v3610_v10 = vpop.f32.mrf.mxu3 }
 0x4c3   :  { %v3611_v5 = vadd.f32 %v3610_v10, %v10350_v62 }
 0x4c4   :  { %v5093_v12 = vmax.f32 %v3342_v30, 0.0  ;;  %v2417_v11 = vpop.f32.mrf.mxu1 }
 0x4c5   :  { %v2418_v22 = vadd.f32 %v10016_v16, %v2417_v11  ;;  %v5158_v4 = vmax.f32 %v3611_v5, 0.0 }
 0x4c6   :  { %v6902_v38 = vmax.f32 %v6901_v40, %v5093_v12  ;;  %3383 = vmatmul.bf16.gmra.mxu2 %v10371_v8 }
 0x4c7   :  { %v2581_v35 = vmax.f32 %v2418_v22, 0.0  ;;  %v6963_v10 = vmax.f32 %v6962_v46, %v5158_v4 }
 0x4c9   :  { %v10457_v7 = vpack.c.bf16 %v2581_v35, %v2580_v45  ;;  %v3344_v9 = vpop.f32.mrf.mxu2 }
 0x4ca   :  { %v3345_v17 = vadd.f32 %v3344_v9, %v10425_v28  ;;  %v3613_v20 = vpop.f32.mrf.mxu3  ;;  %3861 = vmatmul.bf16.gmra.mxu0 %v10276_v54 }
 0x4cb   :  { %v3614_v59 = vadd.f32 %v3613_v20, %v10350_v62 }
 0x4cc   :  { %v5101_v6 = vmax.f32 %v3345_v17, 0.0  ;;  %v3085_v30 = vpop.f32.mrf.mxu1 }
 0x4cd   :  { %v5166_v11 = vmax.f32 %v3614_v59, 0.0  ;;  %v3086_v35 = vadd.f32 %v3085_v30, %v10463_v25 }
 0x4ce   :  { %v6903_v40 = vmax.f32 %v6902_v38, %v5101_v6 }
 0x4cf   :  { %v6964_v12 = vmax.f32 %v6963_v10, %v5166_v11  ;;  %3124 = vmatmul.bf16.gmra.mxu1 %v10332_v31  ;;  %v5068_v38 = vmax.f32 %v3086_v35, 0.0 }
 0x4d1   :  { %v3346_v5 = vpop.f32.mrf.mxu2 }
 0x4d2   :  { %v3347_v22 = vadd.f32 %v3346_v5, %v10425_v28  ;;  %v3615_v45 = vpop.f32.mrf.mxu3 }
 0x4d3   :  { %v3616_v17 = vadd.f32 %v3615_v45, %v10350_v62 }
 0x4d4   :  { %v5109_v9 = vmax.f32 %v3347_v22, 0.0  ;;  %v3087_v54 = vpop.f32.mrf.mxu1 }
 0x4d5   :  { %v3088_v46 = vadd.f32 %v3087_v54, %v10463_v25  ;;  %v5174_v6 = vmax.f32 %v3616_v17, 0.0 }
 0x4d6   :  { %v6904_v4 = vmax.f32 %v6903_v40, %v5109_v9  ;;  %3388 = vmatmul.bf16.gmra.mxu2 %v10445_v37 }
 0x4d7   :  { %v5076_v20 = vmax.f32 %v3088_v46, 0.0  ;;  %v2350_v59 = vpop.f32.mrf.mxu0  ;;  %v6965_v24 = vmax.f32 %v6964_v12, %v5174_v6 }
 0x4d8   :  { %v2351_v35 = vadd.f32 %v10016_v16, %v2350_v59 }
 0x4d9   :  { %v6847_v10 = vmax.f32 %v5068_v38, %v5076_v20  ;;  %v3349_v11 = vpop.f32.mrf.mxu2 }
 0x4da   :  { %v3350_v5 = vadd.f32 %v3349_v11, %v10425_v28  ;;  %v3618_v27 = vpop.f32.mrf.mxu3  ;;  %3866 = vmatmul.bf16.gmra.mxu0 %v10312_v18  ;;  %v2554_v3 = vmax.f32 %v2351_v35, 0.0  ;;  %v10492_v35 = vperm.slane %v10347_v42, 3 }
 0x4db   :  { %v3619_v30 = vadd.f32 %v3618_v27, %v10350_v62 }
 0x4dc   :  { %v5117_v22 = vmax.f32 %v3350_v5, 0.0  ;;  %v3090_v45 = vpop.f32.mrf.mxu1 }
 0x4dd   :  { %v5182_v54 = vmax.f32 %v3619_v30, 0.0  ;;  %v3091_v40 = vadd.f32 %v3090_v45, %v10463_v25 }
 0x4de   :  { %v6905_v9 = vmax.f32 %v6904_v4, %v5117_v22 }
 0x4df   :  { %v6966_v46 = vmax.f32 %v6965_v24, %v5182_v54  ;;  %v5084_v17 = vmax.f32 %v3091_v40, 0.0  ;;  %v2352_v38 = vpop.f32.mrf.mxu0  ;;  %3129 = vmatmul.bf16.gmra.mxu1 %v10356_v56 }
 0x4e0   :  { %v2353_v20 = vadd.f32 %v10016_v16, %v2352_v38 }
 0x4e1   :  { %v6848_v11 = vmax.f32 %v6847_v10, %v5084_v17  ;;  %v3351_v18 = vpop.f32.mrf.mxu2 }
 0x4e2   :  { %v2555_v27 = vmax.f32 %v2353_v20, 0.0  ;;  %v3352_v5 = vadd.f32 %v3351_v18, %v10425_v28  ;;  %v3620_v12 = vpop.f32.mrf.mxu3  ;;  %v8149_v18 = vld [vmem:[%s11926_s5 + $0x174] sm:$0xf0] }
 0x4e3   :  { %v3621_v4 = vadd.f32 %v3620_v12, %v10350_v62 }
 0x4e4   :  { %v10479_v6 = vpack.c.bf16 %v2555_v27, %v2554_v3  ;;  %v5125_v30 = vmax.f32 %v3352_v5, 0.0  ;;  %v3092_v45 = vpop.f32.mrf.mxu1  ;;  %v8028_v3 = vld [vmem:[%s11926_s5 + $0x158] sm:$0xf] }
 0x4e5   :  { %v3093_v24 = vadd.f32 %v3092_v45, %v10463_v25  ;;  %v5190_v22 = vmax.f32 %v3621_v4, 0.0  ;;  %v8029_v38 = vor.u32 %v8149_v18, %v8028_v3 }
 0x4e6   :  { %v6906_v59 = vmax.f32 %v6905_v9, %v5125_v30  ;;  %3393 = vmatmul.bf16.gmra.mxu2 %v10479_v6  ;;  %3642 = vmatmul.bf16.gmra.mxu3 %v10479_v6 }
 0x4e7   :  { %v5092_v16 = vmax.f32 %v3093_v24, 0.0  ;;  %v3832_v10 = vpop.f32.mrf.mxu0  ;;  %4572 = vmatpush.bf16.msra.mxu3 %v8029_v38  ;;  %v6967_v42 = vmax.f32 %v6966_v46, %v5190_v22 }
 0x4e8   :  { %v3833_v24 = vadd.f32 %v3832_v10, %v10492_v35 }
 0x4e9   :  { %v6849_v54 = vmax.f32 %v6848_v11, %v5092_v16  ;;  %v3354_v40 = vpop.f32.mrf.mxu2  ;;  %v10500_v11 = vld [vmem:[%s11925_s4] ss:$0 sm:$0xff] }
 0x4ea   :  { %v3355_v9 = vadd.f32 %v3354_v40, %v10425_v28  ;;  %v3623_v17 = vpop.f32.mrf.mxu3  ;;  %3871 = vmatmul.bf16.gmra.mxu0 %v10332_v31  ;;  %v2358_v27 = vadd.f32 %v10500_v11, %v10042_v58  ;;  %v2356_v4 = vadd.f32 %v10500_v11, %v10022_v43  ;;  %v5071_v22 = vmax.f32 %v3833_v24, 0.0 }
 0x4eb   :  { %v3624_v20 = vadd.f32 %v3623_v17, %v10350_v62 }
 0x4ec   :  { %v5133_v5 = vmax.f32 %v3355_v9, 0.0  ;;  %v3095_v12 = vpop.f32.mrf.mxu1  ;;  %v2557_v17 = vmax.f32 %v2358_v27, 0.0  ;;  %v2556_v46 = vmax.f32 %v2356_v4, 0.0 }
 0x4ed   :  { %v5198_v30 = vmax.f32 %v3624_v20, 0.0  ;;  %v3096_v45 = vadd.f32 %v3095_v12, %v10463_v25 }
 0x4ee   :  { %v6907_v16 = vmax.f32 %v6906_v59, %v5133_v5  ;;  %v10511_v43 = vpack.c.bf16 %v2557_v17, %v2556_v46  ;;  %v8144_v17 = vld [vmem:[%s11926_s5 + $0x154] sm:$0xf] }
 0x4ef   :  { %v6968_v40 = vmax.f32 %v6967_v42, %v5198_v30  ;;  %v5100_v3 = vmax.f32 %v3096_v45, 0.0  ;;  %3134 = vmatmul.bf16.gmra.mxu1 %v10371_v8  ;;  %v3834_v18 = vpop.f32.mrf.mxu0 }
 0x4f0   :  { %v3835_v58 = vadd.f32 %v3834_v18, %v10492_v35 }
 0x4f1   :  { %v6850_v9 = vmax.f32 %v6849_v54, %v5100_v3  ;;  %v3356_v38 = vpop.f32.mrf.mxu2 }
 0x4f2   :  { %v5079_v20 = vmax.f32 %v3835_v58, 0.0  ;;  %v3357_v12 = vadd.f32 %v3356_v38, %v10425_v28  ;;  %v3625_v31 = vpop.f32.mrf.mxu3 }
 0x4f3   :  { %v3626_v42 = vadd.f32 %v3625_v31, %v10350_v62  ;;  %v8022_v31 = vld [vmem:[%s11926_s5 + $0x170] sm:$0xf0] }
 0x4f4   :  { %v7006_v10 = vmax.f32 %v5071_v22, %v5079_v20  ;;  %v5141_v59 = vmax.f32 %v3357_v12, 0.0  ;;  %v3097_v5 = vpop.f32.mrf.mxu1  ;;  %v8025_v46 = vor.u32 %v8144_v17, %v8022_v31 }
 0x4f5   :  { %v3098_v30 = vadd.f32 %v3097_v5, %v10463_v25  ;;  %v5206_v24 = vmax.f32 %v3626_v42, 0.0 }
 0x4f6   :  { %v6908_v27 = vmax.f32 %v6907_v16, %v5141_v59  ;;  %3398 = vmatmul.bf16.gmra.mxu2 %v10511_v43  ;;  %3647 = vmatmul.bf16.gmra.mxu3 %v10511_v43 }
 0x4f7   :  { %v5108_v54 = vmax.f32 %v3098_v30, 0.0  ;;  %v3837_v45 = vpop.f32.mrf.mxu0  ;;  %4323 = vmatpush.bf16.msra.mxu2 %v8025_v46  ;;  %v6969_v5 = vmax.f32 %v6968_v40, %v5206_v24 }
 0x4f8   :  { %v3838_v4 = vadd.f32 %v3837_v45, %v10492_v35 }
 0x4f9   :  { %v6851_v3 = vmax.f32 %v6850_v9, %v5108_v54  ;;  %v3359_v18 = vpop.f32.mrf.mxu2  ;;  %v2363_v9 = vadd.f32 %v10500_v11, %v10094_v36  ;;  %v2361_v54 = vadd.f32 %v10500_v11, %v10061_v13  ;;  %v8148_v36 = vld [vmem:[%s11926_s5 + $0x16c] sm:$0xf0] }
 0x4fa   :  { %v5087_v16 = vmax.f32 %v3838_v4, 0.0  ;;  %v3360_v58 = vadd.f32 %v3359_v18, %v10425_v28  ;;  %v3628_v38 = vpop.f32.mrf.mxu3  ;;  %3876 = vmatmul.bf16.gmra.mxu0 %v10356_v56  ;;  %v8020_v4 = vld [vmem:[%s11926_s5 + $0x150] sm:$0xf] }
 0x4fb   :  { %v3629_v22 = vadd.f32 %v3628_v38, %v10350_v62  ;;  %v8021_v24 = vor.u32 %v8148_v36, %v8020_v4  ;;  %v2559_v17 = vmax.f32 %v2363_v9, 0.0 }
 0x4fc   :  { %v7007_v20 = vmax.f32 %v7006_v10, %v5087_v16  ;;  %v5149_v12 = vmax.f32 %v3360_v58, 0.0  ;;  %v3100_v59 = vpop.f32.mrf.mxu1 }
 0x4fd   :  { %v5214_v42 = vmax.f32 %v3629_v22, 0.0  ;;  %v3101_v30 = vadd.f32 %v3100_v59, %v10463_v25  ;;  %4074 = vmatpush.bf16.msra.mxu1 %v8021_v24 }
 0x4fe   :  { %v6909_v45 = vmax.f32 %v6908_v27, %v5149_v12  ;;  %v2558_v27 = vmax.f32 %v2361_v54, 0.0 }
 0x4ff   :  { %v6970_v10 = vmax.f32 %v6969_v5, %v5214_v42  ;;  %v5116_v18 = vmax.f32 %v3101_v30, 0.0  ;;  %3139 = vmatmul.bf16.gmra.mxu1 %v10445_v37  ;;  %v3839_v40 = vpop.f32.mrf.mxu0 }
 0x500   :  { %v3840_v31 = vadd.f32 %v3839_v40, %v10492_v35  ;;  %v10541_v22 = vpack.c.bf16 %v2559_v17, %v2558_v27 }
 0x501   :  { %v6852_v16 = vmax.f32 %v6851_v3, %v5116_v18  ;;  %v3361_v13 = vpop.f32.mrf.mxu2 }
 0x502   :  { %v5095_v58 = vmax.f32 %v3840_v31, 0.0  ;;  %v3362_v38 = vadd.f32 %v3361_v13, %v10425_v28  ;;  %v3630_v46 = vpop.f32.mrf.mxu3 }
 0x503   :  { %v3631_v42 = vadd.f32 %v3630_v46, %v10350_v62 }
 0x504   :  { %v7008_v12 = vmax.f32 %v7007_v20, %v5095_v58  ;;  %v5157_v59 = vmax.f32 %v3362_v38, 0.0  ;;  %v3102_v5 = vpop.f32.mrf.mxu1 }
 0x505   :  { %v3103_v30 = vadd.f32 %v3102_v5, %v10463_v25  ;;  %v5222_v36 = vmax.f32 %v3631_v42, 0.0  ;;  %v8145_v42 = vld [vmem:[%s11926_s5 + $0x15c] sm:$0xf] }
 0x506   :  { %v6910_v9 = vmax.f32 %v6909_v45, %v5157_v59  ;;  %3403 = vmatmul.bf16.gmra.mxu2 %v10541_v22  ;;  %3652 = vmatmul.bf16.gmra.mxu3 %v10541_v22  ;;  %v2368_v45 = vadd.f32 %v10500_v11, %v10156_v15 }
 0x507   :  { %v5124_v3 = vmax.f32 %v3103_v30, 0.0  ;;  %v3842_v54 = vpop.f32.mrf.mxu0  ;;  %v6971_v38 = vmax.f32 %v6970_v10, %v5222_v36  ;;  %v8030_v30 = vld [vmem:[%s11926_s5 + $0x178] sm:$0xf0] }
 0x508   :  { %v3843_v4 = vadd.f32 %v3842_v54, %v10492_v35  ;;  %v2561_v54 = vmax.f32 %v2368_v45, 0.0 }
 0x509   :  { %v6853_v18 = vmax.f32 %v6852_v16, %v5124_v3  ;;  %v3364_v40 = vpop.f32.mrf.mxu2  ;;  %v2366_v16 = vadd.f32 %v10500_v11, %v10133_v60  ;;  %v10565_v3 = vor.u32 %v8145_v42, %v8030_v30 }
 0x50a   :  { %v5103_v24 = vmax.f32 %v3843_v4, 0.0  ;;  %v3365_v20 = vadd.f32 %v3364_v40, %v10425_v28  ;;  %v3633_v17 = vpop.f32.mrf.mxu3  ;;  %3881 = vmatmul.bf16.gmra.mxu0 %v10371_v8 }
 0x50b   :  { %v3634_v31 = vadd.f32 %v3633_v17, %v10350_v62  ;;  %4821 = vmatpush.bf16.msra.mxu0 %v10565_v3  ;;  %v2560_v36 = vmax.f32 %v2366_v16, 0.0 }
 0x50c   :  { %v7009_v13 = vmax.f32 %v7008_v12, %v5103_v24  ;;  %v5165_v27 = vmax.f32 %v3365_v20, 0.0  ;;  %v3105_v58 = vpop.f32.mrf.mxu1 }
 0x50d   :  { %v5230_v46 = vmax.f32 %v3634_v31, 0.0  ;;  %v3106_v59 = vadd.f32 %v3105_v58, %v10463_v25  ;;  %v10570_v20 = vpack.c.bf16 %v2561_v54, %v2560_v36 }
 0x50e   :  { %v6911_v5 = vmax.f32 %v6910_v9, %v5165_v27 }
 0x50f   :  { %v10562_v15 = vmax.f32 %v6971_v38, %v5230_v46  ;;  %v5132_v12 = vmax.f32 %v3106_v59, 0.0  ;;  %3144 = vmatmul.bf16.gmra.mxu1 %v10479_v6  ;;  %v3844_v10 = vpop.f32.mrf.mxu0 }
 0x510   :  { %v3845_v60 = vadd.f32 %v3844_v10, %v10492_v35 }
 0x511   :  { %v6854_v9 = vmax.f32 %v6853_v18, %v5132_v12  ;;  %v3366_v4 = vpop.f32.mrf.mxu2 }
 0x512   :  { %v5111_v40 = vmax.f32 %v3845_v60, 0.0  ;;  %v3367_v24 = vadd.f32 %v3366_v4, %v10425_v28  ;;  %v2371_v60 = vadd.f32 %v10500_v11, %v10169_v2 }
 0x514   :  { %v7010_v17 = vmax.f32 %v7009_v13, %v5111_v40  ;;  %v5173_v31 = vmax.f32 %v3367_v24, 0.0  ;;  %v3107_v27 = vpop.f32.mrf.mxu1  ;;  %v2373_v13 = vadd.f32 %v10500_v11, %v10187_v19 }
 0x515   :  { %v3108_v58 = vadd.f32 %v3107_v27, %v10463_v25 }
 0x516   :  { %v6912_v38 = vmax.f32 %v6911_v5, %v5173_v31  ;;  %3408 = vmatmul.bf16.gmra.mxu2 %v10570_v20  ;;  %3657 = vmatmul.bf16.gmra.mxu3 %v10570_v20  ;;  %v2563_v40 = vmax.f32 %v2373_v13, 0.0 }
 0x517   :  { %v5140_v18 = vmax.f32 %v3108_v58, 0.0  ;;  %v3847_v45 = vpop.f32.mrf.mxu0  ;;  %v2562_v58 = vmax.f32 %v2371_v60, 0.0 }
 0x518   :  { %v3848_v46 = vadd.f32 %v3847_v45, %v10492_v35 }
 0x519   :  { %v6855_v59 = vmax.f32 %v6854_v9, %v5140_v18  ;;  %v3369_v16 = vpop.f32.mrf.mxu2  ;;  %v10586_v18 = vpack.c.bf16 %v2563_v40, %v2562_v58  ;;  %v2376_v40 = vadd.f32 %v10500_v11, %v10215_v61 }
 0x51a   :  { %v5119_v42 = vmax.f32 %v3848_v46, 0.0  ;;  %v3370_v30 = vadd.f32 %v3369_v16, %v10425_v28  ;;  %3886 = vmatmul.bf16.gmra.mxu0 %v10445_v37 }
 0x51c   :  { %v7011_v12 = vmax.f32 %v7010_v17, %v5119_v42  ;;  %v5181_v5 = vmax.f32 %v3370_v30, 0.0  ;;  %v3110_v10 = vpop.f32.mrf.mxu1 }
 0x51d   :  { %v3111_v54 = vadd.f32 %v3110_v10, %v10463_v25 }
 0x51e   :  { %v6913_v4 = vmax.f32 %v6912_v38, %v5181_v5 }
 0x51f   :  { %v5148_v36 = vmax.f32 %v3111_v54, 0.0  ;;  %3149 = vmatmul.bf16.gmra.mxu1 %v10511_v43  ;;  %v3849_v9 = vpop.f32.mrf.mxu0 }
 0x520   :  { %v3850_v24 = vadd.f32 %v3849_v9, %v10492_v35 }
 0x521   :  { %v6856_v31 = vmax.f32 %v6855_v59, %v5148_v36  ;;  %v3371_v27 = vpop.f32.mrf.mxu2 }
 0x522   :  { %v5127_v19 = vmax.f32 %v3850_v24, 0.0  ;;  %v3372_v17 = vadd.f32 %v3371_v27, %v10425_v28 }
 0x524   :  { %v7012_v45 = vmax.f32 %v7011_v12, %v5127_v19  ;;  %v5189_v46 = vmax.f32 %v3372_v17, 0.0  ;;  %v3112_v16 = vpop.f32.mrf.mxu1  ;;  %v2378_v12 = vadd.f32 %v10500_v11, %v10234_v53 }
 0x525   :  { %v3113_v2 = vadd.f32 %v3112_v16, %v10463_v25  ;;  %v2564_v16 = vmax.f32 %v2376_v40, 0.0  ;;  %v2383_v40 = vadd.f32 %v10500_v11, %v10282_v14 }
 0x526   :  { %v6914_v38 = vmax.f32 %v6913_v4, %v5189_v46  ;;  %3413 = vmatmul.bf16.gmra.mxu2 %v10586_v18  ;;  %3662 = vmatmul.bf16.gmra.mxu3 %v10586_v18  ;;  %v2565_v58 = vmax.f32 %v2378_v12, 0.0 }
 0x527   :  { %v5156_v42 = vmax.f32 %v3113_v2, 0.0  ;;  %v3852_v30 = vpop.f32.mrf.mxu0 }
 0x528   :  { %v3853_v59 = vadd.f32 %v3852_v30, %v10492_v35  ;;  %v10602_v2 = vpack.c.bf16 %v2565_v58, %v2564_v16  ;;  %v2381_v58 = vadd.f32 %v10500_v11, %v10268_v23 }
 0x529   :  { %v6857_v13 = vmax.f32 %v6856_v31, %v5156_v42  ;;  %v3374_v5 = vpop.f32.mrf.mxu2 }
 0x52a   :  { %v5135_v10 = vmax.f32 %v3853_v59, 0.0  ;;  %v3375_v54 = vadd.f32 %v3374_v5, %v10425_v28  ;;  %3891 = vmatmul.bf16.gmra.mxu0 %v10479_v6  ;;  %v3635_v5 = vpop.f32.mrf.mxu3 }
 0x52c   :  { %v7013_v60 = vmax.f32 %v7012_v45, %v5135_v10  ;;  %v5197_v4 = vmax.f32 %v3375_v54, 0.0  ;;  %v3115_v36 = vpop.f32.mrf.mxu1 }
 0x52d   :  { %v3116_v9 = vadd.f32 %v3115_v36, %v10463_v25  ;;  %v3636_v36 = vadd.f32 %v3635_v5, %v10350_v62 }
 0x52e   :  { %v6915_v24 = vmax.f32 %v6914_v38, %v5197_v4 }
 0x52f   :  { %v5164_v27 = vmax.f32 %v3116_v9, 0.0  ;;  %3154 = vmatmul.bf16.gmra.mxu1 %v10541_v22  ;;  %v3854_v31 = vpop.f32.mrf.mxu0 }
 0x530   :  { %v3855_v19 = vadd.f32 %v3854_v31, %v10492_v35 }
 0x531   :  { %v6858_v17 = vmax.f32 %v6857_v13, %v5164_v27  ;;  %v3376_v46 = vpop.f32.mrf.mxu2 }
 0x532   :  { %v5143_v53 = vmax.f32 %v3855_v19, 0.0  ;;  %v3377_v45 = vadd.f32 %v3376_v46, %v10425_v28 }
 0x534   :  { %v7014_v42 = vmax.f32 %v7013_v60, %v5143_v53  ;;  %v5205_v30 = vmax.f32 %v3377_v45, 0.0  ;;  %v3117_v59 = vpop.f32.mrf.mxu1 }
 0x535   :  { %v3118_v61 = vadd.f32 %v3117_v59, %v10463_v25 }
 0x536   :  { %v6916_v38 = vmax.f32 %v6915_v24, %v5205_v30  ;;  %3418 = vmatmul.bf16.gmra.mxu2 %v10602_v2  ;;  %3667 = vmatmul.bf16.gmra.mxu3 %v10602_v2  ;;  %v2567_v30 = vmax.f32 %v2383_v40, 0.0 }
 0x537   :  { %v5172_v10 = vmax.f32 %v3118_v61, 0.0  ;;  %v3857_v13 = vpop.f32.mrf.mxu0 }
 0x538   :  { %v3858_v54 = vadd.f32 %v3857_v13, %v10492_v35 }
 0x539   :  { %v6859_v12 = vmax.f32 %v6858_v17, %v5172_v10  ;;  %v3379_v4 = vpop.f32.mrf.mxu2  ;;  %v5238_v17 = vmax.f32 %v3636_v36, 0.0 }
 0x53a   :  { %v5151_v9 = vmax.f32 %v3858_v54, 0.0  ;;  %v3380_v60 = vadd.f32 %v3379_v4, %v10425_v28  ;;  %3896 = vmatmul.bf16.gmra.mxu0 %v10511_v43 }
 0x53b   :  { %v6973_v10 = vmax.f32 %v10562_v15, %v5238_v17  ;;  %v7996_v17 = vld [vmem:[%s11926_s5 + $0x118] sm:$0xf] }
 0x53c   :  { %v7015_v24 = vmax.f32 %v7014_v42, %v5151_v9  ;;  %v5213_v27 = vmax.f32 %v3380_v60, 0.0  ;;  %v3120_v31 = vpop.f32.mrf.mxu1  ;;  %v2566_v42 = vmax.f32 %v2381_v58, 0.0 }
 0x53d   :  { %v3121_v19 = vadd.f32 %v3120_v31, %v10463_v25 }
 0x53e   :  { %v6917_v46 = vmax.f32 %v6916_v38, %v5213_v27  ;;  %v10621_v38 = vpack.c.bf16 %v2567_v30, %v2566_v42 }
 0x53f   :  { %v5180_v16 = vmax.f32 %v3121_v19, 0.0  ;;  %3159 = vmatmul.bf16.gmra.mxu1 %v10570_v20  ;;  %v3638_v53 = vpop.f32.mrf.mxu3  ;;  %v3859_v45 = vpop.f32.mrf.mxu0 }
 0x540   :  { %v3639_v59 = vadd.f32 %v3638_v53, %v10350_v62  ;;  %v3860_v14 = vadd.f32 %v3859_v45, %v10492_v35  ;;  %v2388_v45 = vadd.f32 %v10500_v11, %v10316_v49 }
 0x541   :  { %v6860_v61 = vmax.f32 %v6859_v12, %v5180_v16  ;;  %v3381_v5 = vpop.f32.mrf.mxu2 }
 0x542   :  { %v5246_v23 = vmax.f32 %v3639_v59, 0.0  ;;  %v5159_v13 = vmax.f32 %v3860_v14, 0.0  ;;  %v3382_v54 = vadd.f32 %v3381_v5, %v10425_v28 }
 0x544   :  { %v10623_v4 = vmax.f32 %v6973_v10, %v5246_v23  ;;  %v7016_v36 = vmax.f32 %v7015_v24, %v5159_v13  ;;  %v5221_v9 = vmax.f32 %v3382_v54, 0.0  ;;  %v3122_v60 = vpop.f32.mrf.mxu1  ;;  %v8141_v24 = vld [vmem:[%s11926_s5 + $0x134] sm:$0xf0]  ;;  %v2569_v13 = vmax.f32 %v2388_v45, 0.0  ;;  %v7990_v45 = vld [vmem:[%s11926_s5 + $0x130] sm:$0xf0] }
 0x545   :  { %v3123_v40 = vadd.f32 %v3122_v60, %v10463_v25  ;;  %v7997_v53 = vor.u32 %v8141_v24, %v7996_v17 }
 0x546   :  { %v6918_v27 = vmax.f32 %v6917_v46, %v5221_v9  ;;  %3423 = vmatmul.bf16.gmra.mxu2 %v10621_v38  ;;  %3672 = vmatmul.bf16.gmra.mxu3 %v10621_v38 }
 0x547   :  { %v5188_v12 = vmax.f32 %v3123_v40, 0.0  ;;  %v3862_v15 = vpop.f32.mrf.mxu0  ;;  %4573 = vmatpush.bf16.msra.mxu3 %v7997_v53  ;;  %v8136_v53 = vld [vmem:[%s11926_s5 + $0x114] sm:$0xf] }
 0x548   :  { %v3863_v31 = vadd.f32 %v3862_v15, %v10492_v35 }
 0x549   :  { %v6861_v58 = vmax.f32 %v6860_v61, %v5188_v12  ;;  %v3384_v19 = vpop.f32.mrf.mxu2  ;;  %v2386_v61 = vadd.f32 %v10500_v11, %v10302_v63 }
 0x54a   :  { %v5167_v16 = vmax.f32 %v3863_v31, 0.0  ;;  %v3385_v46 = vadd.f32 %v3384_v19, %v10425_v28  ;;  %3901 = vmatmul.bf16.gmra.mxu0 %v10541_v22 }
 0x54b   :  { %v2568_v49 = vmax.f32 %v2386_v61, 0.0 }
 0x54c   :  { %v7017_v30 = vmax.f32 %v7016_v36, %v5167_v16  ;;  %v5229_v59 = vmax.f32 %v3385_v46, 0.0  ;;  %v3125_v14 = vpop.f32.mrf.mxu1 }
 0x54d   :  { %v3126_v42 = vadd.f32 %v3125_v14, %v10463_v25  ;;  %v10645_v12 = vpack.c.bf16 %v2569_v13, %v2568_v49  ;;  %v7993_v14 = vor.u32 %v8136_v53, %v7990_v45  ;;  %v2391_v13 = vadd.f32 %v10500_v11, %v10326_v39 }
 0x54e   :  { %v6919_v5 = vmax.f32 %v6918_v27, %v5229_v59 }
 0x54f   :  { %v5196_v10 = vmax.f32 %v3126_v42, 0.0  ;;  %3164 = vmatmul.bf16.gmra.mxu1 %v10586_v18  ;;  %v3864_v23 = vpop.f32.mrf.mxu0  ;;  %v2393_v42 = vadd.f32 %v10500_v11, %v10337_v51  ;;  %4324 = vmatpush.bf16.msra.mxu2 %v7993_v14 }
 0x550   :  { %v3865_v54 = vadd.f32 %v3864_v23, %v10492_v35 }
 0x551   :  { %v6862_v9 = vmax.f32 %v6861_v58, %v5196_v10  ;;  %v3386_v60 = vpop.f32.mrf.mxu2 }
 0x552   :  { %v5175_v36 = vmax.f32 %v3865_v54, 0.0  ;;  %v3387_v40 = vadd.f32 %v3386_v60, %v10425_v28  ;;  %v8140_v60 = vld [vmem:[%s11926_s5 + $0x12c] sm:$0xf0] }
 0x554   :  { %v7018_v15 = vmax.f32 %v7017_v30, %v5175_v36  ;;  %v5237_v31 = vmax.f32 %v3387_v40, 0.0  ;;  %v3127_v19 = vpop.f32.mrf.mxu1  ;;  %v2571_v40 = vmax.f32 %v2393_v42, 0.0 }
 0x555   :  { %v3128_v63 = vadd.f32 %v3127_v19, %v10463_v25 }
 0x556   :  { %v6920_v27 = vmax.f32 %v6919_v5, %v5237_v31  ;;  %3428 = vmatmul.bf16.gmra.mxu2 %v10645_v12  ;;  %3677 = vmatmul.bf16.gmra.mxu3 %v10645_v12  ;;  %v3640_v31 = vpop.f32.mrf.mxu3 }
 0x557   :  { %v5204_v17 = vmax.f32 %v3128_v63, 0.0  ;;  %v3867_v24 = vpop.f32.mrf.mxu0  ;;  %v2570_v63 = vmax.f32 %v2391_v13, 0.0 }
 0x558   :  { %v3868_v58 = vadd.f32 %v3867_v24, %v10492_v35 }
 0x559   :  { %v6863_v16 = vmax.f32 %v6862_v9, %v5204_v17  ;;  %v3389_v46 = vpop.f32.mrf.mxu2  ;;  %v7988_v9 = vld [vmem:[%s11926_s5 + $0x110] sm:$0xf]  ;;  %v10673_v24 = vpack.c.bf16 %v2571_v40, %v2570_v63 }
 0x55a   :  { %v5183_v30 = vmax.f32 %v3868_v58, 0.0  ;;  %v3390_v59 = vadd.f32 %v3389_v46, %v10425_v28  ;;  %3906 = vmatmul.bf16.gmra.mxu0 %v10570_v20  ;;  %v7989_v36 = vor.u32 %v8140_v60, %v7988_v9  ;;  %v3641_v58 = vadd.f32 %v3640_v31, %v10350_v62 }
 0x55c   :  { %v7019_v61 = vmax.f32 %v7018_v15, %v5183_v30  ;;  %v5245_v5 = vmax.f32 %v3390_v59, 0.0  ;;  %v3130_v10 = vpop.f32.mrf.mxu1  ;;  %4075 = vmatpush.bf16.msra.mxu1 %v7989_v36  ;;  %v5254_v42 = vmax.f32 %v3641_v58, 0.0 }
 0x55d   :  { %v3131_v23 = vadd.f32 %v3130_v10, %v10463_v25 }
 0x55e   :  { %v6921_v54 = vmax.f32 %v6920_v27, %v5245_v5 }
 0x55f   :  { %v5212_v49 = vmax.f32 %v3131_v23, 0.0  ;;  %3169 = vmatmul.bf16.gmra.mxu1 %v10602_v2  ;;  %v3869_v51 = vpop.f32.mrf.mxu0 }
 0x560   :  { %v3870_v15 = vadd.f32 %v3869_v51, %v10492_v35 }
 0x561   :  { %v6864_v19 = vmax.f32 %v6863_v16, %v5212_v49  ;;  %v3391_v39 = vpop.f32.mrf.mxu2  ;;  %v6975_v49 = vmax.f32 %v10623_v4, %v5254_v42 }
 0x562   :  { %v5191_v27 = vmax.f32 %v3870_v15, 0.0  ;;  %v3392_v17 = vadd.f32 %v3391_v39, %v10425_v28 }
 0x564   :  { %v7020_v46 = vmax.f32 %v7019_v61, %v5191_v27  ;;  %v5253_v53 = vmax.f32 %v3392_v17, 0.0  ;;  %v3132_v45 = vpop.f32.mrf.mxu1  ;;  %v8137_v27 = vld [vmem:[%s11926_s5 + $0x11c] sm:$0xf] }
 0x565   :  { %v3133_v30 = vadd.f32 %v3132_v45, %v10463_v25 }
 0x566   :  { %v6922_v59 = vmax.f32 %v6921_v54, %v5253_v53  ;;  %3433 = vmatmul.bf16.gmra.mxu2 %v10673_v24  ;;  %3682 = vmatmul.bf16.gmra.mxu3 %v10673_v24  ;;  %v2398_v54 = vadd.f32 %v10500_v11, %v10364_v44  ;;  %v7998_v44 = vld [vmem:[%s11926_s5 + $0x138] sm:$0xf0] }
 0x567   :  { %v5220_v16 = vmax.f32 %v3133_v30, 0.0  ;;  %v3872_v14 = vpop.f32.mrf.mxu0  ;;  %v10696_v58 = vor.u32 %v8137_v27, %v7998_v44 }
 0x568   :  { %v3873_v5 = vadd.f32 %v3872_v14, %v10492_v35 }
 0x569   :  { %v6865_v10 = vmax.f32 %v6864_v19, %v5220_v16  ;;  %v3394_v23 = vpop.f32.mrf.mxu2  ;;  %v3643_v13 = vpop.f32.mrf.mxu3  ;;  %v2396_v19 = vadd.f32 %v10500_v11, %v10352_v55  ;;  %4822 = vmatpush.bf16.msra.mxu0 %v10696_v58 }
 0x56a   :  { %v5199_v9 = vmax.f32 %v3873_v5, 0.0  ;;  %v3395_v61 = vadd.f32 %v3394_v23, %v10425_v28  ;;  %v3644_v60 = vadd.f32 %v3643_v13, %v10350_v62  ;;  %3911 = vmatmul.bf16.gmra.mxu0 %v10586_v18 }
 0x56c   :  { %v7021_v51 = vmax.f32 %v7020_v46, %v5199_v9  ;;  %v5261_v36 = vmax.f32 %v3395_v61, 0.0  ;;  %v5262_v40 = vmax.f32 %v3644_v60, 0.0  ;;  %v3135_v15 = vpop.f32.mrf.mxu1  ;;  %v2573_v46 = vmax.f32 %v2398_v54, 0.0 }
 0x56d   :  { %v3136_v31 = vadd.f32 %v3135_v15, %v10463_v25 }
 0x56e   :  { %v6923_v39 = vmax.f32 %v6922_v59, %v5261_v36  ;;  %v6976_v63 = vmax.f32 %v6975_v49, %v5262_v40  ;;  %v2572_v59 = vmax.f32 %v2396_v19, 0.0 }
 0x56f   :  { %v5228_v4 = vmax.f32 %v3136_v31, 0.0  ;;  %3174 = vmatmul.bf16.gmra.mxu1 %v10621_v38  ;;  %v3874_v17 = vpop.f32.mrf.mxu0 }
 0x570   :  { %v3875_v53 = vadd.f32 %v3874_v17, %v10492_v35  ;;  %v10702_v5 = vpack.c.bf16 %v2573_v46, %v2572_v59 }
 0x571   :  { %v6866_v55 = vmax.f32 %v6865_v10, %v5228_v4  ;;  %v3396_v45 = vpop.f32.mrf.mxu2  ;;  %v3645_v30 = vpop.f32.mrf.mxu3 }
 0x572   :  { %v5207_v16 = vmax.f32 %v3875_v53, 0.0  ;;  %v3397_v14 = vadd.f32 %v3396_v45, %v10425_v28  ;;  %v3646_v42 = vadd.f32 %v3645_v30, %v10350_v62 }
 0x574   :  { %v7022_v23 = vmax.f32 %v7021_v51, %v5207_v16  ;;  %v5269_v13 = vmax.f32 %v3397_v14, 0.0  ;;  %v5270_v9 = vmax.f32 %v3646_v42, 0.0  ;;  %v3137_v61 = vpop.f32.mrf.mxu1 }
 0x575   :  { %v3138_v60 = vadd.f32 %v3137_v61, %v10463_v25 }
 0x576   :  { %v6924_v54 = vmax.f32 %v6923_v39, %v5269_v13  ;;  %v6977_v10 = vmax.f32 %v6976_v63, %v5270_v9  ;;  %3438 = vmatmul.bf16.gmra.mxu2 %v10702_v5  ;;  %3687 = vmatmul.bf16.gmra.mxu3 %v10702_v5  ;;  %v2403_v39 = vadd.f32 %v10500_v11, %v10389_v0 }
 0x577   :  { %v5236_v49 = vmax.f32 %v3138_v60, 0.0  ;;  %v3877_v36 = vpop.f32.mrf.mxu0 }
 0x578   :  { %v3878_v40 = vadd.f32 %v3877_v36, %v10492_v35  ;;  %v2575_v14 = vmax.f32 %v2403_v39, 0.0 }
 0x579   :  { %v6867_v15 = vmax.f32 %v6866_v55, %v5236_v49  ;;  %v3399_v31 = vpop.f32.mrf.mxu2  ;;  %v3648_v19 = vpop.f32.mrf.mxu3  ;;  %v2401_v55 = vadd.f32 %v10500_v11, %v10374_v34 }
 0x57a   :  { %v5215_v27 = vmax.f32 %v3878_v40, 0.0  ;;  %v3400_v51 = vadd.f32 %v3399_v31, %v10425_v28  ;;  %v3649_v44 = vadd.f32 %v3648_v19, %v10350_v62  ;;  %3916 = vmatmul.bf16.gmra.mxu0 %v10602_v2 }
 0x57b   :  { %v2574_v9 = vmax.f32 %v2401_v55, 0.0  ;;  %v2408_v55 = vadd.f32 %v10500_v11, %v10413_v57 }
 0x57c   :  { %v7023_v63 = vmax.f32 %v7022_v23, %v5215_v27  ;;  %v5277_v4 = vmax.f32 %v3400_v51, 0.0  ;;  %v5278_v17 = vmax.f32 %v3649_v44, 0.0  ;;  %v3140_v46 = vpop.f32.mrf.mxu1 }
 0x57d   :  { %v3141_v53 = vadd.f32 %v3140_v46, %v10463_v25  ;;  %v10720_v36 = vpack.c.bf16 %v2575_v14, %v2574_v9 }
 0x57e   :  { %v6925_v45 = vmax.f32 %v6924_v54, %v5277_v4  ;;  %v6978_v30 = vmax.f32 %v6977_v10, %v5278_v17 }
 0x57f   :  { %v5244_v59 = vmax.f32 %v3141_v53, 0.0  ;;  %3179 = vmatmul.bf16.gmra.mxu1 %v10645_v12  ;;  %v3879_v16 = vpop.f32.mrf.mxu0 }
 0x580   :  { %v3880_v42 = vadd.f32 %v3879_v16, %v10492_v35 }
 0x581   :  { %v6868_v13 = vmax.f32 %v6867_v15, %v5244_v59  ;;  %v3401_v0 = vpop.f32.mrf.mxu2  ;;  %v3650_v23 = vpop.f32.mrf.mxu3 }
 0x582   :  { %v5223_v61 = vmax.f32 %v3880_v42, 0.0  ;;  %v3402_v60 = vadd.f32 %v3401_v0, %v10425_v28  ;;  %v3651_v49 = vadd.f32 %v3650_v23, %v10350_v62  ;;  %v2406_v42 = vadd.f32 %v10500_v11, %v10401_v52 }
 0x584   :  { %v7024_v34 = vmax.f32 %v7023_v63, %v5223_v61  ;;  %v5285_v54 = vmax.f32 %v3402_v60, 0.0  ;;  %v5286_v10 = vmax.f32 %v3651_v49, 0.0  ;;  %v3142_v40 = vpop.f32.mrf.mxu1  ;;  %v2577_v61 = vmax.f32 %v2408_v55, 0.0 }
 0x585   :  { %v3143_v31 = vadd.f32 %v3142_v40, %v10463_v25 }
 0x586   :  { %v6926_v19 = vmax.f32 %v6925_v45, %v5285_v54  ;;  %v6979_v27 = vmax.f32 %v6978_v30, %v5286_v10  ;;  %3443 = vmatmul.bf16.gmra.mxu2 %v10720_v36  ;;  %3692 = vmatmul.bf16.gmra.mxu3 %v10720_v36  ;;  %v2576_v54 = vmax.f32 %v2406_v42, 0.0 }
 0x587   :  { %v5252_v15 = vmax.f32 %v3143_v31, 0.0  ;;  %v3882_v51 = vpop.f32.mrf.mxu0 }
 0x588   :  { %v3883_v44 = vadd.f32 %v3882_v51, %v10492_v35 }
 0x589   :  { %v6869_v39 = vmax.f32 %v6868_v13, %v5252_v15  ;;  %v3404_v4 = vpop.f32.mrf.mxu2  ;;  %v3653_v17 = vpop.f32.mrf.mxu3  ;;  %v10738_v15 = vpack.c.bf16 %v2577_v61, %v2576_v54  ;;  %v2411_v61 = vadd.f32 %v10500_v11, %v10420_v41 }
 0x58a   :  { %v5231_v46 = vmax.f32 %v3883_v44, 0.0  ;;  %v3405_v63 = vadd.f32 %v3404_v4, %v10425_v28  ;;  %v3654_v53 = vadd.f32 %v3653_v17, %v10350_v62  ;;  %3921 = vmatmul.bf16.gmra.mxu0 %v10621_v38 }
 0x58c   :  { %v7025_v45 = vmax.f32 %v7024_v34, %v5231_v46  ;;  %v5293_v30 = vmax.f32 %v3405_v63, 0.0  ;;  %v5294_v59 = vmax.f32 %v3654_v53, 0.0  ;;  %v3145_v16 = vpop.f32.mrf.mxu1 }
 0x58d   :  { %v3146_v14 = vadd.f32 %v3145_v16, %v10463_v25 }
 0x58e   :  { %v6927_v13 = vmax.f32 %v6926_v19, %v5293_v30  ;;  %v6980_v0 = vmax.f32 %v6979_v27, %v5294_v59 }
 0x58f   :  { %v5260_v23 = vmax.f32 %v3146_v14, 0.0  ;;  %3184 = vmatmul.bf16.gmra.mxu1 %v10673_v24  ;;  %v3884_v9 = vpop.f32.mrf.mxu0  ;;  %v2413_v14 = vadd.f32 %v10500_v11, %v10439_v32 }
 0x590   :  { %v3885_v60 = vadd.f32 %v3884_v9, %v10492_v35 }
 0x591   :  { %v6870_v49 = vmax.f32 %v6869_v39, %v5260_v23  ;;  %v3406_v57 = vpop.f32.mrf.mxu2  ;;  %v3655_v34 = vpop.f32.mrf.mxu3  ;;  %v2579_v54 = vmax.f32 %v2413_v14, 0.0  ;;  %v7964_v14 = vld [vmem:[%s11926_s5 + $0xd8] sm:$0xf] }
 0x592   :  { %v5239_v10 = vmax.f32 %v3885_v60, 0.0  ;;  %v3407_v40 = vadd.f32 %v3406_v57, %v10425_v28  ;;  %v3656_v31 = vadd.f32 %v3655_v34, %v10350_v62 }
 0x594   :  { %v7026_v52 = vmax.f32 %v7025_v45, %v5239_v10  ;;  %v5301_v19 = vmax.f32 %v3407_v40, 0.0  ;;  %v5302_v27 = vmax.f32 %v3656_v31, 0.0  ;;  %v3147_v51 = vpop.f32.mrf.mxu1 }
 0x595   :  { %v3148_v44 = vadd.f32 %v3147_v51, %v10463_v25 }
 0x596   :  { %v6928_v4 = vmax.f32 %v6927_v13, %v5301_v19  ;;  %v6981_v17 = vmax.f32 %v6980_v0, %v5302_v27  ;;  %3448 = vmatmul.bf16.gmra.mxu2 %v10738_v15  ;;  %3697 = vmatmul.bf16.gmra.mxu3 %v10738_v15 }
 0x597   :  { %v5268_v39 = vmax.f32 %v3148_v44, 0.0  ;;  %v3887_v46 = vpop.f32.mrf.mxu0 }
 0x598   :  { %v3888_v63 = vadd.f32 %v3887_v46, %v10492_v35 }
 0x599   :  { %v6871_v53 = vmax.f32 %v6870_v49, %v5268_v39  ;;  %v3409_v55 = vpop.f32.mrf.mxu2  ;;  %v3658_v30 = vpop.f32.mrf.mxu3 }
 0x59a   :  { %v5247_v59 = vmax.f32 %v3888_v63, 0.0  ;;  %v3410_v45 = vadd.f32 %v3409_v55, %v10425_v28  ;;  %v3659_v16 = vadd.f32 %v3658_v30, %v10350_v62  ;;  %3926 = vmatmul.bf16.gmra.mxu0 %v10645_v12 }
 0x59c   :  { %v7027_v42 = vmax.f32 %v7026_v52, %v5247_v59  ;;  %v5309_v13 = vmax.f32 %v3410_v45, 0.0  ;;  %v5310_v0 = vmax.f32 %v3659_v16, 0.0  ;;  %v3150_v23 = vpop.f32.mrf.mxu1  ;;  %v2578_v52 = vmax.f32 %v2411_v61, 0.0 }
 0x59d   :  { %v3151_v9 = vadd.f32 %v3150_v23, %v10463_v25 }
 0x59e   :  { %v6929_v60 = vmax.f32 %v6928_v4, %v5309_v13  ;;  %v6982_v49 = vmax.f32 %v6981_v17, %v5310_v0  ;;  %v10756_v44 = vpack.c.bf16 %v2579_v54, %v2578_v52 }
 0x59f   :  { %v5276_v57 = vmax.f32 %v3151_v9, 0.0  ;;  %3189 = vmatmul.bf16.gmra.mxu1 %v10702_v5  ;;  %v3889_v34 = vpop.f32.mrf.mxu0 }
 0x5a0   :  { %v3890_v10 = vadd.f32 %v3889_v34, %v10492_v35 }
 0x5a1   :  { %v6872_v40 = vmax.f32 %v6871_v53, %v5276_v57  ;;  %v3411_v32 = vpop.f32.mrf.mxu2  ;;  %v3660_v31 = vpop.f32.mrf.mxu3 }
 0x5a2   :  { %v5255_v19 = vmax.f32 %v3890_v10, 0.0  ;;  %v3412_v27 = vadd.f32 %v3411_v32, %v10425_v28  ;;  %v3661_v51 = vadd.f32 %v3660_v31, %v10350_v62 }
 0x5a4   :  { %v7028_v41 = vmax.f32 %v7027_v42, %v5255_v19  ;;  %v5317_v11 = vmax.f32 %v3412_v27, 0.0  ;;  %v5318_v4 = vmax.f32 %v3661_v51, 0.0  ;;  %v3152_v17 = vpop.f32.mrf.mxu1  ;;  %v8133_v42 = vld [vmem:[%s11926_s5 + $0xf4] sm:$0xf0] }
 0x5a5   :  { %v3153_v39 = vadd.f32 %v3152_v17, %v10463_v25  ;;  %v7965_v9 = vor.u32 %v8133_v42, %v7964_v14 }
 0x5a6   :  { %v6930_v46 = vmax.f32 %v6929_v60, %v5317_v11  ;;  %v6983_v63 = vmax.f32 %v6982_v49, %v5318_v4  ;;  %3453 = vmatmul.bf16.gmra.mxu2 %v10756_v44  ;;  %3702 = vmatmul.bf16.gmra.mxu3 %v10756_v44 }
 0x5a7   :  { %v5284_v53 = vmax.f32 %v3153_v39, 0.0  ;;  %v3892_v55 = vpop.f32.mrf.mxu0  ;;  %4574 = vmatpush.bf16.msra.mxu3 %v7965_v9  ;;  %v10786_v9 = vld [vmem:[%s11925_s4] ss:$0 sm:$0xff] }
 0x5a8   :  { %v3893_v30 = vadd.f32 %v3892_v55, %v10492_v35 }
 0x5a9   :  { %v6873_v59 = vmax.f32 %v6872_v40, %v5284_v53  ;;  %v3414_v45 = vpop.f32.mrf.mxu2  ;;  %v3663_v16 = vpop.f32.mrf.mxu3 }
 0x5aa   :  { %v5263_v13 = vmax.f32 %v3893_v30, 0.0  ;;  %v3415_v0 = vadd.f32 %v3414_v45, %v10425_v28  ;;  %v3664_v23 = vadd.f32 %v3663_v16, %v10350_v62  ;;  %3931 = vmatmul.bf16.gmra.mxu0 %v10673_v24 }
 0x5ac   :  { %v7029_v61 = vmax.f32 %v7028_v41, %v5263_v13  ;;  %v5325_v60 = vmax.f32 %v3415_v0, 0.0  ;;  %v5326_v49 = vmax.f32 %v3664_v23, 0.0  ;;  %v3155_v57 = vpop.f32.mrf.mxu1 }
 0x5ad   :  { %v3156_v34 = vadd.f32 %v3155_v57, %v10463_v25 }
 0x5ae   :  { %v6931_v54 = vmax.f32 %v6930_v46, %v5325_v60  ;;  %v6984_v10 = vmax.f32 %v6983_v63, %v5326_v49 }
 0x5af   :  { %v5292_v40 = vmax.f32 %v3156_v34, 0.0  ;;  %3194 = vmatmul.bf16.gmra.mxu1 %v10720_v36  ;;  %v3894_v32 = vpop.f32.mrf.mxu0 }
 0x5b0   :  { %v3895_v31 = vadd.f32 %v3894_v32, %v10492_v35 }
 0x5b1   :  { %v6874_v52 = vmax.f32 %v6873_v59, %v5292_v40  ;;  %v3416_v19 = vpop.f32.mrf.mxu2  ;;  %v3665_v27 = vpop.f32.mrf.mxu3 }
 0x5b2   :  { %v5271_v51 = vmax.f32 %v3895_v31, 0.0  ;;  %v3417_v41 = vadd.f32 %v3416_v19, %v10425_v28  ;;  %v3666_v11 = vadd.f32 %v3665_v27, %v10350_v62 }
 0x5b4   :  { %v7030_v4 = vmax.f32 %v7029_v61, %v5271_v51  ;;  %v5333_v17 = vmax.f32 %v3417_v41, 0.0  ;;  %v5334_v39 = vmax.f32 %v3666_v11, 0.0  ;;  %v3157_v53 = vpop.f32.mrf.mxu1  ;;  %v2423_v61 = vadd.f32 %v10786_v9, %v9998_v48 }
 0x5b5   :  { %v3158_v46 = vadd.f32 %v3157_v53, %v10463_v25 }
 0x5b6   :  { %v6932_v63 = vmax.f32 %v6931_v54, %v5333_v17  ;;  %v6985_v55 = vmax.f32 %v6984_v10, %v5334_v39  ;;  %3458 = vmatmul.bf16.gmra.mxu2 %v10457_v7  ;;  %3707 = vmatmul.bf16.gmra.mxu3 %v10457_v7  ;;  %v2421_v10 = vadd.f32 %v10786_v9, %v9986_v33  ;;  %v2583_v19 = vmax.f32 %v2423_v61, 0.0 }
 0x5b7   :  { %v5300_v30 = vmax.f32 %v3158_v46, 0.0  ;;  %v3897_v59 = vpop.f32.mrf.mxu0 }
 0x5b8   :  { %v3898_v45 = vadd.f32 %v3897_v59, %v10492_v35  ;;  %v2582_v11 = vmax.f32 %v2421_v10, 0.0  ;;  %v8128_v59 = vld [vmem:[%s11926_s5 + $0xd4] sm:$0xf] }
 0x5b9   :  { %v6875_v16 = vmax.f32 %v6874_v52, %v5300_v30  ;;  %v3419_v14 = vpop.f32.mrf.mxu2  ;;  %v3668_v42 = vpop.f32.mrf.mxu3 }
 0x5ba   :  { %v5279_v13 = vmax.f32 %v3898_v45, 0.0  ;;  %v3420_v0 = vadd.f32 %v3419_v14, %v10425_v28  ;;  %v3669_v23 = vadd.f32 %v3668_v42, %v10350_v62  ;;  %3936 = vmatmul.bf16.gmra.mxu0 %v10702_v5  ;;  %v10797_v53 = vpack.c.bf16 %v2583_v19, %v2582_v11  ;;  %v7958_v45 = vld [vmem:[%s11926_s5 + $0xf0] sm:$0xf0] }
 0x5bb   :  { %v2428_v19 = vadd.f32 %v10786_v9, %v10046_v47 }
 0x5bc   :  { %v7031_v60 = vmax.f32 %v7030_v4, %v5279_v13  ;;  %v5341_v49 = vmax.f32 %v3420_v0, 0.0  ;;  %v5342_v57 = vmax.f32 %v3669_v23, 0.0  ;;  %v3160_v34 = vpop.f32.mrf.mxu1  ;;  %v7961_v13 = vor.u32 %v8128_v59, %v7958_v45  ;;  %v8132_v0 = vld [vmem:[%s11926_s5 + $0xec] sm:$0xf0] }
 0x5bd   :  { %v3161_v54 = vadd.f32 %v3160_v34, %v10463_v25  ;;  %v2585_v59 = vmax.f32 %v2428_v19, 0.0 }
 0x5be   :  { %v6933_v40 = vmax.f32 %v6932_v63, %v5341_v49  ;;  %v6986_v32 = vmax.f32 %v6985_v55, %v5342_v57  ;;  %4325 = vmatpush.bf16.msra.mxu2 %v7961_v13 }
 0x5bf   :  { %v5308_v31 = vmax.f32 %v3161_v54, 0.0  ;;  %3199 = vmatmul.bf16.gmra.mxu1 %v10738_v15  ;;  %v3899_v52 = vpop.f32.mrf.mxu0 }
 0x5c0   :  { %v3900_v27 = vadd.f32 %v3899_v52, %v10492_v35 }
 0x5c1   :  { %v6876_v51 = vmax.f32 %v6875_v16, %v5308_v31  ;;  %v3421_v48 = vpop.f32.mrf.mxu2  ;;  %v3670_v41 = vpop.f32.mrf.mxu3  ;;  %v7956_v16 = vld [vmem:[%s11926_s5 + $0xd0] sm:$0xf] }
 0x5c2   :  { %v5287_v4 = vmax.f32 %v3900_v27, 0.0  ;;  %v3422_v17 = vadd.f32 %v3421_v48, %v10425_v28  ;;  %v3671_v39 = vadd.f32 %v3670_v41, %v10350_v62  ;;  %v7957_v49 = vor.u32 %v8132_v0, %v7956_v16 }
 0x5c4   :  { %v7032_v33 = vmax.f32 %v7031_v60, %v5287_v4  ;;  %v5349_v46 = vmax.f32 %v3422_v17, 0.0  ;;  %v5350_v63 = vmax.f32 %v3671_v39, 0.0  ;;  %v3162_v55 = vpop.f32.mrf.mxu1  ;;  %v5837_v60 = vlaneseq  ;;  %4076 = vmatpush.bf16.msra.mxu1 %v7957_v49  ;;  %v7966_v4 = vld [vmem:[%s11926_s5 + $0xf8] sm:$0xf0] }
 0x5c5   :  { %v3163_v30 = vadd.f32 %v3162_v55, %v10463_v25 }
 0x5c6   :  { %v6934_v14 = vmax.f32 %v6933_v40, %v5349_v46  ;;  %v6987_v42 = vmax.f32 %v6986_v32, %v5350_v63  ;;  %3463 = vmatmul.bf16.gmra.mxu2 %v10797_v53  ;;  %3712 = vmatmul.bf16.gmra.mxu3 %v10797_v53  ;;  %v5838_v52 = vshrl.u32 %v5837_v60, 7  ;;  %v2426_v46 = vadd.f32 %v10786_v9, %v10026_v29 }
 0x5c7   :  { %v5316_v23 = vmax.f32 %v3163_v30, 0.0  ;;  %v3902_v61 = vpop.f32.mrf.mxu0 }
 0x5c8   :  { %v3903_v57 = vadd.f32 %v3902_v61, %v10492_v35  ;;  %v10832_v30 = vadd.s32 296, %v5838_v52 }
 0x5c9   :  { %v6877_v34 = vmax.f32 %v6876_v51, %v5316_v23  ;;  %v3424_v54 = vpop.f32.mrf.mxu2  ;;  %v3673_v10 = vpop.f32.mrf.mxu3  ;;  %v8129_v51 = vld [vmem:[%s11926_s5 + $0xdc] sm:$0xf]  ;;  %v2584_v23 = vmax.f32 %v2426_v46, 0.0 }
 0x5ca   :  { %v5295_v40 = vmax.f32 %v3903_v57, 0.0  ;;  %v3425_v32 = vadd.f32 %v3424_v54, %v10425_v28  ;;  %v3674_v31 = vadd.f32 %v3673_v10, %v10350_v62  ;;  %3941 = vmatmul.bf16.gmra.mxu0 %v10720_v36  ;;  %v10827_v39 = vor.u32 %v8129_v51, %v7966_v4 }
 0x5cb   :  { %vm5972_vm1 = vcmp.lt.s32.totalorder %v10832_v30, 300  ;;  %v2433_v4 = vadd.f32 %v10786_v9, %v10110_v1 }
 0x5cc   :  { %v7033_v27 = vmax.f32 %v7032_v33, %v5295_v40  ;;  %v5357_v48 = vmax.f32 %v3425_v32, 0.0  ;;  %v5358_v41 = vmax.f32 %v3674_v31, 0.0  ;;  %v3165_v11 = vpop.f32.mrf.mxu1  ;;  %4823 = vmatpush.bf16.msra.mxu0 %v10827_v39 }
 0x5cd   :  { %v3166_v17 = vadd.f32 %v3165_v11, %v10463_v25 }
 0x5ce   :  { %v6935_v47 = vmax.f32 %v6934_v14, %v5357_v48  ;;  %v6988_v33 = vmax.f32 %v6987_v42, %v5358_v41  ;;  %v10839_v42 = vpack.c.bf16 %v2585_v59, %v2584_v23  ;;  %v2587_v59 = vmax.f32 %v2433_v4, 0.0 }
 0x5cf   :  { %v5324_v63 = vmax.f32 %v3166_v17, 0.0  ;;  %3204 = vmatmul.bf16.gmra.mxu1 %v10756_v44  ;;  %v3904_v55 = vpop.f32.mrf.mxu0 }
 0x5d0   :  { %v3905_v45 = vadd.f32 %v3904_v55, %v10492_v35 }
 0x5d1   :  { %v6878_v16 = vmax.f32 %v6877_v34, %v5324_v63  ;;  %v3426_v13 = vpop.f32.mrf.mxu2  ;;  %v3675_v0 = vpop.f32.mrf.mxu3 }
 0x5d2   :  { %v5303_v61 = vmax.f32 %v3905_v45, 0.0  ;;  %v3427_v29 = vadd.f32 %v3426_v13, %v10425_v28  ;;  %v3676_v14 = vadd.f32 %v3675_v0, %v10350_v62 }
 0x5d4   :  { %v7034_v60 = vmax.f32 %v7033_v27, %v5303_v61  ;;  %v5365_v49 = vmax.f32 %v3427_v29, 0.0  ;;  %v5366_v57 = vmax.f32 %v3676_v14, 0.0  ;;  %v3167_v54 = vpop.f32.mrf.mxu1 }
 0x5d5   :  { %v3168_v10 = vadd.f32 %v3167_v54, %v10463_v25 }
 0x5d6   :  { %v6376_v34 = vsel %vm5972_vm1, %v5365_v49, -inf  ;;  %v6377_v40 = vsel %vm5972_vm1, %v5366_v57, -inf  ;;  %3468 = vmatmul.bf16.gmra.mxu2 %v10839_v42  ;;  %3717 = vmatmul.bf16.gmra.mxu3 %v10839_v42 }
 0x5d7   :  { %v6936_v32 = vmax.f32 %v6935_v47, %v6376_v34  ;;  %v10848_v31 = vmax.f32 %v6988_v33, %v6377_v40  ;;  %v5332_v52 = vmax.f32 %v3168_v10, 0.0  ;;  %v3907_v19 = vpop.f32.mrf.mxu0  ;;  %v2431_v47 = vadd.f32 %v10786_v9, %v10077_v21 }
 0x5d8   :  { %v3908_v27 = vadd.f32 %v3907_v19, %v10492_v35 }
 0x5d9   :  { %v6879_v48 = vmax.f32 %v6878_v16, %v5332_v52  ;;  %v3429_v41 = vpop.f32.mrf.mxu2  ;;  %v3678_v11 = vpop.f32.mrf.mxu3  ;;  %v2586_v23 = vmax.f32 %v2431_v47, 0.0  ;;  %v2438_v52 = vadd.f32 %v10786_v9, %v10161_v26 }
 0x5da   :  { %v5311_v51 = vmax.f32 %v3908_v27, 0.0  ;;  %3946 = vmatmul.bf16.gmra.mxu0 %v10738_v15  ;;  %v2436_v41 = vadd.f32 %v10786_v9, %v10137_v50  ;;  %v6947_v11 = vrot.slane %v6936_v32, 4 }
 0x5db   :  { %v10859_v1 = vpack.c.bf16 %v2587_v59, %v2586_v23 }
 0x5dc   :  { %v7035_v17 = vmax.f32 %v7034_v60, %v5311_v51  ;;  %v3170_v46 = vpop.f32.mrf.mxu1  ;;  %v6948_v26 = vmax.f32 %v6936_v32, %v6947_v11 }
 0x5dd   :  { %v3171_v63 = vadd.f32 %v3170_v46, %v10463_v25 }
 0x5df   :  { %v5340_v33 = vmax.f32 %v3171_v63, 0.0  ;;  %3209 = vmatmul.bf16.gmra.mxu1 %v10457_v7  ;;  %v3909_v55 = vpop.f32.mrf.mxu0 }
 0x5e0   :  { %v3910_v45 = vadd.f32 %v3909_v55, %v10492_v35  ;;  %v2588_v55 = vmax.f32 %v2436_v41, 0.0 }
 0x5e1   :  { %v6880_v16 = vmax.f32 %v6879_v48, %v5340_v33  ;;  %v3431_v13 = vpop.f32.mrf.mxu2  ;;  %v3680_v0 = vpop.f32.mrf.mxu3 }
 0x5e2   :  { %v5319_v61 = vmax.f32 %v3910_v45, 0.0  ;;  %v6949_v0 = vrot.slane %v6948_v26, 2 }
 0x5e4   :  { %v7036_v29 = vmax.f32 %v7035_v17, %v5319_v61  ;;  %v3172_v14 = vpop.f32.mrf.mxu1  ;;  %v2589_v17 = vmax.f32 %v2438_v52, 0.0 }
 0x5e5   :  { %v3173_v60 = vadd.f32 %v3172_v14, %v10463_v25 }
 0x5e6   :  { %3473 = vmatmul.bf16.gmra.mxu2 %v10859_v1  ;;  %3722 = vmatmul.bf16.gmra.mxu3 %v10859_v1  ;;  %v10873_v45 = vpack.c.bf16 %v2589_v17, %v2588_v55 }
 0x5e7   :  { %v5348_v21 = vmax.f32 %v3173_v60, 0.0  ;;  %v3912_v49 = vpop.f32.mrf.mxu0 }
 0x5e8   :  { %v3913_v57 = vadd.f32 %v3912_v49, %v10492_v35 }
 0x5e9   :  { %v6881_v54 = vmax.f32 %v6880_v16, %v5348_v21  ;;  %v3434_v10 = vpop.f32.mrf.mxu2  ;;  %v3683_v34 = vpop.f32.mrf.mxu3  ;;  %v6950_v21 = vmax.f32 %v6948_v26, %v6949_v0  ;;  %v7932_v0 = vld [vmem:[%s11926_s5 + $0x98] sm:$0xf] }
 0x5ea   :  { %v5327_v40 = vmax.f32 %v3913_v57, 0.0  ;;  %3951 = vmatmul.bf16.gmra.mxu0 %v10756_v44 }
 0x5ec   :  { %v7037_v19 = vmax.f32 %v7036_v29, %v5327_v40  ;;  %v3175_v27 = vpop.f32.mrf.mxu1 }
 0x5ed   :  { %v3176_v48 = vadd.f32 %v3175_v27, %v10463_v25 }
 0x5ef   :  { %v5356_v51 = vmax.f32 %v3176_v48, 0.0  ;;  %3214 = vmatmul.bf16.gmra.mxu1 %v10797_v53  ;;  %v3914_v4 = vpop.f32.mrf.mxu0  ;;  %v6951_v48 = vrot.slane %v6950_v21, 1 }
 0x5f0   :  { %v3915_v46 = vadd.f32 %v3914_v4, %v10492_v35 }
 0x5f1   :  { %v6882_v63 = vmax.f32 %v6881_v54, %v5356_v51  ;;  %v3436_v47 = vpop.f32.mrf.mxu2  ;;  %v3685_v33 = vpop.f32.mrf.mxu3  ;;  %v12073_v54 = vld [vmem:[#allocation23_spill] sm:$0xff] }
 0x5f2   :  { %v5335_v59 = vmax.f32 %v3915_v46, 0.0  ;;  %v2443_v10 = vadd.f32 %v10786_v9, %v12073_v54  ;;  %v6952_v33 = vmax.f32 %v6950_v21, %v6951_v48 }
 0x5f4   :  { %v7038_v16 = vmax.f32 %v7037_v19, %v5335_v59  ;;  %v3177_v13 = vpop.f32.mrf.mxu1  ;;  %v12074_v19 = vld [vmem:[#allocation20_spill] sm:$0xff]  ;;  %v2591_v51 = vmax.f32 %v2443_v10, 0.0  ;;  %v7000_v10 = vrot.slane %v10848_v31, 4 }
 0x5f5   :  { %v3178_v50 = vadd.f32 %v3177_v13, %v10463_v25  ;;  %v2441_v27 = vadd.f32 %v10786_v9, %v12074_v19 }
 0x5f6   :  { %3478 = vmatmul.bf16.gmra.mxu2 %v10873_v45  ;;  %3727 = vmatmul.bf16.gmra.mxu3 %v10873_v45 }
 0x5f7   :  { %v5364_v23 = vmax.f32 %v3178_v50, 0.0  ;;  %v3917_v61 = vpop.f32.mrf.mxu0  ;;  %v2590_v47 = vmax.f32 %v2441_v27, 0.0  ;;  %v12076_v27 = vld [vmem:[#allocation25_spill] sm:$0xff] }
 0x5f8   :  { %v3918_v29 = vadd.f32 %v3917_v61, %v10492_v35  ;;  %v7711_v61 = vrot.slane %v6952_v33, 6  ;;  %v2446_v48 = vadd.f32 %v10786_v9, %v12076_v27  ;;  %v7924_v27 = vld [vmem:[%s11926_s5 + $0x90] sm:$0xf] }
 0x5f9   :  { %v6375_v14 = vsel %vm5972_vm1, %v5364_v23, -inf  ;;  %v3439_v32 = vpop.f32.mrf.mxu2  ;;  %v3688_v60 = vpop.f32.mrf.mxu3  ;;  %v10888_v59 = vpack.c.bf16 %v2591_v51, %v2590_v47  ;;  %v8125_v23 = vld [vmem:[%s11926_s5 + $0xb4] sm:$0xf0] }
 0x5fa   :  { %v6883_v49 = vmax.f32 %v6882_v63, %v6375_v14  ;;  %v5343_v57 = vmax.f32 %v3918_v29, 0.0  ;;  %3956 = vmatmul.bf16.gmra.mxu0 %v10457_v7  ;;  %v7933_v14 = vor.u32 %v8125_v23, %v7932_v0 }
 0x5fc   :  { %v6894_v34 = vrot.slane %v6883_v49, 4  ;;  %v7039_v40 = vmax.f32 %v7038_v16, %v5343_v57  ;;  %v3180_v52 = vpop.f32.mrf.mxu1  ;;  %4575 = vmatpush.bf16.msra.mxu3 %v7933_v14 }
 0x5fe   :  { %v6895_v41 = vmax.f32 %v6883_v49, %v6894_v34  ;;  %v12075_v34 = vld [vmem:[#allocation29_spill] sm:$0xff] }
 0x5ff   :  { %3219 = vmatmul.bf16.gmra.mxu1 %v10839_v42  ;;  %v3919_v11 = vpop.f32.mrf.mxu0 }
 0x600   :  { %v6896_v4 = vrot.slane %v6895_v41, 2  ;;  %v3920_v17 = vadd.f32 %v3919_v11, %v10492_v35 }
 0x601   :  { %v3441_v46 = vpop.f32.mrf.mxu2  ;;  %v3690_v63 = vpop.f32.mrf.mxu3 }
 0x602   :  { %v6897_v55 = vmax.f32 %v6895_v41, %v6896_v4  ;;  %v5351_v26 = vmax.f32 %v3920_v17, 0.0  ;;  %v7001_v41 = vmax.f32 %v10848_v31, %v7000_v10  ;;  %v2592_v63 = vmax.f32 %v2446_v48, 0.0  ;;  %v8120_v31 = vld [vmem:[%s11926_s5 + $0x94] sm:$0xf]  ;;  %v8124_v48 = vld [vmem:[%s11926_s5 + $0xac] sm:$0xf0] }
 0x604   :  { %v6898_v16 = vrot.slane %v6897_v55, 1  ;;  %v7040_v13 = vmax.f32 %v7039_v40, %v5351_v26  ;;  %v3182_v50 = vpop.f32.mrf.mxu1  ;;  %v2448_v40 = vadd.f32 %v10786_v9, %v12075_v34  ;;  %v7002_v33 = vrot.slane %v7001_v41, 2 }
 0x605   :  { %v7926_v50 = vld [vmem:[%s11926_s5 + $0xb0] sm:$0xf0] }
 0x606   :  { %v6899_v29 = vmax.f32 %v6897_v55, %v6898_v16  ;;  %3483 = vmatmul.bf16.gmra.mxu2 %v10888_v59  ;;  %3732 = vmatmul.bf16.gmra.mxu3 %v10888_v59  ;;  %v2593_v51 = vmax.f32 %v2448_v40, 0.0  ;;  %v7003_v0 = vmax.f32 %v7001_v41, %v7002_v33 }
 0x607   :  { %v3922_v32 = vpop.f32.mrf.mxu0 }
 0x608   :  { %v10899_v60 = vsel %vm7723_vm2, %v6899_v29, %v7711_v61  ;;  %v3923_v21 = vadd.f32 %v3922_v32, %v10492_v35  ;;  %v10911_v55 = vpack.c.bf16 %v2593_v51, %v2592_v63  ;;  %v7929_v29 = vor.u32 %v8120_v31, %v7926_v50 }
 0x609   :  { %v3444_v49 = vpop.f32.mrf.mxu2  ;;  %v3693_v57 = vpop.f32.mrf.mxu3 }
 0x60a   :  { %v5359_v54 = vmax.f32 %v3923_v21, 0.0  ;;  %3961 = vmatmul.bf16.gmra.mxu0 %v10797_v53  ;;  %12077 = vst [vmem:[#allocation23_spill] sm:$0xff] %v10911_v55  ;;  %4326 = vmatpush.bf16.msra.mxu2 %v7929_v29  ;;  %v7004_v49 = vrot.slane %v7003_v0, 1 }
 0x60c   :  { %v7041_v52 = vmax.f32 %v7040_v13, %v5359_v54  ;;  %v3185_v19 = vpop.f32.mrf.mxu1  ;;  %v12078_v54 = vld [vmem:[#allocation34_spill] sm:$0xff]  ;;  %v7005_v41 = vmax.f32 %v7003_v0, %v7004_v49  ;;  %v12082_v49 = vld [vmem:[#allocation36_spill] sm:$0xff] }
 0x60d   :  { %v2453_v10 = vadd.f32 %v10786_v9, %v12078_v54  ;;  %v8121_v54 = vld [vmem:[%s11926_s5 + $0x9c] sm:$0xf] }
 0x60f   :  { %3224 = vmatmul.bf16.gmra.mxu1 %v10859_v1  ;;  %v3924_v11 = vpop.f32.mrf.mxu0 }
 0x610   :  { %v3925_v4 = vadd.f32 %v3924_v11, %v10492_v35 }
 0x611   :  { %v3446_v17 = vpop.f32.mrf.mxu2  ;;  %v3695_v46 = vpop.f32.mrf.mxu3 }
 0x612   :  { %v5367_v47 = vmax.f32 %v3925_v4, 0.0  ;;  %v7925_v4 = vor.u32 %v8124_v48, %v7924_v27  ;;  %v2595_v17 = vmax.f32 %v2453_v10, 0.0 }
 0x614   :  { %v6378_v26 = vsel %vm5972_vm1, %v5367_v47, -inf  ;;  %v3187_v16 = vpop.f32.mrf.mxu1  ;;  %4077 = vmatpush.bf16.msra.mxu1 %v7925_v4 }
 0x615   :  { %v7042_v13 = vmax.f32 %v7041_v52, %v6378_v26  ;;  %v12079_v52 = vld [vmem:[#allocation30_spill] sm:$0xff]  ;;  %v7712_v26 = vrot.slane %v7005_v41, 4 }
 0x616   :  { %3488 = vmatmul.bf16.gmra.mxu2 %v10911_v55  ;;  %3737 = vmatmul.bf16.gmra.mxu3 %v10911_v55  ;;  %v2451_v19 = vadd.f32 %v10786_v9, %v12079_v52 }
 0x617   :  { %v7053_v23 = vrot.slane %v7042_v13, 4  ;;  %v3927_v61 = vpop.f32.mrf.mxu0 }
 0x618   :  { %v2594_v33 = vmax.f32 %v2451_v19, 0.0 }
 0x619   :  { %v7054_v14 = vmax.f32 %v7042_v13, %v7053_v23  ;;  %v3449_v32 = vpop.f32.mrf.mxu2  ;;  %v3698_v21 = vpop.f32.mrf.mxu3 }
 0x61a   :  { %3966 = vmatmul.bf16.gmra.mxu0 %v10839_v42  ;;  %v10935_v13 = vpack.c.bf16 %v2595_v17, %v2594_v33 }
 0x61b   :  { %v7055_v57 = vrot.slane %v7054_v14, 2 }
 0x61c   :  { %v3190_v34 = vpop.f32.mrf.mxu1  ;;  %12080 = vst [vmem:[#allocation20_spill] sm:$0xff] %v10935_v13 }
 0x61d   :  { %v7056_v40 = vmax.f32 %v7054_v14, %v7055_v57  ;;  %v12081_v14 = vld [vmem:[#allocation40_spill] sm:$0xff]  ;;  %v2456_v57 = vadd.f32 %v10786_v9, %v12082_v49 }
 0x61e   :  { %v2458_v32 = vadd.f32 %v10786_v9, %v12081_v14  ;;  %v12084_v14 = vld [vmem:[#allocation44_spill] sm:$0xff] }
 0x61f   :  { %v7057_v11 = vrot.slane %v7056_v40, 1  ;;  %3229 = vmatmul.bf16.gmra.mxu1 %v10873_v45  ;;  %v3929_v51 = vpop.f32.mrf.mxu0  ;;  %v2596_v27 = vmax.f32 %v2456_v57, 0.0 }
 0x620   :  { %v2597_v10 = vmax.f32 %v2458_v32, 0.0  ;;  %v2463_v32 = vadd.f32 %v10786_v9, %v12084_v14 }
 0x621   :  { %v7058_v46 = vmax.f32 %v7056_v40, %v7057_v11  ;;  %v3451_v63 = vpop.f32.mrf.mxu2  ;;  %v3700_v47 = vpop.f32.mrf.mxu3 }
 0x622   :  { %v10963_v4 = vpack.c.bf16 %v2597_v10, %v2596_v27 }
 0x623   :  { %v7713_v16 = vrot.slane %v7058_v46, 2 }
 0x624   :  { %v3192_v31 = vpop.f32.mrf.mxu1  ;;  %12083 = vst [vmem:[#allocation29_spill] sm:$0xff] %v10963_v4 }
 0x625   :  { %v7726_v50 = vsel %vm7725_vm3, %v7712_v26, %v7713_v16 }
 0x626   :  { %3493 = vmatmul.bf16.gmra.mxu2 %v10935_v13  ;;  %3742 = vmatmul.bf16.gmra.mxu3 %v10935_v13  ;;  %v10942_v0 = vsel %vm7727_vm4, %v10899_v60, %v7726_v50  ;;  %v7934_v60 = vld [vmem:[%s11926_s5 + $0xb8] sm:$0xf0] }
 0x627   :  { %v3932_v23 = vpop.f32.mrf.mxu0  ;;  %v10956_v40 = vor.u32 %v8121_v54, %v7934_v60  ;;  %v12085_v54 = vld [vmem:[#allocation42_spill] sm:$0xff] }
 0x628   :  { %v2461_v60 = vadd.f32 %v10786_v9, %v12085_v54 }
 0x629   :  { %v3454_v61 = vpop.f32.mrf.mxu2  ;;  %v3703_v29 = vpop.f32.mrf.mxu3  ;;  %4824 = vmatpush.bf16.msra.mxu0 %v10956_v40 }
 0x62a   :  { %3971 = vmatmul.bf16.gmra.mxu0 %v10859_v1  ;;  %v3455_v52 = vadd.f32 %v3454_v61, %v10425_v28  ;;  %v3704_v19 = vadd.f32 %v3703_v29, %v10350_v62 }
 0x62c   :  { %v3195_v21 = vpop.f32.mrf.mxu1  ;;  %v5453_v17 = vmax.f32 %v3455_v52, 0.0  ;;  %v5454_v46 = vmax.f32 %v3704_v19, 0.0  ;;  %v2599_v19 = vmax.f32 %v2463_v32, 0.0 }
 0x62f   :  { %3234 = vmatmul.bf16.gmra.mxu1 %v10888_v59  ;;  %v3934_v34 = vpop.f32.mrf.mxu0 }
 0x631   :  { %v3456_v48 = vpop.f32.mrf.mxu2  ;;  %v3705_v41 = vpop.f32.mrf.mxu3 }
 0x632   :  { %v3457_v11 = vadd.f32 %v3456_v48, %v10425_v28  ;;  %v3706_v51 = vadd.f32 %v3705_v41, %v10350_v62  ;;  %v2598_v41 = vmax.f32 %v2461_v60, 0.0 }
 0x634   :  { %v5461_v63 = vmax.f32 %v3457_v11, 0.0  ;;  %v5462_v47 = vmax.f32 %v3706_v51, 0.0  ;;  %v3197_v33 = vpop.f32.mrf.mxu1 }
 0x636   :  { %v7324_v26 = vmax.f32 %v5453_v17, %v5461_v63  ;;  %v7377_v16 = vmax.f32 %v5454_v46, %v5462_v47  ;;  %3498 = vmatmul.bf16.gmra.mxu2 %v10963_v4  ;;  %3747 = vmatmul.bf16.gmra.mxu3 %v10963_v4  ;;  %v10977_v17 = vpack.c.bf16 %v2599_v19, %v2598_v41 }
 0x637   :  { %v3937_v31 = vpop.f32.mrf.mxu0 }
 0x638   :  { %12086 = vst [vmem:[#allocation25_spill] sm:$0xff] %v10977_v17 }
 0x639   :  { %v3459_v50 = vpop.f32.mrf.mxu2  ;;  %v3708_v23 = vpop.f32.mrf.mxu3 }
 0x63a   :  { %v3460_v61 = vadd.f32 %v3459_v50, %v10425_v28  ;;  %v3709_v29 = vadd.f32 %v3708_v23, %v10350_v62  ;;  %3976 = vmatmul.bf16.gmra.mxu0 %v10873_v45 }
 0x63c   :  { %v5469_v21 = vmax.f32 %v3460_v61, 0.0  ;;  %v5470_v49 = vmax.f32 %v3709_v29, 0.0  ;;  %v3200_v57 = vpop.f32.mrf.mxu1  ;;  %v12087_v29 = vld [vmem:[#allocation46_spill] sm:$0xff] }
 0x63d   :  { %v2468_v14 = vadd.f32 %v10786_v9, %v12087_v29  ;;  %v12088_v57 = vld [vmem:[#allocation45_spill] sm:$0xff] }
 0x63e   :  { %v7325_v10 = vmax.f32 %v7324_v26, %v5469_v21  ;;  %v7378_v34 = vmax.f32 %v7377_v16, %v5470_v49  ;;  %v2466_v54 = vadd.f32 %v10786_v9, %v12088_v57  ;;  %v12090_v57 = vld [vmem:[#allocation48_spill] sm:$0xff] }
 0x63f   :  { %3239 = vmatmul.bf16.gmra.mxu1 %v10911_v55  ;;  %v3939_v52 = vpop.f32.mrf.mxu0 }
 0x640   :  { %v2601_v52 = vmax.f32 %v2468_v14, 0.0 }
 0x641   :  { %v3461_v27 = vpop.f32.mrf.mxu2  ;;  %v3710_v48 = vpop.f32.mrf.mxu3 }
 0x642   :  { %v3462_v11 = vadd.f32 %v3461_v27, %v10425_v28  ;;  %v3711_v51 = vadd.f32 %v3710_v48, %v10350_v62  ;;  %v2600_v48 = vmax.f32 %v2466_v54, 0.0  ;;  %v2473_v54 = vadd.f32 %v10786_v9, %v12090_v57 }
 0x644   :  { %v5477_v46 = vmax.f32 %v3462_v11, 0.0  ;;  %v5478_v63 = vmax.f32 %v3711_v51, 0.0  ;;  %v3202_v47 = vpop.f32.mrf.mxu1 }
 0x646   :  { %v7326_v33 = vmax.f32 %v7325_v10, %v5477_v46  ;;  %v7379_v31 = vmax.f32 %v7378_v34, %v5478_v63  ;;  %3503 = vmatmul.bf16.gmra.mxu2 %v10977_v17  ;;  %3752 = vmatmul.bf16.gmra.mxu3 %v10977_v17  ;;  %v10992_v46 = vpack.c.bf16 %v2601_v52, %v2600_v48 }
 0x647   :  { %v3942_v26 = vpop.f32.mrf.mxu0 }
 0x648   :  { %12089 = vst [vmem:[#allocation34_spill] sm:$0xff] %v10992_v46 }
 0x649   :  { %v3464_v16 = vpop.f32.mrf.mxu2  ;;  %v3713_v50 = vpop.f32.mrf.mxu3 }
 0x64a   :  { %v3465_v23 = vadd.f32 %v3464_v16, %v10425_v28  ;;  %v3714_v61 = vadd.f32 %v3713_v50, %v10350_v62  ;;  %3981 = vmatmul.bf16.gmra.mxu0 %v10888_v59 }
 0x64c   :  { %v5485_v32 = vmax.f32 %v3465_v23, 0.0  ;;  %v5486_v21 = vmax.f32 %v3714_v61, 0.0  ;;  %v3205_v49 = vpop.f32.mrf.mxu1 }
 0x64d   :  { %v3206_v51 = vadd.f32 %v3205_v49, %v10463_v25 }
 0x64e   :  { %v7327_v60 = vmax.f32 %v7326_v33, %v5485_v32  ;;  %v7380_v10 = vmax.f32 %v7379_v31, %v5486_v21 }
 0x64f   :  { %3244 = vmatmul.bf16.gmra.mxu1 %v10935_v13  ;;  %v3944_v34 = vpop.f32.mrf.mxu0  ;;  %v5452_v50 = vmax.f32 %v3206_v51, 0.0 }
 0x651   :  { %v3466_v19 = vpop.f32.mrf.mxu2  ;;  %v3715_v27 = vpop.f32.mrf.mxu3 }
 0x652   :  { %v3467_v41 = vadd.f32 %v3466_v19, %v10425_v28  ;;  %v3716_v11 = vadd.f32 %v3715_v27, %v10350_v62  ;;  %v12091_v19 = vld [vmem:[#allocation47_spill] sm:$0xff] }
 0x653   :  { %v2471_v27 = vadd.f32 %v10786_v9, %v12091_v19  ;;  %v8117_v19 = vld [vmem:[%s11926_s5 + $0x74] sm:$0xf0] }
 0x654   :  { %v5493_v63 = vmax.f32 %v3467_v41, 0.0  ;;  %v5494_v47 = vmax.f32 %v3716_v11, 0.0  ;;  %v3207_v26 = vpop.f32.mrf.mxu1 }
 0x655   :  { %v3208_v33 = vadd.f32 %v3207_v26, %v10463_v25 }
 0x656   :  { %v7328_v31 = vmax.f32 %v7327_v60, %v5493_v63  ;;  %v7381_v16 = vmax.f32 %v7380_v10, %v5494_v47  ;;  %3508 = vmatmul.bf16.gmra.mxu2 %v10992_v46  ;;  %3757 = vmatmul.bf16.gmra.mxu3 %v10992_v46  ;;  %v2603_v63 = vmax.f32 %v2473_v54, 0.0 }
 0x657   :  { %v5460_v23 = vmax.f32 %v3208_v33, 0.0  ;;  %v3947_v61 = vpop.f32.mrf.mxu0 }
 0x659   :  { %v7271_v29 = vmax.f32 %v5452_v50, %v5460_v23  ;;  %v3469_v14 = vpop.f32.mrf.mxu2  ;;  %v3718_v32 = vpop.f32.mrf.mxu3  ;;  %v2602_v50 = vmax.f32 %v2471_v27, 0.0 }
 0x65a   :  { %v3470_v21 = vadd.f32 %v3469_v14, %v10425_v28  ;;  %v3719_v49 = vadd.f32 %v3718_v32, %v10350_v62  ;;  %3986 = vmatmul.bf16.gmra.mxu0 %v10911_v55 }
 0x65b   :  { %v11008_v14 = vpack.c.bf16 %v2603_v63, %v2602_v50 }
 0x65c   :  { %v5501_v60 = vmax.f32 %v3470_v21, 0.0  ;;  %v5502_v10 = vmax.f32 %v3719_v49, 0.0  ;;  %v3210_v34 = vpop.f32.mrf.mxu1 }
 0x65d   :  { %v3211_v52 = vadd.f32 %v3210_v34, %v10463_v25  ;;  %12092 = vst [vmem:[#allocation30_spill] sm:$0xff] %v11008_v14 }
 0x65e   :  { %v7329_v48 = vmax.f32 %v7328_v31, %v5501_v60  ;;  %v7382_v41 = vmax.f32 %v7381_v16, %v5502_v10 }
 0x65f   :  { %v5468_v11 = vmax.f32 %v3211_v52, 0.0  ;;  %3249 = vmatmul.bf16.gmra.mxu1 %v10963_v4  ;;  %v3949_v51 = vpop.f32.mrf.mxu0  ;;  %v7900_v52 = vld [vmem:[%s11926_s5 + $0x58] sm:$0xf] }
 0x661   :  { %v7272_v47 = vmax.f32 %v7271_v29, %v5468_v11  ;;  %v3471_v26 = vpop.f32.mrf.mxu2  ;;  %v3720_v33 = vpop.f32.mrf.mxu3 }
 0x662   :  { %v3472_v23 = vadd.f32 %v3471_v26, %v10425_v28  ;;  %v3721_v61 = vadd.f32 %v3720_v33, %v10350_v62 }
 0x664   :  { %v5509_v32 = vmax.f32 %v3472_v23, 0.0  ;;  %v5510_v21 = vmax.f32 %v3721_v61, 0.0  ;;  %v3212_v49 = vpop.f32.mrf.mxu1 }
 0x665   :  { %v3213_v31 = vadd.f32 %v3212_v49, %v10463_v25 }
 0x666   :  { %v7330_v16 = vmax.f32 %v7329_v48, %v5509_v32  ;;  %v7383_v57 = vmax.f32 %v7382_v41, %v5510_v21  ;;  %3513 = vmatmul.bf16.gmra.mxu2 %v11008_v14  ;;  %3762 = vmatmul.bf16.gmra.mxu3 %v11008_v14  ;;  %v7901_v41 = vor.u32 %v8117_v19, %v7900_v52 }
 0x667   :  { %v5476_v29 = vmax.f32 %v3213_v31, 0.0  ;;  %v3952_v54 = vpop.f32.mrf.mxu0 }
 0x668   :  { %4576 = vmatpush.bf16.msra.mxu3 %v7901_v41  ;;  %v3953_v26 = vadd.f32 %v3952_v54, %v10492_v35 }
 0x669   :  { %v7273_v60 = vmax.f32 %v7272_v47, %v5476_v29  ;;  %v3474_v10 = vpop.f32.mrf.mxu2  ;;  %v3723_v34 = vpop.f32.mrf.mxu3 }
 0x66a   :  { %v3475_v27 = vadd.f32 %v3474_v10, %v10425_v28  ;;  %v3724_v48 = vadd.f32 %v3723_v34, %v10350_v62  ;;  %3991 = vmatmul.bf16.gmra.mxu0 %v10935_v13  ;;  %v5455_v29 = vmax.f32 %v3953_v26, 0.0 }
 0x66c   :  { %v5517_v11 = vmax.f32 %v3475_v27, 0.0  ;;  %v5518_v51 = vmax.f32 %v3724_v48, 0.0  ;;  %v3215_v63 = vpop.f32.mrf.mxu1 }
 0x66d   :  { %v3216_v47 = vadd.f32 %v3215_v63, %v10463_v25 }
 0x66e   :  { %v7331_v33 = vmax.f32 %v7330_v16, %v5517_v11  ;;  %v7384_v50 = vmax.f32 %v7383_v57, %v5518_v51  ;;  %v12093_v11 = vld [vmem:[#allocation49_spill] sm:$0xff] }
 0x66f   :  { %v5484_v23 = vmax.f32 %v3216_v47, 0.0  ;;  %3254 = vmatmul.bf16.gmra.mxu1 %v10977_v17  ;;  %v3954_v61 = vpop.f32.mrf.mxu0 }
 0x670   :  { %v3955_v32 = vadd.f32 %v3954_v61, %v10492_v35  ;;  %v8112_v61 = vld [vmem:[%s11926_s5 + $0x54] sm:$0xf] }
 0x671   :  { %v7274_v21 = vmax.f32 %v7273_v60, %v5484_v23  ;;  %v3476_v49 = vpop.f32.mrf.mxu2  ;;  %v3725_v31 = vpop.f32.mrf.mxu3 }
 0x672   :  { %v5463_v10 = vmax.f32 %v3955_v32, 0.0  ;;  %v3477_v34 = vadd.f32 %v3476_v49, %v10425_v28  ;;  %v3726_v52 = vadd.f32 %v3725_v31, %v10350_v62 }
 0x674   :  { %v7430_v19 = vmax.f32 %v5455_v29, %v5463_v10  ;;  %v5525_v27 = vmax.f32 %v3477_v34, 0.0  ;;  %v5526_v54 = vmax.f32 %v3726_v52, 0.0  ;;  %v3217_v16 = vpop.f32.mrf.mxu1  ;;  %v12094_v29 = vld [vmem:[#allocation6_spill] sm:$0xff] }
 0x675   :  { %v3218_v57 = vadd.f32 %v3217_v16, %v10463_v25  ;;  %v12095_v16 = vld [vmem:[#allocation5_spill] sm:$0xff] }
 0x676   :  { %v7332_v48 = vmax.f32 %v7331_v33, %v5525_v27  ;;  %v7385_v41 = vmax.f32 %v7384_v50, %v5526_v54  ;;  %3518 = vmatmul.bf16.gmra.mxu2 %v12093_v11  ;;  %3767 = vmatmul.bf16.gmra.mxu3 %v12093_v11  ;;  %v7894_v33 = vld [vmem:[%s11926_s5 + $0x70] sm:$0xf0] }
 0x677   :  { %v5492_v60 = vmax.f32 %v3218_v57, 0.0  ;;  %v3957_v51 = vpop.f32.mrf.mxu0  ;;  %v7897_v31 = vor.u32 %v8112_v61, %v7894_v33  ;;  %v2481_v57 = vadd.f32 %v10786_v9, %v12095_v16 }
 0x678   :  { %v3958_v63 = vadd.f32 %v3957_v51, %v10492_v35 }
 0x679   :  { %v7275_v47 = vmax.f32 %v7274_v21, %v5492_v60  ;;  %v3479_v26 = vpop.f32.mrf.mxu2  ;;  %v3728_v23 = vpop.f32.mrf.mxu3  ;;  %v2483_v21 = vadd.f32 %v10786_v9, %v12094_v29  ;;  %4327 = vmatpush.bf16.msra.mxu2 %v7897_v31 }
 0x67a   :  { %v5471_v50 = vmax.f32 %v3958_v63, 0.0  ;;  %v3480_v32 = vadd.f32 %v3479_v26, %v10425_v28  ;;  %v3729_v49 = vadd.f32 %v3728_v23, %v10350_v62  ;;  %3996 = vmatmul.bf16.gmra.mxu0 %v10963_v4  ;;  %v7892_v63 = vld [vmem:[%s11926_s5 + $0x50] sm:$0xf] }
 0x67b   :  { %v8116_v26 = vld [vmem:[%s11926_s5 + $0x6c] sm:$0xf0]  ;;  %v2607_v33 = vmax.f32 %v2483_v21, 0.0 }
 0x67c   :  { %v7431_v10 = vmax.f32 %v7430_v19, %v5471_v50  ;;  %v5533_v34 = vmax.f32 %v3480_v32, 0.0  ;;  %v5534_v52 = vmax.f32 %v3729_v49, 0.0  ;;  %v3220_v27 = vpop.f32.mrf.mxu1  ;;  %v7893_v61 = vor.u32 %v8116_v26, %v7892_v63 }
 0x67d   :  { %v3221_v54 = vadd.f32 %v3220_v27, %v10463_v25 }
 0x67e   :  { %v7333_v60 = vmax.f32 %v7332_v48, %v5533_v34  ;;  %v7386_v51 = vmax.f32 %v7385_v41, %v5534_v52  ;;  %4078 = vmatpush.bf16.msra.mxu1 %v7893_v61  ;;  %v2606_v41 = vmax.f32 %v2481_v57, 0.0 }
 0x67f   :  { %v5500_v19 = vmax.f32 %v3221_v54, 0.0  ;;  %3259 = vmatmul.bf16.gmra.mxu1 %v10992_v46  ;;  %v3959_v23 = vpop.f32.mrf.mxu0 }
 0x680   :  { %v3960_v50 = vadd.f32 %v3959_v23, %v10492_v35  ;;  %v11056_v52 = vpack.c.bf16 %v2607_v33, %v2606_v41 }
 0x681   :  { %v7276_v32 = vmax.f32 %v7275_v47, %v5500_v19  ;;  %v3481_v49 = vpop.f32.mrf.mxu2  ;;  %v3730_v48 = vpop.f32.mrf.mxu3 }
 0x682   :  { %v5479_v31 = vmax.f32 %v3960_v50, 0.0  ;;  %v3482_v29 = vadd.f32 %v3481_v49, %v10425_v28  ;;  %v3731_v34 = vadd.f32 %v3730_v48, %v10350_v62  ;;  %12096 = vst [vmem:[#allocation40_spill] sm:$0xff] %v11056_v52 }
 0x684   :  { %v7432_v27 = vmax.f32 %v7431_v10, %v5479_v31  ;;  %v5541_v54 = vmax.f32 %v3482_v29, 0.0  ;;  %v5542_v16 = vmax.f32 %v3731_v34, 0.0  ;;  %v3222_v4 = vpop.f32.mrf.mxu1  ;;  %v12098_v34 = vld [vmem:[#allocation14_spill] sm:$0xff] }
 0x685   :  { %v3223_v21 = vadd.f32 %v3222_v4, %v10463_v25  ;;  %v12097_v4 = vld [vmem:[#allocation17_spill] sm:$0xff] }
 0x686   :  { %v7334_v63 = vmax.f32 %v7333_v60, %v5541_v54  ;;  %v7387_v26 = vmax.f32 %v7386_v51, %v5542_v16  ;;  %3523 = vmatmul.bf16.gmra.mxu2 %v11056_v52  ;;  %3772 = vmatmul.bf16.gmra.mxu3 %v11056_v52  ;;  %v2488_v60 = vadd.f32 %v10786_v9, %v12097_v4 }
 0x687   :  { %v5508_v47 = vmax.f32 %v3223_v21, 0.0  ;;  %v3962_v57 = vpop.f32.mrf.mxu0  ;;  %v8113_v21 = vld [vmem:[%s11926_s5 + $0x5c] sm:$0xf] }
 0x688   :  { %v3963_v19 = vadd.f32 %v3962_v57, %v10492_v35 }
 0x689   :  { %v7277_v23 = vmax.f32 %v7276_v32, %v5508_v47  ;;  %v3484_v61 = vpop.f32.mrf.mxu2  ;;  %v3733_v33 = vpop.f32.mrf.mxu3  ;;  %v2486_v32 = vadd.f32 %v10786_v9, %v12098_v34  ;;  %v7902_v47 = vld [vmem:[%s11926_s5 + $0x78] sm:$0xf0] }
 0x68a   :  { %v5487_v50 = vmax.f32 %v3963_v19, 0.0  ;;  %v3485_v10 = vadd.f32 %v3484_v61, %v10425_v28  ;;  %v3734_v49 = vadd.f32 %v3733_v33, %v10350_v62  ;;  %4001 = vmatmul.bf16.gmra.mxu0 %v10977_v17  ;;  %v11077_v19 = vor.u32 %v8113_v21, %v7902_v47 }
 0x68b   :  { %v2609_v61 = vmax.f32 %v2488_v60, 0.0 }
 0x68c   :  { %v7433_v51 = vmax.f32 %v7432_v27, %v5487_v50  ;;  %v5549_v48 = vmax.f32 %v3485_v10, 0.0  ;;  %v5550_v41 = vmax.f32 %v3734_v49, 0.0  ;;  %v3225_v31 = vpop.f32.mrf.mxu1  ;;  %4825 = vmatpush.bf16.msra.mxu0 %v11077_v19  ;;  %v2608_v50 = vmax.f32 %v2486_v32, 0.0 }
 0x68d   :  { %v3226_v29 = vadd.f32 %v3225_v31, %v10463_v25 }
 0x68e   :  { %v7335_v54 = vmax.f32 %v7334_v63, %v5549_v48  ;;  %v7388_v16 = vmax.f32 %v7387_v26, %v5550_v41  ;;  %v11083_v48 = vpack.c.bf16 %v2609_v61, %v2608_v50 }
 0x68f   :  { %v5516_v57 = vmax.f32 %v3226_v29, 0.0  ;;  %3264 = vmatmul.bf16.gmra.mxu1 %v11008_v14  ;;  %v3964_v27 = vpop.f32.mrf.mxu0 }
 0x690   :  { %v3965_v33 = vadd.f32 %v3964_v27, %v10492_v35  ;;  %12099 = vst [vmem:[#allocation36_spill] sm:$0xff] %v11083_v48 }
 0x691   :  { %v7278_v9 = vmax.f32 %v7277_v23, %v5516_v57  ;;  %v3486_v63 = vpop.f32.mrf.mxu2  ;;  %v3735_v26 = vpop.f32.mrf.mxu3 }
 0x692   :  { %v5495_v10 = vmax.f32 %v3965_v33, 0.0  ;;  %v3487_v49 = vadd.f32 %v3486_v63, %v10425_v28  ;;  %v3736_v4 = vadd.f32 %v3735_v26, %v10350_v62 }
 0x694   :  { %v7434_v41 = vmax.f32 %v7433_v51, %v5495_v10  ;;  %v5557_v31 = vmax.f32 %v3487_v49, 0.0  ;;  %v5558_v29 = vmax.f32 %v3736_v4, 0.0  ;;  %v3227_v34 = vpop.f32.mrf.mxu1 }
 0x695   :  { %v3228_v60 = vadd.f32 %v3227_v34, %v10463_v25 }
 0x696   :  { %v7336_v21 = vmax.f32 %v7335_v54, %v5557_v31  ;;  %v7389_v23 = vmax.f32 %v7388_v16, %v5558_v29  ;;  %3528 = vmatmul.bf16.gmra.mxu2 %v11083_v48  ;;  %3777 = vmatmul.bf16.gmra.mxu3 %v11083_v48  ;;  %v11095_v54 = vld [vmem:[%s11925_s4] ss:$0 sm:$0xff] }
 0x697   :  { %v5524_v32 = vmax.f32 %v3228_v60, 0.0  ;;  %v3967_v47 = vpop.f32.mrf.mxu0  ;;  %v12100_v16 = vld [vmem:[#allocation19_spill] sm:$0xff] }
 0x698   :  { %v3968_v57 = vadd.f32 %v3967_v47, %v10492_v35  ;;  %v2493_v50 = vadd.f32 %v11095_v54, %v12100_v16  ;;  %v12101_v29 = vld [vmem:[#allocation7_spill] sm:$0xff] }
 0x699   :  { %v7279_v27 = vmax.f32 %v7278_v9, %v5524_v32  ;;  %v3489_v33 = vpop.f32.mrf.mxu2  ;;  %v3738_v61 = vpop.f32.mrf.mxu3  ;;  %v2491_v34 = vadd.f32 %v11095_v54, %v12101_v29 }
 0x69a   :  { %v5503_v63 = vmax.f32 %v3968_v57, 0.0  ;;  %v3490_v51 = vadd.f32 %v3489_v33, %v10425_v28  ;;  %v3739_v26 = vadd.f32 %v3738_v61, %v10350_v62  ;;  %4006 = vmatmul.bf16.gmra.mxu0 %v10992_v46  ;;  %v2611_v33 = vmax.f32 %v2493_v50, 0.0 }
 0x69c   :  { %v7435_v10 = vmax.f32 %v7434_v41, %v5503_v63  ;;  %v5565_v49 = vmax.f32 %v3490_v51, 0.0  ;;  %v5566_v9 = vmax.f32 %v3739_v26, 0.0  ;;  %v3230_v4 = vpop.f32.mrf.mxu1  ;;  %v2610_v63 = vmax.f32 %v2491_v34, 0.0 }
 0x69d   :  { %v3231_v31 = vadd.f32 %v3230_v4, %v10463_v25 }
 0x69e   :  { %v7337_v60 = vmax.f32 %v7336_v21, %v5565_v49  ;;  %v7390_v32 = vmax.f32 %v7389_v23, %v5566_v9  ;;  %v11106_v17 = vpack.c.bf16 %v2611_v33, %v2610_v63 }
 0x69f   :  { %v5532_v47 = vmax.f32 %v3231_v31, 0.0  ;;  %3269 = vmatmul.bf16.gmra.mxu1 %v12093_v11  ;;  %v3969_v57 = vpop.f32.mrf.mxu0 }
 0x6a0   :  { %v3970_v61 = vadd.f32 %v3969_v57, %v10492_v35  ;;  %12102 = vst [vmem:[#allocation44_spill] sm:$0xff] %v11106_v17 }
 0x6a1   :  { %v7280_v46 = vmax.f32 %v7279_v27, %v5532_v47  ;;  %v3491_v16 = vpop.f32.mrf.mxu2  ;;  %v3740_v41 = vpop.f32.mrf.mxu3 }
 0x6a2   :  { %v5511_v51 = vmax.f32 %v3970_v61, 0.0  ;;  %v3492_v26 = vadd.f32 %v3491_v16, %v10425_v28  ;;  %v3741_v4 = vadd.f32 %v3740_v41, %v10350_v62 }
 0x6a4   :  { %v7436_v21 = vmax.f32 %v7435_v10, %v5511_v51  ;;  %v5573_v23 = vmax.f32 %v3492_v26, 0.0  ;;  %v5574_v49 = vmax.f32 %v3741_v4, 0.0  ;;  %v3232_v9 = vpop.f32.mrf.mxu1 }
 0x6a5   :  { %v3233_v31 = vadd.f32 %v3232_v9, %v10463_v25 }
 0x6a6   :  { %v7338_v50 = vmax.f32 %v7337_v60, %v5573_v23  ;;  %v7391_v29 = vmax.f32 %v7390_v32, %v5574_v49  ;;  %3533 = vmatmul.bf16.gmra.mxu2 %v11106_v17  ;;  %3782 = vmatmul.bf16.gmra.mxu3 %v11106_v17  ;;  %v12103_v60 = vld [vmem:[#allocation11_spill] sm:$0xff]  ;;  %v12104_v49 = vld [vmem:[#allocation9_spill] sm:$0xff] }
 0x6a7   :  { %v5540_v27 = vmax.f32 %v3233_v31, 0.0  ;;  %v3972_v34 = vpop.f32.mrf.mxu0  ;;  %v2498_v32 = vadd.f32 %v11095_v54, %v12103_v60 }
 0x6a8   :  { %v3973_v47 = vadd.f32 %v3972_v34, %v10492_v35 }
 0x6a9   :  { %v7281_v57 = vmax.f32 %v7280_v46, %v5540_v27  ;;  %v3494_v61 = vpop.f32.mrf.mxu2  ;;  %v3743_v33 = vpop.f32.mrf.mxu3  ;;  %v2496_v46 = vadd.f32 %v11095_v54, %v12104_v49 }
 0x6aa   :  { %v5519_v16 = vmax.f32 %v3973_v47, 0.0  ;;  %v3495_v10 = vadd.f32 %v3494_v61, %v10425_v28  ;;  %v3744_v41 = vadd.f32 %v3743_v33, %v10350_v62  ;;  %4011 = vmatmul.bf16.gmra.mxu0 %v11008_v14  ;;  %v2613_v47 = vmax.f32 %v2498_v32, 0.0 }
 0x6ac   :  { %v7437_v63 = vmax.f32 %v7436_v21, %v5519_v16  ;;  %v5581_v51 = vmax.f32 %v3495_v10, 0.0  ;;  %v5582_v26 = vmax.f32 %v3744_v41, 0.0  ;;  %v3235_v4 = vpop.f32.mrf.mxu1  ;;  %v2612_v16 = vmax.f32 %v2496_v46, 0.0 }
 0x6ad   :  { %v3236_v23 = vadd.f32 %v3235_v4, %v10463_v25 }
 0x6ae   :  { %v7339_v9 = vmax.f32 %v7338_v50, %v5581_v51  ;;  %v7392_v31 = vmax.f32 %v7391_v29, %v5582_v26  ;;  %v11124_v14 = vpack.c.bf16 %v2613_v47, %v2612_v16 }
 0x6af   :  { %v5548_v27 = vmax.f32 %v3236_v23, 0.0  ;;  %3274 = vmatmul.bf16.gmra.mxu1 %v11056_v52  ;;  %v3974_v34 = vpop.f32.mrf.mxu0 }
 0x6b0   :  { %v3975_v61 = vadd.f32 %v3974_v34, %v10492_v35  ;;  %12105 = vst [vmem:[#allocation42_spill] sm:$0xff] %v11124_v14 }
 0x6b1   :  { %v7282_v33 = vmax.f32 %v7281_v57, %v5548_v27  ;;  %v3496_v60 = vpop.f32.mrf.mxu2  ;;  %v3745_v21 = vpop.f32.mrf.mxu3 }
 0x6b2   :  { %v5527_v10 = vmax.f32 %v3975_v61, 0.0  ;;  %v3497_v41 = vadd.f32 %v3496_v60, %v10425_v28  ;;  %v3746_v4 = vadd.f32 %v3745_v21, %v10350_v62 }
 0x6b4   :  { %v7438_v50 = vmax.f32 %v7437_v63, %v5527_v10  ;;  %v5589_v29 = vmax.f32 %v3497_v41, 0.0  ;;  %v5590_v51 = vmax.f32 %v3746_v4, 0.0  ;;  %v3237_v26 = vpop.f32.mrf.mxu1 }
 0x6b5   :  { %v3238_v23 = vadd.f32 %v3237_v26, %v10463_v25 }
 0x6b6   :  { %v7340_v32 = vmax.f32 %v7339_v9, %v5589_v29  ;;  %v7393_v49 = vmax.f32 %v7392_v31, %v5590_v51  ;;  %3538 = vmatmul.bf16.gmra.mxu2 %v11124_v14  ;;  %3787 = vmatmul.bf16.gmra.mxu3 %v11124_v14  ;;  %v12106_v9 = vld [vmem:[#allocation15_spill] sm:$0xff]  ;;  %v12107_v51 = vld [vmem:[#allocation12_spill] sm:$0xff] }
 0x6b7   :  { %v5556_v57 = vmax.f32 %v3238_v23, 0.0  ;;  %v3977_v46 = vpop.f32.mrf.mxu0  ;;  %v2503_v31 = vadd.f32 %v11095_v54, %v12106_v9 }
 0x6b8   :  { %v3978_v27 = vadd.f32 %v3977_v46, %v10492_v35 }
 0x6b9   :  { %v7283_v34 = vmax.f32 %v7282_v33, %v5556_v57  ;;  %v3499_v61 = vpop.f32.mrf.mxu2  ;;  %v3748_v47 = vpop.f32.mrf.mxu3  ;;  %v2501_v33 = vadd.f32 %v11095_v54, %v12107_v51 }
 0x6ba   :  { %v5535_v60 = vmax.f32 %v3978_v27, 0.0  ;;  %v3500_v63 = vadd.f32 %v3499_v61, %v10425_v28  ;;  %v3749_v21 = vadd.f32 %v3748_v47, %v10350_v62  ;;  %4016 = vmatmul.bf16.gmra.mxu0 %v12093_v11  ;;  %v2615_v27 = vmax.f32 %v2503_v31, 0.0 }
 0x6bc   :  { %v7439_v16 = vmax.f32 %v7438_v50, %v5535_v60  ;;  %v5597_v10 = vmax.f32 %v3500_v63, 0.0  ;;  %v5598_v41 = vmax.f32 %v3749_v21, 0.0  ;;  %v3240_v4 = vpop.f32.mrf.mxu1  ;;  %v2614_v60 = vmax.f32 %v2501_v33, 0.0 }
 0x6bd   :  { %v3241_v29 = vadd.f32 %v3240_v4, %v10463_v25 }
 0x6be   :  { %v7341_v26 = vmax.f32 %v7340_v32, %v5597_v10  ;;  %v7394_v23 = vmax.f32 %v7393_v49, %v5598_v41  ;;  %v11142_v11 = vpack.c.bf16 %v2615_v27, %v2614_v60 }
 0x6bf   :  { %v5564_v57 = vmax.f32 %v3241_v29, 0.0  ;;  %3279 = vmatmul.bf16.gmra.mxu1 %v11083_v48  ;;  %v3979_v46 = vpop.f32.mrf.mxu0 }
 0x6c0   :  { %v3980_v61 = vadd.f32 %v3979_v46, %v10492_v35  ;;  %12108 = vst [vmem:[#allocation46_spill] sm:$0xff] %v11142_v11 }
 0x6c1   :  { %v7284_v47 = vmax.f32 %v7283_v34, %v5564_v57  ;;  %v3501_v9 = vpop.f32.mrf.mxu2  ;;  %v3750_v50 = vpop.f32.mrf.mxu3 }
 0x6c2   :  { %v5543_v63 = vmax.f32 %v3980_v61, 0.0  ;;  %v3502_v21 = vadd.f32 %v3501_v9, %v10425_v28  ;;  %v3751_v4 = vadd.f32 %v3750_v50, %v10350_v62 }
 0x6c4   :  { %v7440_v32 = vmax.f32 %v7439_v16, %v5543_v63  ;;  %v5605_v49 = vmax.f32 %v3502_v21, 0.0  ;;  %v5606_v10 = vmax.f32 %v3751_v4, 0.0  ;;  %v3242_v41 = vpop.f32.mrf.mxu1  ;;  %v7868_v16 = vld [vmem:[%s11926_s5 + $0x18] sm:$0xf]  ;;  %v12109_v63 = vld [vmem:[#allocation21_spill] sm:$0xff] }
 0x6c5   :  { %v3243_v29 = vadd.f32 %v3242_v41, %v10463_v25 }
 0x6c6   :  { %v7342_v31 = vmax.f32 %v7341_v26, %v5605_v49  ;;  %v7395_v51 = vmax.f32 %v7394_v23, %v5606_v10  ;;  %3543 = vmatmul.bf16.gmra.mxu2 %v11142_v11  ;;  %3792 = vmatmul.bf16.gmra.mxu3 %v11142_v11  ;;  %v8109_v26 = vld [vmem:[%s11926_s5 + $0x34] sm:$0xf0] }
 0x6c7   :  { %v5572_v34 = vmax.f32 %v3243_v29, 0.0  ;;  %v3982_v33 = vpop.f32.mrf.mxu0  ;;  %v7869_v60 = vor.u32 %v8109_v26, %v7868_v16  ;;  %v12110_v29 = vld [vmem:[#allocation35_spill] sm:$0xff] }
 0x6c8   :  { %v3983_v57 = vadd.f32 %v3982_v33, %v10492_v35 }
 0x6c9   :  { %v7285_v46 = vmax.f32 %v7284_v47, %v5572_v34  ;;  %v3504_v61 = vpop.f32.mrf.mxu2  ;;  %v3753_v27 = vpop.f32.mrf.mxu3  ;;  %v2508_v47 = vadd.f32 %v11095_v54, %v12109_v63  ;;  %4577 = vmatpush.bf16.msra.mxu3 %v7869_v60  ;;  %v12111_v34 = vld [vmem:[#allocation16_spill] sm:$0xff]  ;;  %v12112_v60 = vld [vmem:[#allocation50_spill] sm:$0xff] }
 0x6ca   :  { %v5551_v23 = vmax.f32 %v3983_v57, 0.0  ;;  %v3505_v9 = vadd.f32 %v3504_v61, %v10425_v28  ;;  %v3754_v50 = vadd.f32 %v3753_v27, %v10350_v62  ;;  %4021 = vmatmul.bf16.gmra.mxu0 %v11056_v52  ;;  %v2506_v33 = vadd.f32 %v11095_v54, %v12111_v34 }
 0x6cb   :  { %v2617_v26 = vmax.f32 %v2508_v47, 0.0 }
 0x6cc   :  { %v7441_v21 = vmax.f32 %v7440_v32, %v5551_v23  ;;  %v5613_v4 = vmax.f32 %v3505_v9, 0.0  ;;  %v5614_v49 = vmax.f32 %v3754_v50, 0.0  ;;  %v3245_v10 = vpop.f32.mrf.mxu1  ;;  %v2616_v63 = vmax.f32 %v2506_v33, 0.0 }
 0x6cd   :  { %v3246_v41 = vadd.f32 %v3245_v10, %v10463_v25  ;;  %8178 = vmatpush.bf16.msrb.mxu3 %v12110_v29 }
 0x6ce   :  { %v7343_v57 = vmax.f32 %v7342_v31, %v5613_v4  ;;  %v7396_v61 = vmax.f32 %v7395_v51, %v5614_v49  ;;  %v11168_v31 = vpack.c.bf16 %v2617_v26, %v2616_v63  ;;  %v12114_v63 = vld [vmem:[#allocation26_spill] sm:$0xff] }
 0x6cf   :  { %v5580_v27 = vmax.f32 %v3246_v41, 0.0  ;;  %3284 = vmatmul.bf16.gmra.mxu1 %v11106_v17  ;;  %v3984_v16 = vpop.f32.mrf.mxu0 }
 0x6d0   :  { %v3985_v32 = vadd.f32 %v3984_v16, %v10492_v35  ;;  %12113 = vst [vmem:[#allocation45_spill] sm:$0xff] %v11168_v31 }
 0x6d1   :  { %v7286_v23 = vmax.f32 %v7285_v46, %v5580_v27  ;;  %v3506_v9 = vpop.f32.mrf.mxu2  ;;  %v3755_v50 = vpop.f32.mrf.mxu3  ;;  %8179 = vmatpush.bf16.msrb.mxu3 %v12112_v60 }
 0x6d2   :  { %v5559_v10 = vmax.f32 %v3985_v32, 0.0  ;;  %v3507_v29 = vadd.f32 %v3506_v9, %v10425_v28  ;;  %v3756_v34 = vadd.f32 %v3755_v50, %v10350_v62  ;;  %v8104_v50 = vld [vmem:[%s11926_s5 + $0x14] sm:$0xf] }
 0x6d4   :  { %v7442_v51 = vmax.f32 %v7441_v21, %v5559_v10  ;;  %v5621_v4 = vmax.f32 %v3507_v29, 0.0  ;;  %v5622_v49 = vmax.f32 %v3756_v34, 0.0  ;;  %v3247_v41 = vpop.f32.mrf.mxu1  ;;  %v2513_v10 = vadd.f32 %v11095_v54, %v12114_v63 }
 0x6d5   :  { %v3248_v47 = vadd.f32 %v3247_v41, %v10463_v25  ;;  %8180 = vmatpush.bf16.msrb.mxu3 %v10565_v3  ;;  %v7862_v3 = vld [vmem:[%s11926_s5 + $0x30] sm:$0xf0] }
 0x6d6   :  { %v7344_v46 = vmax.f32 %v7343_v57, %v5621_v4  ;;  %v7397_v27 = vmax.f32 %v7396_v61, %v5622_v49  ;;  %3548 = vmatmul.bf16.gmra.mxu2 %v11168_v31  ;;  %3797 = vmatmul.bf16.gmra.mxu3 %v11168_v31 }
 0x6d7   :  { %v5588_v33 = vmax.f32 %v3248_v47, 0.0  ;;  %v3987_v16 = vpop.f32.mrf.mxu0 }
 0x6d8   :  { %v3988_v32 = vadd.f32 %v3987_v16, %v10492_v35 }
 0x6d9   :  { %v7287_v26 = vmax.f32 %v7286_v23, %v5588_v33  ;;  %v3509_v9 = vpop.f32.mrf.mxu2  ;;  %v3758_v21 = vpop.f32.mrf.mxu3  ;;  %8181 = vmatpush.bf16.msrb.mxu3 %v10696_v58  ;;  %v7865_v23 = vor.u32 %v8104_v50, %v7862_v3  ;;  %v12115_v58 = vld [vmem:[#allocation22_spill] sm:$0xff]  ;;  %v2619_v3 = vmax.f32 %v2513_v10, 0.0 }
 0x6da   :  { %v5567_v57 = vmax.f32 %v3988_v32, 0.0  ;;  %v3510_v61 = vadd.f32 %v3509_v9, %v10425_v28  ;;  %v3759_v60 = vadd.f32 %v3758_v21, %v10350_v62  ;;  %4026 = vmatmul.bf16.gmra.mxu0 %v11083_v48  ;;  %v2511_v47 = vadd.f32 %v11095_v54, %v12115_v58  ;;  %v7860_v32 = vld [vmem:[%s11926_s5 + $0x10] sm:$0xf] }
 0x6db   :  { %4328 = vmatpush.bf16.msra.mxu2 %v7865_v23 }
 0x6dc   :  { %v7443_v29 = vmax.f32 %v7442_v51, %v5567_v57  ;;  %v5629_v34 = vmax.f32 %v3510_v61, 0.0  ;;  %v5630_v4 = vmax.f32 %v3759_v60, 0.0  ;;  %v3250_v49 = vpop.f32.mrf.mxu1  ;;  %v8108_v51 = vld [vmem:[%s11926_s5 + $0x2c] sm:$0xf0] }
 0x6dd   :  { %v3251_v41 = vadd.f32 %v3250_v49, %v10463_v25  ;;  %8182 = vmatpush.bf16.msrb.mxu3 %v10827_v39  ;;  %v7861_v50 = vor.u32 %v8108_v51, %v7860_v32 }
 0x6de   :  { %v7345_v33 = vmax.f32 %v7344_v46, %v5629_v34  ;;  %v7398_v16 = vmax.f32 %v7397_v27, %v5630_v4  ;;  %v2618_v27 = vmax.f32 %v2511_v47, 0.0 }
 0x6df   :  { %v5596_v9 = vmax.f32 %v3251_v41, 0.0  ;;  %3289 = vmatmul.bf16.gmra.mxu1 %v11124_v14  ;;  %v3989_v21 = vpop.f32.mrf.mxu0 }
 0x6e0   :  { %v3990_v39 = vadd.f32 %v3989_v21, %v10492_v35  ;;  %4079 = vmatpush.bf16.msra.mxu1 %v7861_v50  ;;  %v11202_v34 = vpack.c.bf16 %v2619_v3, %v2618_v27 }
 0x6e1   :  { %v7288_v57 = vmax.f32 %v7287_v26, %v5596_v9  ;;  %v3511_v61 = vpop.f32.mrf.mxu2  ;;  %v3760_v46 = vpop.f32.mrf.mxu3  ;;  %8183 = vmatpush.bf16.msrb.mxu3 %v10956_v40 }
 0x6e2   :  { %v5575_v60 = vmax.f32 %v3990_v39, 0.0  ;;  %v3512_v23 = vadd.f32 %v3511_v61, %v10425_v28  ;;  %v3761_v63 = vadd.f32 %v3760_v46, %v10350_v62  ;;  %12116 = vst [vmem:[#allocation48_spill] sm:$0xff] %v11202_v34 }
 0x6e4   :  { %v7444_v4 = vmax.f32 %v7443_v29, %v5575_v60  ;;  %v5637_v49 = vmax.f32 %v3512_v23, 0.0  ;;  %v5638_v41 = vmax.f32 %v3761_v63, 0.0  ;;  %v3252_v10 = vpop.f32.mrf.mxu1  ;;  %v12118_v23 = vld [vmem:[#allocation28_spill] sm:$0xff] }
 0x6e5   :  { %v3253_v58 = vadd.f32 %v3252_v10, %v10463_v25  ;;  %8184 = vmatpush.bf16.msrb.mxu3 %v11077_v19  ;;  %v12117_v19 = vld [vmem:[#allocation31_spill] sm:$0xff]  ;;  %v7870_v10 = vld [vmem:[%s11926_s5 + $0x38] sm:$0xf0] }
 0x6e6   :  { %v7346_v26 = vmax.f32 %v7345_v33, %v5637_v49  ;;  %v7399_v32 = vmax.f32 %v7398_v16, %v5638_v41  ;;  %3553 = vmatmul.bf16.gmra.mxu2 %v11202_v34  ;;  %3802 = vmatmul.bf16.gmra.mxu3 %v11202_v34  ;;  %v2518_v33 = vadd.f32 %v11095_v54, %v12117_v19  ;;  %v8105_v41 = vld [vmem:[%s11926_s5 + $0x1c] sm:$0xf] }
 0x6e7   :  { %v5604_v40 = vmax.f32 %v3253_v58, 0.0  ;;  %v3992_v47 = vpop.f32.mrf.mxu0 }
 0x6e8   :  { %v3993_v51 = vadd.f32 %v3992_v47, %v10492_v35  ;;  %v2621_v47 = vmax.f32 %v2518_v33, 0.0 }
 0x6e9   :  { %v7289_v9 = vmax.f32 %v7288_v57, %v5604_v40  ;;  %v3514_v21 = vpop.f32.mrf.mxu2  ;;  %v3763_v29 = vpop.f32.mrf.mxu3  ;;  %v2516_v57 = vadd.f32 %v11095_v54, %v12118_v23  ;;  %v7873_v40 = vor.u32 %v8105_v41, %v7870_v10 }
 0x6ea   :  { %v5583_v50 = vmax.f32 %v3993_v51, 0.0  ;;  %v3515_v3 = vadd.f32 %v3514_v21, %v10425_v28  ;;  %v3764_v39 = vadd.f32 %v3763_v29, %v10350_v62  ;;  %4031 = vmatmul.bf16.gmra.mxu0 %v11106_v17 }
 0x6eb   :  { %4826 = vmatpush.bf16.msra.mxu0 %v7873_v40  ;;  %8185 = vmatpush.bf16.msrb.mxu3 %v7873_v40 }
 0x6ec   :  { %v7445_v16 = vmax.f32 %v7444_v4, %v5583_v50  ;;  %v5645_v61 = vmax.f32 %v3515_v3, 0.0  ;;  %v5646_v46 = vmax.f32 %v3764_v39, 0.0  ;;  %v3255_v27 = vpop.f32.mrf.mxu1 }
 0x6ed   :  { %v3256_v60 = vadd.f32 %v3255_v27, %v10463_v25 }
 0x6ee   :  { %v7347_v63 = vmax.f32 %v7346_v26, %v5645_v61  ;;  %v7400_v49 = vmax.f32 %v7399_v32, %v5646_v46  ;;  %v2620_v32 = vmax.f32 %v2516_v57, 0.0 }
 0x6ef   :  { %v5612_v58 = vmax.f32 %v3256_v60, 0.0  ;;  %3294 = vmatmul.bf16.gmra.mxu1 %v11142_v11  ;;  %v3994_v4 = vpop.f32.mrf.mxu0 }
 0x6f0   :  { %v3995_v51 = vadd.f32 %v3994_v4, %v10492_v35  ;;  %v11227_v19 = vpack.c.bf16 %v2621_v47, %v2620_v32 }
 0x6f1   :  { %v7290_v21 = vmax.f32 %v7289_v9, %v5612_v58  ;;  %v3516_v29 = vpop.f32.mrf.mxu2  ;;  %v3765_v26 = vpop.f32.mrf.mxu3 }
 0x6f2   :  { %v5591_v50 = vmax.f32 %v3995_v51, 0.0  ;;  %v3517_v3 = vadd.f32 %v3516_v29, %v10425_v28  ;;  %v3766_v39 = vadd.f32 %v3765_v26, %v10350_v62  ;;  %12119 = vst [vmem:[#allocation47_spill] sm:$0xff] %v11227_v19 }
 0x6f4   :  { %v7446_v61 = vmax.f32 %v7445_v16, %v5591_v50  ;;  %v5653_v46 = vmax.f32 %v3517_v3, 0.0  ;;  %v5654_v27 = vmax.f32 %v3766_v39, 0.0  ;;  %v3257_v60 = vpop.f32.mrf.mxu1  ;;  %v12121_v39 = vld [vmem:[#allocation33_spill] sm:$0xff] }
 0x6f5   :  { %v3258_v33 = vadd.f32 %v3257_v60, %v10463_v25 }
 0x6f6   :  { %v7348_v23 = vmax.f32 %v7347_v63, %v5653_v46  ;;  %v7401_v9 = vmax.f32 %v7400_v49, %v5654_v27  ;;  %3558 = vmatmul.bf16.gmra.mxu2 %v11227_v19  ;;  %3807 = vmatmul.bf16.gmra.mxu3 %v11227_v19  ;;  %v12120_v63 = vld [vmem:[#allocation37_spill] sm:$0xff] }
 0x6f7   :  { %v5620_v57 = vmax.f32 %v3258_v33, 0.0  ;;  %v3997_v41 = vpop.f32.mrf.mxu0  ;;  %v2523_v49 = vadd.f32 %v11095_v54, %v12120_v63 }
 0x6f8   :  { %v3998_v10 = vadd.f32 %v3997_v41, %v10492_v35 }
 0x6f9   :  { %v7291_v58 = vmax.f32 %v7290_v21, %v5620_v57  ;;  %v3519_v4 = vpop.f32.mrf.mxu2  ;;  %v3768_v40 = vpop.f32.mrf.mxu3  ;;  %v2521_v21 = vadd.f32 %v11095_v54, %v12121_v39  ;;  %v2623_v57 = vmax.f32 %v2523_v49, 0.0 }
 0x6fa   :  { %v5599_v47 = vmax.f32 %v3998_v10, 0.0  ;;  %v3520_v16 = vadd.f32 %v3519_v4, %v10425_v28  ;;  %v3769_v51 = vadd.f32 %v3768_v40, %v10350_v62  ;;  %4036 = vmatmul.bf16.gmra.mxu0 %v11124_v14 }
 0x6fb   :  { %v2622_v40 = vmax.f32 %v2521_v21, 0.0 }
 0x6fc   :  { %v7447_v29 = vmax.f32 %v7446_v61, %v5599_v47  ;;  %v5661_v26 = vmax.f32 %v3520_v16, 0.0  ;;  %v5662_v32 = vmax.f32 %v3769_v51, 0.0  ;;  %v3260_v50 = vpop.f32.mrf.mxu1 }
 0x6fd   :  { %v3261_v3 = vadd.f32 %v3260_v50, %v10463_v25  ;;  %v11245_v63 = vpack.c.bf16 %v2623_v57, %v2622_v40 }
 0x6fe   :  { %v7349_v46 = vmax.f32 %v7348_v23, %v5661_v26  ;;  %v7402_v27 = vmax.f32 %v7401_v9, %v5662_v32 }
 0x6ff   :  { %v5628_v60 = vmax.f32 %v3261_v3, 0.0  ;;  %3299 = vmatmul.bf16.gmra.mxu1 %v11168_v31  ;;  %v3999_v33 = vpop.f32.mrf.mxu0  ;;  %12122 = vst [vmem:[#allocation6_spill] sm:$0xff] %v11245_v63 }
 0x700   :  { %v4000_v41 = vadd.f32 %v3999_v33, %v10492_v35 }
 0x701   :  { %v7292_v10 = vmax.f32 %v7291_v58, %v5628_v60  ;;  %v3521_v4 = vpop.f32.mrf.mxu2  ;;  %v3770_v61 = vpop.f32.mrf.mxu3 }
 0x702   :  { %v5607_v47 = vmax.f32 %v4000_v41, 0.0  ;;  %v3522_v16 = vadd.f32 %v3521_v4, %v10425_v28  ;;  %v3771_v51 = vadd.f32 %v3770_v61, %v10350_v62 }
 0x704   :  { %v7448_v23 = vmax.f32 %v7447_v29, %v5607_v47  ;;  %v5669_v9 = vmax.f32 %v3522_v16, 0.0  ;;  %v5670_v26 = vmax.f32 %v3771_v51, 0.0  ;;  %v3262_v32 = vpop.f32.mrf.mxu1 }
 0x705   :  { %v3263_v50 = vadd.f32 %v3262_v32, %v10463_v25 }
 0x706   :  { %v7350_v49 = vmax.f32 %v7349_v46, %v5669_v9  ;;  %v7403_v3 = vmax.f32 %v7402_v27, %v5670_v26  ;;  %3563 = vmatmul.bf16.gmra.mxu2 %v11245_v63  ;;  %3812 = vmatmul.bf16.gmra.mxu3 %v11245_v63  ;;  %v12123_v46 = vld [vmem:[#allocation41_spill] sm:$0xff]  ;;  %v12124_v9 = vld [vmem:[#allocation39_spill] sm:$0xff] }
 0x707   :  { %v5636_v58 = vmax.f32 %v3263_v50, 0.0  ;;  %v4002_v39 = vpop.f32.mrf.mxu0  ;;  %v2528_v27 = vadd.f32 %v11095_v54, %v12123_v46 }
 0x708   :  { %v4003_v21 = vadd.f32 %v4002_v39, %v10492_v35 }
 0x709   :  { %v7293_v60 = vmax.f32 %v7292_v10, %v5636_v58  ;;  %v3524_v33 = vpop.f32.mrf.mxu2  ;;  %v3773_v57 = vpop.f32.mrf.mxu3  ;;  %v2526_v10 = vadd.f32 %v11095_v54, %v12124_v9  ;;  %v2625_v39 = vmax.f32 %v2528_v27, 0.0 }
 0x70a   :  { %v5615_v41 = vmax.f32 %v4003_v21, 0.0  ;;  %v3525_v29 = vadd.f32 %v3524_v33, %v10425_v28  ;;  %v3774_v4 = vadd.f32 %v3773_v57, %v10350_v62  ;;  %4041 = vmatmul.bf16.gmra.mxu0 %v11142_v11 }
 0x70c   :  { %v7449_v61 = vmax.f32 %v7448_v23, %v5615_v41  ;;  %v5677_v40 = vmax.f32 %v3525_v29, 0.0  ;;  %v5678_v47 = vmax.f32 %v3774_v4, 0.0  ;;  %v3265_v16 = vpop.f32.mrf.mxu1  ;;  %v2624_v41 = vmax.f32 %v2526_v10, 0.0 }
 0x70d   :  { %v3266_v51 = vadd.f32 %v3265_v16, %v10463_v25 }
 0x70e   :  { %v7351_v26 = vmax.f32 %v7350_v49, %v5677_v40  ;;  %v7404_v32 = vmax.f32 %v7403_v3, %v5678_v47  ;;  %v11263_v16 = vpack.c.bf16 %v2625_v39, %v2624_v41 }
 0x70f   :  { %v5644_v50 = vmax.f32 %v3266_v51, 0.0  ;;  %3304 = vmatmul.bf16.gmra.mxu1 %v11202_v34  ;;  %v4004_v58 = vpop.f32.mrf.mxu0 }
 0x710   :  { %v4005_v21 = vadd.f32 %v4004_v58, %v10492_v35  ;;  %12125 = vst [vmem:[#allocation5_spill] sm:$0xff] %v11263_v16 }
 0x711   :  { %v7294_v33 = vmax.f32 %v7293_v60, %v5644_v50  ;;  %v3526_v57 = vpop.f32.mrf.mxu2  ;;  %v3775_v23 = vpop.f32.mrf.mxu3 }
 0x712   :  { %v5623_v29 = vmax.f32 %v4005_v21, 0.0  ;;  %v3527_v4 = vadd.f32 %v3526_v57, %v10425_v28  ;;  %v3776_v46 = vadd.f32 %v3775_v23, %v10350_v62 }
 0x714   :  { %v7450_v54 = vmax.f32 %v7449_v61, %v5623_v29  ;;  %v5685_v49 = vmax.f32 %v3527_v4, 0.0  ;;  %v5686_v3 = vmax.f32 %v3776_v46, 0.0  ;;  %v3267_v40 = vpop.f32.mrf.mxu1 }
 0x715   :  { %v3268_v47 = vadd.f32 %v3267_v40, %v10463_v25 }
 0x716   :  { %v7352_v27 = vmax.f32 %v7351_v26, %v5685_v49  ;;  %v7405_v51 = vmax.f32 %v7404_v32, %v5686_v3  ;;  %3568 = vmatmul.bf16.gmra.mxu2 %v11263_v16  ;;  %3817 = vmatmul.bf16.gmra.mxu3 %v11263_v16 }
 0x717   :  { %v5652_v60 = vmax.f32 %v3268_v47, 0.0  ;;  %v4007_v9 = vpop.f32.mrf.mxu0 }
 0x718   :  { %v4008_v10 = vadd.f32 %v4007_v9, %v10492_v35 }
 0x719   :  { %v7295_v50 = vmax.f32 %v7294_v33, %v5652_v60  ;;  %v3529_v58 = vpop.f32.mrf.mxu2  ;;  %v3778_v39 = vpop.f32.mrf.mxu3 }
 0x71a   :  { %v5631_v21 = vmax.f32 %v4008_v10, 0.0  ;;  %v3530_v61 = vadd.f32 %v3529_v58, %v10425_v28  ;;  %v3779_v57 = vadd.f32 %v3778_v39, %v10350_v62  ;;  %4046 = vmatmul.bf16.gmra.mxu0 %v11168_v31 }
 0x71c   :  { %v7451_v26 = vmax.f32 %v7450_v54, %v5631_v21  ;;  %v5693_v32 = vmax.f32 %v3530_v61, 0.0  ;;  %v5694_v23 = vmax.f32 %v3779_v57, 0.0  ;;  %v3270_v41 = vpop.f32.mrf.mxu1 }
 0x71d   :  { %v3271_v29 = vadd.f32 %v3270_v41, %v10463_v25 }
 0x71e   :  { %v7353_v4 = vmax.f32 %v7352_v27, %v5693_v32  ;;  %v7406_v46 = vmax.f32 %v7405_v51, %v5694_v23  ;;  %v12126_v32 = vld [vmem:[#allocation8_spill] sm:$0xff] }
 0x71f   :  { %v5660_v49 = vmax.f32 %v3271_v29, 0.0  ;;  %3309 = vmatmul.bf16.gmra.mxu1 %v11227_v19  ;;  %v4009_v33 = vpop.f32.mrf.mxu0 }
 0x720   :  { %v4010_v3 = vadd.f32 %v4009_v33, %v10492_v35 }
 0x721   :  { %v7296_v40 = vmax.f32 %v7295_v50, %v5660_v49  ;;  %v3531_v47 = vpop.f32.mrf.mxu2  ;;  %v3780_v60 = vpop.f32.mrf.mxu3 }
 0x722   :  { %v5639_v9 = vmax.f32 %v4010_v3, 0.0  ;;  %v3532_v10 = vadd.f32 %v3531_v47, %v10425_v28  ;;  %v3781_v54 = vadd.f32 %v3780_v60, %v10350_v62 }
 0x724   :  { %v7452_v58 = vmax.f32 %v7451_v26, %v5639_v9  ;;  %v5701_v39 = vmax.f32 %v3532_v10, 0.0  ;;  %v5702_v21 = vmax.f32 %v3781_v54, 0.0  ;;  %v3272_v61 = vpop.f32.mrf.mxu1 }
 0x725   :  { %v3273_v27 = vadd.f32 %v3272_v61, %v10463_v25 }
 0x726   :  { %v7354_v51 = vmax.f32 %v7353_v4, %v5701_v39  ;;  %v7407_v57 = vmax.f32 %v7406_v46, %v5702_v21  ;;  %4329 = vmatmul.bf16.vlgmr.msra.gmra.mxu2 %v12126_v32  ;;  %4578 = vmatmul.bf16.vlgmr.msra.gmra.mxu3 %v12126_v32 }
 0x727   :  { %v5668_v50 = vmax.f32 %v3273_v27, 0.0  ;;  %v4012_v23 = vpop.f32.mrf.mxu0 }
 0x728   :  { %v4013_v41 = vadd.f32 %v4012_v23, %v10492_v35 }
 0x729   :  { %v7297_v29 = vmax.f32 %v7296_v40, %v5668_v50  ;;  %v3534_v49 = vpop.f32.mrf.mxu2  ;;  %v3783_v33 = vpop.f32.mrf.mxu3 }
 0x72a   :  { %v5647_v3 = vmax.f32 %v4013_v41, 0.0  ;;  %v3535_v26 = vadd.f32 %v3534_v49, %v10425_v28  ;;  %v3784_v47 = vadd.f32 %v3783_v33, %v10350_v62  ;;  %4051 = vmatmul.bf16.gmra.mxu0 %v11202_v34 }
 0x72c   :  { %v7453_v4 = vmax.f32 %v7452_v58, %v5647_v3  ;;  %v5709_v46 = vmax.f32 %v3535_v26, 0.0  ;;  %v5710_v60 = vmax.f32 %v3784_v47, 0.0  ;;  %v3275_v9 = vpop.f32.mrf.mxu1 }
 0x72d   :  { %v3276_v10 = vadd.f32 %v3275_v9, %v10463_v25 }
 0x72e   :  { %v7355_v54 = vmax.f32 %v7354_v51, %v5709_v46  ;;  %v7408_v39 = vmax.f32 %v7407_v57, %v5710_v60  ;;  %v12127_v60 = vld [vmem:[#allocation10_spill] sm:$0xff] }
 0x72f   :  { %v5676_v21 = vmax.f32 %v3276_v10, 0.0  ;;  %3314 = vmatmul.bf16.gmra.mxu1 %v11245_v63  ;;  %v4014_v40 = vpop.f32.mrf.mxu0 }
 0x730   :  { %v4015_v61 = vadd.f32 %v4014_v40, %v10492_v35 }
 0x731   :  { %v7298_v27 = vmax.f32 %v7297_v29, %v5676_v21  ;;  %v3536_v50 = vpop.f32.mrf.mxu2  ;;  %v3785_v23 = vpop.f32.mrf.mxu3 }
 0x732   :  { %v5655_v41 = vmax.f32 %v4015_v61, 0.0  ;;  %v3537_v49 = vadd.f32 %v3536_v50, %v10425_v28  ;;  %v3786_v58 = vadd.f32 %v3785_v23, %v10350_v62 }
 0x734   :  { %v7454_v33 = vmax.f32 %v7453_v4, %v5655_v41  ;;  %v5717_v3 = vmax.f32 %v3537_v49, 0.0  ;;  %v5718_v26 = vmax.f32 %v3786_v58, 0.0  ;;  %v3277_v47 = vpop.f32.mrf.mxu1 }
 0x735   :  { %v3278_v51 = vadd.f32 %v3277_v47, %v10463_v25 }
 0x736   :  { %v7356_v57 = vmax.f32 %v7355_v54, %v5717_v3  ;;  %v7409_v46 = vmax.f32 %v7408_v39, %v5718_v26  ;;  %4334 = vmatmul.bf16.gmra.mxu2 %v12127_v60  ;;  %4583 = vmatmul.bf16.gmra.mxu3 %v12127_v60 }
 0x737   :  { %v5684_v29 = vmax.f32 %v3278_v51, 0.0  ;;  %v4017_v9 = vpop.f32.mrf.mxu0 }
 0x738   :  { %v4018_v10 = vadd.f32 %v4017_v9, %v10492_v35 }
 0x739   :  { %v7299_v21 = vmax.f32 %v7298_v27, %v5684_v29  ;;  %v3539_v40 = vpop.f32.mrf.mxu2  ;;  %v3788_v61 = vpop.f32.mrf.mxu3 }
 0x73a   :  { %v5663_v50 = vmax.f32 %v4018_v10, 0.0  ;;  %v3540_v4 = vadd.f32 %v3539_v40, %v10425_v28  ;;  %v3789_v23 = vadd.f32 %v3788_v61, %v10350_v62  ;;  %4056 = vmatmul.bf16.gmra.mxu0 %v11227_v19  ;;  %v12130_v19 = vld [vmem:[#allocation24_spill] sm:$0xff] }
 0x73c   :  { %v11296_v54 = vmax.f32 %v7454_v33, %v5663_v50  ;;  %v5725_v39 = vmax.f32 %v3540_v4, 0.0  ;;  %v5726_v41 = vmax.f32 %v3789_v23, 0.0  ;;  %v3280_v49 = vpop.f32.mrf.mxu1 }
 0x73d   :  { %v3281_v58 = vadd.f32 %v3280_v49, %v10463_v25 }
 0x73e   :  { %v7357_v3 = vmax.f32 %v7356_v57, %v5725_v39  ;;  %v7410_v26 = vmax.f32 %v7409_v46, %v5726_v41  ;;  %v12128_v46 = vld [vmem:[#allocation13_spill] sm:$0xff] }
 0x73f   :  { %v5692_v47 = vmax.f32 %v3281_v58, 0.0  ;;  %3319 = vmatmul.bf16.gmra.mxu1 %v11263_v16  ;;  %v11300_v27 = vpop.f32.mrf.mxu0 }
 0x741   :  { %v7300_v51 = vmax.f32 %v7299_v21, %v5692_v47  ;;  %v3541_v29 = vpop.f32.mrf.mxu2  ;;  %v3790_v9 = vpop.f32.mrf.mxu3 }
 0x742   :  { %v3542_v10 = vadd.f32 %v3541_v29, %v10425_v28  ;;  %v3791_v33 = vadd.f32 %v3790_v9, %v10350_v62 }
 0x744   :  { %v5733_v40 = vmax.f32 %v3542_v10, 0.0  ;;  %v5734_v61 = vmax.f32 %v3791_v33, 0.0  ;;  %v3282_v50 = vpop.f32.mrf.mxu1 }
 0x745   :  { %v3283_v4 = vadd.f32 %v3282_v50, %v10463_v25 }
 0x746   :  { %v7358_v23 = vmax.f32 %v7357_v3, %v5733_v40  ;;  %v7411_v57 = vmax.f32 %v7410_v26, %v5734_v61  ;;  %4339 = vmatmul.bf16.gmra.mxu2 %v12128_v46  ;;  %4588 = vmatmul.bf16.gmra.mxu3 %v12128_v46 }
 0x747   :  { %v5700_v39 = vmax.f32 %v3283_v4, 0.0  ;;  %v11307_v41 = vpop.f32.mrf.mxu0  ;;  %v12129_v4 = vld [vmem:[#allocation18_spill] sm:$0xff] }
 0x749   :  { %v7301_v21 = vmax.f32 %v7300_v51, %v5700_v39  ;;  %v3544_v49 = vpop.f32.mrf.mxu2  ;;  %v3793_v58 = vpop.f32.mrf.mxu3 }
 0x74a   :  { %v3545_v47 = vadd.f32 %v3544_v49, %v10425_v28  ;;  %v3794_v29 = vadd.f32 %v3793_v58, %v10350_v62  ;;  %4061 = vmatmul.bf16.gmra.mxu0 %v11245_v63 }
 0x74c   :  { %v5741_v9 = vmax.f32 %v3545_v47, 0.0  ;;  %v5742_v10 = vmax.f32 %v3794_v29, 0.0  ;;  %v3285_v3 = vpop.f32.mrf.mxu1 }
 0x74e   :  { %v7359_v26 = vmax.f32 %v7358_v23, %v5741_v9  ;;  %v11312_v33 = vmax.f32 %v7411_v57, %v5742_v10 }
 0x74f   :  { %v11314_v40 = vpop.f32.mrf.mxu0  ;;  %4080 = vmatmul.bf16.vlgmr.msra.gmra.mxu1 %v12126_v32 }
 0x751   :  { %v3546_v61 = vpop.f32.mrf.mxu2  ;;  %v3795_v51 = vpop.f32.mrf.mxu3 }
 0x752   :  { %v3547_v57 = vadd.f32 %v3546_v61, %v10425_v28 }
 0x754   :  { %v3287_v50 = vpop.f32.mrf.mxu1  ;;  %v5749_v10 = vmax.f32 %v3547_v57, 0.0 }
 0x755   :  { %v3288_v31 = vadd.f32 %v3287_v50, %v10463_v25 }
 0x756   :  { %4344 = vmatmul.bf16.gmra.mxu2 %v12129_v4  ;;  %4593 = vmatmul.bf16.gmra.mxu3 %v12129_v4 }
 0x757   :  { %v11319_v39 = vpop.f32.mrf.mxu0  ;;  %v5716_v14 = vmax.f32 %v3288_v31, 0.0 }
 0x759   :  { %v3549_v49 = vpop.f32.mrf.mxu2  ;;  %v3798_v58 = vpop.f32.mrf.mxu3 }
 0x75a   :  { %4066 = vmatmul.bf16.gmra.mxu0 %v11263_v16  ;;  %v6760_v49 = vsel %vm5972_vm1, %v5749_v10, -inf  ;;  %v3286_v16 = vadd.f32 %v3285_v3, %v10463_v25 }
 0x75b   :  { %v7360_v34 = vmax.f32 %v7359_v26, %v6760_v49 }
 0x75c   :  { %v3290_v23 = vpop.f32.mrf.mxu1  ;;  %v5708_v57 = vmax.f32 %v3286_v16, 0.0 }
 0x75d   :  { %v7371_v11 = vrot.slane %v7360_v34, 4 }
 0x75e   :  { %v7302_v48 = vmax.f32 %v7301_v21, %v5708_v57 }
 0x75f   :  { %v11323_v47 = vpop.f32.mrf.mxu0  ;;  %4085 = vmatmul.bf16.gmra.mxu1 %v12127_v60  ;;  %v7372_v50 = vmax.f32 %v7360_v34, %v7371_v11 }
 0x761   :  { %v3551_v29 = vpop.f32.mrf.mxu2  ;;  %v3800_v9 = vpop.f32.mrf.mxu3  ;;  %v7373_v31 = vrot.slane %v7372_v50, 2 }
 0x762   :  { %v3291_v29 = vadd.f32 %v3290_v23, %v10463_v25 }
 0x764   :  { %v3292_v63 = vpop.f32.mrf.mxu1  ;;  %v5724_v3 = vmax.f32 %v3291_v29, 0.0 }
 0x765   :  { %v3293_v17 = vadd.f32 %v3292_v63, %v10463_v25  ;;  %v12131_v63 = vld [vmem:[#allocation27_spill] sm:$0xff] }
 0x766   :  { %4349 = vmatmul.bf16.gmra.mxu2 %v12130_v19  ;;  %4598 = vmatmul.bf16.gmra.mxu3 %v12130_v19 }
 0x767   :  { %v11330_v58 = vpop.f32.mrf.mxu0 }
 0x769   :  { %v3554_v28 = vpop.f32.mrf.mxu2  ;;  %v3803_v61 = vpop.f32.mrf.mxu3 }
 0x76a   :  { %4827 = vmatmul.bf16.vlgmr.msra.gmra.mxu0 %v12126_v32  ;;  %v7303_v61 = vmax.f32 %v7302_v48, %v5716_v14  ;;  %v5732_v32 = vmax.f32 %v3293_v17, 0.0  ;;  %v7374_v48 = vmax.f32 %v7372_v50, %v7373_v31  ;;  %v4028_v50 = vadd.f32 %v11319_v39, %v10492_v35 }
 0x76b   :  { %v4033_v39 = vadd.f32 %v11330_v58, %v10492_v35 }
 0x76c   :  { %v3295_v9 = vpop.f32.mrf.mxu1  ;;  %v7304_v16 = vmax.f32 %v7303_v61, %v5724_v3  ;;  %v3796_v3 = vadd.f32 %v3795_v51, %v10350_v62  ;;  %v4030_v51 = vadd.f32 %v11323_v47, %v10492_v35 }
 0x76d   :  { %v3296_v28 = vadd.f32 %v3295_v9, %v10463_v25  ;;  %v4020_v9 = vadd.f32 %v11300_v27, %v10492_v35  ;;  %v7375_v27 = vrot.slane %v7374_v48, 1 }
 0x76e   :  { %v7305_v55 = vmax.f32 %v7304_v16, %v5732_v32 }
 0x76f   :  { %v4034_v10 = vpop.f32.mrf.mxu0  ;;  %4090 = vmatmul.bf16.gmra.mxu1 %v12128_v46  ;;  %v5740_v52 = vmax.f32 %v3296_v28, 0.0 }
 0x771   :  { %v3556_v26 = vpop.f32.mrf.mxu2  ;;  %v3805_v49 = vpop.f32.mrf.mxu3  ;;  %v7306_v29 = vmax.f32 %v7305_v55, %v5740_v52  ;;  %v5671_v55 = vmax.f32 %v4020_v9, 0.0  ;;  %v4025_v52 = vadd.f32 %v11314_v40, %v10492_v35  ;;  %v7376_v40 = vmax.f32 %v7374_v48, %v7375_v27 }
 0x773   :  { %v5687_v62 = vmax.f32 %v4025_v52, 0.0 }
 0x774   :  { %v3297_v23 = vpop.f32.mrf.mxu1 }
 0x775   :  { %v3298_v13 = vadd.f32 %v3297_v23, %v10463_v25  ;;  %v4023_v25 = vadd.f32 %v11307_v41, %v10492_v35  ;;  %v7456_v41 = vmax.f32 %v11296_v54, %v5671_v55  ;;  %v5703_v54 = vmax.f32 %v4030_v51, 0.0 }
 0x776   :  { %4354 = vmatmul.bf16.gmra.mxu2 %v12131_v63  ;;  %4603 = vmatmul.bf16.gmra.mxu3 %v12131_v63 }
 0x777   :  { %v5748_v21 = vmax.f32 %v3298_v13, 0.0  ;;  %v4037_v57 = vpop.f32.mrf.mxu0  ;;  %v5679_v49 = vmax.f32 %v4023_v25, 0.0  ;;  %v7717_v25 = vrot.slane %v7376_v40, 6 }
 0x778   :  { %v4038_v58 = vadd.f32 %v4037_v57, %v10492_v35 }
 0x779   :  { %v6759_v17 = vsel %vm5972_vm1, %v5748_v21, -inf  ;;  %v3559_v14 = vpop.f32.mrf.mxu2  ;;  %v3808_v11 = vpop.f32.mrf.mxu3  ;;  %v7457_v21 = vmax.f32 %v7456_v41, %v5679_v49 }
 0x77a   :  { %v7307_v34 = vmax.f32 %v7306_v29, %v6759_v17  ;;  %4832 = vmatmul.bf16.gmra.mxu0 %v12127_v60  ;;  %v5750_v60 = vmax.f32 %v3796_v3, 0.0  ;;  %v5695_v29 = vmax.f32 %v4028_v50, 0.0  ;;  %v12132_v3 = vld [vmem:[#allocation32_spill] sm:$0xff]  ;;  %v5727_v41 = vmax.f32 %v4038_v58, 0.0 }
 0x77b   :  { %v7458_v11 = vmax.f32 %v7457_v21, %v5687_v62 }
 0x77c   :  { %v7318_v13 = vrot.slane %v7307_v34, 4  ;;  %v3300_v28 = vpop.f32.mrf.mxu1  ;;  %v6761_v9 = vsel %vm5972_vm1, %v5750_v60, -inf }
 0x77d   :  { %v7413_v48 = vmax.f32 %v11312_v33, %v6761_v9  ;;  %v5711_v28 = vmax.f32 %v4033_v39, 0.0 }
 0x77e   :  { %v7319_v26 = vmax.f32 %v7307_v34, %v7318_v13  ;;  %v4035_v34 = vadd.f32 %v4034_v10, %v10492_v35  ;;  %v7459_v13 = vmax.f32 %v7458_v11, %v5695_v29 }
 0x77f   :  { %v4039_v61 = vpop.f32.mrf.mxu0  ;;  %4095 = vmatmul.bf16.gmra.mxu1 %v12129_v4  ;;  %v7424_v60 = vrot.slane %v7413_v48, 4 }
 0x780   :  { %v7320_v32 = vrot.slane %v7319_v26, 2  ;;  %v7460_v27 = vmax.f32 %v7459_v13, %v5703_v54  ;;  %v4040_v49 = vadd.f32 %v4039_v61, %v10492_v35 }
 0x781   :  { %v3561_v16 = vpop.f32.mrf.mxu2  ;;  %v3810_v23 = vpop.f32.mrf.mxu3  ;;  %v7425_v57 = vmax.f32 %v7413_v48, %v7424_v60 }
 0x782   :  { %v7321_v31 = vmax.f32 %v7319_v26, %v7320_v32  ;;  %v5719_v26 = vmax.f32 %v4035_v34, 0.0  ;;  %v7461_v32 = vmax.f32 %v7460_v27, %v5711_v28  ;;  %v5735_v16 = vmax.f32 %v4040_v49, 0.0  ;;  %v12133_v34 = vld [vmem:[#allocation38_spill] sm:$0xff] }
 0x783   :  { %v7426_v9 = vrot.slane %v7425_v57, 2 }
 0x784   :  { %v7322_v17 = vrot.slane %v7321_v31, 1  ;;  %v3302_v14 = vpop.f32.mrf.mxu1  ;;  %v7462_v51 = vmax.f32 %v7461_v32, %v5719_v26 }
 0x786   :  { %v7323_v47 = vmax.f32 %v7321_v31, %v7322_v17  ;;  %4359 = vmatmul.bf16.gmra.mxu2 %v12132_v3  ;;  %4608 = vmatmul.bf16.gmra.mxu3 %v12132_v3  ;;  %v7463_v23 = vmax.f32 %v7462_v51, %v5727_v41 }
 0x787   :  { %v4042_v55 = vpop.f32.mrf.mxu0 }
 0x788   :  { %v7732_v52 = vsel %vm7723_vm2, %v7323_v47, %v7717_v25  ;;  %v4043_v33 = vadd.f32 %v4042_v55, %v10492_v35  ;;  %v7464_v21 = vmax.f32 %v7463_v23, %v5735_v16  ;;  %v7427_v25 = vmax.f32 %v7425_v57, %v7426_v9  ;;  %v12134_v57 = vld [vmem:[#allocation43_spill] sm:$0xff] }
 0x789   :  { %v3564_v10 = vpop.f32.mrf.mxu2  ;;  %v3813_v50 = vpop.f32.mrf.mxu3 }
 0x78a   :  { %4837 = vmatmul.bf16.gmra.mxu0 %v12128_v46  ;;  %v5743_v40 = vmax.f32 %v4043_v33, 0.0  ;;  %v7428_v58 = vrot.slane %v7427_v25, 1 }
 0x78c   :  { %v3305_v62 = vpop.f32.mrf.mxu1  ;;  %v7465_v17 = vmax.f32 %v7464_v21, %v5743_v40  ;;  %v7429_v49 = vmax.f32 %v7427_v25, %v7428_v58 }
 0x78e   :  { %v7718_v33 = vrot.slane %v7429_v49, 4 }
 0x78f   :  { %v4044_v31 = vpop.f32.mrf.mxu0  ;;  %4100 = vmatmul.bf16.gmra.mxu1 %v12130_v19 }
 0x790   :  { %v4045_v61 = vadd.f32 %v4044_v31, %v10492_v35 }
 0x791   :  { %v3566_v29 = vpop.f32.mrf.mxu2  ;;  %v3815_v39 = vpop.f32.mrf.mxu3 }
 0x792   :  { %v5751_v46 = vmax.f32 %v4045_v61, 0.0 }
 0x794   :  { %v6762_v14 = vsel %vm5972_vm1, %v5751_v46, -inf  ;;  %v3307_v11 = vpop.f32.mrf.mxu1 }
 0x795   :  { %v7466_v54 = vmax.f32 %v7465_v17, %v6762_v14 }
 0x796   :  { %4364 = vmatmul.bf16.gmra.mxu2 %v12133_v34  ;;  %4613 = vmatmul.bf16.gmra.mxu3 %v12133_v34 }
 0x797   :  { %v7477_v47 = vrot.slane %v7466_v54, 4  ;;  %v4047_v48 = vpop.f32.mrf.mxu0 }
 0x799   :  { %v7478_v13 = vmax.f32 %v7466_v54, %v7477_v47  ;;  %v3569_v35 = vpop.f32.mrf.mxu2  ;;  %v3818_v28 = vpop.f32.mrf.mxu3 }
 0x79a   :  { %4842 = vmatmul.bf16.gmra.mxu0 %v12129_v4 }
 0x79b   :  { %v7479_v55 = vrot.slane %v7478_v13, 2 }
 0x79c   :  { %v3310_v27 = vpop.f32.mrf.mxu1 }
 0x79d   :  { %v7480_v26 = vmax.f32 %v7478_v13, %v7479_v55 }
 0x79f   :  { %v7481_v10 = vrot.slane %v7480_v26, 1  ;;  %v4049_v50 = vpop.f32.mrf.mxu0  ;;  %4105 = vmatmul.bf16.gmra.mxu1 %v12131_v63 }
 0x7a1   :  { %v7482_v60 = vmax.f32 %v7480_v26, %v7481_v10  ;;  %v3571_v32 = vpop.f32.mrf.mxu2  ;;  %v3820_v41 = vpop.f32.mrf.mxu3 }
 0x7a3   :  { %v7719_v62 = vrot.slane %v7482_v60, 2 }
 0x7a4   :  { %v3312_v51 = vpop.f32.mrf.mxu1 }
 0x7a5   :  { %v7733_v16 = vsel %vm7725_vm3, %v7718_v33, %v7719_v62 }
 0x7a6   :  { %4369 = vmatmul.bf16.gmra.mxu2 %v12134_v57  ;;  %4618 = vmatmul.bf16.gmra.mxu3 %v12134_v57  ;;  %v7734_v4 = vsel %vm7727_vm4, %v7732_v52, %v7733_v16  ;;  %v11391_v52 = vld [vmem:[%s11927_s6] sm:$0xff]  ;;  %s8400_s6 = smov [#allocation2]  }
 0x7a7   :  { %v4052_v23 = vpop.f32.mrf.mxu0  ;;  %v7742_v40 = vrot.slane %v7734_v4, 7  ;;  %v11394_v46 = vperm.slane %v11391_v52, 5  ;;  %v11397_v9 = vperm.slane %v11391_v52, 6  ;;  %s7767_s28 = sshll.u32 %s8400_s6, 4  ;;  %s7768_s28 = int_to_ptr.vmem [resolvable:$true] %s7767_s28 }
 0x7a9   :  { %v4330_v31 = vpop.f32.mrf.mxu2  ;;  %v4579_v61 = vpop.f32.mrf.mxu3  ;;  %v7744_v21 = vsel %vm7743_vm5, %v7742_v40, %v10942_v0 }
 0x7aa   :  { %4847 = vmatmul.bf16.gmra.mxu0 %v12130_v19  ;;  %v7746_v29 = vsel %vm7745_vm6, %v7742_v40, %v7744_v21  ;;  %v4331_v14 = vadd.f32 %v4330_v31, %v11394_v46  ;;  %v4580_v11 = vadd.f32 %v4579_v61, %v11397_v9 }
 0x7ab   :  { %v7748_v39 = vsel %vm7747_vm7, %v7742_v40, %v7746_v29 }
 0x7ac   :  { %v3315_v17 = vpop.f32.mrf.mxu1  ;;  %v7750_v0 = vsel %vm7749_vm8, %v7742_v40, %v7748_v39  ;;  %v5073_v13 = vmax.f32 %v4331_v14, 0.0  ;;  %v5074_v35 = vmax.f32 %v4580_v11, 0.0 }
 0x7ad   :  { %7760 = vst [vmem:[#allocation2] sm:$0xff] %v7750_v0 }
 0x7af   :  { %v4054_v19 = vpop.f32.mrf.mxu0  ;;  %4110 = vmatmul.bf16.gmra.mxu1 %v12132_v3 }
 0x7b1   :  { %v4332_v54 = vpop.f32.mrf.mxu2  ;;  %v4581_v25 = vpop.f32.mrf.mxu3 }
 0x7b2   :  { %v4333_v47 = vadd.f32 %v4332_v54, %v11394_v46  ;;  %v4582_v48 = vadd.f32 %v4581_v25, %v11397_v9 }
 0x7b4   :  { %v5081_v28 = vmax.f32 %v4333_v47, 0.0  ;;  %v5082_v58 = vmax.f32 %v4582_v48, 0.0  ;;  %v3317_v55 = vpop.f32.mrf.mxu1 }
 0x7b6   :  { %v7112_v27 = vmax.f32 %v5073_v13, %v5081_v28  ;;  %v7165_v26 = vmax.f32 %v5074_v35, %v5082_v58  ;;  %4374 = vmatmul.bf16.gmra.mxu2 %v10356_v56  ;;  %4623 = vmatmul.bf16.gmra.mxu3 %v10356_v56  ;;  %v11419_v28 = vperm.slane %v11391_v52, 4 }
 0x7b7   :  { %v4057_v49 = vpop.f32.mrf.mxu0 }
 0x7b9   :  { %v4335_v10 = vpop.f32.mrf.mxu2  ;;  %v4584_v50 = vpop.f32.mrf.mxu3 }
 0x7ba   :  { %v4336_v60 = vadd.f32 %v4335_v10, %v11394_v46  ;;  %v4585_v32 = vadd.f32 %v4584_v50, %v11397_v9  ;;  %4852 = vmatmul.bf16.gmra.mxu0 %v12131_v63 }
 0x7bc   :  { %v5089_v41 = vmax.f32 %v4336_v60, 0.0  ;;  %v5090_v33 = vmax.f32 %v4585_v32, 0.0  ;;  %v3320_v62 = vpop.f32.mrf.mxu1 }
 0x7be   :  { %v7113_v51 = vmax.f32 %v7112_v27, %v5089_v41  ;;  %v7166_v16 = vmax.f32 %v7165_v26, %v5090_v33 }
 0x7bf   :  { %v4059_v4 = vpop.f32.mrf.mxu0  ;;  %4115 = vmatmul.bf16.gmra.mxu1 %v12133_v34 }
 0x7c1   :  { %v4337_v23 = vpop.f32.mrf.mxu2  ;;  %v4586_v40 = vpop.f32.mrf.mxu3 }
 0x7c2   :  { %v4338_v31 = vadd.f32 %v4337_v23, %v11394_v46  ;;  %v4587_v61 = vadd.f32 %v4586_v40, %v11397_v9 }
 0x7c4   :  { %v5097_v21 = vmax.f32 %v4338_v31, 0.0  ;;  %v5098_v29 = vmax.f32 %v4587_v61, 0.0  ;;  %v3322_v39 = vpop.f32.mrf.mxu1 }
 0x7c6   :  { %v7114_v17 = vmax.f32 %v7113_v51, %v5097_v21  ;;  %v7167_v0 = vmax.f32 %v7166_v16, %v5098_v29  ;;  %4379 = vmatmul.bf16.gmra.mxu2 %v10371_v8  ;;  %4628 = vmatmul.bf16.gmra.mxu3 %v10371_v8 }
 0x7c7   :  { %v4062_v63 = vpop.f32.mrf.mxu0 }
 0x7c9   :  { %v4340_v19 = vpop.f32.mrf.mxu2  ;;  %v4589_v14 = vpop.f32.mrf.mxu3 }
 0x7ca   :  { %v4341_v11 = vadd.f32 %v4340_v19, %v11394_v46  ;;  %v4590_v54 = vadd.f32 %v4589_v14, %v11397_v9  ;;  %4857 = vmatmul.bf16.gmra.mxu0 %v12132_v3 }
 0x7cc   :  { %v5105_v25 = vmax.f32 %v4341_v11, 0.0  ;;  %v5106_v47 = vmax.f32 %v4590_v54, 0.0  ;;  %v4081_v48 = vpop.f32.mrf.mxu1 }
 0x7cd   :  { %v4082_v10 = vadd.f32 %v4081_v48, %v11419_v28 }
 0x7ce   :  { %v7115_v13 = vmax.f32 %v7114_v17, %v5105_v25  ;;  %v7168_v35 = vmax.f32 %v7167_v0, %v5106_v47 }
 0x7cf   :  { %v4064_v58 = vpop.f32.mrf.mxu0  ;;  %4120 = vmatmul.bf16.gmra.mxu1 %v12134_v57  ;;  %v5072_v62 = vmax.f32 %v4082_v10, 0.0 }
 0x7d1   :  { %v4342_v55 = vpop.f32.mrf.mxu2  ;;  %v4591_v27 = vpop.f32.mrf.mxu3 }
 0x7d2   :  { %v4343_v26 = vadd.f32 %v4342_v55, %v11394_v46  ;;  %v4592_v49 = vadd.f32 %v4591_v27, %v11397_v9 }
 0x7d4   :  { %v5113_v3 = vmax.f32 %v4343_v26, 0.0  ;;  %v5114_v50 = vmax.f32 %v4592_v49, 0.0  ;;  %v4083_v60 = vpop.f32.mrf.mxu1 }
 0x7d5   :  { %v4084_v32 = vadd.f32 %v4083_v60, %v11419_v28  ;;  %v11439_v60 = vperm.slane %v11391_v52, 7 }
 0x7d6   :  { %v7116_v41 = vmax.f32 %v7115_v13, %v5113_v3  ;;  %v7169_v33 = vmax.f32 %v7168_v35, %v5114_v50  ;;  %4384 = vmatmul.bf16.gmra.mxu2 %v10445_v37  ;;  %4633 = vmatmul.bf16.gmra.mxu3 %v10445_v37 }
 0x7d7   :  { %v5080_v51 = vmax.f32 %v4084_v32, 0.0  ;;  %v4067_v16 = vpop.f32.mrf.mxu0 }
 0x7d9   :  { %v7059_v4 = vmax.f32 %v5072_v62, %v5080_v51  ;;  %v4345_v23 = vpop.f32.mrf.mxu2  ;;  %v4594_v40 = vpop.f32.mrf.mxu3 }
 0x7da   :  { %v4346_v31 = vadd.f32 %v4345_v23, %v11394_v46  ;;  %v4595_v61 = vadd.f32 %v4594_v40, %v11397_v9  ;;  %4862 = vmatmul.bf16.gmra.mxu0 %v12133_v34 }
 0x7dc   :  { %v5121_v21 = vmax.f32 %v4346_v31, 0.0  ;;  %v5122_v29 = vmax.f32 %v4595_v61, 0.0  ;;  %v4086_v39 = vpop.f32.mrf.mxu1 }
 0x7dd   :  { %v4087_v17 = vadd.f32 %v4086_v39, %v11419_v28 }
 0x7de   :  { %v7117_v0 = vmax.f32 %v7116_v41, %v5121_v21  ;;  %v7170_v63 = vmax.f32 %v7169_v33, %v5122_v29 }
 0x7df   :  { %v5088_v19 = vmax.f32 %v4087_v17, 0.0  ;;  %v4069_v14 = vpop.f32.mrf.mxu0  ;;  %4125 = vmatmul.bf16.gmra.mxu1 %v10356_v56 }
 0x7e1   :  { %v7060_v11 = vmax.f32 %v7059_v4, %v5088_v19  ;;  %v4347_v54 = vpop.f32.mrf.mxu2  ;;  %v4596_v25 = vpop.f32.mrf.mxu3 }
 0x7e2   :  { %v4348_v47 = vadd.f32 %v4347_v54, %v11394_v46  ;;  %v4597_v48 = vadd.f32 %v4596_v25, %v11397_v9 }
 0x7e4   :  { %v5129_v13 = vmax.f32 %v4348_v47, 0.0  ;;  %v5130_v34 = vmax.f32 %v4597_v48, 0.0  ;;  %v4088_v35 = vpop.f32.mrf.mxu1 }
 0x7e5   :  { %v4089_v58 = vadd.f32 %v4088_v35, %v11419_v28 }
 0x7e6   :  { %v7118_v55 = vmax.f32 %v7117_v0, %v5129_v13  ;;  %v7171_v27 = vmax.f32 %v7170_v63, %v5130_v34  ;;  %4389 = vmatmul.bf16.gmra.mxu2 %v10479_v6  ;;  %4638 = vmatmul.bf16.gmra.mxu3 %v10479_v6 }
 0x7e7   :  { %v5096_v26 = vmax.f32 %v4089_v58, 0.0  ;;  %v4828_v49 = vpop.f32.mrf.mxu0 }
 0x7e8   :  { %v4829_v4 = vadd.f32 %v4828_v49, %v11439_v60 }
 0x7e9   :  { %v7061_v10 = vmax.f32 %v7060_v11, %v5096_v26  ;;  %v4350_v3 = vpop.f32.mrf.mxu2  ;;  %v4599_v50 = vpop.f32.mrf.mxu3 }
 0x7ea   :  { %v4351_v32 = vadd.f32 %v4350_v3, %v11394_v46  ;;  %v4600_v41 = vadd.f32 %v4599_v50, %v11397_v9  ;;  %4867 = vmatmul.bf16.gmra.mxu0 %v12134_v57  ;;  %v5075_v17 = vmax.f32 %v4829_v4, 0.0 }
 0x7ec   :  { %v5137_v33 = vmax.f32 %v4351_v32, 0.0  ;;  %v5138_v62 = vmax.f32 %v4600_v41, 0.0  ;;  %v4091_v51 = vpop.f32.mrf.mxu1 }
 0x7ed   :  { %v4092_v16 = vadd.f32 %v4091_v51, %v11419_v28 }
 0x7ee   :  { %v7119_v23 = vmax.f32 %v7118_v55, %v5137_v33  ;;  %v7172_v40 = vmax.f32 %v7171_v27, %v5138_v62 }
 0x7ef   :  { %v5104_v31 = vmax.f32 %v4092_v16, 0.0  ;;  %4130 = vmatmul.bf16.gmra.mxu1 %v10371_v8  ;;  %v4830_v52 = vpop.f32.mrf.mxu0 }
 0x7f0   :  { %v4831_v61 = vadd.f32 %v4830_v52, %v11439_v60 }
 0x7f1   :  { %v7062_v21 = vmax.f32 %v7061_v10, %v5104_v31  ;;  %v4352_v29 = vpop.f32.mrf.mxu2  ;;  %v4601_v39 = vpop.f32.mrf.mxu3 }
 0x7f2   :  { %v5083_v57 = vmax.f32 %v4831_v61, 0.0  ;;  %v4353_v0 = vadd.f32 %v4352_v29, %v11394_v46  ;;  %v4602_v63 = vadd.f32 %v4601_v39, %v11397_v9 }
 0x7f4   :  { %v7218_v19 = vmax.f32 %v5075_v17, %v5083_v57  ;;  %v5145_v14 = vmax.f32 %v4353_v0, 0.0  ;;  %v5146_v11 = vmax.f32 %v4602_v63, 0.0  ;;  %v4093_v54 = vpop.f32.mrf.mxu1 }
 0x7f5   :  { %v4094_v25 = vadd.f32 %v4093_v54, %v11419_v28 }
 0x7f6   :  { %v7120_v47 = vmax.f32 %v7119_v23, %v5145_v14  ;;  %v7173_v48 = vmax.f32 %v7172_v40, %v5146_v11  ;;  %4394 = vmatmul.bf16.gmra.mxu2 %v10511_v43  ;;  %4643 = vmatmul.bf16.gmra.mxu3 %v10511_v43 }
 0x7f7   :  { %v5112_v13 = vmax.f32 %v4094_v25, 0.0  ;;  %v4833_v34 = vpop.f32.mrf.mxu0 }
 0x7f8   :  { %v4834_v35 = vadd.f32 %v4833_v34, %v11439_v60 }
 0x7f9   :  { %v7063_v58 = vmax.f32 %v7062_v21, %v5112_v13  ;;  %v4355_v55 = vpop.f32.mrf.mxu2  ;;  %v4604_v27 = vpop.f32.mrf.mxu3 }
 0x7fa   :  { %v5091_v26 = vmax.f32 %v4834_v35, 0.0  ;;  %v4356_v49 = vadd.f32 %v4355_v55, %v11394_v46  ;;  %v4605_v10 = vadd.f32 %v4604_v27, %v11397_v9  ;;  %4872 = vmatmul.bf16.gmra.mxu0 %v10356_v56 }
 0x7fc   :  { %v7219_v3 = vmax.f32 %v7218_v19, %v5091_v26  ;;  %v5153_v50 = vmax.f32 %v4356_v49, 0.0  ;;  %v5154_v32 = vmax.f32 %v4605_v10, 0.0  ;;  %v4096_v41 = vpop.f32.mrf.mxu1 }
 0x7fd   :  { %v4097_v33 = vadd.f32 %v4096_v41, %v11419_v28 }
 0x7fe   :  { %v7121_v62 = vmax.f32 %v7120_v47, %v5153_v50  ;;  %v7174_v51 = vmax.f32 %v7173_v48, %v5154_v32 }
 0x7ff   :  { %v5120_v16 = vmax.f32 %v4097_v33, 0.0  ;;  %4135 = vmatmul.bf16.gmra.mxu1 %v10445_v37  ;;  %v4835_v4 = vpop.f32.mrf.mxu0 }
 0x800   :  { %v4836_v23 = vadd.f32 %v4835_v4, %v11439_v60 }
 0x801   :  { %v7064_v40 = vmax.f32 %v7063_v58, %v5120_v16  ;;  %v4357_v31 = vpop.f32.mrf.mxu2  ;;  %v4606_v52 = vpop.f32.mrf.mxu3 }
 0x802   :  { %v5099_v61 = vmax.f32 %v4836_v23, 0.0  ;;  %v4358_v56 = vadd.f32 %v4357_v31, %v11394_v46  ;;  %v4607_v21 = vadd.f32 %v4606_v52, %v11397_v9 }
 0x804   :  { %v7220_v29 = vmax.f32 %v7219_v3, %v5099_v61  ;;  %v5161_v39 = vmax.f32 %v4358_v56, 0.0  ;;  %v5162_v17 = vmax.f32 %v4607_v21, 0.0  ;;  %v4098_v57 = vpop.f32.mrf.mxu1 }
 0x805   :  { %v4099_v0 = vadd.f32 %v4098_v57, %v11419_v28 }
 0x806   :  { %v7122_v63 = vmax.f32 %v7121_v62, %v5161_v39  ;;  %v7175_v19 = vmax.f32 %v7174_v51, %v5162_v17  ;;  %4399 = vmatmul.bf16.gmra.mxu2 %v10541_v22  ;;  %4648 = vmatmul.bf16.gmra.mxu3 %v10541_v22 }
 0x807   :  { %v5128_v14 = vmax.f32 %v4099_v0, 0.0  ;;  %v4838_v11 = vpop.f32.mrf.mxu0 }
 0x808   :  { %v4839_v54 = vadd.f32 %v4838_v11, %v11439_v60 }
 0x809   :  { %v7065_v25 = vmax.f32 %v7064_v40, %v5128_v14  ;;  %v4360_v47 = vpop.f32.mrf.mxu2  ;;  %v4609_v48 = vpop.f32.mrf.mxu3 }
 0x80a   :  { %v5107_v13 = vmax.f32 %v4839_v54, 0.0  ;;  %v4361_v34 = vadd.f32 %v4360_v47, %v11394_v46  ;;  %v4610_v35 = vadd.f32 %v4609_v48, %v11397_v9  ;;  %4877 = vmatmul.bf16.gmra.mxu0 %v10371_v8 }
 0x80c   :  { %v7221_v58 = vmax.f32 %v7220_v29, %v5107_v13  ;;  %v5169_v55 = vmax.f32 %v4361_v34, 0.0  ;;  %v5170_v27 = vmax.f32 %v4610_v35, 0.0  ;;  %v4101_v26 = vpop.f32.mrf.mxu1 }
 0x80d   :  { %v4102_v49 = vadd.f32 %v4101_v26, %v11419_v28 }
 0x80e   :  { %v7123_v10 = vmax.f32 %v7122_v63, %v5169_v55  ;;  %v7176_v3 = vmax.f32 %v7175_v19, %v5170_v27 }
 0x80f   :  { %v5136_v50 = vmax.f32 %v4102_v49, 0.0  ;;  %4140 = vmatmul.bf16.gmra.mxu1 %v10479_v6  ;;  %v4840_v32 = vpop.f32.mrf.mxu0 }
 0x810   :  { %v4841_v41 = vadd.f32 %v4840_v32, %v11439_v60 }
 0x811   :  { %v7066_v33 = vmax.f32 %v7065_v25, %v5136_v50  ;;  %v4362_v62 = vpop.f32.mrf.mxu2  ;;  %v4611_v51 = vpop.f32.mrf.mxu3 }
 0x812   :  { %v5115_v16 = vmax.f32 %v4841_v41, 0.0  ;;  %v4363_v8 = vadd.f32 %v4362_v62, %v11394_v46  ;;  %v4612_v4 = vadd.f32 %v4611_v51, %v11397_v9 }
 0x814   :  { %v7222_v23 = vmax.f32 %v7221_v58, %v5115_v16  ;;  %v5177_v40 = vmax.f32 %v4363_v8, 0.0  ;;  %v5178_v31 = vmax.f32 %v4612_v4, 0.0  ;;  %v4103_v52 = vpop.f32.mrf.mxu1 }
 0x815   :  { %v4104_v61 = vadd.f32 %v4103_v52, %v11419_v28 }
 0x816   :  { %v7124_v56 = vmax.f32 %v7123_v10, %v5177_v40  ;;  %v7177_v21 = vmax.f32 %v7176_v3, %v5178_v31  ;;  %4404 = vmatmul.bf16.gmra.mxu2 %v10570_v20  ;;  %4653 = vmatmul.bf16.gmra.mxu3 %v10570_v20 }
 0x817   :  { %v5144_v29 = vmax.f32 %v4104_v61, 0.0  ;;  %v4843_v39 = vpop.f32.mrf.mxu0 }
 0x818   :  { %v4844_v17 = vadd.f32 %v4843_v39, %v11439_v60 }
 0x819   :  { %v7067_v57 = vmax.f32 %v7066_v33, %v5144_v29  ;;  %v4365_v0 = vpop.f32.mrf.mxu2  ;;  %v4614_v63 = vpop.f32.mrf.mxu3 }
 0x81a   :  { %v5123_v19 = vmax.f32 %v4844_v17, 0.0  ;;  %v4366_v14 = vadd.f32 %v4365_v0, %v11394_v46  ;;  %v4615_v11 = vadd.f32 %v4614_v63, %v11397_v9  ;;  %4882 = vmatmul.bf16.gmra.mxu0 %v10445_v37 }
 0x81c   :  { %v7223_v54 = vmax.f32 %v7222_v23, %v5123_v19  ;;  %v5185_v25 = vmax.f32 %v4366_v14, 0.0  ;;  %v5186_v47 = vmax.f32 %v4615_v11, 0.0  ;;  %v4106_v48 = vpop.f32.mrf.mxu1 }
 0x81d   :  { %v4107_v13 = vadd.f32 %v4106_v48, %v11419_v28 }
 0x81e   :  { %v7125_v34 = vmax.f32 %v7124_v56, %v5185_v25  ;;  %v7178_v35 = vmax.f32 %v7177_v21, %v5186_v47 }
 0x81f   :  { %v5152_v58 = vmax.f32 %v4107_v13, 0.0  ;;  %4145 = vmatmul.bf16.gmra.mxu1 %v10511_v43  ;;  %v4845_v55 = vpop.f32.mrf.mxu0 }
 0x820   :  { %v4846_v27 = vadd.f32 %v4845_v55, %v11439_v60 }
 0x821   :  { %v7068_v26 = vmax.f32 %v7067_v57, %v5152_v58  ;;  %v4367_v49 = vpop.f32.mrf.mxu2  ;;  %v4616_v10 = vpop.f32.mrf.mxu3 }
 0x822   :  { %v5131_v3 = vmax.f32 %v4846_v27, 0.0  ;;  %v4368_v37 = vadd.f32 %v4367_v49, %v11394_v46  ;;  %v4617_v50 = vadd.f32 %v4616_v10, %v11397_v9 }
 0x824   :  { %v7224_v32 = vmax.f32 %v7223_v54, %v5131_v3  ;;  %v5193_v41 = vmax.f32 %v4368_v37, 0.0  ;;  %v5194_v33 = vmax.f32 %v4617_v50, 0.0  ;;  %v4108_v62 = vpop.f32.mrf.mxu1 }
 0x825   :  { %v4109_v51 = vadd.f32 %v4108_v62, %v11419_v28 }
 0x826   :  { %v7126_v16 = vmax.f32 %v7125_v34, %v5193_v41  ;;  %v7179_v8 = vmax.f32 %v7178_v35, %v5194_v33  ;;  %4409 = vmatmul.bf16.gmra.mxu2 %v10586_v18  ;;  %4658 = vmatmul.bf16.gmra.mxu3 %v10586_v18 }
 0x827   :  { %v5160_v4 = vmax.f32 %v4109_v51, 0.0  ;;  %v4848_v23 = vpop.f32.mrf.mxu0 }
 0x828   :  { %v4849_v40 = vadd.f32 %v4848_v23, %v11439_v60 }
 0x829   :  { %v7069_v31 = vmax.f32 %v7068_v26, %v5160_v4  ;;  %v4370_v52 = vpop.f32.mrf.mxu2  ;;  %v4619_v61 = vpop.f32.mrf.mxu3 }
 0x82a   :  { %v5139_v56 = vmax.f32 %v4849_v40, 0.0  ;;  %v4371_v21 = vadd.f32 %v4370_v52, %v11394_v46  ;;  %v4620_v29 = vadd.f32 %v4619_v61, %v11397_v9  ;;  %4887 = vmatmul.bf16.gmra.mxu0 %v10479_v6 }
 0x82c   :  { %v7225_v39 = vmax.f32 %v7224_v32, %v5139_v56  ;;  %v5201_v17 = vmax.f32 %v4371_v21, 0.0  ;;  %v5202_v57 = vmax.f32 %v4620_v29, 0.0  ;;  %v4111_v0 = vpop.f32.mrf.mxu1 }
 0x82d   :  { %v4112_v63 = vadd.f32 %v4111_v0, %v11419_v28 }
 0x82e   :  { %v7127_v19 = vmax.f32 %v7126_v16, %v5201_v17  ;;  %v7180_v14 = vmax.f32 %v7179_v8, %v5202_v57 }
 0x82f   :  { %v5168_v11 = vmax.f32 %v4112_v63, 0.0  ;;  %4150 = vmatmul.bf16.gmra.mxu1 %v10541_v22  ;;  %v4850_v54 = vpop.f32.mrf.mxu0 }
 0x830   :  { %v4851_v25 = vadd.f32 %v4850_v54, %v11439_v60 }
 0x831   :  { %v7070_v47 = vmax.f32 %v7069_v31, %v5168_v11  ;;  %v4372_v48 = vpop.f32.mrf.mxu2  ;;  %v4621_v13 = vpop.f32.mrf.mxu3 }
 0x832   :  { %v5147_v34 = vmax.f32 %v4851_v25, 0.0  ;;  %v4373_v6 = vadd.f32 %v4372_v48, %v11394_v46  ;;  %v4622_v35 = vadd.f32 %v4621_v13, %v11397_v9 }
 0x834   :  { %v7226_v58 = vmax.f32 %v7225_v39, %v5147_v34  ;;  %v5209_v55 = vmax.f32 %v4373_v6, 0.0  ;;  %v5210_v27 = vmax.f32 %v4622_v35, 0.0  ;;  %v4113_v26 = vpop.f32.mrf.mxu1 }
 0x835   :  { %v4114_v49 = vadd.f32 %v4113_v26, %v11419_v28 }
 0x836   :  { %v7128_v10 = vmax.f32 %v7127_v19, %v5209_v55  ;;  %v7181_v3 = vmax.f32 %v7180_v14, %v5210_v27  ;;  %4414 = vmatmul.bf16.gmra.mxu2 %v10602_v2  ;;  %4663 = vmatmul.bf16.gmra.mxu3 %v10602_v2 }
 0x837   :  { %v5176_v37 = vmax.f32 %v4114_v49, 0.0  ;;  %v4853_v50 = vpop.f32.mrf.mxu0 }
 0x838   :  { %v4854_v32 = vadd.f32 %v4853_v50, %v11439_v60 }
 0x839   :  { %v7071_v41 = vmax.f32 %v7070_v47, %v5176_v37  ;;  %v4375_v33 = vpop.f32.mrf.mxu2  ;;  %v4624_v62 = vpop.f32.mrf.mxu3 }
 0x83a   :  { %v5155_v51 = vmax.f32 %v4854_v32, 0.0  ;;  %v4376_v16 = vadd.f32 %v4375_v33, %v11394_v46  ;;  %v4625_v8 = vadd.f32 %v4624_v62, %v11397_v9  ;;  %4892 = vmatmul.bf16.gmra.mxu0 %v10511_v43 }
 0x83c   :  { %v7227_v4 = vmax.f32 %v7226_v58, %v5155_v51  ;;  %v5217_v23 = vmax.f32 %v4376_v16, 0.0  ;;  %v5218_v40 = vmax.f32 %v4625_v8, 0.0  ;;  %v4116_v31 = vpop.f32.mrf.mxu1 }
 0x83d   :  { %v4117_v52 = vadd.f32 %v4116_v31, %v11419_v28 }
 0x83e   :  { %v7129_v61 = vmax.f32 %v7128_v10, %v5217_v23  ;;  %v7182_v56 = vmax.f32 %v7181_v3, %v5218_v40 }
 0x83f   :  { %v5184_v21 = vmax.f32 %v4117_v52, 0.0  ;;  %4155 = vmatmul.bf16.gmra.mxu1 %v10570_v20  ;;  %v4855_v29 = vpop.f32.mrf.mxu0 }
 0x840   :  { %v4856_v39 = vadd.f32 %v4855_v29, %v11439_v60 }
 0x841   :  { %v7072_v17 = vmax.f32 %v7071_v41, %v5184_v21  ;;  %v4377_v57 = vpop.f32.mrf.mxu2  ;;  %v4626_v0 = vpop.f32.mrf.mxu3 }
 0x842   :  { %v5163_v63 = vmax.f32 %v4856_v39, 0.0  ;;  %v4378_v43 = vadd.f32 %v4377_v57, %v11394_v46  ;;  %v4627_v19 = vadd.f32 %v4626_v0, %v11397_v9 }
 0x844   :  { %v7228_v14 = vmax.f32 %v7227_v4, %v5163_v63  ;;  %v5225_v11 = vmax.f32 %v4378_v43, 0.0  ;;  %v5226_v54 = vmax.f32 %v4627_v19, 0.0  ;;  %v4118_v25 = vpop.f32.mrf.mxu1 }
 0x845   :  { %v4119_v47 = vadd.f32 %v4118_v25, %v11419_v28 }
 0x846   :  { %v7130_v48 = vmax.f32 %v7129_v61, %v5225_v11  ;;  %v7183_v13 = vmax.f32 %v7182_v56, %v5226_v54  ;;  %4419 = vmatmul.bf16.gmra.mxu2 %v10621_v38  ;;  %4668 = vmatmul.bf16.gmra.mxu3 %v10621_v38 }
 0x847   :  { %v5192_v34 = vmax.f32 %v4119_v47, 0.0  ;;  %v4858_v6 = vpop.f32.mrf.mxu0 }
 0x848   :  { %v4859_v35 = vadd.f32 %v4858_v6, %v11439_v60 }
 0x849   :  { %v7073_v58 = vmax.f32 %v7072_v17, %v5192_v34  ;;  %v4380_v55 = vpop.f32.mrf.mxu2  ;;  %v4629_v27 = vpop.f32.mrf.mxu3 }
 0x84a   :  { %v5171_v26 = vmax.f32 %v4859_v35, 0.0  ;;  %v4381_v49 = vadd.f32 %v4380_v55, %v11394_v46  ;;  %v4630_v10 = vadd.f32 %v4629_v27, %v11397_v9  ;;  %4897 = vmatmul.bf16.gmra.mxu0 %v10541_v22 }
 0x84c   :  { %v7229_v3 = vmax.f32 %v7228_v14, %v5171_v26  ;;  %v5233_v37 = vmax.f32 %v4381_v49, 0.0  ;;  %v5234_v50 = vmax.f32 %v4630_v10, 0.0  ;;  %v4121_v32 = vpop.f32.mrf.mxu1 }
 0x84d   :  { %v4122_v41 = vadd.f32 %v4121_v32, %v11419_v28 }
 0x84e   :  { %v7131_v33 = vmax.f32 %v7130_v48, %v5233_v37  ;;  %v7184_v62 = vmax.f32 %v7183_v13, %v5234_v50 }
 0x84f   :  { %v5200_v51 = vmax.f32 %v4122_v41, 0.0  ;;  %4160 = vmatmul.bf16.gmra.mxu1 %v10586_v18  ;;  %v4860_v16 = vpop.f32.mrf.mxu0 }
 0x850   :  { %v4861_v8 = vadd.f32 %v4860_v16, %v11439_v60 }
 0x851   :  { %v7074_v4 = vmax.f32 %v7073_v58, %v5200_v51  ;;  %v4382_v23 = vpop.f32.mrf.mxu2  ;;  %v4631_v40 = vpop.f32.mrf.mxu3 }
 0x852   :  { %v5179_v31 = vmax.f32 %v4861_v8, 0.0  ;;  %v4383_v22 = vadd.f32 %v4382_v23, %v11394_v46  ;;  %v4632_v52 = vadd.f32 %v4631_v40, %v11397_v9 }
 0x854   :  { %v7230_v61 = vmax.f32 %v7229_v3, %v5179_v31  ;;  %v5241_v56 = vmax.f32 %v4383_v22, 0.0  ;;  %v5242_v21 = vmax.f32 %v4632_v52, 0.0  ;;  %v4123_v29 = vpop.f32.mrf.mxu1 }
 0x855   :  { %v4124_v39 = vadd.f32 %v4123_v29, %v11419_v28 }
 0x856   :  { %v7132_v17 = vmax.f32 %v7131_v33, %v5241_v56  ;;  %v7185_v57 = vmax.f32 %v7184_v62, %v5242_v21  ;;  %4424 = vmatmul.bf16.gmra.mxu2 %v10645_v12  ;;  %4673 = vmatmul.bf16.gmra.mxu3 %v10645_v12 }
 0x857   :  { %v5208_v0 = vmax.f32 %v4124_v39, 0.0  ;;  %v4863_v63 = vpop.f32.mrf.mxu0 }
 0x858   :  { %v4864_v43 = vadd.f32 %v4863_v63, %v11439_v60 }
 0x859   :  { %v7075_v19 = vmax.f32 %v7074_v4, %v5208_v0  ;;  %v4385_v14 = vpop.f32.mrf.mxu2  ;;  %v4634_v11 = vpop.f32.mrf.mxu3 }
 0x85a   :  { %v5187_v54 = vmax.f32 %v4864_v43, 0.0  ;;  %v4386_v25 = vadd.f32 %v4385_v14, %v11394_v46  ;;  %v4635_v47 = vadd.f32 %v4634_v11, %v11397_v9  ;;  %4902 = vmatmul.bf16.gmra.mxu0 %v10570_v20 }
 0x85c   :  { %v7231_v48 = vmax.f32 %v7230_v61, %v5187_v54  ;;  %v5249_v13 = vmax.f32 %v4386_v25, 0.0  ;;  %v5250_v34 = vmax.f32 %v4635_v47, 0.0  ;;  %v4126_v6 = vpop.f32.mrf.mxu1 }
 0x85d   :  { %v4127_v35 = vadd.f32 %v4126_v6, %v11419_v28 }
 0x85e   :  { %v7133_v58 = vmax.f32 %v7132_v17, %v5249_v13  ;;  %v7186_v55 = vmax.f32 %v7185_v57, %v5250_v34 }
 0x85f   :  { %v5216_v27 = vmax.f32 %v4127_v35, 0.0  ;;  %4165 = vmatmul.bf16.gmra.mxu1 %v10602_v2  ;;  %v4865_v26 = vpop.f32.mrf.mxu0 }
 0x860   :  { %v4866_v49 = vadd.f32 %v4865_v26, %v11439_v60 }
 0x861   :  { %v7076_v10 = vmax.f32 %v7075_v19, %v5216_v27  ;;  %v4387_v3 = vpop.f32.mrf.mxu2  ;;  %v4636_v37 = vpop.f32.mrf.mxu3 }
 0x862   :  { %v5195_v50 = vmax.f32 %v4866_v49, 0.0  ;;  %v4388_v20 = vadd.f32 %v4387_v3, %v11394_v46  ;;  %v4637_v32 = vadd.f32 %v4636_v37, %v11397_v9 }
 0x864   :  { %v7232_v41 = vmax.f32 %v7231_v48, %v5195_v50  ;;  %v5257_v33 = vmax.f32 %v4388_v20, 0.0  ;;  %v5258_v62 = vmax.f32 %v4637_v32, 0.0  ;;  %v4128_v51 = vpop.f32.mrf.mxu1 }
 0x865   :  { %v4129_v16 = vadd.f32 %v4128_v51, %v11419_v28 }
 0x866   :  { %v7134_v8 = vmax.f32 %v7133_v58, %v5257_v33  ;;  %v7187_v4 = vmax.f32 %v7186_v55, %v5258_v62  ;;  %4429 = vmatmul.bf16.gmra.mxu2 %v10673_v24  ;;  %4678 = vmatmul.bf16.gmra.mxu3 %v10673_v24 }
 0x867   :  { %v5224_v23 = vmax.f32 %v4129_v16, 0.0  ;;  %v4868_v40 = vpop.f32.mrf.mxu0 }
 0x868   :  { %v4869_v31 = vadd.f32 %v4868_v40, %v11439_v60 }
 0x869   :  { %v7077_v22 = vmax.f32 %v7076_v10, %v5224_v23  ;;  %v4390_v52 = vpop.f32.mrf.mxu2  ;;  %v4639_v61 = vpop.f32.mrf.mxu3 }
 0x86a   :  { %v5203_v56 = vmax.f32 %v4869_v31, 0.0  ;;  %v4391_v21 = vadd.f32 %v4390_v52, %v11394_v46  ;;  %v4640_v29 = vadd.f32 %v4639_v61, %v11397_v9  ;;  %4907 = vmatmul.bf16.gmra.mxu0 %v10586_v18 }
 0x86c   :  { %v7233_v39 = vmax.f32 %v7232_v41, %v5203_v56  ;;  %v5265_v17 = vmax.f32 %v4391_v21, 0.0  ;;  %v5266_v57 = vmax.f32 %v4640_v29, 0.0  ;;  %v4131_v0 = vpop.f32.mrf.mxu1 }
 0x86d   :  { %v4132_v63 = vadd.f32 %v4131_v0, %v11419_v28 }
 0x86e   :  { %v7135_v43 = vmax.f32 %v7134_v8, %v5265_v17  ;;  %v7188_v19 = vmax.f32 %v7187_v4, %v5266_v57 }
 0x86f   :  { %v5232_v14 = vmax.f32 %v4132_v63, 0.0  ;;  %4170 = vmatmul.bf16.gmra.mxu1 %v10621_v38  ;;  %v4870_v11 = vpop.f32.mrf.mxu0 }
 0x870   :  { %v4871_v54 = vadd.f32 %v4870_v11, %v11439_v60 }
 0x871   :  { %v7078_v25 = vmax.f32 %v7077_v22, %v5232_v14  ;;  %v4392_v47 = vpop.f32.mrf.mxu2  ;;  %v4641_v48 = vpop.f32.mrf.mxu3 }
 0x872   :  { %v5211_v13 = vmax.f32 %v4871_v54, 0.0  ;;  %v4393_v18 = vadd.f32 %v4392_v47, %v11394_v46  ;;  %v4642_v34 = vadd.f32 %v4641_v48, %v11397_v9 }
 0x874   :  { %v7234_v6 = vmax.f32 %v7233_v39, %v5211_v13  ;;  %v5273_v35 = vmax.f32 %v4393_v18, 0.0  ;;  %v5274_v58 = vmax.f32 %v4642_v34, 0.0  ;;  %v4133_v55 = vpop.f32.mrf.mxu1 }
 0x875   :  { %v4134_v27 = vadd.f32 %v4133_v55, %v11419_v28 }
 0x876   :  { %v7136_v26 = vmax.f32 %v7135_v43, %v5273_v35  ;;  %v7189_v49 = vmax.f32 %v7188_v19, %v5274_v58  ;;  %4434 = vmatmul.bf16.gmra.mxu2 %v10702_v5  ;;  %4683 = vmatmul.bf16.gmra.mxu3 %v10702_v5 }
 0x877   :  { %v5240_v10 = vmax.f32 %v4134_v27, 0.0  ;;  %v4873_v3 = vpop.f32.mrf.mxu0 }
 0x878   :  { %v4874_v37 = vadd.f32 %v4873_v3, %v11439_v60 }
 0x879   :  { %v7079_v50 = vmax.f32 %v7078_v25, %v5240_v10  ;;  %v4395_v20 = vpop.f32.mrf.mxu2  ;;  %v4644_v32 = vpop.f32.mrf.mxu3 }
 0x87a   :  { %v5219_v41 = vmax.f32 %v4874_v37, 0.0  ;;  %v4396_v33 = vadd.f32 %v4395_v20, %v11394_v46  ;;  %v4645_v62 = vadd.f32 %v4644_v32, %v11397_v9  ;;  %4912 = vmatmul.bf16.gmra.mxu0 %v10602_v2 }
 0x87c   :  { %v7235_v51 = vmax.f32 %v7234_v6, %v5219_v41  ;;  %v5281_v16 = vmax.f32 %v4396_v33, 0.0  ;;  %v5282_v8 = vmax.f32 %v4645_v62, 0.0  ;;  %v4136_v4 = vpop.f32.mrf.mxu1 }
 0x87d   :  { %v4137_v23 = vadd.f32 %v4136_v4, %v11419_v28 }
 0x87e   :  { %v7137_v40 = vmax.f32 %v7136_v26, %v5281_v16  ;;  %v7190_v31 = vmax.f32 %v7189_v49, %v5282_v8 }
 0x87f   :  { %v5248_v22 = vmax.f32 %v4137_v23, 0.0  ;;  %4175 = vmatmul.bf16.gmra.mxu1 %v10645_v12  ;;  %v4875_v52 = vpop.f32.mrf.mxu0 }
 0x880   :  { %v4876_v61 = vadd.f32 %v4875_v52, %v11439_v60 }
 0x881   :  { %v7080_v56 = vmax.f32 %v7079_v50, %v5248_v22  ;;  %v4397_v21 = vpop.f32.mrf.mxu2  ;;  %v4646_v29 = vpop.f32.mrf.mxu3 }
 0x882   :  { %v5227_v39 = vmax.f32 %v4876_v61, 0.0  ;;  %v4398_v2 = vadd.f32 %v4397_v21, %v11394_v46  ;;  %v4647_v17 = vadd.f32 %v4646_v29, %v11397_v9 }
 0x884   :  { %v7236_v57 = vmax.f32 %v7235_v51, %v5227_v39  ;;  %v5289_v0 = vmax.f32 %v4398_v2, 0.0  ;;  %v5290_v63 = vmax.f32 %v4647_v17, 0.0  ;;  %v4138_v43 = vpop.f32.mrf.mxu1 }
 0x885   :  { %v4139_v19 = vadd.f32 %v4138_v43, %v11419_v28 }
 0x886   :  { %v7138_v14 = vmax.f32 %v7137_v40, %v5289_v0  ;;  %v7191_v11 = vmax.f32 %v7190_v31, %v5290_v63  ;;  %4439 = vmatmul.bf16.gmra.mxu2 %v10720_v36  ;;  %4688 = vmatmul.bf16.gmra.mxu3 %v10720_v36 }
 0x887   :  { %v5256_v54 = vmax.f32 %v4139_v19, 0.0  ;;  %v4878_v25 = vpop.f32.mrf.mxu0 }
 0x888   :  { %v4879_v47 = vadd.f32 %v4878_v25, %v11439_v60 }
 0x889   :  { %v7081_v48 = vmax.f32 %v7080_v56, %v5256_v54  ;;  %v4400_v13 = vpop.f32.mrf.mxu2  ;;  %v4649_v18 = vpop.f32.mrf.mxu3 }
 0x88a   :  { %v5235_v34 = vmax.f32 %v4879_v47, 0.0  ;;  %v4401_v6 = vadd.f32 %v4400_v13, %v11394_v46  ;;  %v4650_v35 = vadd.f32 %v4649_v18, %v11397_v9  ;;  %4917 = vmatmul.bf16.gmra.mxu0 %v10621_v38 }
 0x88c   :  { %v7237_v58 = vmax.f32 %v7236_v57, %v5235_v34  ;;  %v5297_v55 = vmax.f32 %v4401_v6, 0.0  ;;  %v5298_v27 = vmax.f32 %v4650_v35, 0.0  ;;  %v4141_v26 = vpop.f32.mrf.mxu1 }
 0x88d   :  { %v4142_v49 = vadd.f32 %v4141_v26, %v11419_v28 }
 0x88e   :  { %v7139_v10 = vmax.f32 %v7138_v14, %v5297_v55  ;;  %v7192_v3 = vmax.f32 %v7191_v11, %v5298_v27 }
 0x88f   :  { %v5264_v37 = vmax.f32 %v4142_v49, 0.0  ;;  %4180 = vmatmul.bf16.gmra.mxu1 %v10673_v24  ;;  %v4880_v50 = vpop.f32.mrf.mxu0 }
 0x890   :  { %v4881_v20 = vadd.f32 %v4880_v50, %v11439_v60 }
 0x891   :  { %v7082_v32 = vmax.f32 %v7081_v48, %v5264_v37  ;;  %v4402_v41 = vpop.f32.mrf.mxu2  ;;  %v4651_v33 = vpop.f32.mrf.mxu3 }
 0x892   :  { %v5243_v62 = vmax.f32 %v4881_v20, 0.0  ;;  %v4403_v38 = vadd.f32 %v4402_v41, %v11394_v46  ;;  %v4652_v51 = vadd.f32 %v4651_v33, %v11397_v9 }
 0x894   :  { %v7238_v16 = vmax.f32 %v7237_v58, %v5243_v62  ;;  %v5305_v8 = vmax.f32 %v4403_v38, 0.0  ;;  %v5306_v4 = vmax.f32 %v4652_v51, 0.0  ;;  %v4143_v23 = vpop.f32.mrf.mxu1 }
 0x895   :  { %v4144_v40 = vadd.f32 %v4143_v23, %v11419_v28 }
 0x896   :  { %v7140_v31 = vmax.f32 %v7139_v10, %v5305_v8  ;;  %v7193_v22 = vmax.f32 %v7192_v3, %v5306_v4  ;;  %4444 = vmatmul.bf16.gmra.mxu2 %v10738_v15  ;;  %4693 = vmatmul.bf16.gmra.mxu3 %v10738_v15 }
 0x897   :  { %v5272_v52 = vmax.f32 %v4144_v40, 0.0  ;;  %v4883_v61 = vpop.f32.mrf.mxu0 }
 0x898   :  { %v4884_v56 = vadd.f32 %v4883_v61, %v11439_v60 }
 0x899   :  { %v7083_v21 = vmax.f32 %v7082_v32, %v5272_v52  ;;  %v4405_v29 = vpop.f32.mrf.mxu2  ;;  %v4654_v39 = vpop.f32.mrf.mxu3 }
 0x89a   :  { %v5251_v2 = vmax.f32 %v4884_v56, 0.0  ;;  %v4406_v17 = vadd.f32 %v4405_v29, %v11394_v46  ;;  %v4655_v57 = vadd.f32 %v4654_v39, %v11397_v9  ;;  %4922 = vmatmul.bf16.gmra.mxu0 %v10645_v12 }
 0x89c   :  { %v7239_v0 = vmax.f32 %v7238_v16, %v5251_v2  ;;  %v5313_v63 = vmax.f32 %v4406_v17, 0.0  ;;  %v5314_v43 = vmax.f32 %v4655_v57, 0.0  ;;  %v4146_v19 = vpop.f32.mrf.mxu1 }
 0x89d   :  { %v4147_v14 = vadd.f32 %v4146_v19, %v11419_v28 }
 0x89e   :  { %v7141_v11 = vmax.f32 %v7140_v31, %v5313_v63  ;;  %v7194_v54 = vmax.f32 %v7193_v22, %v5314_v43 }
 0x89f   :  { %v5280_v25 = vmax.f32 %v4147_v14, 0.0  ;;  %4185 = vmatmul.bf16.gmra.mxu1 %v10702_v5  ;;  %v4885_v47 = vpop.f32.mrf.mxu0 }
 0x8a0   :  { %v4886_v48 = vadd.f32 %v4885_v47, %v11439_v60 }
 0x8a1   :  { %v7084_v13 = vmax.f32 %v7083_v21, %v5280_v25  ;;  %v4407_v18 = vpop.f32.mrf.mxu2  ;;  %v4656_v34 = vpop.f32.mrf.mxu3 }
 0x8a2   :  { %v5259_v6 = vmax.f32 %v4886_v48, 0.0  ;;  %v4408_v12 = vadd.f32 %v4407_v18, %v11394_v46  ;;  %v4657_v35 = vadd.f32 %v4656_v34, %v11397_v9 }
 0x8a4   :  { %v7240_v58 = vmax.f32 %v7239_v0, %v5259_v6  ;;  %v5321_v55 = vmax.f32 %v4408_v12, 0.0  ;;  %v5322_v27 = vmax.f32 %v4657_v35, 0.0  ;;  %v4148_v26 = vpop.f32.mrf.mxu1 }
 0x8a5   :  { %v4149_v49 = vadd.f32 %v4148_v26, %v11419_v28 }
 0x8a6   :  { %v7142_v10 = vmax.f32 %v7141_v11, %v5321_v55  ;;  %v7195_v3 = vmax.f32 %v7194_v54, %v5322_v27  ;;  %4449 = vmatmul.bf16.gmra.mxu2 %v10756_v44  ;;  %4698 = vmatmul.bf16.gmra.mxu3 %v10756_v44 }
 0x8a7   :  { %v5288_v37 = vmax.f32 %v4149_v49, 0.0  ;;  %v4888_v50 = vpop.f32.mrf.mxu0 }
 0x8a8   :  { %v4889_v20 = vadd.f32 %v4888_v50, %v11439_v60 }
 0x8a9   :  { %v7085_v32 = vmax.f32 %v7084_v13, %v5288_v37  ;;  %v4410_v41 = vpop.f32.mrf.mxu2  ;;  %v4659_v33 = vpop.f32.mrf.mxu3 }
 0x8aa   :  { %v5267_v62 = vmax.f32 %v4889_v20, 0.0  ;;  %v4411_v38 = vadd.f32 %v4410_v41, %v11394_v46  ;;  %v4660_v51 = vadd.f32 %v4659_v33, %v11397_v9  ;;  %4927 = vmatmul.bf16.gmra.mxu0 %v10673_v24 }
 0x8ac   :  { %v7241_v16 = vmax.f32 %v7240_v58, %v5267_v62  ;;  %v5329_v8 = vmax.f32 %v4411_v38, 0.0  ;;  %v5330_v4 = vmax.f32 %v4660_v51, 0.0  ;;  %v4151_v23 = vpop.f32.mrf.mxu1 }
 0x8ad   :  { %v4152_v40 = vadd.f32 %v4151_v23, %v11419_v28 }
 0x8ae   :  { %v7143_v31 = vmax.f32 %v7142_v10, %v5329_v8  ;;  %v7196_v22 = vmax.f32 %v7195_v3, %v5330_v4 }
 0x8af   :  { %v5296_v52 = vmax.f32 %v4152_v40, 0.0  ;;  %4190 = vmatmul.bf16.gmra.mxu1 %v10720_v36  ;;  %v4890_v61 = vpop.f32.mrf.mxu0 }
 0x8b0   :  { %v4891_v56 = vadd.f32 %v4890_v61, %v11439_v60 }
 0x8b1   :  { %v7086_v21 = vmax.f32 %v7085_v32, %v5296_v52  ;;  %v4412_v29 = vpop.f32.mrf.mxu2  ;;  %v4661_v39 = vpop.f32.mrf.mxu3 }
 0x8b2   :  { %v5275_v2 = vmax.f32 %v4891_v56, 0.0  ;;  %v4413_v24 = vadd.f32 %v4412_v29, %v11394_v46  ;;  %v4662_v17 = vadd.f32 %v4661_v39, %v11397_v9 }
 0x8b4   :  { %v7242_v57 = vmax.f32 %v7241_v16, %v5275_v2  ;;  %v5337_v0 = vmax.f32 %v4413_v24, 0.0  ;;  %v5338_v63 = vmax.f32 %v4662_v17, 0.0  ;;  %v4153_v43 = vpop.f32.mrf.mxu1 }
 0x8b5   :  { %v4154_v19 = vadd.f32 %v4153_v43, %v11419_v28 }
 0x8b6   :  { %v7144_v14 = vmax.f32 %v7143_v31, %v5337_v0  ;;  %v7197_v11 = vmax.f32 %v7196_v22, %v5338_v63  ;;  %4454 = vmatmul.bf16.gmra.mxu2 %v10457_v7  ;;  %4703 = vmatmul.bf16.gmra.mxu3 %v10457_v7 }
 0x8b7   :  { %v5304_v54 = vmax.f32 %v4154_v19, 0.0  ;;  %v4893_v25 = vpop.f32.mrf.mxu0 }
 0x8b8   :  { %v4894_v47 = vadd.f32 %v4893_v25, %v11439_v60 }
 0x8b9   :  { %v7087_v48 = vmax.f32 %v7086_v21, %v5304_v54  ;;  %v4415_v13 = vpop.f32.mrf.mxu2  ;;  %v4664_v18 = vpop.f32.mrf.mxu3 }
 0x8ba   :  { %v5283_v34 = vmax.f32 %v4894_v47, 0.0  ;;  %v4416_v6 = vadd.f32 %v4415_v13, %v11394_v46  ;;  %v4665_v12 = vadd.f32 %v4664_v18, %v11397_v9  ;;  %4932 = vmatmul.bf16.gmra.mxu0 %v10702_v5 }
 0x8bc   :  { %v7243_v35 = vmax.f32 %v7242_v57, %v5283_v34  ;;  %v5345_v58 = vmax.f32 %v4416_v6, 0.0  ;;  %v5346_v55 = vmax.f32 %v4665_v12, 0.0  ;;  %v4156_v27 = vpop.f32.mrf.mxu1 }
 0x8bd   :  { %v4157_v26 = vadd.f32 %v4156_v27, %v11419_v28 }
 0x8be   :  { %v7145_v49 = vmax.f32 %v7144_v14, %v5345_v58  ;;  %v7198_v10 = vmax.f32 %v7197_v11, %v5346_v55 }
 0x8bf   :  { %v5312_v3 = vmax.f32 %v4157_v26, 0.0  ;;  %4195 = vmatmul.bf16.gmra.mxu1 %v10738_v15  ;;  %v4895_v37 = vpop.f32.mrf.mxu0 }
 0x8c0   :  { %v4896_v50 = vadd.f32 %v4895_v37, %v11439_v60 }
 0x8c1   :  { %v7088_v20 = vmax.f32 %v7087_v48, %v5312_v3  ;;  %v4417_v32 = vpop.f32.mrf.mxu2  ;;  %v4666_v41 = vpop.f32.mrf.mxu3 }
 0x8c2   :  { %v5291_v33 = vmax.f32 %v4896_v50, 0.0  ;;  %v4418_v5 = vadd.f32 %v4417_v32, %v11394_v46  ;;  %v4667_v62 = vadd.f32 %v4666_v41, %v11397_v9 }
 0x8c4   :  { %v7244_v38 = vmax.f32 %v7243_v35, %v5291_v33  ;;  %v5353_v51 = vmax.f32 %v4418_v5, 0.0  ;;  %v5354_v16 = vmax.f32 %v4667_v62, 0.0  ;;  %v4158_v8 = vpop.f32.mrf.mxu1 }
 0x8c5   :  { %v4159_v4 = vadd.f32 %v4158_v8, %v11419_v28 }
 0x8c6   :  { %v7146_v23 = vmax.f32 %v7145_v49, %v5353_v51  ;;  %v7199_v40 = vmax.f32 %v7198_v10, %v5354_v16  ;;  %4459 = vmatmul.bf16.gmra.mxu2 %v10797_v53  ;;  %4708 = vmatmul.bf16.gmra.mxu3 %v10797_v53 }
 0x8c7   :  { %v5320_v31 = vmax.f32 %v4159_v4, 0.0  ;;  %v4898_v22 = vpop.f32.mrf.mxu0 }
 0x8c8   :  { %v4899_v52 = vadd.f32 %v4898_v22, %v11439_v60 }
 0x8c9   :  { %v7089_v61 = vmax.f32 %v7088_v20, %v5320_v31  ;;  %v4420_v56 = vpop.f32.mrf.mxu2  ;;  %v4669_v21 = vpop.f32.mrf.mxu3 }
 0x8ca   :  { %v5299_v29 = vmax.f32 %v4899_v52, 0.0  ;;  %v4421_v39 = vadd.f32 %v4420_v56, %v11394_v46  ;;  %v4670_v2 = vadd.f32 %v4669_v21, %v11397_v9  ;;  %4937 = vmatmul.bf16.gmra.mxu0 %v10720_v36 }
 0x8cc   :  { %v7245_v24 = vmax.f32 %v7244_v38, %v5299_v29  ;;  %v5361_v17 = vmax.f32 %v4421_v39, 0.0  ;;  %v5362_v57 = vmax.f32 %v4670_v2, 0.0  ;;  %v4161_v0 = vpop.f32.mrf.mxu1 }
 0x8cd   :  { %v4162_v63 = vadd.f32 %v4161_v0, %v11419_v28 }
 0x8ce   :  { %v7147_v43 = vmax.f32 %v7146_v23, %v5361_v17  ;;  %v7200_v19 = vmax.f32 %v7199_v40, %v5362_v57 }
 0x8cf   :  { %v5328_v14 = vmax.f32 %v4162_v63, 0.0  ;;  %4200 = vmatmul.bf16.gmra.mxu1 %v10756_v44  ;;  %v4900_v11 = vpop.f32.mrf.mxu0 }
 0x8d0   :  { %v4901_v54 = vadd.f32 %v4900_v11, %v11439_v60 }
 0x8d1   :  { %v7090_v25 = vmax.f32 %v7089_v61, %v5328_v14  ;;  %v4422_v47 = vpop.f32.mrf.mxu2  ;;  %v4671_v48 = vpop.f32.mrf.mxu3 }
 0x8d2   :  { %v5307_v13 = vmax.f32 %v4901_v54, 0.0  ;;  %v4423_v36 = vadd.f32 %v4422_v47, %v11394_v46  ;;  %v4672_v18 = vadd.f32 %v4671_v48, %v11397_v9 }
 0x8d4   :  { %v7246_v34 = vmax.f32 %v7245_v24, %v5307_v13  ;;  %v5369_v6 = vmax.f32 %v4423_v36, 0.0  ;;  %v5370_v12 = vmax.f32 %v4672_v18, 0.0  ;;  %v4163_v35 = vpop.f32.mrf.mxu1 }
 0x8d5   :  { %v4164_v58 = vadd.f32 %v4163_v35, %v11419_v28 }
 0x8d6   :  { %v6380_v55 = vsel %vm5972_vm1, %v5369_v6, -inf  ;;  %v6381_v27 = vsel %vm5972_vm1, %v5370_v12, -inf  ;;  %4464 = vmatmul.bf16.gmra.mxu2 %v10839_v42  ;;  %4713 = vmatmul.bf16.gmra.mxu3 %v10839_v42 }
 0x8d7   :  { %v7148_v26 = vmax.f32 %v7147_v43, %v6380_v55  ;;  %v11625_v49 = vmax.f32 %v7200_v19, %v6381_v27  ;;  %v5336_v10 = vmax.f32 %v4164_v58, 0.0  ;;  %v4903_v3 = vpop.f32.mrf.mxu0 }
 0x8d8   :  { %v4904_v37 = vadd.f32 %v4903_v3, %v11439_v60 }
 0x8d9   :  { %v7091_v50 = vmax.f32 %v7090_v25, %v5336_v10  ;;  %v4425_v20 = vpop.f32.mrf.mxu2  ;;  %v4674_v32 = vpop.f32.mrf.mxu3  ;;  %v7159_v0 = vrot.slane %v7148_v26, 4 }
 0x8da   :  { %v5315_v41 = vmax.f32 %v4904_v37, 0.0  ;;  %4942 = vmatmul.bf16.gmra.mxu0 %v10738_v15 }
 0x8db   :  { %v7160_v25 = vmax.f32 %v7148_v26, %v7159_v0 }
 0x8dc   :  { %v7247_v33 = vmax.f32 %v7246_v34, %v5315_v41  ;;  %v4166_v5 = vpop.f32.mrf.mxu1 }
 0x8dd   :  { %v4167_v62 = vadd.f32 %v4166_v5, %v11419_v28  ;;  %v7161_v36 = vrot.slane %v7160_v25, 2 }
 0x8df   :  { %v5344_v38 = vmax.f32 %v4167_v62, 0.0  ;;  %4205 = vmatmul.bf16.gmra.mxu1 %v10457_v7  ;;  %v4905_v51 = vpop.f32.mrf.mxu0  ;;  %v7162_v55 = vmax.f32 %v7160_v25, %v7161_v36 }
 0x8e0   :  { %v4906_v16 = vadd.f32 %v4905_v51, %v11439_v60 }
 0x8e1   :  { %v7092_v8 = vmax.f32 %v7091_v50, %v5344_v38  ;;  %v4427_v4 = vpop.f32.mrf.mxu2  ;;  %v4676_v23 = vpop.f32.mrf.mxu3  ;;  %v7163_v50 = vrot.slane %v7162_v55, 1 }
 0x8e2   :  { %v5323_v40 = vmax.f32 %v4906_v16, 0.0 }
 0x8e3   :  { %v7164_v38 = vmax.f32 %v7162_v55, %v7163_v50  ;;  %v12136_v50 = vld [vmem:[#allocation20_spill] sm:$0xff] }
 0x8e4   :  { %v7248_v31 = vmax.f32 %v7247_v33, %v5323_v40  ;;  %v4168_v22 = vpop.f32.mrf.mxu1 }
 0x8e5   :  { %v4169_v52 = vadd.f32 %v4168_v22, %v11419_v28 }
 0x8e6   :  { %4469 = vmatmul.bf16.gmra.mxu2 %v10859_v1  ;;  %4718 = vmatmul.bf16.gmra.mxu3 %v10859_v1 }
 0x8e7   :  { %v5352_v15 = vmax.f32 %v4169_v52, 0.0  ;;  %v4908_v61 = vpop.f32.mrf.mxu0 }
 0x8e8   :  { %v4909_v56 = vadd.f32 %v4908_v61, %v11439_v60 }
 0x8e9   :  { %v7093_v21 = vmax.f32 %v7092_v8, %v5352_v15  ;;  %v4430_v29 = vpop.f32.mrf.mxu2  ;;  %v4679_v39 = vpop.f32.mrf.mxu3 }
 0x8ea   :  { %v5331_v2 = vmax.f32 %v4909_v56, 0.0  ;;  %4947 = vmatmul.bf16.gmra.mxu0 %v10756_v44 }
 0x8ec   :  { %v7249_v24 = vmax.f32 %v7248_v31, %v5331_v2  ;;  %v4171_v17 = vpop.f32.mrf.mxu1 }
 0x8ed   :  { %v4172_v57 = vadd.f32 %v4171_v17, %v11419_v28 }
 0x8ef   :  { %v5360_v63 = vmax.f32 %v4172_v57, 0.0  ;;  %4210 = vmatmul.bf16.gmra.mxu1 %v10797_v53  ;;  %v4910_v43 = vpop.f32.mrf.mxu0 }
 0x8f0   :  { %v4911_v19 = vadd.f32 %v4910_v43, %v11439_v60 }
 0x8f1   :  { %v7094_v14 = vmax.f32 %v7093_v21, %v5360_v63  ;;  %v4432_v11 = vpop.f32.mrf.mxu2  ;;  %v4681_v54 = vpop.f32.mrf.mxu3  ;;  %v7212_v21 = vrot.slane %v11625_v49, 4 }
 0x8f2   :  { %v5339_v47 = vmax.f32 %v4911_v19, 0.0  ;;  %v12135_v11 = vld [vmem:[#allocation23_spill] sm:$0xff] }
 0x8f3   :  { %v7213_v2 = vmax.f32 %v11625_v49, %v7212_v21 }
 0x8f4   :  { %v7250_v48 = vmax.f32 %v7249_v24, %v5339_v47  ;;  %v4173_v13 = vpop.f32.mrf.mxu1 }
 0x8f5   :  { %v4174_v44 = vadd.f32 %v4173_v13, %v11419_v28  ;;  %v7214_v43 = vrot.slane %v7213_v2, 2 }
 0x8f6   :  { %4474 = vmatmul.bf16.gmra.mxu2 %v10873_v45  ;;  %4723 = vmatmul.bf16.gmra.mxu3 %v10873_v45 }
 0x8f7   :  { %v5368_v18 = vmax.f32 %v4174_v44, 0.0  ;;  %v4913_v34 = vpop.f32.mrf.mxu0  ;;  %v7215_v54 = vmax.f32 %v7213_v2, %v7214_v43 }
 0x8f8   :  { %v4914_v6 = vadd.f32 %v4913_v34, %v11439_v60 }
 0x8f9   :  { %v6379_v12 = vsel %vm5972_vm1, %v5368_v18, -inf  ;;  %v4435_v35 = vpop.f32.mrf.mxu2  ;;  %v4684_v58 = vpop.f32.mrf.mxu3  ;;  %v7216_v44 = vrot.slane %v7215_v54, 1 }
 0x8fa   :  { %v7095_v27 = vmax.f32 %v7094_v14, %v6379_v12  ;;  %v5347_v26 = vmax.f32 %v4914_v6, 0.0  ;;  %4952 = vmatmul.bf16.gmra.mxu0 %v10457_v7  ;;  %v7714_v7 = vrot.slane %v7164_v38, 6 }
 0x8fb   :  { %v7217_v6 = vmax.f32 %v7215_v54, %v7216_v44 }
 0x8fc   :  { %v7106_v10 = vrot.slane %v7095_v27, 4  ;;  %v7251_v3 = vmax.f32 %v7250_v48, %v5347_v26  ;;  %v4176_v37 = vpop.f32.mrf.mxu1 }
 0x8fd   :  { %v7715_v26 = vrot.slane %v7217_v6, 4 }
 0x8fe   :  { %v7107_v20 = vmax.f32 %v7095_v27, %v7106_v10 }
 0x8ff   :  { %4215 = vmatmul.bf16.gmra.mxu1 %v10839_v42  ;;  %v4915_v32 = vpop.f32.mrf.mxu0 }
 0x900   :  { %v7108_v41 = vrot.slane %v7107_v20, 2  ;;  %v4916_v33 = vadd.f32 %v4915_v32, %v11439_v60 }
 0x901   :  { %v4437_v5 = vpop.f32.mrf.mxu2  ;;  %v4686_v62 = vpop.f32.mrf.mxu3 }
 0x902   :  { %v7109_v51 = vmax.f32 %v7107_v20, %v7108_v41  ;;  %v5355_v16 = vmax.f32 %v4916_v33, 0.0 }
 0x904   :  { %v7110_v8 = vrot.slane %v7109_v51, 1  ;;  %v7252_v4 = vmax.f32 %v7251_v3, %v5355_v16  ;;  %v4178_v23 = vpop.f32.mrf.mxu1 }
 0x906   :  { %v7111_v40 = vmax.f32 %v7109_v51, %v7110_v8  ;;  %4479 = vmatmul.bf16.gmra.mxu2 %v10888_v59  ;;  %4728 = vmatmul.bf16.gmra.mxu3 %v10888_v59 }
 0x907   :  { %v4918_v31 = vpop.f32.mrf.mxu0 }
 0x908   :  { %v7729_v22 = vsel %vm7723_vm2, %v7111_v40, %v7714_v7  ;;  %v4919_v52 = vadd.f32 %v4918_v31, %v11439_v60 }
 0x909   :  { %v4440_v15 = vpop.f32.mrf.mxu2  ;;  %v4689_v61 = vpop.f32.mrf.mxu3 }
 0x90a   :  { %v5363_v56 = vmax.f32 %v4919_v52, 0.0  ;;  %4957 = vmatmul.bf16.gmra.mxu0 %v10797_v53  ;;  %v12137_v15 = vld [vmem:[#allocation29_spill] sm:$0xff] }
 0x90c   :  { %v7253_v29 = vmax.f32 %v7252_v4, %v5363_v56  ;;  %v4181_v39 = vpop.f32.mrf.mxu1 }
 0x90f   :  { %4220 = vmatmul.bf16.gmra.mxu1 %v10859_v1  ;;  %v4920_v24 = vpop.f32.mrf.mxu0 }
 0x910   :  { %v4921_v17 = vadd.f32 %v4920_v24, %v11439_v60 }
 0x911   :  { %v4442_v57 = vpop.f32.mrf.mxu2  ;;  %v4691_v0 = vpop.f32.mrf.mxu3 }
 0x912   :  { %v5371_v63 = vmax.f32 %v4921_v17, 0.0 }
 0x914   :  { %v6382_v19 = vsel %vm5972_vm1, %v5371_v63, -inf  ;;  %v4183_v14 = vpop.f32.mrf.mxu1 }
 0x915   :  { %v7254_v53 = vmax.f32 %v7253_v29, %v6382_v19 }
 0x916   :  { %4484 = vmatmul.bf16.gmra.mxu2 %v12135_v11  ;;  %4733 = vmatmul.bf16.gmra.mxu3 %v12135_v11 }
 0x917   :  { %v7265_v49 = vrot.slane %v7254_v53, 4  ;;  %v4923_v25 = vpop.f32.mrf.mxu0 }
 0x919   :  { %v7266_v47 = vmax.f32 %v7254_v53, %v7265_v49  ;;  %v4445_v48 = vpop.f32.mrf.mxu2  ;;  %v4694_v13 = vpop.f32.mrf.mxu3 }
 0x91a   :  { %4962 = vmatmul.bf16.gmra.mxu0 %v10839_v42 }
 0x91b   :  { %v7267_v36 = vrot.slane %v7266_v47, 2 }
 0x91c   :  { %v4186_v18 = vpop.f32.mrf.mxu1 }
 0x91d   :  { %v7268_v34 = vmax.f32 %v7266_v47, %v7267_v36 }
 0x91f   :  { %v7269_v12 = vrot.slane %v7268_v34, 1  ;;  %4225 = vmatmul.bf16.gmra.mxu1 %v10873_v45  ;;  %v4925_v35 = vpop.f32.mrf.mxu0 }
 0x921   :  { %v7270_v58 = vmax.f32 %v7268_v34, %v7269_v12  ;;  %v4447_v55 = vpop.f32.mrf.mxu2  ;;  %v4696_v27 = vpop.f32.mrf.mxu3 }
 0x923   :  { %v7716_v10 = vrot.slane %v7270_v58, 2 }
 0x924   :  { %v4188_v3 = vpop.f32.mrf.mxu1 }
 0x925   :  { %v7730_v37 = vsel %vm7725_vm3, %v7715_v26, %v7716_v10 }
 0x926   :  { %4489 = vmatmul.bf16.gmra.mxu2 %v12136_v50  ;;  %4738 = vmatmul.bf16.gmra.mxu3 %v12136_v50  ;;  %v11668_v42 = vsel %vm7727_vm4, %v7729_v22, %v7730_v37 }
 0x927   :  { %v4928_v20 = vpop.f32.mrf.mxu0 }
 0x929   :  { %v4450_v32 = vpop.f32.mrf.mxu2  ;;  %v4699_v41 = vpop.f32.mrf.mxu3 }
 0x92a   :  { %4967 = vmatmul.bf16.gmra.mxu0 %v10859_v1  ;;  %v4451_v62 = vadd.f32 %v4450_v32, %v11394_v46  ;;  %v4700_v38 = vadd.f32 %v4699_v41, %v11397_v9 }
 0x92c   :  { %v4191_v33 = vpop.f32.mrf.mxu1  ;;  %v5457_v23 = vmax.f32 %v4451_v62, 0.0  ;;  %v5458_v7 = vmax.f32 %v4700_v38, 0.0  ;;  %v12139_v38 = vld [vmem:[#allocation34_spill] sm:$0xff] }
 0x92f   :  { %4230 = vmatmul.bf16.gmra.mxu1 %v10888_v59  ;;  %v4930_v5 = vpop.f32.mrf.mxu0 }
 0x931   :  { %v4452_v51 = vpop.f32.mrf.mxu2  ;;  %v4701_v16 = vpop.f32.mrf.mxu3 }
 0x932   :  { %v4453_v8 = vadd.f32 %v4452_v51, %v11394_v46  ;;  %v4702_v4 = vadd.f32 %v4701_v16, %v11397_v9 }
 0x934   :  { %v5465_v40 = vmax.f32 %v4453_v8, 0.0  ;;  %v5466_v31 = vmax.f32 %v4702_v4, 0.0  ;;  %v4193_v22 = vpop.f32.mrf.mxu1 }
 0x936   :  { %v7536_v1 = vmax.f32 %v5457_v23, %v5465_v40  ;;  %v7589_v52 = vmax.f32 %v5458_v7, %v5466_v31  ;;  %4494 = vmatmul.bf16.gmra.mxu2 %v12137_v15  ;;  %4743 = vmatmul.bf16.gmra.mxu3 %v12137_v15 }
 0x937   :  { %v4933_v61 = vpop.f32.mrf.mxu0 }
 0x939   :  { %v4455_v56 = vpop.f32.mrf.mxu2  ;;  %v4704_v21 = vpop.f32.mrf.mxu3 }
 0x93a   :  { %v4456_v29 = vadd.f32 %v4455_v56, %v11394_v46  ;;  %v4705_v39 = vadd.f32 %v4704_v21, %v11397_v9  ;;  %4972 = vmatmul.bf16.gmra.mxu0 %v10873_v45  ;;  %v12138_v45 = vld [vmem:[#allocation25_spill] sm:$0xff] }
 0x93c   :  { %v5473_v2 = vmax.f32 %v4456_v29, 0.0  ;;  %v5474_v24 = vmax.f32 %v4705_v39, 0.0  ;;  %v4196_v17 = vpop.f32.mrf.mxu1 }
 0x93e   :  { %v7537_v57 = vmax.f32 %v7536_v1, %v5473_v2  ;;  %v7590_v0 = vmax.f32 %v7589_v52, %v5474_v24 }
 0x93f   :  { %4235 = vmatmul.bf16.gmra.mxu1 %v12135_v11  ;;  %v4935_v63 = vpop.f32.mrf.mxu0 }
 0x941   :  { %v4457_v43 = vpop.f32.mrf.mxu2  ;;  %v4706_v19 = vpop.f32.mrf.mxu3 }
 0x942   :  { %v4458_v14 = vadd.f32 %v4457_v43, %v11394_v46  ;;  %v4707_v53 = vadd.f32 %v4706_v19, %v11397_v9 }
 0x944   :  { %v5481_v54 = vmax.f32 %v4458_v14, 0.0  ;;  %v5482_v49 = vmax.f32 %v4707_v53, 0.0  ;;  %v4198_v25 = vpop.f32.mrf.mxu1 }
 0x946   :  { %v7538_v47 = vmax.f32 %v7537_v57, %v5481_v54  ;;  %v7591_v48 = vmax.f32 %v7590_v0, %v5482_v49  ;;  %4499 = vmatmul.bf16.gmra.mxu2 %v12138_v45  ;;  %4748 = vmatmul.bf16.gmra.mxu3 %v12138_v45  ;;  %v12140_v54 = vld [vmem:[#allocation30_spill] sm:$0xff] }
 0x947   :  { %v4938_v13 = vpop.f32.mrf.mxu0 }
 0x949   :  { %v4460_v44 = vpop.f32.mrf.mxu2  ;;  %v4709_v36 = vpop.f32.mrf.mxu3 }
 0x94a   :  { %v4461_v18 = vadd.f32 %v4460_v44, %v11394_v46  ;;  %v4710_v34 = vadd.f32 %v4709_v36, %v11397_v9  ;;  %4977 = vmatmul.bf16.gmra.mxu0 %v10888_v59 }
 0x94c   :  { %v5489_v6 = vmax.f32 %v4461_v18, 0.0  ;;  %v5490_v12 = vmax.f32 %v4710_v34, 0.0  ;;  %v4201_v35 = vpop.f32.mrf.mxu1 }
 0x94d   :  { %v4202_v20 = vadd.f32 %v4201_v35, %v11419_v28 }
 0x94e   :  { %v7539_v58 = vmax.f32 %v7538_v47, %v5489_v6  ;;  %v7592_v55 = vmax.f32 %v7591_v48, %v5490_v12 }
 0x94f   :  { %4240 = vmatmul.bf16.gmra.mxu1 %v12136_v50  ;;  %v4940_v27 = vpop.f32.mrf.mxu0  ;;  %v5456_v51 = vmax.f32 %v4202_v20, 0.0 }
 0x951   :  { %v4462_v26 = vpop.f32.mrf.mxu2  ;;  %v4711_v10 = vpop.f32.mrf.mxu3 }
 0x952   :  { %v4463_v3 = vadd.f32 %v4462_v26, %v11394_v46  ;;  %v4712_v37 = vadd.f32 %v4711_v10, %v11397_v9 }
 0x954   :  { %v5497_v32 = vmax.f32 %v4463_v3, 0.0  ;;  %v5498_v41 = vmax.f32 %v4712_v37, 0.0  ;;  %v4203_v33 = vpop.f32.mrf.mxu1 }
 0x955   :  { %v4204_v59 = vadd.f32 %v4203_v33, %v11419_v28 }
 0x956   :  { %v7540_v5 = vmax.f32 %v7539_v58, %v5497_v32  ;;  %v7593_v62 = vmax.f32 %v7592_v55, %v5498_v41  ;;  %4504 = vmatmul.bf16.gmra.mxu2 %v12139_v38  ;;  %4753 = vmatmul.bf16.gmra.mxu3 %v12139_v38 }
 0x957   :  { %v5464_v16 = vmax.f32 %v4204_v59, 0.0  ;;  %v4943_v8 = vpop.f32.mrf.mxu0 }
 0x959   :  { %v7483_v4 = vmax.f32 %v5456_v51, %v5464_v16  ;;  %v4465_v23 = vpop.f32.mrf.mxu2  ;;  %v4714_v7 = vpop.f32.mrf.mxu3 }
 0x95a   :  { %v4466_v40 = vadd.f32 %v4465_v23, %v11394_v46  ;;  %v4715_v31 = vadd.f32 %v4714_v7, %v11397_v9  ;;  %4982 = vmatmul.bf16.gmra.mxu0 %v12135_v11  ;;  %v12141_v23 = vld [vmem:[#allocation49_spill] sm:$0xff] }
 0x95c   :  { %v5505_v22 = vmax.f32 %v4466_v40, 0.0  ;;  %v5506_v1 = vmax.f32 %v4715_v31, 0.0  ;;  %v4206_v52 = vpop.f32.mrf.mxu1 }
 0x95d   :  { %v4207_v61 = vadd.f32 %v4206_v52, %v11419_v28 }
 0x95e   :  { %v7541_v56 = vmax.f32 %v7540_v5, %v5505_v22  ;;  %v7594_v21 = vmax.f32 %v7593_v62, %v5506_v1 }
 0x95f   :  { %v5472_v29 = vmax.f32 %v4207_v61, 0.0  ;;  %4245 = vmatmul.bf16.gmra.mxu1 %v12137_v15  ;;  %v4945_v39 = vpop.f32.mrf.mxu0 }
 0x961   :  { %v7484_v2 = vmax.f32 %v7483_v4, %v5472_v29  ;;  %v4467_v24 = vpop.f32.mrf.mxu2  ;;  %v4716_v17 = vpop.f32.mrf.mxu3 }
 0x962   :  { %v4468_v57 = vadd.f32 %v4467_v24, %v11394_v46  ;;  %v4717_v0 = vadd.f32 %v4716_v17, %v11397_v9 }
 0x964   :  { %v5513_v63 = vmax.f32 %v4468_v57, 0.0  ;;  %v5514_v11 = vmax.f32 %v4717_v0, 0.0  ;;  %v4208_v43 = vpop.f32.mrf.mxu1 }
 0x965   :  { %v4209_v19 = vadd.f32 %v4208_v43, %v11419_v28 }
 0x966   :  { %v7542_v14 = vmax.f32 %v7541_v56, %v5513_v63  ;;  %v7595_v53 = vmax.f32 %v7594_v21, %v5514_v11  ;;  %4509 = vmatmul.bf16.gmra.mxu2 %v12140_v54  ;;  %4758 = vmatmul.bf16.gmra.mxu3 %v12140_v54 }
 0x967   :  { %v5480_v49 = vmax.f32 %v4209_v19, 0.0  ;;  %v4948_v25 = vpop.f32.mrf.mxu0 }
 0x968   :  { %v4949_v35 = vadd.f32 %v4948_v25, %v11439_v60 }
 0x969   :  { %v7485_v47 = vmax.f32 %v7484_v2, %v5480_v49  ;;  %v4470_v48 = vpop.f32.mrf.mxu2  ;;  %v4719_v13 = vpop.f32.mrf.mxu3 }
 0x96a   :  { %v4471_v44 = vadd.f32 %v4470_v48, %v11394_v46  ;;  %v4720_v36 = vadd.f32 %v4719_v13, %v11397_v9  ;;  %4987 = vmatmul.bf16.gmra.mxu0 %v12136_v50  ;;  %v5459_v32 = vmax.f32 %v4949_v35, 0.0 }
 0x96c   :  { %v5521_v18 = vmax.f32 %v4471_v44, 0.0  ;;  %v5522_v34 = vmax.f32 %v4720_v36, 0.0  ;;  %v4211_v6 = vpop.f32.mrf.mxu1 }
 0x96d   :  { %v4212_v12 = vadd.f32 %v4211_v6, %v11419_v28  ;;  %v12142_v6 = vld [vmem:[#allocation40_spill] sm:$0xff] }
 0x96e   :  { %v7543_v58 = vmax.f32 %v7542_v14, %v5521_v18  ;;  %v7596_v55 = vmax.f32 %v7595_v53, %v5522_v34 }
 0x96f   :  { %v5488_v27 = vmax.f32 %v4212_v12, 0.0  ;;  %4250 = vmatmul.bf16.gmra.mxu1 %v12138_v45  ;;  %v4950_v26 = vpop.f32.mrf.mxu0 }
 0x970   :  { %v4951_v10 = vadd.f32 %v4950_v26, %v11439_v60 }
 0x971   :  { %v7486_v3 = vmax.f32 %v7485_v47, %v5488_v27  ;;  %v4472_v37 = vpop.f32.mrf.mxu2  ;;  %v4721_v20 = vpop.f32.mrf.mxu3 }
 0x972   :  { %v5467_v50 = vmax.f32 %v4951_v10, 0.0  ;;  %v4473_v41 = vadd.f32 %v4472_v37, %v11394_v46  ;;  %v4722_v33 = vadd.f32 %v4721_v20, %v11397_v9 }
 0x974   :  { %v7642_v59 = vmax.f32 %v5459_v32, %v5467_v50  ;;  %v5529_v5 = vmax.f32 %v4473_v41, 0.0  ;;  %v5530_v62 = vmax.f32 %v4722_v33, 0.0  ;;  %v4213_v51 = vpop.f32.mrf.mxu1 }
 0x975   :  { %v4214_v16 = vadd.f32 %v4213_v51, %v11419_v28 }
 0x976   :  { %v7544_v8 = vmax.f32 %v7543_v58, %v5529_v5  ;;  %v7597_v4 = vmax.f32 %v7596_v55, %v5530_v62  ;;  %4514 = vmatmul.bf16.gmra.mxu2 %v12141_v23  ;;  %4763 = vmatmul.bf16.gmra.mxu3 %v12141_v23 }
 0x977   :  { %v5496_v7 = vmax.f32 %v4214_v16, 0.0  ;;  %v4953_v40 = vpop.f32.mrf.mxu0 }
 0x978   :  { %v4954_v31 = vadd.f32 %v4953_v40, %v11439_v60 }
 0x979   :  { %v7487_v22 = vmax.f32 %v7486_v3, %v5496_v7  ;;  %v4475_v1 = vpop.f32.mrf.mxu2  ;;  %v4724_v52 = vpop.f32.mrf.mxu3 }
 0x97a   :  { %v5475_v61 = vmax.f32 %v4954_v31, 0.0  ;;  %v4476_v56 = vadd.f32 %v4475_v1, %v11394_v46  ;;  %v4725_v21 = vadd.f32 %v4724_v52, %v11397_v9  ;;  %4992 = vmatmul.bf16.gmra.mxu0 %v12137_v15 }
 0x97c   :  { %v7643_v29 = vmax.f32 %v7642_v59, %v5475_v61  ;;  %v5537_v39 = vmax.f32 %v4476_v56, 0.0  ;;  %v5538_v2 = vmax.f32 %v4725_v21, 0.0  ;;  %v4216_v24 = vpop.f32.mrf.mxu1 }
 0x97d   :  { %v4217_v17 = vadd.f32 %v4216_v24, %v11419_v28 }
 0x97e   :  { %v7545_v57 = vmax.f32 %v7544_v8, %v5537_v39  ;;  %v7598_v0 = vmax.f32 %v7597_v4, %v5538_v2  ;;  %v12143_v39 = vld [vmem:[#allocation36_spill] sm:$0xff] }
 0x97f   :  { %v5504_v63 = vmax.f32 %v4217_v17, 0.0  ;;  %4255 = vmatmul.bf16.gmra.mxu1 %v12139_v38  ;;  %v4955_v11 = vpop.f32.mrf.mxu0 }
 0x980   :  { %v4956_v43 = vadd.f32 %v4955_v11, %v11439_v60 }
 0x981   :  { %v7488_v19 = vmax.f32 %v7487_v22, %v5504_v63  ;;  %v4477_v14 = vpop.f32.mrf.mxu2  ;;  %v4726_v53 = vpop.f32.mrf.mxu3 }
 0x982   :  { %v5483_v49 = vmax.f32 %v4956_v43, 0.0  ;;  %v4478_v15 = vadd.f32 %v4477_v14, %v11394_v46  ;;  %v4727_v25 = vadd.f32 %v4726_v53, %v11397_v9 }
 0x984   :  { %v7644_v47 = vmax.f32 %v7643_v29, %v5483_v49  ;;  %v5545_v48 = vmax.f32 %v4478_v15, 0.0  ;;  %v5546_v13 = vmax.f32 %v4727_v25, 0.0  ;;  %v4218_v44 = vpop.f32.mrf.mxu1 }
 0x985   :  { %v4219_v36 = vadd.f32 %v4218_v44, %v11419_v28 }
 0x986   :  { %v7546_v18 = vmax.f32 %v7545_v57, %v5545_v48  ;;  %v7599_v34 = vmax.f32 %v7598_v0, %v5546_v13  ;;  %4519 = vmatmul.bf16.gmra.mxu2 %v12142_v6  ;;  %4768 = vmatmul.bf16.gmra.mxu3 %v12142_v6 }
 0x987   :  { %v5512_v12 = vmax.f32 %v4219_v36, 0.0  ;;  %v4958_v35 = vpop.f32.mrf.mxu0 }
 0x988   :  { %v4959_v58 = vadd.f32 %v4958_v35, %v11439_v60 }
 0x989   :  { %v7489_v55 = vmax.f32 %v7488_v19, %v5512_v12  ;;  %v4480_v27 = vpop.f32.mrf.mxu2  ;;  %v4729_v26 = vpop.f32.mrf.mxu3 }
 0x98a   :  { %v5491_v10 = vmax.f32 %v4959_v58, 0.0  ;;  %v4481_v3 = vadd.f32 %v4480_v27, %v11394_v46  ;;  %v4730_v37 = vadd.f32 %v4729_v26, %v11397_v9  ;;  %4997 = vmatmul.bf16.gmra.mxu0 %v12138_v45 }
 0x98c   :  { %v7645_v20 = vmax.f32 %v7644_v47, %v5491_v10  ;;  %v5553_v32 = vmax.f32 %v4481_v3, 0.0  ;;  %v5554_v50 = vmax.f32 %v4730_v37, 0.0  ;;  %v4221_v41 = vpop.f32.mrf.mxu1 }
 0x98d   :  { %v4222_v33 = vadd.f32 %v4221_v41, %v11419_v28 }
 0x98e   :  { %v7547_v59 = vmax.f32 %v7546_v18, %v5553_v32  ;;  %v7600_v5 = vmax.f32 %v7599_v34, %v5554_v50  ;;  %v12144_v32 = vld [vmem:[#allocation44_spill] sm:$0xff] }
 0x98f   :  { %v5520_v62 = vmax.f32 %v4222_v33, 0.0  ;;  %4260 = vmatmul.bf16.gmra.mxu1 %v12140_v54  ;;  %v4960_v51 = vpop.f32.mrf.mxu0 }
 0x990   :  { %v4961_v16 = vadd.f32 %v4960_v51, %v11439_v60 }
 0x991   :  { %v7490_v8 = vmax.f32 %v7489_v55, %v5520_v62  ;;  %v4482_v4 = vpop.f32.mrf.mxu2  ;;  %v4731_v7 = vpop.f32.mrf.mxu3 }
 0x992   :  { %v5499_v40 = vmax.f32 %v4961_v16, 0.0  ;;  %v4483_v45 = vadd.f32 %v4482_v4, %v11394_v46  ;;  %v4732_v31 = vadd.f32 %v4731_v7, %v11397_v9 }
 0x994   :  { %v7646_v22 = vmax.f32 %v7645_v20, %v5499_v40  ;;  %v5561_v1 = vmax.f32 %v4483_v45, 0.0  ;;  %v5562_v52 = vmax.f32 %v4732_v31, 0.0  ;;  %v4223_v61 = vpop.f32.mrf.mxu1 }
 0x995   :  { %v4224_v56 = vadd.f32 %v4223_v61, %v11419_v28 }
 0x996   :  { %v7548_v21 = vmax.f32 %v7547_v59, %v5561_v1  ;;  %v7601_v29 = vmax.f32 %v7600_v5, %v5562_v52  ;;  %4524 = vmatmul.bf16.gmra.mxu2 %v12143_v39  ;;  %4773 = vmatmul.bf16.gmra.mxu3 %v12143_v39 }
 0x997   :  { %v5528_v2 = vmax.f32 %v4224_v56, 0.0  ;;  %v4963_v24 = vpop.f32.mrf.mxu0 }
 0x998   :  { %v4964_v17 = vadd.f32 %v4963_v24, %v11439_v60 }
 0x999   :  { %v7491_v57 = vmax.f32 %v7490_v8, %v5528_v2  ;;  %v4485_v0 = vpop.f32.mrf.mxu2  ;;  %v4734_v63 = vpop.f32.mrf.mxu3 }
 0x99a   :  { %v5507_v11 = vmax.f32 %v4964_v17, 0.0  ;;  %v4486_v43 = vadd.f32 %v4485_v0, %v11394_v46  ;;  %v4735_v19 = vadd.f32 %v4734_v63, %v11397_v9  ;;  %5002 = vmatmul.bf16.gmra.mxu0 %v12139_v38 }
 0x99c   :  { %v7647_v14 = vmax.f32 %v7646_v22, %v5507_v11  ;;  %v5569_v53 = vmax.f32 %v4486_v43, 0.0  ;;  %v5570_v49 = vmax.f32 %v4735_v19, 0.0  ;;  %v4226_v15 = vpop.f32.mrf.mxu1 }
 0x99d   :  { %v4227_v25 = vadd.f32 %v4226_v15, %v11419_v28 }
 0x99e   :  { %v7549_v47 = vmax.f32 %v7548_v21, %v5569_v53  ;;  %v7602_v48 = vmax.f32 %v7601_v29, %v5570_v49  ;;  %v12145_v53 = vld [vmem:[#allocation42_spill] sm:$0xff] }
 0x99f   :  { %v5536_v13 = vmax.f32 %v4227_v25, 0.0  ;;  %4265 = vmatmul.bf16.gmra.mxu1 %v12141_v23  ;;  %v4965_v44 = vpop.f32.mrf.mxu0 }
 0x9a0   :  { %v4966_v36 = vadd.f32 %v4965_v44, %v11439_v60 }
 0x9a1   :  { %v7492_v18 = vmax.f32 %v7491_v57, %v5536_v13  ;;  %v4487_v34 = vpop.f32.mrf.mxu2  ;;  %v4736_v12 = vpop.f32.mrf.mxu3 }
 0x9a2   :  { %v5515_v35 = vmax.f32 %v4966_v36, 0.0  ;;  %v4488_v38 = vadd.f32 %v4487_v34, %v11394_v46  ;;  %v4737_v58 = vadd.f32 %v4736_v12, %v11397_v9 }
 0x9a4   :  { %v7648_v55 = vmax.f32 %v7647_v14, %v5515_v35  ;;  %v5577_v27 = vmax.f32 %v4488_v38, 0.0  ;;  %v5578_v26 = vmax.f32 %v4737_v58, 0.0  ;;  %v4228_v10 = vpop.f32.mrf.mxu1 }
 0x9a5   :  { %v4229_v3 = vadd.f32 %v4228_v10, %v11419_v28 }
 0x9a6   :  { %v7550_v37 = vmax.f32 %v7549_v47, %v5577_v27  ;;  %v7603_v20 = vmax.f32 %v7602_v48, %v5578_v26  ;;  %4529 = vmatmul.bf16.gmra.mxu2 %v12144_v32  ;;  %4778 = vmatmul.bf16.gmra.mxu3 %v12144_v32 }
 0x9a7   :  { %v5544_v50 = vmax.f32 %v4229_v3, 0.0  ;;  %v4968_v41 = vpop.f32.mrf.mxu0 }
 0x9a8   :  { %v4969_v33 = vadd.f32 %v4968_v41, %v11439_v60 }
 0x9a9   :  { %v7493_v59 = vmax.f32 %v7492_v18, %v5544_v50  ;;  %v4490_v5 = vpop.f32.mrf.mxu2  ;;  %v4739_v62 = vpop.f32.mrf.mxu3 }
 0x9aa   :  { %v5523_v51 = vmax.f32 %v4969_v33, 0.0  ;;  %v4491_v16 = vadd.f32 %v4490_v5, %v11394_v46  ;;  %v4740_v8 = vadd.f32 %v4739_v62, %v11397_v9  ;;  %5007 = vmatmul.bf16.gmra.mxu0 %v12140_v54 }
 0x9ac   :  { %v7649_v4 = vmax.f32 %v7648_v55, %v5523_v51  ;;  %v5585_v7 = vmax.f32 %v4491_v16, 0.0  ;;  %v5586_v40 = vmax.f32 %v4740_v8, 0.0  ;;  %v4231_v45 = vpop.f32.mrf.mxu1 }
 0x9ad   :  { %v4232_v31 = vadd.f32 %v4231_v45, %v11419_v28 }
 0x9ae   :  { %v7551_v22 = vmax.f32 %v7550_v37, %v5585_v7  ;;  %v7604_v1 = vmax.f32 %v7603_v20, %v5586_v40  ;;  %v12146_v7 = vld [vmem:[#allocation46_spill] sm:$0xff] }
 0x9af   :  { %v5552_v52 = vmax.f32 %v4232_v31, 0.0  ;;  %4270 = vmatmul.bf16.gmra.mxu1 %v12142_v6  ;;  %v4970_v61 = vpop.f32.mrf.mxu0 }
 0x9b0   :  { %v4971_v56 = vadd.f32 %v4970_v61, %v11439_v60 }
 0x9b1   :  { %v7494_v21 = vmax.f32 %v7493_v59, %v5552_v52  ;;  %v4492_v29 = vpop.f32.mrf.mxu2  ;;  %v4741_v2 = vpop.f32.mrf.mxu3 }
 0x9b2   :  { %v5531_v24 = vmax.f32 %v4971_v56, 0.0  ;;  %v4493_v54 = vadd.f32 %v4492_v29, %v11394_v46  ;;  %v4742_v17 = vadd.f32 %v4741_v2, %v11397_v9 }
 0x9b4   :  { %v7650_v57 = vmax.f32 %v7649_v4, %v5531_v24  ;;  %v5593_v0 = vmax.f32 %v4493_v54, 0.0  ;;  %v5594_v63 = vmax.f32 %v4742_v17, 0.0  ;;  %v4233_v11 = vpop.f32.mrf.mxu1 }
 0x9b5   :  { %v4234_v43 = vadd.f32 %v4233_v11, %v11419_v28 }
 0x9b6   :  { %v7552_v19 = vmax.f32 %v7551_v22, %v5593_v0  ;;  %v7605_v14 = vmax.f32 %v7604_v1, %v5594_v63  ;;  %4534 = vmatmul.bf16.gmra.mxu2 %v12145_v53  ;;  %4783 = vmatmul.bf16.gmra.mxu3 %v12145_v53 }
 0x9b7   :  { %v5560_v49 = vmax.f32 %v4234_v43, 0.0  ;;  %v4973_v15 = vpop.f32.mrf.mxu0 }
 0x9b8   :  { %v4974_v25 = vadd.f32 %v4973_v15, %v11439_v60 }
 0x9b9   :  { %v7495_v47 = vmax.f32 %v7494_v21, %v5560_v49  ;;  %v4495_v48 = vpop.f32.mrf.mxu2  ;;  %v4744_v13 = vpop.f32.mrf.mxu3 }
 0x9ba   :  { %v5539_v44 = vmax.f32 %v4974_v25, 0.0  ;;  %v4496_v36 = vadd.f32 %v4495_v48, %v11394_v46  ;;  %v4745_v18 = vadd.f32 %v4744_v13, %v11397_v9  ;;  %5012 = vmatmul.bf16.gmra.mxu0 %v12141_v23 }
 0x9bc   :  { %v7651_v34 = vmax.f32 %v7650_v57, %v5539_v44  ;;  %v5601_v12 = vmax.f32 %v4496_v36, 0.0  ;;  %v5602_v35 = vmax.f32 %v4745_v18, 0.0  ;;  %v4236_v38 = vpop.f32.mrf.mxu1 }
 0x9bd   :  { %v4237_v58 = vadd.f32 %v4236_v38, %v11419_v28 }
 0x9be   :  { %v7553_v55 = vmax.f32 %v7552_v19, %v5601_v12  ;;  %v7606_v27 = vmax.f32 %v7605_v14, %v5602_v35  ;;  %v12147_v12 = vld [vmem:[#allocation45_spill] sm:$0xff] }
 0x9bf   :  { %v5568_v26 = vmax.f32 %v4237_v58, 0.0  ;;  %4275 = vmatmul.bf16.gmra.mxu1 %v12143_v39  ;;  %v4975_v10 = vpop.f32.mrf.mxu0 }
 0x9c0   :  { %v4976_v3 = vadd.f32 %v4975_v10, %v11439_v60 }
 0x9c1   :  { %v7496_v37 = vmax.f32 %v7495_v47, %v5568_v26  ;;  %v4497_v20 = vpop.f32.mrf.mxu2  ;;  %v4746_v50 = vpop.f32.mrf.mxu3 }
 0x9c2   :  { %v5547_v41 = vmax.f32 %v4976_v3, 0.0  ;;  %v4498_v23 = vadd.f32 %v4497_v20, %v11394_v46  ;;  %v4747_v33 = vadd.f32 %v4746_v50, %v11397_v9 }
 0x9c4   :  { %v7652_v59 = vmax.f32 %v7651_v34, %v5547_v41  ;;  %v5609_v5 = vmax.f32 %v4498_v23, 0.0  ;;  %v5610_v62 = vmax.f32 %v4747_v33, 0.0  ;;  %v4238_v51 = vpop.f32.mrf.mxu1 }
 0x9c5   :  { %v4239_v16 = vadd.f32 %v4238_v51, %v11419_v28 }
 0x9c6   :  { %v7554_v8 = vmax.f32 %v7553_v55, %v5609_v5  ;;  %v7607_v4 = vmax.f32 %v7606_v27, %v5610_v62  ;;  %4539 = vmatmul.bf16.gmra.mxu2 %v12146_v7  ;;  %4788 = vmatmul.bf16.gmra.mxu3 %v12146_v7 }
 0x9c7   :  { %v5576_v40 = vmax.f32 %v4239_v16, 0.0  ;;  %v4978_v45 = vpop.f32.mrf.mxu0 }
 0x9c8   :  { %v4979_v31 = vadd.f32 %v4978_v45, %v11439_v60 }
 0x9c9   :  { %v7497_v22 = vmax.f32 %v7496_v37, %v5576_v40  ;;  %v4500_v1 = vpop.f32.mrf.mxu2  ;;  %v4749_v52 = vpop.f32.mrf.mxu3 }
 0x9ca   :  { %v5555_v61 = vmax.f32 %v4979_v31, 0.0  ;;  %v4501_v56 = vadd.f32 %v4500_v1, %v11394_v46  ;;  %v4750_v21 = vadd.f32 %v4749_v52, %v11397_v9  ;;  %5017 = vmatmul.bf16.gmra.mxu0 %v12142_v6 }
 0x9cc   :  { %v7653_v29 = vmax.f32 %v7652_v59, %v5555_v61  ;;  %v5617_v2 = vmax.f32 %v4501_v56, 0.0  ;;  %v5618_v24 = vmax.f32 %v4750_v21, 0.0  ;;  %v4241_v54 = vpop.f32.mrf.mxu1 }
 0x9cd   :  { %v4242_v17 = vadd.f32 %v4241_v54, %v11419_v28 }
 0x9ce   :  { %v7555_v57 = vmax.f32 %v7554_v8, %v5617_v2  ;;  %v7608_v0 = vmax.f32 %v7607_v4, %v5618_v24  ;;  %v12148_v2 = vld [vmem:[#allocation48_spill] sm:$0xff] }
 0x9cf   :  { %v5584_v63 = vmax.f32 %v4242_v17, 0.0  ;;  %4280 = vmatmul.bf16.gmra.mxu1 %v12144_v32  ;;  %v4980_v11 = vpop.f32.mrf.mxu0 }
 0x9d0   :  { %v4981_v43 = vadd.f32 %v4980_v11, %v11439_v60 }
 0x9d1   :  { %v7498_v19 = vmax.f32 %v7497_v22, %v5584_v63  ;;  %v4502_v14 = vpop.f32.mrf.mxu2  ;;  %v4751_v49 = vpop.f32.mrf.mxu3 }
 0x9d2   :  { %v5563_v15 = vmax.f32 %v4981_v43, 0.0  ;;  %v4503_v6 = vadd.f32 %v4502_v14, %v11394_v46  ;;  %v4752_v25 = vadd.f32 %v4751_v49, %v11397_v9 }
 0x9d4   :  { %v7654_v47 = vmax.f32 %v7653_v29, %v5563_v15  ;;  %v5625_v48 = vmax.f32 %v4503_v6, 0.0  ;;  %v5626_v13 = vmax.f32 %v4752_v25, 0.0  ;;  %v4243_v44 = vpop.f32.mrf.mxu1 }
 0x9d5   :  { %v4244_v36 = vadd.f32 %v4243_v44, %v11419_v28 }
 0x9d6   :  { %v7556_v18 = vmax.f32 %v7555_v57, %v5625_v48  ;;  %v7609_v34 = vmax.f32 %v7608_v0, %v5626_v13  ;;  %4544 = vmatmul.bf16.gmra.mxu2 %v12147_v12  ;;  %4793 = vmatmul.bf16.gmra.mxu3 %v12147_v12 }
 0x9d7   :  { %v5592_v35 = vmax.f32 %v4244_v36, 0.0  ;;  %v4983_v38 = vpop.f32.mrf.mxu0 }
 0x9d8   :  { %v4984_v58 = vadd.f32 %v4983_v38, %v11439_v60 }
 0x9d9   :  { %v7499_v55 = vmax.f32 %v7498_v19, %v5592_v35  ;;  %v4505_v27 = vpop.f32.mrf.mxu2  ;;  %v4754_v26 = vpop.f32.mrf.mxu3 }
 0x9da   :  { %v5571_v10 = vmax.f32 %v4984_v58, 0.0  ;;  %v4506_v3 = vadd.f32 %v4505_v27, %v11394_v46  ;;  %v4755_v37 = vadd.f32 %v4754_v26, %v11397_v9  ;;  %5022 = vmatmul.bf16.gmra.mxu0 %v12143_v39 }
 0x9dc   :  { %v7655_v20 = vmax.f32 %v7654_v47, %v5571_v10  ;;  %v5633_v50 = vmax.f32 %v4506_v3, 0.0  ;;  %v5634_v41 = vmax.f32 %v4755_v37, 0.0  ;;  %v4246_v23 = vpop.f32.mrf.mxu1 }
 0x9dd   :  { %v4247_v33 = vadd.f32 %v4246_v23, %v11419_v28 }
 0x9de   :  { %v7557_v59 = vmax.f32 %v7556_v18, %v5633_v50  ;;  %v7610_v5 = vmax.f32 %v7609_v34, %v5634_v41  ;;  %v12149_v50 = vld [vmem:[#allocation47_spill] sm:$0xff] }
 0x9df   :  { %v5600_v62 = vmax.f32 %v4247_v33, 0.0  ;;  %4285 = vmatmul.bf16.gmra.mxu1 %v12145_v53  ;;  %v4985_v51 = vpop.f32.mrf.mxu0 }
 0x9e0   :  { %v4986_v16 = vadd.f32 %v4985_v51, %v11439_v60 }
 0x9e1   :  { %v7500_v8 = vmax.f32 %v7499_v55, %v5600_v62  ;;  %v4507_v4 = vpop.f32.mrf.mxu2  ;;  %v4756_v40 = vpop.f32.mrf.mxu3 }
 0x9e2   :  { %v5579_v45 = vmax.f32 %v4986_v16, 0.0  ;;  %v4508_v39 = vadd.f32 %v4507_v4, %v11394_v46  ;;  %v4757_v31 = vadd.f32 %v4756_v40, %v11397_v9 }
 0x9e4   :  { %v7656_v22 = vmax.f32 %v7655_v20, %v5579_v45  ;;  %v5641_v1 = vmax.f32 %v4508_v39, 0.0  ;;  %v5642_v52 = vmax.f32 %v4757_v31, 0.0  ;;  %v4248_v61 = vpop.f32.mrf.mxu1 }
 0x9e5   :  { %v4249_v56 = vadd.f32 %v4248_v61, %v11419_v28 }
 0x9e6   :  { %v7558_v21 = vmax.f32 %v7557_v59, %v5641_v1  ;;  %v7611_v29 = vmax.f32 %v7610_v5, %v5642_v52  ;;  %4549 = vmatmul.bf16.gmra.mxu2 %v12148_v2  ;;  %4798 = vmatmul.bf16.gmra.mxu3 %v12148_v2 }
 0x9e7   :  { %v5608_v24 = vmax.f32 %v4249_v56, 0.0  ;;  %v4988_v54 = vpop.f32.mrf.mxu0 }
 0x9e8   :  { %v4989_v17 = vadd.f32 %v4988_v54, %v11439_v60 }
 0x9e9   :  { %v7501_v57 = vmax.f32 %v7500_v8, %v5608_v24  ;;  %v4510_v0 = vpop.f32.mrf.mxu2  ;;  %v4759_v63 = vpop.f32.mrf.mxu3 }
 0x9ea   :  { %v5587_v11 = vmax.f32 %v4989_v17, 0.0  ;;  %v4511_v43 = vadd.f32 %v4510_v0, %v11394_v46  ;;  %v4760_v19 = vadd.f32 %v4759_v63, %v11397_v9  ;;  %5027 = vmatmul.bf16.gmra.mxu0 %v12144_v32 }
 0x9ec   :  { %v7657_v14 = vmax.f32 %v7656_v22, %v5587_v11  ;;  %v5649_v49 = vmax.f32 %v4511_v43, 0.0  ;;  %v5650_v15 = vmax.f32 %v4760_v19, 0.0  ;;  %v4251_v6 = vpop.f32.mrf.mxu1 }
 0x9ed   :  { %v4252_v25 = vadd.f32 %v4251_v6, %v11419_v28 }
 0x9ee   :  { %v7559_v47 = vmax.f32 %v7558_v21, %v5649_v49  ;;  %v7612_v48 = vmax.f32 %v7611_v29, %v5650_v15  ;;  %v12150_v49 = vld [vmem:[#allocation6_spill] sm:$0xff] }
 0x9ef   :  { %v5616_v13 = vmax.f32 %v4252_v25, 0.0  ;;  %4290 = vmatmul.bf16.gmra.mxu1 %v12146_v7  ;;  %v4990_v44 = vpop.f32.mrf.mxu0 }
 0x9f0   :  { %v4991_v36 = vadd.f32 %v4990_v44, %v11439_v60 }
 0x9f1   :  { %v7502_v18 = vmax.f32 %v7501_v57, %v5616_v13  ;;  %v4512_v34 = vpop.f32.mrf.mxu2  ;;  %v4761_v35 = vpop.f32.mrf.mxu3 }
 0x9f2   :  { %v5595_v38 = vmax.f32 %v4991_v36, 0.0  ;;  %v4513_v32 = vadd.f32 %v4512_v34, %v11394_v46  ;;  %v4762_v58 = vadd.f32 %v4761_v35, %v11397_v9 }
 0x9f4   :  { %v7658_v55 = vmax.f32 %v7657_v14, %v5595_v38  ;;  %v5657_v27 = vmax.f32 %v4513_v32, 0.0  ;;  %v5658_v26 = vmax.f32 %v4762_v58, 0.0  ;;  %v4253_v10 = vpop.f32.mrf.mxu1 }
 0x9f5   :  { %v4254_v3 = vadd.f32 %v4253_v10, %v11419_v28 }
 0x9f6   :  { %v7560_v37 = vmax.f32 %v7559_v47, %v5657_v27  ;;  %v7613_v20 = vmax.f32 %v7612_v48, %v5658_v26  ;;  %4554 = vmatmul.bf16.gmra.mxu2 %v12149_v50  ;;  %4803 = vmatmul.bf16.gmra.mxu3 %v12149_v50 }
 0x9f7   :  { %v5624_v41 = vmax.f32 %v4254_v3, 0.0  ;;  %v4993_v23 = vpop.f32.mrf.mxu0 }
 0x9f8   :  { %v4994_v33 = vadd.f32 %v4993_v23, %v11439_v60 }
 0x9f9   :  { %v7503_v59 = vmax.f32 %v7502_v18, %v5624_v41  ;;  %v4515_v5 = vpop.f32.mrf.mxu2  ;;  %v4764_v62 = vpop.f32.mrf.mxu3 }
 0x9fa   :  { %v5603_v51 = vmax.f32 %v4994_v33, 0.0  ;;  %v4516_v16 = vadd.f32 %v4515_v5, %v11394_v46  ;;  %v4765_v8 = vadd.f32 %v4764_v62, %v11397_v9  ;;  %5032 = vmatmul.bf16.gmra.mxu0 %v12145_v53 }
 0x9fc   :  { %v7659_v4 = vmax.f32 %v7658_v55, %v5603_v51  ;;  %v5665_v40 = vmax.f32 %v4516_v16, 0.0  ;;  %v5666_v45 = vmax.f32 %v4765_v8, 0.0  ;;  %v4256_v39 = vpop.f32.mrf.mxu1 }
 0x9fd   :  { %v4257_v31 = vadd.f32 %v4256_v39, %v11419_v28 }
 0x9fe   :  { %v7561_v22 = vmax.f32 %v7560_v37, %v5665_v40  ;;  %v7614_v1 = vmax.f32 %v7613_v20, %v5666_v45  ;;  %v12151_v40 = vld [vmem:[#allocation5_spill] sm:$0xff] }
 0x9ff   :  { %v5632_v52 = vmax.f32 %v4257_v31, 0.0  ;;  %4295 = vmatmul.bf16.gmra.mxu1 %v12147_v12  ;;  %v4995_v61 = vpop.f32.mrf.mxu0 }
 0xa00   :  { %v4996_v56 = vadd.f32 %v4995_v61, %v11439_v60 }
 0xa01   :  { %v7504_v21 = vmax.f32 %v7503_v59, %v5632_v52  ;;  %v4517_v29 = vpop.f32.mrf.mxu2  ;;  %v4766_v24 = vpop.f32.mrf.mxu3 }
 0xa02   :  { %v5611_v54 = vmax.f32 %v4996_v56, 0.0  ;;  %v4518_v53 = vadd.f32 %v4517_v29, %v11394_v46  ;;  %v4767_v17 = vadd.f32 %v4766_v24, %v11397_v9 }
 0xa04   :  { %v7660_v57 = vmax.f32 %v7659_v4, %v5611_v54  ;;  %v5673_v0 = vmax.f32 %v4518_v53, 0.0  ;;  %v5674_v63 = vmax.f32 %v4767_v17, 0.0  ;;  %v4258_v11 = vpop.f32.mrf.mxu1 }
 0xa05   :  { %v4259_v43 = vadd.f32 %v4258_v11, %v11419_v28 }
 0xa06   :  { %v7562_v19 = vmax.f32 %v7561_v22, %v5673_v0  ;;  %v7615_v14 = vmax.f32 %v7614_v1, %v5674_v63  ;;  %4559 = vmatmul.bf16.gmra.mxu2 %v12150_v49  ;;  %4808 = vmatmul.bf16.gmra.mxu3 %v12150_v49 }
 0xa07   :  { %v5640_v15 = vmax.f32 %v4259_v43, 0.0  ;;  %v4998_v6 = vpop.f32.mrf.mxu0 }
 0xa08   :  { %v4999_v25 = vadd.f32 %v4998_v6, %v11439_v60 }
 0xa09   :  { %v7505_v47 = vmax.f32 %v7504_v21, %v5640_v15  ;;  %v4520_v48 = vpop.f32.mrf.mxu2  ;;  %v4769_v13 = vpop.f32.mrf.mxu3 }
 0xa0a   :  { %v5619_v44 = vmax.f32 %v4999_v25, 0.0  ;;  %v4521_v36 = vadd.f32 %v4520_v48, %v11394_v46  ;;  %v4770_v18 = vadd.f32 %v4769_v13, %v11397_v9  ;;  %5037 = vmatmul.bf16.gmra.mxu0 %v12146_v7 }
 0xa0c   :  { %v7661_v34 = vmax.f32 %v7660_v57, %v5619_v44  ;;  %v5681_v35 = vmax.f32 %v4521_v36, 0.0  ;;  %v5682_v38 = vmax.f32 %v4770_v18, 0.0  ;;  %v4261_v32 = vpop.f32.mrf.mxu1 }
 0xa0d   :  { %v4262_v58 = vadd.f32 %v4261_v32, %v11419_v28 }
 0xa0e   :  { %v7563_v55 = vmax.f32 %v7562_v19, %v5681_v35  ;;  %v7616_v27 = vmax.f32 %v7615_v14, %v5682_v38 }
 0xa0f   :  { %v5648_v26 = vmax.f32 %v4262_v58, 0.0  ;;  %4300 = vmatmul.bf16.gmra.mxu1 %v12148_v2  ;;  %v5000_v10 = vpop.f32.mrf.mxu0 }
 0xa10   :  { %v5001_v3 = vadd.f32 %v5000_v10, %v11439_v60 }
 0xa11   :  { %v7506_v37 = vmax.f32 %v7505_v47, %v5648_v26  ;;  %v4522_v20 = vpop.f32.mrf.mxu2  ;;  %v4771_v41 = vpop.f32.mrf.mxu3 }
 0xa12   :  { %v5627_v23 = vmax.f32 %v5001_v3, 0.0  ;;  %v4523_v7 = vadd.f32 %v4522_v20, %v11394_v46  ;;  %v4772_v33 = vadd.f32 %v4771_v41, %v11397_v9 }
 0xa14   :  { %v7662_v59 = vmax.f32 %v7661_v34, %v5627_v23  ;;  %v5689_v5 = vmax.f32 %v4523_v7, 0.0  ;;  %v5690_v62 = vmax.f32 %v4772_v33, 0.0  ;;  %v4263_v51 = vpop.f32.mrf.mxu1 }
 0xa15   :  { %v4264_v16 = vadd.f32 %v4263_v51, %v11419_v28 }
 0xa16   :  { %v7564_v8 = vmax.f32 %v7563_v55, %v5689_v5  ;;  %v7617_v4 = vmax.f32 %v7616_v27, %v5690_v62  ;;  %4564 = vmatmul.bf16.gmra.mxu2 %v12151_v40  ;;  %4813 = vmatmul.bf16.gmra.mxu3 %v12151_v40 }
 0xa17   :  { %v5656_v45 = vmax.f32 %v4264_v16, 0.0  ;;  %v5003_v39 = vpop.f32.mrf.mxu0 }
 0xa18   :  { %v5004_v31 = vadd.f32 %v5003_v39, %v11439_v60 }
 0xa19   :  { %v7507_v22 = vmax.f32 %v7506_v37, %v5656_v45  ;;  %v4525_v1 = vpop.f32.mrf.mxu2  ;;  %v4774_v52 = vpop.f32.mrf.mxu3 }
 0xa1a   :  { %v5635_v61 = vmax.f32 %v5004_v31, 0.0  ;;  %v4526_v56 = vadd.f32 %v4525_v1, %v11394_v46  ;;  %v4775_v21 = vadd.f32 %v4774_v52, %v11397_v9  ;;  %5042 = vmatmul.bf16.gmra.mxu0 %v12147_v12 }
 0xa1c   :  { %v7663_v29 = vmax.f32 %v7662_v59, %v5635_v61  ;;  %v5697_v24 = vmax.f32 %v4526_v56, 0.0  ;;  %v5698_v54 = vmax.f32 %v4775_v21, 0.0  ;;  %v4266_v53 = vpop.f32.mrf.mxu1 }
 0xa1d   :  { %v4267_v17 = vadd.f32 %v4266_v53, %v11419_v28 }
 0xa1e   :  { %v7565_v57 = vmax.f32 %v7564_v8, %v5697_v24  ;;  %v7618_v0 = vmax.f32 %v7617_v4, %v5698_v54 }
 0xa1f   :  { %v5664_v63 = vmax.f32 %v4267_v17, 0.0  ;;  %4305 = vmatmul.bf16.gmra.mxu1 %v12149_v50  ;;  %v5005_v11 = vpop.f32.mrf.mxu0 }
 0xa20   :  { %v5006_v43 = vadd.f32 %v5005_v11, %v11439_v60 }
 0xa21   :  { %v7508_v19 = vmax.f32 %v7507_v22, %v5664_v63  ;;  %v4527_v14 = vpop.f32.mrf.mxu2  ;;  %v4776_v15 = vpop.f32.mrf.mxu3 }
 0xa22   :  { %v5643_v6 = vmax.f32 %v5006_v43, 0.0  ;;  %v4528_v12 = vadd.f32 %v4527_v14, %v11394_v46  ;;  %v4777_v25 = vadd.f32 %v4776_v15, %v11397_v9 }
 0xa24   :  { %v7664_v47 = vmax.f32 %v7663_v29, %v5643_v6  ;;  %v5705_v48 = vmax.f32 %v4528_v12, 0.0  ;;  %v5706_v13 = vmax.f32 %v4777_v25, 0.0  ;;  %v4268_v44 = vpop.f32.mrf.mxu1 }
 0xa25   :  { %v4269_v36 = vadd.f32 %v4268_v44, %v11419_v28 }
 0xa26   :  { %v7566_v18 = vmax.f32 %v7565_v57, %v5705_v48  ;;  %v7619_v34 = vmax.f32 %v7618_v0, %v5706_v13  ;;  %5062 = vmatmul.bf16.vlgmr.msrb.gmra.mxu3 %v12151_v40 }
 0xa27   :  { %v5672_v35 = vmax.f32 %v4269_v36, 0.0  ;;  %v5008_v38 = vpop.f32.mrf.mxu0 }
 0xa28   :  { %v5009_v32 = vadd.f32 %v5008_v38, %v11439_v60 }
 0xa29   :  { %v7509_v58 = vmax.f32 %v7508_v19, %v5672_v35  ;;  %v4530_v55 = vpop.f32.mrf.mxu2  ;;  %v4779_v27 = vpop.f32.mrf.mxu3 }
 0xa2a   :  { %v5651_v26 = vmax.f32 %v5009_v32, 0.0  ;;  %v4531_v10 = vadd.f32 %v4530_v55, %v11394_v46  ;;  %v4780_v3 = vadd.f32 %v4779_v27, %v11397_v9  ;;  %5047 = vmatmul.bf16.gmra.mxu0 %v12148_v2 }
 0xa2c   :  { %v7665_v37 = vmax.f32 %v7664_v47, %v5651_v26  ;;  %v5713_v20 = vmax.f32 %v4531_v10, 0.0  ;;  %v5714_v41 = vmax.f32 %v4780_v3, 0.0  ;;  %v4271_v23 = vpop.f32.mrf.mxu1 }
 0xa2d   :  { %v4272_v7 = vadd.f32 %v4271_v23, %v11419_v28 }
 0xa2e   :  { %v7567_v33 = vmax.f32 %v7566_v18, %v5713_v20  ;;  %v7620_v59 = vmax.f32 %v7619_v34, %v5714_v41 }
 0xa2f   :  { %v5680_v5 = vmax.f32 %v4272_v7, 0.0  ;;  %4310 = vmatmul.bf16.gmra.mxu1 %v12150_v49  ;;  %v5010_v62 = vpop.f32.mrf.mxu0 }
 0xa30   :  { %v5011_v51 = vadd.f32 %v5010_v62, %v11439_v60 }
 0xa31   :  { %v7510_v16 = vmax.f32 %v7509_v58, %v5680_v5  ;;  %v4532_v8 = vpop.f32.mrf.mxu2  ;;  %v4781_v4 = vpop.f32.mrf.mxu3 }
 0xa32   :  { %v5659_v45 = vmax.f32 %v5011_v51, 0.0  ;;  %v4533_v2 = vadd.f32 %v4532_v8, %v11394_v46  ;;  %v4782_v39 = vadd.f32 %v4781_v4, %v11397_v9 }
 0xa34   :  { %v7666_v31 = vmax.f32 %v7665_v37, %v5659_v45  ;;  %v5721_v22 = vmax.f32 %v4533_v2, 0.0  ;;  %v5722_v1 = vmax.f32 %v4782_v39, 0.0  ;;  %v4273_v52 = vpop.f32.mrf.mxu1 }
 0xa35   :  { %v4274_v61 = vadd.f32 %v4273_v52, %v11419_v28 }
 0xa36   :  { %v7568_v56 = vmax.f32 %v7567_v33, %v5721_v22  ;;  %v7621_v21 = vmax.f32 %v7620_v59, %v5722_v1 }
 0xa37   :  { %v5688_v29 = vmax.f32 %v4274_v61, 0.0  ;;  %v5013_v24 = vpop.f32.mrf.mxu0 }
 0xa38   :  { %v5014_v54 = vadd.f32 %v5013_v24, %v11439_v60 }
 0xa39   :  { %v7511_v53 = vmax.f32 %v7510_v16, %v5688_v29  ;;  %v4535_v17 = vpop.f32.mrf.mxu2  ;;  %v4784_v57 = vpop.f32.mrf.mxu3 }
 0xa3a   :  { %v5667_v0 = vmax.f32 %v5014_v54, 0.0  ;;  %v4536_v63 = vadd.f32 %v4535_v17, %v11394_v46  ;;  %v4785_v11 = vadd.f32 %v4784_v57, %v11397_v9  ;;  %5052 = vmatmul.bf16.gmra.mxu0 %v12149_v50 }
 0xa3c   :  { %v11863_v43 = vmax.f32 %v7666_v31, %v5667_v0  ;;  %v5729_v19 = vmax.f32 %v4536_v63, 0.0  ;;  %v5730_v14 = vmax.f32 %v4785_v11, 0.0  ;;  %v4276_v15 = vpop.f32.mrf.mxu1 }
 0xa3d   :  { %v4277_v6 = vadd.f32 %v4276_v15, %v11419_v28 }
 0xa3e   :  { %v7569_v12 = vmax.f32 %v7568_v56, %v5729_v19  ;;  %v7622_v25 = vmax.f32 %v7621_v21, %v5730_v14 }
 0xa3f   :  { %v5696_v47 = vmax.f32 %v4277_v6, 0.0  ;;  %4315 = vmatmul.bf16.gmra.mxu1 %v12151_v40  ;;  %v11867_v48 = vpop.f32.mrf.mxu0 }
 0xa41   :  { %v7512_v13 = vmax.f32 %v7511_v53, %v5696_v47  ;;  %v4537_v44 = vpop.f32.mrf.mxu2  ;;  %v4786_v36 = vpop.f32.mrf.mxu3 }
 0xa42   :  { %v4538_v18 = vadd.f32 %v4537_v44, %v11394_v46  ;;  %v4787_v50 = vadd.f32 %v4786_v36, %v11397_v9 }
 0xa44   :  { %v5737_v34 = vmax.f32 %v4538_v18, 0.0  ;;  %v5738_v35 = vmax.f32 %v4787_v50, 0.0  ;;  %v4278_v38 = vpop.f32.mrf.mxu1 }
 0xa45   :  { %v4279_v32 = vadd.f32 %v4278_v38, %v11419_v28 }
 0xa46   :  { %v7570_v58 = vmax.f32 %v7569_v12, %v5737_v34  ;;  %v7623_v55 = vmax.f32 %v7622_v25, %v5738_v35 }
 0xa47   :  { %v5704_v27 = vmax.f32 %v4279_v32, 0.0  ;;  %v11872_v26 = vpop.f32.mrf.mxu0 }
 0xa49   :  { %v7513_v40 = vmax.f32 %v7512_v13, %v5704_v27  ;;  %v4540_v10 = vpop.f32.mrf.mxu2  ;;  %v4789_v3 = vpop.f32.mrf.mxu3  ;;  %v5016_v27 = vadd.f32 %v11867_v48, %v11439_v60 }
 0xa4a   :  { %v4541_v37 = vadd.f32 %v4540_v10, %v11394_v46  ;;  %v4790_v20 = vadd.f32 %v4789_v3, %v11397_v9  ;;  %5057 = vmatmul.bf16.gmra.mxu0 %v12150_v49 }
 0xa4c   :  { %v5745_v41 = vmax.f32 %v4541_v37, 0.0  ;;  %v5746_v23 = vmax.f32 %v4790_v20, 0.0  ;;  %v4281_v7 = vpop.f32.mrf.mxu1 }
 0xa4d   :  { %v4282_v21 = vadd.f32 %v4281_v7, %v11419_v28 }
 0xa4e   :  { %v7571_v33 = vmax.f32 %v7570_v58, %v5745_v41  ;;  %v11877_v59 = vmax.f32 %v7623_v55, %v5746_v23  ;;  %v5019_v41 = vadd.f32 %v11872_v26, %v11439_v60 }
 0xa4f   :  { %v5020_v5 = vpop.f32.mrf.mxu0  ;;  %v5712_v17 = vmax.f32 %v4282_v21, 0.0 }
 0xa50   :  { %v5683_v48 = vmax.f32 %v5019_v41, 0.0 }
 0xa51   :  { %v4542_v62 = vpop.f32.mrf.mxu2  ;;  %v4791_v51 = vpop.f32.mrf.mxu3  ;;  %v7514_v14 = vmax.f32 %v7513_v40, %v5712_v17 }
 0xa52   :  { %v4543_v39 = vadd.f32 %v4542_v62, %v11394_v46  ;;  %v5021_v62 = vadd.f32 %v5020_v5, %v11439_v60 }
 0xa54   :  { %v4283_v16 = vpop.f32.mrf.mxu1  ;;  %v5753_v49 = vmax.f32 %v4543_v39, 0.0 }
 0xa55   :  { %v4284_v53 = vadd.f32 %v4283_v16, %v11419_v28 }
 0xa56   :  { %v6764_v61 = vsel %vm5972_vm1, %v5753_v49, -inf  ;;  %v5691_v49 = vmax.f32 %v5021_v62, 0.0 }
 0xa57   :  { %v5023_v8 = vpop.f32.mrf.mxu0  ;;  %v7572_v54 = vmax.f32 %v7571_v33, %v6764_v61  ;;  %v5720_v63 = vmax.f32 %v4284_v53, 0.0  ;;  %v5675_v33 = vmax.f32 %v5016_v27, 0.0 }
 0xa59   :  { %v4545_v4 = vpop.f32.mrf.mxu2  ;;  %v4794_v45 = vpop.f32.mrf.mxu3  ;;  %v7583_v0 = vrot.slane %v7572_v54, 4  ;;  %v7515_v13 = vmax.f32 %v7514_v14, %v5720_v63 }
 0xa5a   :  { %v5024_v45 = vadd.f32 %v5023_v8, %v11439_v60 }
 0xa5b   :  { %v7584_v47 = vmax.f32 %v7572_v54, %v7583_v0 }
 0xa5c   :  { %v4286_v2 = vpop.f32.mrf.mxu1 }
 0xa5d   :  { %v4287_v57 = vadd.f32 %v4286_v2, %v11419_v28  ;;  %v7585_v35 = vrot.slane %v7584_v47, 2 }
 0xa5f   :  { %v5025_v31 = vpop.f32.mrf.mxu0  ;;  %v5728_v15 = vmax.f32 %v4287_v57, 0.0  ;;  %v7586_v37 = vmax.f32 %v7584_v47, %v7585_v35 }
 0xa60   :  { %v5026_v26 = vadd.f32 %v5025_v31, %v11439_v60 }
 0xa61   :  { %v4547_v22 = vpop.f32.mrf.mxu2  ;;  %v4796_v1 = vpop.f32.mrf.mxu3  ;;  %v7516_v36 = vmax.f32 %v7515_v13, %v5728_v15  ;;  %v7587_v16 = vrot.slane %v7586_v37, 1 }
 0xa62   :  { %v7668_v1 = vmax.f32 %v11863_v43, %v5675_v33  ;;  %v5707_v17 = vmax.f32 %v5026_v26, 0.0 }
 0xa64   :  { %v4288_v52 = vpop.f32.mrf.mxu1  ;;  %v7669_v21 = vmax.f32 %v7668_v1, %v5683_v48 }
 0xa65   :  { %v4289_v11 = vadd.f32 %v4288_v52, %v11419_v28 }
 0xa66   :  { %v7670_v53 = vmax.f32 %v7669_v21, %v5691_v49 }
 0xa67   :  { %v5028_v56 = vpop.f32.mrf.mxu0  ;;  %v5736_v44 = vmax.f32 %v4289_v11, 0.0 }
 0xa68   :  { %v5029_v5 = vadd.f32 %v5028_v56, %v11439_v60 }
 0xa69   :  { %v4550_v29 = vpop.f32.mrf.mxu2  ;;  %v4799_v24 = vpop.f32.mrf.mxu3  ;;  %v7517_v38 = vmax.f32 %v7516_v36, %v5736_v44 }
 0xa6a   :  { %v5699_v29 = vmax.f32 %v5024_v45, 0.0  ;;  %v5715_v63 = vmax.f32 %v5029_v5, 0.0 }
 0xa6c   :  { %v4291_v46 = vpop.f32.mrf.mxu1  ;;  %v7671_v0 = vmax.f32 %v7670_v53, %v5699_v29 }
 0xa6d   :  { %v4292_v6 = vadd.f32 %v4291_v46, %v11419_v28 }
 0xa6e   :  { %v7672_v15 = vmax.f32 %v7671_v0, %v5707_v17 }
 0xa6f   :  { %v5030_v19 = vpop.f32.mrf.mxu0  ;;  %v5744_v18 = vmax.f32 %v4292_v6, 0.0 }
 0xa70   :  { %v5031_v43 = vadd.f32 %v5030_v19, %v11439_v60  ;;  %v7673_v44 = vmax.f32 %v7672_v15, %v5715_v63 }
 0xa71   :  { %v4552_v12 = vpop.f32.mrf.mxu2  ;;  %v4801_v25 = vpop.f32.mrf.mxu3  ;;  %v7518_v55 = vmax.f32 %v7517_v38, %v5744_v18 }
 0xa72   :  { %v5723_v6 = vmax.f32 %v5031_v43, 0.0 }
 0xa74   :  { %v4293_v50 = vpop.f32.mrf.mxu1 }
 0xa75   :  { %v4294_v34 = vadd.f32 %v4293_v50, %v11419_v28  ;;  %v4792_v28 = vadd.f32 %v4791_v51, %v11397_v9  ;;  %v7588_v51 = vmax.f32 %v7586_v37, %v7587_v16 }
 0xa77   :  { %v5752_v32 = vmax.f32 %v4294_v34, 0.0  ;;  %v5033_v58 = vpop.f32.mrf.mxu0  ;;  %v5754_v39 = vmax.f32 %v4792_v28, 0.0  ;;  %v7720_v57 = vrot.slane %v7588_v51, 6 }
 0xa78   :  { %v5034_v11 = vadd.f32 %v5033_v58, %v11439_v60 }
 0xa79   :  { %v6763_v40 = vsel %vm5972_vm1, %v5752_v32, -inf  ;;  %v4555_v10 = vpop.f32.mrf.mxu2  ;;  %v4804_v3 = vpop.f32.mrf.mxu3  ;;  %v6765_v24 = vsel %vm5972_vm1, %v5754_v39, -inf }
 0xa7a   :  { %v7519_v20 = vmax.f32 %v7518_v55, %v6763_v40  ;;  %v7625_v31 = vmax.f32 %v11877_v59, %v6765_v24  ;;  %v5731_v19 = vmax.f32 %v5034_v11, 0.0  ;;  %v7674_v59 = vmax.f32 %v7673_v44, %v5723_v6 }
 0xa7c   :  { %v7530_v23 = vrot.slane %v7519_v20, 4  ;;  %v4296_v7 = vpop.f32.mrf.mxu1  ;;  %v7636_v13 = vrot.slane %v7625_v31, 4  ;;  %v7675_v35 = vmax.f32 %v7674_v59, %v5731_v19 }
 0xa7e   :  { %v7531_v4 = vmax.f32 %v7519_v20, %v7530_v23  ;;  %v7637_v34 = vmax.f32 %v7625_v31, %v7636_v13 }
 0xa7f   :  { %v5035_v2 = vpop.f32.mrf.mxu0 }
 0xa80   :  { %v7532_v22 = vrot.slane %v7531_v4, 2  ;;  %v5036_v12 = vadd.f32 %v5035_v2, %v11439_v60  ;;  %v7638_v3 = vrot.slane %v7637_v34, 2 }
 0xa81   :  { %v4557_v52 = vpop.f32.mrf.mxu2  ;;  %v4806_v9 = vpop.f32.mrf.mxu3 }
 0xa82   :  { %v7533_v61 = vmax.f32 %v7531_v4, %v7532_v22  ;;  %v5739_v50 = vmax.f32 %v5036_v12, 0.0  ;;  %v7639_v23 = vmax.f32 %v7637_v34, %v7638_v3 }
 0xa84   :  { %v7534_v8 = vrot.slane %v7533_v61, 1  ;;  %v4298_v54 = vpop.f32.mrf.mxu1  ;;  %v7676_v55 = vmax.f32 %v7675_v35, %v5739_v50  ;;  %v7640_v48 = vrot.slane %v7639_v23, 1 }
 0xa86   :  { %v7535_v46 = vmax.f32 %v7533_v61, %v7534_v8  ;;  %v7641_v39 = vmax.f32 %v7639_v23, %v7640_v48 }
 0xa87   :  { %v5038_v14 = vpop.f32.mrf.mxu0 }
 0xa88   :  { %v7735_v56 = vsel %vm7723_vm2, %v7535_v46, %v7720_v57  ;;  %v5039_v36 = vadd.f32 %v5038_v14, %v11439_v60  ;;  %v7721_v30 = vrot.slane %v7641_v39, 4 }
 0xa89   :  { %v4560_v25 = vpop.f32.mrf.mxu2  ;;  %v4809_v47 = vpop.f32.mrf.mxu3 }
 0xa8a   :  { %v5747_v38 = vmax.f32 %v5039_v36, 0.0 }
 0xa8c   :  { %v4301_v18 = vpop.f32.mrf.mxu1  ;;  %v7677_v37 = vmax.f32 %v7676_v55, %v5747_v38 }
 0xa8f   :  { %v5040_v32 = vpop.f32.mrf.mxu0 }
 0xa90   :  { %v5041_v58 = vadd.f32 %v5040_v32, %v11439_v60 }
 0xa91   :  { %v4562_v27 = vpop.f32.mrf.mxu2  ;;  %v4811_v40 = vpop.f32.mrf.mxu3 }
 0xa92   :  { %v5755_v10 = vmax.f32 %v5041_v58, 0.0 }
 0xa94   :  { %v6766_v20 = vsel %vm5972_vm1, %v5755_v10, -inf  ;;  %v4303_v41 = vpop.f32.mrf.mxu1 }
 0xa95   :  { %v7678_v28 = vmax.f32 %v7677_v37, %v6766_v20 }
 0xa97   :  { %v7689_v7 = vrot.slane %v7678_v28, 4  ;;  %v5043_v33 = vpop.f32.mrf.mxu0 }
 0xa99   :  { %v7690_v62 = vmax.f32 %v7678_v28, %v7689_v7  ;;  %v4565_v16 = vpop.f32.mrf.mxu2  ;;  %v4814_v4 = vpop.f32.mrf.mxu3 }
 0xa9b   :  { %v7691_v45 = vrot.slane %v7690_v62, 2 }
 0xa9c   :  { %v4306_v60 = vpop.f32.mrf.mxu1 }
 0xa9d   :  { %v7692_v2 = vmax.f32 %v7690_v62, %v7691_v45 }
 0xa9f   :  { %v7693_v22 = vrot.slane %v7692_v2, 1  ;;  %v5045_v1 = vpop.f32.mrf.mxu0 }
 0xaa1   :  { %v7694_v49 = vmax.f32 %v7692_v2, %v7693_v22  ;;  %v4567_v26 = vpop.f32.mrf.mxu2  ;;  %v4816_v52 = vpop.f32.mrf.mxu3 }
 0xaa3   :  { %v7722_v9 = vrot.slane %v7694_v49, 2 }
 0xaa4   :  { %v4308_v51 = vpop.f32.mrf.mxu1 }
 0xaa5   :  { %v7736_v61 = vsel %vm7725_vm3, %v7721_v30, %v7722_v9 }
 0xaa6   :  { %v7737_v21 = vsel %vm7727_vm4, %v7735_v56, %v7736_v61 }
 0xaa7   :  { %v5048_v29 = vpop.f32.mrf.mxu0  ;;  %v7753_v5 = vrot.slane %v7737_v21, 7 }
 0xaa9   :  { %v5063_v24 = vpop.f32.mrf.mxu3  ;;  %v7754_v8 = vsel %vm7743_vm5, %v7753_v5, %v11668_v42 }
 0xaaa   :  { %v7755_v54 = vsel %vm7745_vm6, %v7753_v5, %v7754_v8 }
 0xaab   :  { %v7756_v53 = vsel %vm7747_vm7, %v7753_v5, %v7755_v54 }
 0xaac   :  { %v4311_v17 = vpop.f32.mrf.mxu1  ;;  %v7757_v43 = vsel %vm7749_vm8, %v7753_v5, %v7756_v53 }
 0xaad   :  { %7761 = vst [vmem:[#allocation2 + $0x8] sm:$0xff] %v7757_v43 }
 0xaae   :  { %7772 = dma.vmem_to_hbm [thread:$0]  %s7768_s28, 256, %s7770_s8, [#allocation3]  }
 0xaaf   :  { %v5050_v57 = vpop.f32.mrf.mxu0 }
 0xab1   :  { %v5065_v46 = vpop.f32.mrf.mxu3 }
 0xab4   :  { %v4313_v31 = vpop.f32.mrf.mxu1 }
 0xab7   :  { %v5053_v0 = vpop.f32.mrf.mxu0 }
 0xabc   :  { %v4316_v63 = vpop.f32.mrf.mxu1 }
 0xabf   :  { %v5055_v11 = vpop.f32.mrf.mxu0 }
 0xac4   :  { %v4318_v14 = vpop.f32.mrf.mxu1 }
 0xac7   :  { %v5058_v56 = vpop.f32.mrf.mxu0 }
 0xacf   :  { %v5060_v42 = vpop.f32.mrf.mxu0 }
 0xad0   :  { %8395 = dma.done.wait [#allocation3], 256  }
 0xad1   :  { %8396 = vsyncadd [#allocation3], 4294967040 }
 0xad2   :  { %7777 = vsyncpa [#allocation3], 1 }

</bundles_post_ra>
